<compile_context>
chip_gen: v6e
topology: v6e:2x2x1
jax: 0.10.0
libtpu: 0.0.40
codegen_flags: <defaults>
</compile_context>

<pallas_src>
import jax
import jax.numpy as jnp
from jax.experimental import pallas as pl
from jax.experimental.pallas import tpu as pltpu


def _graph_series_kernel(node_ref, adj_ref, wts_ref, nnum_ref,
                         emb_ref, wgnn_ref, bgnn_ref, ct_ref, c2_ref,
                         price_ref, wg_ref, wp_ref, bo_ref, out_ref):
    """Fully fused forward: embed -> mask -> GNN -> centroid pool -> head.

    node_ref : (M, 1)      int32, node ids, all prev_days flattened (M = P*N)
    adj_ref  : (P, N, Mn)  int32, neighbor ids (per day)
    wts_ref  : (P, N, Mn)  f32,   neighbor weights
    nnum_ref : (P,)        int32 in SMEM, valid node count per day
    emb_ref  : (T, E)      bf16,  embedding table
    wgnn_ref : (2E, E)     bf16,  stacked [W_self; W_neigh]
    bgnn_ref : (1, E)      f32,   GNN bias
    ct_ref   : (E, K)      bf16,  centroids, pre-transposed
    c2_ref   : (1, K)      f32,   squared centroid norms
    price_ref: (1, 2P)     f32
    wg_ref   : (P, K, C)   f32,   head weights for the graph features
    wp_ref   : (2P, C)     f32,   head weights for the price features
    bo_ref   : (1, C)      f32,   head bias
    out_ref  : (1, C)      f32,   log-probabilities
    """
    M = node_ref.shape[0]
    P, N, MN = adj_ref.shape
    T, E = emb_ref.shape
    K = ct_ref.shape[1]

    # ---- Embedding lookup for all M rows: one-hot @ table on the MXU ------
    oh = jnp.where(
        node_ref[...] == jax.lax.broadcasted_iota(jnp.int32, (M, T), 1),
        1.0, 0.0).astype(jnp.bfloat16)                                # (M, T)
    x = jnp.dot(oh, emb_ref[...],
                preferred_element_type=jnp.float32)                   # (M, E) f32

    # ---- Per day: mask rows, build dense (N, N) adjacency, aggregate ------
    iota_rows = jax.lax.broadcasted_iota(jnp.int32, (N, 1), 0)        # (N, 1)
    iota_cols = jax.lax.broadcasted_iota(jnp.int32, (N, N), 1)        # (N, N)
    x_parts, agg_parts = [], []
    for p in range(P):                                   # static unroll, P small
        nn = nnum_ref[p]                                 # scalar from SMEM
        mask_p = jnp.where(iota_rows < nn, 1.0, 0.0)     # (N, 1) f32
        x_p = x[p * N:(p + 1) * N, :] * mask_p           # masked node embeddings
        adj_p = adj_ref[p]                               # (N, Mn) int32
        wts_p = wts_ref[p]                               # (N, Mn) f32
        a_p = jnp.zeros((N, N), jnp.float32)
        for m in range(MN):                              # static unroll, Mn small
            a_p = a_p + jnp.where(adj_p[:, m:m + 1] == iota_cols,
                                  wts_p[:, m:m + 1], 0.0)
        agg_p = jnp.dot(a_p.astype(jnp.bfloat16), x_p.astype(jnp.bfloat16),
                        preferred_element_type=jnp.float32)           # (N, E)
        x_parts.append(x_p)
        agg_parts.append(agg_p)
    xm = jnp.concatenate(x_parts, axis=0)                             # (M, E)
    agg = jnp.concatenate(agg_parts, axis=0)                          # (M, E)

    # ---- GNN layer: relu([x, agg] @ [Ws; Wn] + b), one merged matmul ------
    xa = jnp.concatenate([xm, agg], axis=-1).astype(jnp.bfloat16)     # (M, 2E)
    h = jnp.dot(xa, wgnn_ref[...],
                preferred_element_type=jnp.float32) + bgnn_ref[...]
    h = jnp.maximum(h, 0.0)                                           # (M, E) f32

    # ---- Euclidean centroid distances ||h - c_k|| -------------------------
    h2 = jnp.sum(h * h, axis=-1, keepdims=True)                       # (M, 1)
    cross = jnp.dot(h.astype(jnp.bfloat16), ct_ref[...],
                    preferred_element_type=jnp.float32)               # (M, K)
    d = jnp.sqrt(jnp.maximum(h2 + c2_ref[...] - 2.0 * cross, 0.0))    # (M, K)

    # ---- Per-day masked mean over valid nodes + output head ---------------
    logit = (jnp.dot(price_ref[...], wp_ref[...],
                     preferred_element_type=jnp.float32) + bo_ref[...])  # (1, C)
    for p in range(P):
        nn = nnum_ref[p]
        mask_p = jnp.where(iota_rows < nn, 1.0, 0.0)                  # (N, 1)
        inv_p = 1.0 / jnp.maximum(nn.astype(jnp.float32), 1.0)        # scalar
        g_p = jnp.sum(d[p * N:(p + 1) * N, :] * (mask_p * inv_p),
                      axis=0, keepdims=True)                          # (1, K)
        logit = logit + jnp.dot(g_p, wg_ref[p],
                                preferred_element_type=jnp.float32)   # (1, C)

    # log_softmax over the class dim.
    zm = logit - jnp.max(logit, axis=-1, keepdims=True)
    out_ref[...] = zm - jnp.log(jnp.sum(jnp.exp(zm), axis=-1, keepdims=True))


def graph_series_forward(params, node_list, adj_mat_list, weight_list,
                         node_num_list, price_feature):
    assert node_list.shape[0] == 1
    node = node_list[0]                                # (P, N)     int
    adj = adj_mat_list[0].astype(jnp.int32)            # (P, N, Mn) int, in [0, N)
    wts = weight_list[0].astype(jnp.float32)           # (P, N, Mn)
    nnum = node_num_list[0].astype(jnp.int32)          # (P,)

    P, N = node.shape
    M = P * N
    E = params["embedding"].shape[1]
    K = params["centroids"].shape[0]
    C = params["b_out"].shape[1]

    # Param prep (tiny, KB-scale): bf16 MXU operands, stacked GNN weights,
    # pre-transposed centroids + squared norms, split output head.
    emb = params["embedding"].astype(jnp.bfloat16)                      # (T, E)
    w_gnn = jnp.concatenate([params["w_self"], params["w_neigh"]],
                            axis=0).astype(jnp.bfloat16)                # (2E, E)
    ct = params["centroids"].astype(jnp.bfloat16).T                     # (E, K)
    c2 = jnp.sum(jnp.square(ct.astype(jnp.float32)), axis=0,
                 keepdims=True)                                         # (1, K)
    wg3 = params["w_out"][:P * K].reshape(P, K, C).astype(jnp.float32)  # (P, K, C)
    wp = params["w_out"][P * K:].astype(jnp.float32)                    # (2P, C)

    node_col = node.reshape(M, 1).astype(jnp.int32)                     # (M, 1)

    vmem = pl.BlockSpec(memory_space=pltpu.MemorySpace.VMEM)
    smem = pl.BlockSpec(memory_space=pltpu.MemorySpace.SMEM)

    out = pl.pallas_call(
        _graph_series_kernel,
        out_shape=jax.ShapeDtypeStruct((1, C), jnp.float32),
        in_specs=[vmem,          # node_col
                  vmem, vmem,    # adj, wts
                  smem,          # nnum (scalars)
                  vmem, vmem, vmem, vmem, vmem,   # emb, w_gnn, b_gnn, ct, c2
                  vmem, vmem, vmem, vmem],        # price, wg3, wp, b_out
        out_specs=vmem,
    )(node_col, adj, wts, nnum,
      emb, w_gnn, params["b_gnn"].astype(jnp.float32), ct, c2,
      price_feature.astype(jnp.float32), wg3, wp,
      params["b_out"].astype(jnp.float32))
    return out


if __name__ == "__main__":
    # Small shapes consistent with the module's forward.
    P, N, Mn, E, K, C, TOTAL = 4, 64, 8, 32, 16, 3, 100

    key = jax.random.PRNGKey(0)
    ks = jax.random.split(key, 11)

    params = {
        "embedding": 0.1 * jax.random.normal(ks[0], (TOTAL, E), jnp.float32),
        "w_self":    0.1 * jax.random.normal(ks[1], (E, E), jnp.float32),
        "w_neigh":   0.1 * jax.random.normal(ks[2], (E, E), jnp.float32),
        "b_gnn":     0.1 * jax.random.normal(ks[3], (1, E), jnp.float32),
        "centroids": 0.1 * jax.random.normal(ks[4], (K, E), jnp.float32),
        "w_out":     0.1 * jax.random.normal(ks[5], (P * K + 2 * P, C), jnp.float32),
        "b_out":     0.1 * jax.random.normal(ks[6], (1, C), jnp.float32),
    }

    node_list = jax.random.randint(ks[7], (1, P, N), 0, TOTAL, dtype=jnp.int32)
    adj_mat_list = jax.random.randint(ks[8], (1, P, N, Mn), 0, N, dtype=jnp.int32)
    weight_list = jax.random.uniform(ks[9], (1, P, N, Mn), jnp.float32)
    node_num_list = jnp.array([[50, 60, 40, 64]], dtype=jnp.int32)
    price_feature = jax.random.normal(ks[10], (1, 2 * P), jnp.float32)

    fwd = jax.jit(graph_series_forward)
    out = fwd(params, node_list, adj_mat_list, weight_list,
              node_num_list, price_feature)
    jax.block_until_ready(out)
    assert out.shape == (1, C)
    assert bool(jnp.all(jnp.isfinite(out)))
    print("KERNEL_OK")
</pallas_src>

<mosaic_0001>
module attributes {stable_mosaic.version = 11 : i64} {
  func.func @_graph_series_kernel(%arg0: memref<256x1xi32, #tpu.memory_space<vmem>>, %arg1: memref<4x64x8xi32, #tpu.memory_space<vmem>>, %arg2: memref<4x64x8xf32, #tpu.memory_space<vmem>>, %arg3: memref<4xi32, #tpu.memory_space<smem>>, %arg4: memref<100x32xbf16, #tpu.memory_space<vmem>>, %arg5: memref<64x32xbf16, #tpu.memory_space<vmem>>, %arg6: memref<1x32xf32, #tpu.memory_space<vmem>>, %arg7: memref<32x16xbf16, #tpu.memory_space<vmem>>, %arg8: memref<1x16xf32, #tpu.memory_space<vmem>>, %arg9: memref<1x8xf32, #tpu.memory_space<vmem>>, %arg10: memref<4x16x3xf32, #tpu.memory_space<vmem>>, %arg11: memref<8x3xf32, #tpu.memory_space<vmem>>, %arg12: memref<1x3xf32, #tpu.memory_space<vmem>>, %arg13: memref<1x3xf32, #tpu.memory_space<vmem>>) attributes {dimension_semantics = [], scalar_prefetch = 0 : i64, scratch_operands = 0 : i64, tpu.core_type = #tpu.core_type<tc>} {
    %c0 = arith.constant 0 : index
    %c0_0 = arith.constant 0 : index
    %0 = vector.load %arg0[%c0, %c0_0] : memref<256x1xi32, #tpu.memory_space<vmem>>, vector<256x1xi32>
    %1 = tpu.iota {dimensions = array<i32: 1>} : vector<256x100xi32>
    %2 = vector.broadcast %0 : vector<256x1xi32> to vector<256x100xi32>
    %3 = arith.cmpi eq, %2, %1 : vector<256x100xi32>
    %cst = arith.constant 1.000000e+00 : f32
    %cst_1 = arith.constant 0.000000e+00 : f32
    %4 = vector.broadcast %cst : f32 to vector<256x100xf32>
    %5 = vector.broadcast %cst_1 : f32 to vector<256x100xf32>
    %6 = arith.select %3, %4, %5 : vector<256x100xi1>, vector<256x100xf32>
    %7 = arith.truncf %6 : vector<256x100xf32> to vector<256x100xbf16>
    %c0_2 = arith.constant 0 : index
    %c0_3 = arith.constant 0 : index
    %8 = vector.load %arg4[%c0_2, %c0_3] : memref<100x32xbf16, #tpu.memory_space<vmem>>, vector<100x32xbf16>
    %cst_4 = arith.constant dense<0.000000e+00> : vector<256x32xf32>
    %9 = tpu.matmul %7, %8, %cst_4 {dimension_numbers = #tpu.dot_dimension_numbers<[1], [0], [0], [1], [0, 0, 1, 1], [], []>} : vector<256x100xbf16>, vector<100x32xbf16>, vector<256x32xf32> -> vector<256x32xf32>
    %10 = tpu.iota {dimensions = array<i32: 0>} : vector<64x1xi32>
    %11 = tpu.iota {dimensions = array<i32: 1>} : vector<64x64xi32>
    %c0_5 = arith.constant 0 : index
    %12 = memref.load %arg3[%c0_5] : memref<4xi32, #tpu.memory_space<smem>>
    %13 = vector.broadcast %12 : i32 to vector<64x1xi32>
    %14 = arith.cmpi slt, %10, %13 : vector<64x1xi32>
    %cst_6 = arith.constant 1.000000e+00 : f32
    %cst_7 = arith.constant 0.000000e+00 : f32
    %15 = vector.broadcast %cst_6 : f32 to vector<64x1xf32>
    %16 = vector.broadcast %cst_7 : f32 to vector<64x1xf32>
    %17 = arith.select %14, %15, %16 : vector<64x1xi1>, vector<64x1xf32>
    %18 = vector.extract_strided_slice %9 {offsets = [0, 0], sizes = [64, 32], strides = [1, 1]} : vector<256x32xf32> to vector<64x32xf32>
    %19 = vector.broadcast %17 : vector<64x1xf32> to vector<64x32xf32>
    %20 = arith.mulf %18, %19 : vector<64x32xf32>
    %c0_8 = arith.constant 0 : index
    %c0_9 = arith.constant 0 : index
    %c0_10 = arith.constant 0 : index
    %21 = vector.load %arg1[%c0_8, %c0_9, %c0_10] : memref<4x64x8xi32, #tpu.memory_space<vmem>>, vector<1x64x8xi32>
    %22 = vector.shape_cast %21 : vector<1x64x8xi32> to vector<64x8xi32>
    %c0_11 = arith.constant 0 : index
    %c0_12 = arith.constant 0 : index
    %c0_13 = arith.constant 0 : index
    %23 = vector.load %arg2[%c0_11, %c0_12, %c0_13] : memref<4x64x8xf32, #tpu.memory_space<vmem>>, vector<1x64x8xf32>
    %24 = vector.shape_cast %23 : vector<1x64x8xf32> to vector<64x8xf32>
    %cst_14 = arith.constant 0.000000e+00 : f32
    %25 = vector.broadcast %cst_14 : f32 to vector<64x64xf32>
    %26 = vector.extract_strided_slice %22 {offsets = [0, 0], sizes = [64, 1], strides = [1, 1]} : vector<64x8xi32> to vector<64x1xi32>
    %27 = vector.broadcast %26 : vector<64x1xi32> to vector<64x64xi32>
    %28 = arith.cmpi eq, %27, %11 : vector<64x64xi32>
    %29 = vector.extract_strided_slice %24 {offsets = [0, 0], sizes = [64, 1], strides = [1, 1]} : vector<64x8xf32> to vector<64x1xf32>
    %cst_15 = arith.constant 0.000000e+00 : f32
    %30 = vector.shape_cast %29 : vector<64x1xf32> to vector<64x1xf32>
    %31 = vector.broadcast %30 : vector<64x1xf32> to vector<64x64xf32>
    %32 = vector.broadcast %cst_15 : f32 to vector<64x64xf32>
    %33 = arith.select %28, %31, %32 : vector<64x64xi1>, vector<64x64xf32>
    %34 = arith.addf %25, %33 : vector<64x64xf32>
    %35 = vector.extract_strided_slice %22 {offsets = [0, 1], sizes = [64, 1], strides = [1, 1]} : vector<64x8xi32> to vector<64x1xi32>
    %36 = vector.broadcast %35 : vector<64x1xi32> to vector<64x64xi32>
    %37 = arith.cmpi eq, %36, %11 : vector<64x64xi32>
    %38 = vector.extract_strided_slice %24 {offsets = [0, 1], sizes = [64, 1], strides = [1, 1]} : vector<64x8xf32> to vector<64x1xf32>
    %cst_16 = arith.constant 0.000000e+00 : f32
    %39 = vector.shape_cast %38 : vector<64x1xf32> to vector<64x1xf32>
    %40 = vector.broadcast %39 : vector<64x1xf32> to vector<64x64xf32>
    %41 = vector.broadcast %cst_16 : f32 to vector<64x64xf32>
    %42 = arith.select %37, %40, %41 : vector<64x64xi1>, vector<64x64xf32>
    %43 = arith.addf %34, %42 : vector<64x64xf32>
    %44 = vector.extract_strided_slice %22 {offsets = [0, 2], sizes = [64, 1], strides = [1, 1]} : vector<64x8xi32> to vector<64x1xi32>
    %45 = vector.broadcast %44 : vector<64x1xi32> to vector<64x64xi32>
    %46 = arith.cmpi eq, %45, %11 : vector<64x64xi32>
    %47 = vector.extract_strided_slice %24 {offsets = [0, 2], sizes = [64, 1], strides = [1, 1]} : vector<64x8xf32> to vector<64x1xf32>
    %cst_17 = arith.constant 0.000000e+00 : f32
    %48 = vector.shape_cast %47 : vector<64x1xf32> to vector<64x1xf32>
    %49 = vector.broadcast %48 : vector<64x1xf32> to vector<64x64xf32>
    %50 = vector.broadcast %cst_17 : f32 to vector<64x64xf32>
    %51 = arith.select %46, %49, %50 : vector<64x64xi1>, vector<64x64xf32>
    %52 = arith.addf %43, %51 : vector<64x64xf32>
    %53 = vector.extract_strided_slice %22 {offsets = [0, 3], sizes = [64, 1], strides = [1, 1]} : vector<64x8xi32> to vector<64x1xi32>
    %54 = vector.broadcast %53 : vector<64x1xi32> to vector<64x64xi32>
    %55 = arith.cmpi eq, %54, %11 : vector<64x64xi32>
    %56 = vector.extract_strided_slice %24 {offsets = [0, 3], sizes = [64, 1], strides = [1, 1]} : vector<64x8xf32> to vector<64x1xf32>
    %cst_18 = arith.constant 0.000000e+00 : f32
    %57 = vector.shape_cast %56 : vector<64x1xf32> to vector<64x1xf32>
    %58 = vector.broadcast %57 : vector<64x1xf32> to vector<64x64xf32>
    %59 = vector.broadcast %cst_18 : f32 to vector<64x64xf32>
    %60 = arith.select %55, %58, %59 : vector<64x64xi1>, vector<64x64xf32>
    %61 = arith.addf %52, %60 : vector<64x64xf32>
    %62 = vector.extract_strided_slice %22 {offsets = [0, 4], sizes = [64, 1], strides = [1, 1]} : vector<64x8xi32> to vector<64x1xi32>
    %63 = vector.broadcast %62 : vector<64x1xi32> to vector<64x64xi32>
    %64 = arith.cmpi eq, %63, %11 : vector<64x64xi32>
    %65 = vector.extract_strided_slice %24 {offsets = [0, 4], sizes = [64, 1], strides = [1, 1]} : vector<64x8xf32> to vector<64x1xf32>
    %cst_19 = arith.constant 0.000000e+00 : f32
    %66 = vector.shape_cast %65 : vector<64x1xf32> to vector<64x1xf32>
    %67 = vector.broadcast %66 : vector<64x1xf32> to vector<64x64xf32>
    %68 = vector.broadcast %cst_19 : f32 to vector<64x64xf32>
    %69 = arith.select %64, %67, %68 : vector<64x64xi1>, vector<64x64xf32>
    %70 = arith.addf %61, %69 : vector<64x64xf32>
    %71 = vector.extract_strided_slice %22 {offsets = [0, 5], sizes = [64, 1], strides = [1, 1]} : vector<64x8xi32> to vector<64x1xi32>
    %72 = vector.broadcast %71 : vector<64x1xi32> to vector<64x64xi32>
    %73 = arith.cmpi eq, %72, %11 : vector<64x64xi32>
    %74 = vector.extract_strided_slice %24 {offsets = [0, 5], sizes = [64, 1], strides = [1, 1]} : vector<64x8xf32> to vector<64x1xf32>
    %cst_20 = arith.constant 0.000000e+00 : f32
    %75 = vector.shape_cast %74 : vector<64x1xf32> to vector<64x1xf32>
    %76 = vector.broadcast %75 : vector<64x1xf32> to vector<64x64xf32>
    %77 = vector.broadcast %cst_20 : f32 to vector<64x64xf32>
    %78 = arith.select %73, %76, %77 : vector<64x64xi1>, vector<64x64xf32>
    %79 = arith.addf %70, %78 : vector<64x64xf32>
    %80 = vector.extract_strided_slice %22 {offsets = [0, 6], sizes = [64, 1], strides = [1, 1]} : vector<64x8xi32> to vector<64x1xi32>
    %81 = vector.broadcast %80 : vector<64x1xi32> to vector<64x64xi32>
    %82 = arith.cmpi eq, %81, %11 : vector<64x64xi32>
    %83 = vector.extract_strided_slice %24 {offsets = [0, 6], sizes = [64, 1], strides = [1, 1]} : vector<64x8xf32> to vector<64x1xf32>
    %cst_21 = arith.constant 0.000000e+00 : f32
    %84 = vector.shape_cast %83 : vector<64x1xf32> to vector<64x1xf32>
    %85 = vector.broadcast %84 : vector<64x1xf32> to vector<64x64xf32>
    %86 = vector.broadcast %cst_21 : f32 to vector<64x64xf32>
    %87 = arith.select %82, %85, %86 : vector<64x64xi1>, vector<64x64xf32>
    %88 = arith.addf %79, %87 : vector<64x64xf32>
    %89 = vector.extract_strided_slice %22 {offsets = [0, 7], sizes = [64, 1], strides = [1, 1]} : vector<64x8xi32> to vector<64x1xi32>
    %90 = vector.broadcast %89 : vector<64x1xi32> to vector<64x64xi32>
    %91 = arith.cmpi eq, %90, %11 : vector<64x64xi32>
    %92 = vector.extract_strided_slice %24 {offsets = [0, 7], sizes = [64, 1], strides = [1, 1]} : vector<64x8xf32> to vector<64x1xf32>
    %cst_22 = arith.constant 0.000000e+00 : f32
    %93 = vector.shape_cast %92 : vector<64x1xf32> to vector<64x1xf32>
    %94 = vector.broadcast %93 : vector<64x1xf32> to vector<64x64xf32>
    %95 = vector.broadcast %cst_22 : f32 to vector<64x64xf32>
    %96 = arith.select %91, %94, %95 : vector<64x64xi1>, vector<64x64xf32>
    %97 = arith.addf %88, %96 : vector<64x64xf32>
    %98 = arith.truncf %97 : vector<64x64xf32> to vector<64x64xbf16>
    %99 = arith.truncf %20 : vector<64x32xf32> to vector<64x32xbf16>
    %cst_23 = arith.constant dense<0.000000e+00> : vector<64x32xf32>
    %100 = tpu.matmul %98, %99, %cst_23 {dimension_numbers = #tpu.dot_dimension_numbers<[1], [0], [0], [1], [0, 0, 1, 1], [], []>} : vector<64x64xbf16>, vector<64x32xbf16>, vector<64x32xf32> -> vector<64x32xf32>
    %c1 = arith.constant 1 : index
    %101 = memref.load %arg3[%c1] : memref<4xi32, #tpu.memory_space<smem>>
    %102 = vector.broadcast %101 : i32 to vector<64x1xi32>
    %103 = arith.cmpi slt, %10, %102 : vector<64x1xi32>
    %cst_24 = arith.constant 1.000000e+00 : f32
    %cst_25 = arith.constant 0.000000e+00 : f32
    %104 = vector.broadcast %cst_24 : f32 to vector<64x1xf32>
    %105 = vector.broadcast %cst_25 : f32 to vector<64x1xf32>
    %106 = arith.select %103, %104, %105 : vector<64x1xi1>, vector<64x1xf32>
    %107 = vector.extract_strided_slice %9 {offsets = [64, 0], sizes = [64, 32], strides = [1, 1]} : vector<256x32xf32> to vector<64x32xf32>
    %108 = vector.broadcast %106 : vector<64x1xf32> to vector<64x32xf32>
    %109 = arith.mulf %107, %108 : vector<64x32xf32>
    %c1_26 = arith.constant 1 : index
    %c0_27 = arith.constant 0 : index
    %c0_28 = arith.constant 0 : index
    %110 = vector.load %arg1[%c1_26, %c0_27, %c0_28] : memref<4x64x8xi32, #tpu.memory_space<vmem>>, vector<1x64x8xi32>
    %111 = vector.shape_cast %110 : vector<1x64x8xi32> to vector<64x8xi32>
    %c1_29 = arith.constant 1 : index
    %c0_30 = arith.constant 0 : index
    %c0_31 = arith.constant 0 : index
    %112 = vector.load %arg2[%c1_29, %c0_30, %c0_31] : memref<4x64x8xf32, #tpu.memory_space<vmem>>, vector<1x64x8xf32>
    %113 = vector.shape_cast %112 : vector<1x64x8xf32> to vector<64x8xf32>
    %cst_32 = arith.constant 0.000000e+00 : f32
    %114 = vector.broadcast %cst_32 : f32 to vector<64x64xf32>
    %115 = vector.extract_strided_slice %111 {offsets = [0, 0], sizes = [64, 1], strides = [1, 1]} : vector<64x8xi32> to vector<64x1xi32>
    %116 = vector.broadcast %115 : vector<64x1xi32> to vector<64x64xi32>
    %117 = arith.cmpi eq, %116, %11 : vector<64x64xi32>
    %118 = vector.extract_strided_slice %113 {offsets = [0, 0], sizes = [64, 1], strides = [1, 1]} : vector<64x8xf32> to vector<64x1xf32>
    %cst_33 = arith.constant 0.000000e+00 : f32
    %119 = vector.shape_cast %118 : vector<64x1xf32> to vector<64x1xf32>
    %120 = vector.broadcast %119 : vector<64x1xf32> to vector<64x64xf32>
    %121 = vector.broadcast %cst_33 : f32 to vector<64x64xf32>
    %122 = arith.select %117, %120, %121 : vector<64x64xi1>, vector<64x64xf32>
    %123 = arith.addf %114, %122 : vector<64x64xf32>
    %124 = vector.extract_strided_slice %111 {offsets = [0, 1], sizes = [64, 1], strides = [1, 1]} : vector<64x8xi32> to vector<64x1xi32>
    %125 = vector.broadcast %124 : vector<64x1xi32> to vector<64x64xi32>
    %126 = arith.cmpi eq, %125, %11 : vector<64x64xi32>
    %127 = vector.extract_strided_slice %113 {offsets = [0, 1], sizes = [64, 1], strides = [1, 1]} : vector<64x8xf32> to vector<64x1xf32>
    %cst_34 = arith.constant 0.000000e+00 : f32
    %128 = vector.shape_cast %127 : vector<64x1xf32> to vector<64x1xf32>
    %129 = vector.broadcast %128 : vector<64x1xf32> to vector<64x64xf32>
    %130 = vector.broadcast %cst_34 : f32 to vector<64x64xf32>
    %131 = arith.select %126, %129, %130 : vector<64x64xi1>, vector<64x64xf32>
    %132 = arith.addf %123, %131 : vector<64x64xf32>
    %133 = vector.extract_strided_slice %111 {offsets = [0, 2], sizes = [64, 1], strides = [1, 1]} : vector<64x8xi32> to vector<64x1xi32>
    %134 = vector.broadcast %133 : vector<64x1xi32> to vector<64x64xi32>
    %135 = arith.cmpi eq, %134, %11 : vector<64x64xi32>
    %136 = vector.extract_strided_slice %113 {offsets = [0, 2], sizes = [64, 1], strides = [1, 1]} : vector<64x8xf32> to vector<64x1xf32>
    %cst_35 = arith.constant 0.000000e+00 : f32
    %137 = vector.shape_cast %136 : vector<64x1xf32> to vector<64x1xf32>
    %138 = vector.broadcast %137 : vector<64x1xf32> to vector<64x64xf32>
    %139 = vector.broadcast %cst_35 : f32 to vector<64x64xf32>
    %140 = arith.select %135, %138, %139 : vector<64x64xi1>, vector<64x64xf32>
    %141 = arith.addf %132, %140 : vector<64x64xf32>
    %142 = vector.extract_strided_slice %111 {offsets = [0, 3], sizes = [64, 1], strides = [1, 1]} : vector<64x8xi32> to vector<64x1xi32>
    %143 = vector.broadcast %142 : vector<64x1xi32> to vector<64x64xi32>
    %144 = arith.cmpi eq, %143, %11 : vector<64x64xi32>
    %145 = vector.extract_strided_slice %113 {offsets = [0, 3], sizes = [64, 1], strides = [1, 1]} : vector<64x8xf32> to vector<64x1xf32>
    %cst_36 = arith.constant 0.000000e+00 : f32
    %146 = vector.shape_cast %145 : vector<64x1xf32> to vector<64x1xf32>
    %147 = vector.broadcast %146 : vector<64x1xf32> to vector<64x64xf32>
    %148 = vector.broadcast %cst_36 : f32 to vector<64x64xf32>
    %149 = arith.select %144, %147, %148 : vector<64x64xi1>, vector<64x64xf32>
    %150 = arith.addf %141, %149 : vector<64x64xf32>
    %151 = vector.extract_strided_slice %111 {offsets = [0, 4], sizes = [64, 1], strides = [1, 1]} : vector<64x8xi32> to vector<64x1xi32>
    %152 = vector.broadcast %151 : vector<64x1xi32> to vector<64x64xi32>
    %153 = arith.cmpi eq, %152, %11 : vector<64x64xi32>
    %154 = vector.extract_strided_slice %113 {offsets = [0, 4], sizes = [64, 1], strides = [1, 1]} : vector<64x8xf32> to vector<64x1xf32>
    %cst_37 = arith.constant 0.000000e+00 : f32
    %155 = vector.shape_cast %154 : vector<64x1xf32> to vector<64x1xf32>
    %156 = vector.broadcast %155 : vector<64x1xf32> to vector<64x64xf32>
    %157 = vector.broadcast %cst_37 : f32 to vector<64x64xf32>
    %158 = arith.select %153, %156, %157 : vector<64x64xi1>, vector<64x64xf32>
    %159 = arith.addf %150, %158 : vector<64x64xf32>
    %160 = vector.extract_strided_slice %111 {offsets = [0, 5], sizes = [64, 1], strides = [1, 1]} : vector<64x8xi32> to vector<64x1xi32>
    %161 = vector.broadcast %160 : vector<64x1xi32> to vector<64x64xi32>
    %162 = arith.cmpi eq, %161, %11 : vector<64x64xi32>
    %163 = vector.extract_strided_slice %113 {offsets = [0, 5], sizes = [64, 1], strides = [1, 1]} : vector<64x8xf32> to vector<64x1xf32>
    %cst_38 = arith.constant 0.000000e+00 : f32
    %164 = vector.shape_cast %163 : vector<64x1xf32> to vector<64x1xf32>
    %165 = vector.broadcast %164 : vector<64x1xf32> to vector<64x64xf32>
    %166 = vector.broadcast %cst_38 : f32 to vector<64x64xf32>
    %167 = arith.select %162, %165, %166 : vector<64x64xi1>, vector<64x64xf32>
    %168 = arith.addf %159, %167 : vector<64x64xf32>
    %169 = vector.extract_strided_slice %111 {offsets = [0, 6], sizes = [64, 1], strides = [1, 1]} : vector<64x8xi32> to vector<64x1xi32>
    %170 = vector.broadcast %169 : vector<64x1xi32> to vector<64x64xi32>
    %171 = arith.cmpi eq, %170, %11 : vector<64x64xi32>
    %172 = vector.extract_strided_slice %113 {offsets = [0, 6], sizes = [64, 1], strides = [1, 1]} : vector<64x8xf32> to vector<64x1xf32>
    %cst_39 = arith.constant 0.000000e+00 : f32
    %173 = vector.shape_cast %172 : vector<64x1xf32> to vector<64x1xf32>
    %174 = vector.broadcast %173 : vector<64x1xf32> to vector<64x64xf32>
    %175 = vector.broadcast %cst_39 : f32 to vector<64x64xf32>
    %176 = arith.select %171, %174, %175 : vector<64x64xi1>, vector<64x64xf32>
    %177 = arith.addf %168, %176 : vector<64x64xf32>
    %178 = vector.extract_strided_slice %111 {offsets = [0, 7], sizes = [64, 1], strides = [1, 1]} : vector<64x8xi32> to vector<64x1xi32>
    %179 = vector.broadcast %178 : vector<64x1xi32> to vector<64x64xi32>
    %180 = arith.cmpi eq, %179, %11 : vector<64x64xi32>
    %181 = vector.extract_strided_slice %113 {offsets = [0, 7], sizes = [64, 1], strides = [1, 1]} : vector<64x8xf32> to vector<64x1xf32>
    %cst_40 = arith.constant 0.000000e+00 : f32
    %182 = vector.shape_cast %181 : vector<64x1xf32> to vector<64x1xf32>
    %183 = vector.broadcast %182 : vector<64x1xf32> to vector<64x64xf32>
    %184 = vector.broadcast %cst_40 : f32 to vector<64x64xf32>
    %185 = arith.select %180, %183, %184 : vector<64x64xi1>, vector<64x64xf32>
    %186 = arith.addf %177, %185 : vector<64x64xf32>
    %187 = arith.truncf %186 : vector<64x64xf32> to vector<64x64xbf16>
    %188 = arith.truncf %109 : vector<64x32xf32> to vector<64x32xbf16>
    %cst_41 = arith.constant dense<0.000000e+00> : vector<64x32xf32>
    %189 = tpu.matmul %187, %188, %cst_41 {dimension_numbers = #tpu.dot_dimension_numbers<[1], [0], [0], [1], [0, 0, 1, 1], [], []>} : vector<64x64xbf16>, vector<64x32xbf16>, vector<64x32xf32> -> vector<64x32xf32>
    %c2 = arith.constant 2 : index
    %190 = memref.load %arg3[%c2] : memref<4xi32, #tpu.memory_space<smem>>
    %191 = vector.broadcast %190 : i32 to vector<64x1xi32>
    %192 = arith.cmpi slt, %10, %191 : vector<64x1xi32>
    %cst_42 = arith.constant 1.000000e+00 : f32
    %cst_43 = arith.constant 0.000000e+00 : f32
    %193 = vector.broadcast %cst_42 : f32 to vector<64x1xf32>
    %194 = vector.broadcast %cst_43 : f32 to vector<64x1xf32>
    %195 = arith.select %192, %193, %194 : vector<64x1xi1>, vector<64x1xf32>
    %196 = vector.extract_strided_slice %9 {offsets = [128, 0], sizes = [64, 32], strides = [1, 1]} : vector<256x32xf32> to vector<64x32xf32>
    %197 = vector.broadcast %195 : vector<64x1xf32> to vector<64x32xf32>
    %198 = arith.mulf %196, %197 : vector<64x32xf32>
    %c2_44 = arith.constant 2 : index
    %c0_45 = arith.constant 0 : index
    %c0_46 = arith.constant 0 : index
    %199 = vector.load %arg1[%c2_44, %c0_45, %c0_46] : memref<4x64x8xi32, #tpu.memory_space<vmem>>, vector<1x64x8xi32>
    %200 = vector.shape_cast %199 : vector<1x64x8xi32> to vector<64x8xi32>
    %c2_47 = arith.constant 2 : index
    %c0_48 = arith.constant 0 : index
    %c0_49 = arith.constant 0 : index
    %201 = vector.load %arg2[%c2_47, %c0_48, %c0_49] : memref<4x64x8xf32, #tpu.memory_space<vmem>>, vector<1x64x8xf32>
    %202 = vector.shape_cast %201 : vector<1x64x8xf32> to vector<64x8xf32>
    %cst_50 = arith.constant 0.000000e+00 : f32
    %203 = vector.broadcast %cst_50 : f32 to vector<64x64xf32>
    %204 = vector.extract_strided_slice %200 {offsets = [0, 0], sizes = [64, 1], strides = [1, 1]} : vector<64x8xi32> to vector<64x1xi32>
    %205 = vector.broadcast %204 : vector<64x1xi32> to vector<64x64xi32>
    %206 = arith.cmpi eq, %205, %11 : vector<64x64xi32>
    %207 = vector.extract_strided_slice %202 {offsets = [0, 0], sizes = [64, 1], strides = [1, 1]} : vector<64x8xf32> to vector<64x1xf32>
    %cst_51 = arith.constant 0.000000e+00 : f32
    %208 = vector.shape_cast %207 : vector<64x1xf32> to vector<64x1xf32>
    %209 = vector.broadcast %208 : vector<64x1xf32> to vector<64x64xf32>
    %210 = vector.broadcast %cst_51 : f32 to vector<64x64xf32>
    %211 = arith.select %206, %209, %210 : vector<64x64xi1>, vector<64x64xf32>
    %212 = arith.addf %203, %211 : vector<64x64xf32>
    %213 = vector.extract_strided_slice %200 {offsets = [0, 1], sizes = [64, 1], strides = [1, 1]} : vector<64x8xi32> to vector<64x1xi32>
    %214 = vector.broadcast %213 : vector<64x1xi32> to vector<64x64xi32>
    %215 = arith.cmpi eq, %214, %11 : vector<64x64xi32>
    %216 = vector.extract_strided_slice %202 {offsets = [0, 1], sizes = [64, 1], strides = [1, 1]} : vector<64x8xf32> to vector<64x1xf32>
    %cst_52 = arith.constant 0.000000e+00 : f32
    %217 = vector.shape_cast %216 : vector<64x1xf32> to vector<64x1xf32>
    %218 = vector.broadcast %217 : vector<64x1xf32> to vector<64x64xf32>
    %219 = vector.broadcast %cst_52 : f32 to vector<64x64xf32>
    %220 = arith.select %215, %218, %219 : vector<64x64xi1>, vector<64x64xf32>
    %221 = arith.addf %212, %220 : vector<64x64xf32>
    %222 = vector.extract_strided_slice %200 {offsets = [0, 2], sizes = [64, 1], strides = [1, 1]} : vector<64x8xi32> to vector<64x1xi32>
    %223 = vector.broadcast %222 : vector<64x1xi32> to vector<64x64xi32>
    %224 = arith.cmpi eq, %223, %11 : vector<64x64xi32>
    %225 = vector.extract_strided_slice %202 {offsets = [0, 2], sizes = [64, 1], strides = [1, 1]} : vector<64x8xf32> to vector<64x1xf32>
    %cst_53 = arith.constant 0.000000e+00 : f32
    %226 = vector.shape_cast %225 : vector<64x1xf32> to vector<64x1xf32>
    %227 = vector.broadcast %226 : vector<64x1xf32> to vector<64x64xf32>
    %228 = vector.broadcast %cst_53 : f32 to vector<64x64xf32>
    %229 = arith.select %224, %227, %228 : vector<64x64xi1>, vector<64x64xf32>
    %230 = arith.addf %221, %229 : vector<64x64xf32>
    %231 = vector.extract_strided_slice %200 {offsets = [0, 3], sizes = [64, 1], strides = [1, 1]} : vector<64x8xi32> to vector<64x1xi32>
    %232 = vector.broadcast %231 : vector<64x1xi32> to vector<64x64xi32>
    %233 = arith.cmpi eq, %232, %11 : vector<64x64xi32>
    %234 = vector.extract_strided_slice %202 {offsets = [0, 3], sizes = [64, 1], strides = [1, 1]} : vector<64x8xf32> to vector<64x1xf32>
    %cst_54 = arith.constant 0.000000e+00 : f32
    %235 = vector.shape_cast %234 : vector<64x1xf32> to vector<64x1xf32>
    %236 = vector.broadcast %235 : vector<64x1xf32> to vector<64x64xf32>
    %237 = vector.broadcast %cst_54 : f32 to vector<64x64xf32>
    %238 = arith.select %233, %236, %237 : vector<64x64xi1>, vector<64x64xf32>
    %239 = arith.addf %230, %238 : vector<64x64xf32>
    %240 = vector.extract_strided_slice %200 {offsets = [0, 4], sizes = [64, 1], strides = [1, 1]} : vector<64x8xi32> to vector<64x1xi32>
    %241 = vector.broadcast %240 : vector<64x1xi32> to vector<64x64xi32>
    %242 = arith.cmpi eq, %241, %11 : vector<64x64xi32>
    %243 = vector.extract_strided_slice %202 {offsets = [0, 4], sizes = [64, 1], strides = [1, 1]} : vector<64x8xf32> to vector<64x1xf32>
    %cst_55 = arith.constant 0.000000e+00 : f32
    %244 = vector.shape_cast %243 : vector<64x1xf32> to vector<64x1xf32>
    %245 = vector.broadcast %244 : vector<64x1xf32> to vector<64x64xf32>
    %246 = vector.broadcast %cst_55 : f32 to vector<64x64xf32>
    %247 = arith.select %242, %245, %246 : vector<64x64xi1>, vector<64x64xf32>
    %248 = arith.addf %239, %247 : vector<64x64xf32>
    %249 = vector.extract_strided_slice %200 {offsets = [0, 5], sizes = [64, 1], strides = [1, 1]} : vector<64x8xi32> to vector<64x1xi32>
    %250 = vector.broadcast %249 : vector<64x1xi32> to vector<64x64xi32>
    %251 = arith.cmpi eq, %250, %11 : vector<64x64xi32>
    %252 = vector.extract_strided_slice %202 {offsets = [0, 5], sizes = [64, 1], strides = [1, 1]} : vector<64x8xf32> to vector<64x1xf32>
    %cst_56 = arith.constant 0.000000e+00 : f32
    %253 = vector.shape_cast %252 : vector<64x1xf32> to vector<64x1xf32>
    %254 = vector.broadcast %253 : vector<64x1xf32> to vector<64x64xf32>
    %255 = vector.broadcast %cst_56 : f32 to vector<64x64xf32>
    %256 = arith.select %251, %254, %255 : vector<64x64xi1>, vector<64x64xf32>
    %257 = arith.addf %248, %256 : vector<64x64xf32>
    %258 = vector.extract_strided_slice %200 {offsets = [0, 6], sizes = [64, 1], strides = [1, 1]} : vector<64x8xi32> to vector<64x1xi32>
    %259 = vector.broadcast %258 : vector<64x1xi32> to vector<64x64xi32>
    %260 = arith.cmpi eq, %259, %11 : vector<64x64xi32>
    %261 = vector.extract_strided_slice %202 {offsets = [0, 6], sizes = [64, 1], strides = [1, 1]} : vector<64x8xf32> to vector<64x1xf32>
    %cst_57 = arith.constant 0.000000e+00 : f32
    %262 = vector.shape_cast %261 : vector<64x1xf32> to vector<64x1xf32>
    %263 = vector.broadcast %262 : vector<64x1xf32> to vector<64x64xf32>
    %264 = vector.broadcast %cst_57 : f32 to vector<64x64xf32>
    %265 = arith.select %260, %263, %264 : vector<64x64xi1>, vector<64x64xf32>
    %266 = arith.addf %257, %265 : vector<64x64xf32>
    %267 = vector.extract_strided_slice %200 {offsets = [0, 7], sizes = [64, 1], strides = [1, 1]} : vector<64x8xi32> to vector<64x1xi32>
    %268 = vector.broadcast %267 : vector<64x1xi32> to vector<64x64xi32>
    %269 = arith.cmpi eq, %268, %11 : vector<64x64xi32>
    %270 = vector.extract_strided_slice %202 {offsets = [0, 7], sizes = [64, 1], strides = [1, 1]} : vector<64x8xf32> to vector<64x1xf32>
    %cst_58 = arith.constant 0.000000e+00 : f32
    %271 = vector.shape_cast %270 : vector<64x1xf32> to vector<64x1xf32>
    %272 = vector.broadcast %271 : vector<64x1xf32> to vector<64x64xf32>
    %273 = vector.broadcast %cst_58 : f32 to vector<64x64xf32>
    %274 = arith.select %269, %272, %273 : vector<64x64xi1>, vector<64x64xf32>
    %275 = arith.addf %266, %274 : vector<64x64xf32>
    %276 = arith.truncf %275 : vector<64x64xf32> to vector<64x64xbf16>
    %277 = arith.truncf %198 : vector<64x32xf32> to vector<64x32xbf16>
    %cst_59 = arith.constant dense<0.000000e+00> : vector<64x32xf32>
    %278 = tpu.matmul %276, %277, %cst_59 {dimension_numbers = #tpu.dot_dimension_numbers<[1], [0], [0], [1], [0, 0, 1, 1], [], []>} : vector<64x64xbf16>, vector<64x32xbf16>, vector<64x32xf32> -> vector<64x32xf32>
    %c3 = arith.constant 3 : index
    %279 = memref.load %arg3[%c3] : memref<4xi32, #tpu.memory_space<smem>>
    %280 = vector.broadcast %279 : i32 to vector<64x1xi32>
    %281 = arith.cmpi slt, %10, %280 : vector<64x1xi32>
    %cst_60 = arith.constant 1.000000e+00 : f32
    %cst_61 = arith.constant 0.000000e+00 : f32
    %282 = vector.broadcast %cst_60 : f32 to vector<64x1xf32>
    %283 = vector.broadcast %cst_61 : f32 to vector<64x1xf32>
    %284 = arith.select %281, %282, %283 : vector<64x1xi1>, vector<64x1xf32>
    %285 = vector.extract_strided_slice %9 {offsets = [192, 0], sizes = [64, 32], strides = [1, 1]} : vector<256x32xf32> to vector<64x32xf32>
    %286 = vector.broadcast %284 : vector<64x1xf32> to vector<64x32xf32>
    %287 = arith.mulf %285, %286 : vector<64x32xf32>
    %c3_62 = arith.constant 3 : index
    %c0_63 = arith.constant 0 : index
    %c0_64 = arith.constant 0 : index
    %288 = vector.load %arg1[%c3_62, %c0_63, %c0_64] : memref<4x64x8xi32, #tpu.memory_space<vmem>>, vector<1x64x8xi32>
    %289 = vector.shape_cast %288 : vector<1x64x8xi32> to vector<64x8xi32>
    %c3_65 = arith.constant 3 : index
    %c0_66 = arith.constant 0 : index
    %c0_67 = arith.constant 0 : index
    %290 = vector.load %arg2[%c3_65, %c0_66, %c0_67] : memref<4x64x8xf32, #tpu.memory_space<vmem>>, vector<1x64x8xf32>
    %291 = vector.shape_cast %290 : vector<1x64x8xf32> to vector<64x8xf32>
    %cst_68 = arith.constant 0.000000e+00 : f32
    %292 = vector.broadcast %cst_68 : f32 to vector<64x64xf32>
    %293 = vector.extract_strided_slice %289 {offsets = [0, 0], sizes = [64, 1], strides = [1, 1]} : vector<64x8xi32> to vector<64x1xi32>
    %294 = vector.broadcast %293 : vector<64x1xi32> to vector<64x64xi32>
    %295 = arith.cmpi eq, %294, %11 : vector<64x64xi32>
    %296 = vector.extract_strided_slice %291 {offsets = [0, 0], sizes = [64, 1], strides = [1, 1]} : vector<64x8xf32> to vector<64x1xf32>
    %cst_69 = arith.constant 0.000000e+00 : f32
    %297 = vector.shape_cast %296 : vector<64x1xf32> to vector<64x1xf32>
    %298 = vector.broadcast %297 : vector<64x1xf32> to vector<64x64xf32>
    %299 = vector.broadcast %cst_69 : f32 to vector<64x64xf32>
    %300 = arith.select %295, %298, %299 : vector<64x64xi1>, vector<64x64xf32>
    %301 = arith.addf %292, %300 : vector<64x64xf32>
    %302 = vector.extract_strided_slice %289 {offsets = [0, 1], sizes = [64, 1], strides = [1, 1]} : vector<64x8xi32> to vector<64x1xi32>
    %303 = vector.broadcast %302 : vector<64x1xi32> to vector<64x64xi32>
    %304 = arith.cmpi eq, %303, %11 : vector<64x64xi32>
    %305 = vector.extract_strided_slice %291 {offsets = [0, 1], sizes = [64, 1], strides = [1, 1]} : vector<64x8xf32> to vector<64x1xf32>
    %cst_70 = arith.constant 0.000000e+00 : f32
    %306 = vector.shape_cast %305 : vector<64x1xf32> to vector<64x1xf32>
    %307 = vector.broadcast %306 : vector<64x1xf32> to vector<64x64xf32>
    %308 = vector.broadcast %cst_70 : f32 to vector<64x64xf32>
    %309 = arith.select %304, %307, %308 : vector<64x64xi1>, vector<64x64xf32>
    %310 = arith.addf %301, %309 : vector<64x64xf32>
    %311 = vector.extract_strided_slice %289 {offsets = [0, 2], sizes = [64, 1], strides = [1, 1]} : vector<64x8xi32> to vector<64x1xi32>
    %312 = vector.broadcast %311 : vector<64x1xi32> to vector<64x64xi32>
    %313 = arith.cmpi eq, %312, %11 : vector<64x64xi32>
    %314 = vector.extract_strided_slice %291 {offsets = [0, 2], sizes = [64, 1], strides = [1, 1]} : vector<64x8xf32> to vector<64x1xf32>
    %cst_71 = arith.constant 0.000000e+00 : f32
    %315 = vector.shape_cast %314 : vector<64x1xf32> to vector<64x1xf32>
    %316 = vector.broadcast %315 : vector<64x1xf32> to vector<64x64xf32>
    %317 = vector.broadcast %cst_71 : f32 to vector<64x64xf32>
    %318 = arith.select %313, %316, %317 : vector<64x64xi1>, vector<64x64xf32>
    %319 = arith.addf %310, %318 : vector<64x64xf32>
    %320 = vector.extract_strided_slice %289 {offsets = [0, 3], sizes = [64, 1], strides = [1, 1]} : vector<64x8xi32> to vector<64x1xi32>
    %321 = vector.broadcast %320 : vector<64x1xi32> to vector<64x64xi32>
    %322 = arith.cmpi eq, %321, %11 : vector<64x64xi32>
    %323 = vector.extract_strided_slice %291 {offsets = [0, 3], sizes = [64, 1], strides = [1, 1]} : vector<64x8xf32> to vector<64x1xf32>
    %cst_72 = arith.constant 0.000000e+00 : f32
    %324 = vector.shape_cast %323 : vector<64x1xf32> to vector<64x1xf32>
    %325 = vector.broadcast %324 : vector<64x1xf32> to vector<64x64xf32>
    %326 = vector.broadcast %cst_72 : f32 to vector<64x64xf32>
    %327 = arith.select %322, %325, %326 : vector<64x64xi1>, vector<64x64xf32>
    %328 = arith.addf %319, %327 : vector<64x64xf32>
    %329 = vector.extract_strided_slice %289 {offsets = [0, 4], sizes = [64, 1], strides = [1, 1]} : vector<64x8xi32> to vector<64x1xi32>
    %330 = vector.broadcast %329 : vector<64x1xi32> to vector<64x64xi32>
    %331 = arith.cmpi eq, %330, %11 : vector<64x64xi32>
    %332 = vector.extract_strided_slice %291 {offsets = [0, 4], sizes = [64, 1], strides = [1, 1]} : vector<64x8xf32> to vector<64x1xf32>
    %cst_73 = arith.constant 0.000000e+00 : f32
    %333 = vector.shape_cast %332 : vector<64x1xf32> to vector<64x1xf32>
    %334 = vector.broadcast %333 : vector<64x1xf32> to vector<64x64xf32>
    %335 = vector.broadcast %cst_73 : f32 to vector<64x64xf32>
    %336 = arith.select %331, %334, %335 : vector<64x64xi1>, vector<64x64xf32>
    %337 = arith.addf %328, %336 : vector<64x64xf32>
    %338 = vector.extract_strided_slice %289 {offsets = [0, 5], sizes = [64, 1], strides = [1, 1]} : vector<64x8xi32> to vector<64x1xi32>
    %339 = vector.broadcast %338 : vector<64x1xi32> to vector<64x64xi32>
    %340 = arith.cmpi eq, %339, %11 : vector<64x64xi32>
    %341 = vector.extract_strided_slice %291 {offsets = [0, 5], sizes = [64, 1], strides = [1, 1]} : vector<64x8xf32> to vector<64x1xf32>
    %cst_74 = arith.constant 0.000000e+00 : f32
    %342 = vector.shape_cast %341 : vector<64x1xf32> to vector<64x1xf32>
    %343 = vector.broadcast %342 : vector<64x1xf32> to vector<64x64xf32>
    %344 = vector.broadcast %cst_74 : f32 to vector<64x64xf32>
    %345 = arith.select %340, %343, %344 : vector<64x64xi1>, vector<64x64xf32>
    %346 = arith.addf %337, %345 : vector<64x64xf32>
    %347 = vector.extract_strided_slice %289 {offsets = [0, 6], sizes = [64, 1], strides = [1, 1]} : vector<64x8xi32> to vector<64x1xi32>
    %348 = vector.broadcast %347 : vector<64x1xi32> to vector<64x64xi32>
    %349 = arith.cmpi eq, %348, %11 : vector<64x64xi32>
    %350 = vector.extract_strided_slice %291 {offsets = [0, 6], sizes = [64, 1], strides = [1, 1]} : vector<64x8xf32> to vector<64x1xf32>
    %cst_75 = arith.constant 0.000000e+00 : f32
    %351 = vector.shape_cast %350 : vector<64x1xf32> to vector<64x1xf32>
    %352 = vector.broadcast %351 : vector<64x1xf32> to vector<64x64xf32>
    %353 = vector.broadcast %cst_75 : f32 to vector<64x64xf32>
    %354 = arith.select %349, %352, %353 : vector<64x64xi1>, vector<64x64xf32>
    %355 = arith.addf %346, %354 : vector<64x64xf32>
    %356 = vector.extract_strided_slice %289 {offsets = [0, 7], sizes = [64, 1], strides = [1, 1]} : vector<64x8xi32> to vector<64x1xi32>
    %357 = vector.broadcast %356 : vector<64x1xi32> to vector<64x64xi32>
    %358 = arith.cmpi eq, %357, %11 : vector<64x64xi32>
    %359 = vector.extract_strided_slice %291 {offsets = [0, 7], sizes = [64, 1], strides = [1, 1]} : vector<64x8xf32> to vector<64x1xf32>
    %cst_76 = arith.constant 0.000000e+00 : f32
    %360 = vector.shape_cast %359 : vector<64x1xf32> to vector<64x1xf32>
    %361 = vector.broadcast %360 : vector<64x1xf32> to vector<64x64xf32>
    %362 = vector.broadcast %cst_76 : f32 to vector<64x64xf32>
    %363 = arith.select %358, %361, %362 : vector<64x64xi1>, vector<64x64xf32>
    %364 = arith.addf %355, %363 : vector<64x64xf32>
    %365 = arith.truncf %364 : vector<64x64xf32> to vector<64x64xbf16>
    %366 = arith.truncf %287 : vector<64x32xf32> to vector<64x32xbf16>
    %cst_77 = arith.constant dense<0.000000e+00> : vector<64x32xf32>
    %367 = tpu.matmul %365, %366, %cst_77 {dimension_numbers = #tpu.dot_dimension_numbers<[1], [0], [0], [1], [0, 0, 1, 1], [], []>} : vector<64x64xbf16>, vector<64x32xbf16>, vector<64x32xf32> -> vector<64x32xf32>
    %368 = tpu.concatenate %20, %109, %198, %287 in 0 : vector<64x32xf32>, vector<64x32xf32>, vector<64x32xf32>, vector<64x32xf32> -> vector<256x32xf32>
    %369 = tpu.concatenate %100, %189, %278, %367 in 0 : vector<64x32xf32>, vector<64x32xf32>, vector<64x32xf32>, vector<64x32xf32> -> vector<256x32xf32>
    %370 = tpu.concatenate %368, %369 in 1 : vector<256x32xf32>, vector<256x32xf32> -> vector<256x64xf32>
    %371 = arith.truncf %370 : vector<256x64xf32> to vector<256x64xbf16>
    %c0_78 = arith.constant 0 : index
    %c0_79 = arith.constant 0 : index
    %372 = vector.load %arg5[%c0_78, %c0_79] : memref<64x32xbf16, #tpu.memory_space<vmem>>, vector<64x32xbf16>
    %cst_80 = arith.constant dense<0.000000e+00> : vector<256x32xf32>
    %373 = tpu.matmul %371, %372, %cst_80 {dimension_numbers = #tpu.dot_dimension_numbers<[1], [0], [0], [1], [0, 0, 1, 1], [], []>} : vector<256x64xbf16>, vector<64x32xbf16>, vector<256x32xf32> -> vector<256x32xf32>
    %c0_81 = arith.constant 0 : index
    %c0_82 = arith.constant 0 : index
    %374 = vector.load %arg6[%c0_81, %c0_82] : memref<1x32xf32, #tpu.memory_space<vmem>>, vector<1x32xf32>
    %375 = vector.broadcast %374 : vector<1x32xf32> to vector<256x32xf32>
    %376 = arith.addf %373, %375 : vector<256x32xf32>
    %cst_83 = arith.constant 0.000000e+00 : f32
    %377 = vector.broadcast %cst_83 : f32 to vector<256x32xf32>
    %378 = arith.maximumf %376, %377 : vector<256x32xf32>
    %379 = arith.mulf %378, %378 : vector<256x32xf32>
    %cst_84 = arith.constant dense<0.000000e+00> : vector<256xf32>
    %380 = vector.multi_reduction <add>, %379, %cst_84 [1] : vector<256x32xf32> to vector<256xf32>
    %381 = vector.shape_cast %380 : vector<256xf32> to vector<256x1xf32>
    %382 = arith.truncf %378 : vector<256x32xf32> to vector<256x32xbf16>
    %c0_85 = arith.constant 0 : index
    %c0_86 = arith.constant 0 : index
    %383 = vector.load %arg7[%c0_85, %c0_86] : memref<32x16xbf16, #tpu.memory_space<vmem>>, vector<32x16xbf16>
    %cst_87 = arith.constant dense<0.000000e+00> : vector<256x16xf32>
    %384 = tpu.matmul %382, %383, %cst_87 {dimension_numbers = #tpu.dot_dimension_numbers<[1], [0], [0], [1], [0, 0, 1, 1], [], []>} : vector<256x32xbf16>, vector<32x16xbf16>, vector<256x16xf32> -> vector<256x16xf32>
    %c0_88 = arith.constant 0 : index
    %c0_89 = arith.constant 0 : index
    %385 = vector.load %arg8[%c0_88, %c0_89] : memref<1x16xf32, #tpu.memory_space<vmem>>, vector<1x16xf32>
    %386 = vector.broadcast %381 : vector<256x1xf32> to vector<256x16xf32>
    %387 = vector.broadcast %385 : vector<1x16xf32> to vector<256x16xf32>
    %388 = arith.addf %386, %387 : vector<256x16xf32>
    %cst_90 = arith.constant 2.000000e+00 : f32
    %389 = vector.broadcast %cst_90 : f32 to vector<256x16xf32>
    %390 = arith.mulf %389, %384 : vector<256x16xf32>
    %391 = arith.subf %388, %390 : vector<256x16xf32>
    %cst_91 = arith.constant 0.000000e+00 : f32
    %392 = vector.broadcast %cst_91 : f32 to vector<256x16xf32>
    %393 = arith.maximumf %391, %392 : vector<256x16xf32>
    %394 = math.sqrt %393 : vector<256x16xf32>
    %c0_92 = arith.constant 0 : index
    %c0_93 = arith.constant 0 : index
    %395 = vector.load %arg9[%c0_92, %c0_93] : memref<1x8xf32, #tpu.memory_space<vmem>>, vector<1x8xf32>
    %c0_94 = arith.constant 0 : index
    %c0_95 = arith.constant 0 : index
    %396 = vector.load %arg11[%c0_94, %c0_95] : memref<8x3xf32, #tpu.memory_space<vmem>>, vector<8x3xf32>
    %cst_96 = arith.constant dense<0.000000e+00> : vector<1x3xf32>
    %397 = tpu.matmul %395, %396, %cst_96 {dimension_numbers = #tpu.dot_dimension_numbers<[1], [0], [0], [1], [0, 0, 1, 1], [], []>} : vector<1x8xf32>, vector<8x3xf32>, vector<1x3xf32> -> vector<1x3xf32>
    %c0_97 = arith.constant 0 : index
    %c0_98 = arith.constant 0 : index
    %398 = vector.load %arg12[%c0_97, %c0_98] : memref<1x3xf32, #tpu.memory_space<vmem>>, vector<1x3xf32>
    %399 = arith.addf %397, %398 : vector<1x3xf32>
    %c0_99 = arith.constant 0 : index
    %400 = memref.load %arg3[%c0_99] : memref<4xi32, #tpu.memory_space<smem>>
    %401 = vector.broadcast %400 : i32 to vector<64x1xi32>
    %402 = arith.cmpi slt, %10, %401 : vector<64x1xi32>
    %cst_100 = arith.constant 1.000000e+00 : f32
    %cst_101 = arith.constant 0.000000e+00 : f32
    %403 = vector.broadcast %cst_100 : f32 to vector<64x1xf32>
    %404 = vector.broadcast %cst_101 : f32 to vector<64x1xf32>
    %405 = arith.select %402, %403, %404 : vector<64x1xi1>, vector<64x1xf32>
    %406 = arith.sitofp %400 : i32 to f32
    %cst_102 = arith.constant 1.000000e+00 : f32
    %407 = arith.maximumf %406, %cst_102 : f32
    %cst_103 = arith.constant 1.000000e+00 : f32
    %408 = arith.divf %cst_103, %407 : f32
    %409 = vector.extract_strided_slice %394 {offsets = [0, 0], sizes = [64, 16], strides = [1, 1]} : vector<256x16xf32> to vector<64x16xf32>
    %410 = vector.broadcast %408 : f32 to vector<64x1xf32>
    %411 = arith.mulf %405, %410 : vector<64x1xf32>
    %412 = vector.broadcast %411 : vector<64x1xf32> to vector<64x16xf32>
    %413 = arith.mulf %409, %412 : vector<64x16xf32>
    %cst_104 = arith.constant dense<0.000000e+00> : vector<16xf32>
    %414 = vector.multi_reduction <add>, %413, %cst_104 [0] : vector<64x16xf32> to vector<16xf32>
    %415 = vector.shape_cast %414 : vector<16xf32> to vector<1x16xf32>
    %c0_105 = arith.constant 0 : index
    %c0_106 = arith.constant 0 : index
    %c0_107 = arith.constant 0 : index
    %416 = vector.load %arg10[%c0_105, %c0_106, %c0_107] : memref<4x16x3xf32, #tpu.memory_space<vmem>>, vector<1x16x3xf32>
    %417 = vector.shape_cast %416 : vector<1x16x3xf32> to vector<16x3xf32>
    %cst_108 = arith.constant dense<0.000000e+00> : vector<1x3xf32>
    %418 = tpu.matmul %415, %417, %cst_108 {dimension_numbers = #tpu.dot_dimension_numbers<[1], [0], [0], [1], [0, 0, 1, 1], [], []>} : vector<1x16xf32>, vector<16x3xf32>, vector<1x3xf32> -> vector<1x3xf32>
    %419 = arith.addf %399, %418 : vector<1x3xf32>
    %c1_109 = arith.constant 1 : index
    %420 = memref.load %arg3[%c1_109] : memref<4xi32, #tpu.memory_space<smem>>
    %421 = vector.broadcast %420 : i32 to vector<64x1xi32>
    %422 = arith.cmpi slt, %10, %421 : vector<64x1xi32>
    %cst_110 = arith.constant 1.000000e+00 : f32
    %cst_111 = arith.constant 0.000000e+00 : f32
    %423 = vector.broadcast %cst_110 : f32 to vector<64x1xf32>
    %424 = vector.broadcast %cst_111 : f32 to vector<64x1xf32>
    %425 = arith.select %422, %423, %424 : vector<64x1xi1>, vector<64x1xf32>
    %426 = arith.sitofp %420 : i32 to f32
    %cst_112 = arith.constant 1.000000e+00 : f32
    %427 = arith.maximumf %426, %cst_112 : f32
    %cst_113 = arith.constant 1.000000e+00 : f32
    %428 = arith.divf %cst_113, %427 : f32
    %429 = vector.extract_strided_slice %394 {offsets = [64, 0], sizes = [64, 16], strides = [1, 1]} : vector<256x16xf32> to vector<64x16xf32>
    %430 = vector.broadcast %428 : f32 to vector<64x1xf32>
    %431 = arith.mulf %425, %430 : vector<64x1xf32>
    %432 = vector.broadcast %431 : vector<64x1xf32> to vector<64x16xf32>
    %433 = arith.mulf %429, %432 : vector<64x16xf32>
    %cst_114 = arith.constant dense<0.000000e+00> : vector<16xf32>
    %434 = vector.multi_reduction <add>, %433, %cst_114 [0] : vector<64x16xf32> to vector<16xf32>
    %435 = vector.shape_cast %434 : vector<16xf32> to vector<1x16xf32>
    %c1_115 = arith.constant 1 : index
    %c0_116 = arith.constant 0 : index
    %c0_117 = arith.constant 0 : index
    %436 = vector.load %arg10[%c1_115, %c0_116, %c0_117] : memref<4x16x3xf32, #tpu.memory_space<vmem>>, vector<1x16x3xf32>
    %437 = vector.shape_cast %436 : vector<1x16x3xf32> to vector<16x3xf32>
    %cst_118 = arith.constant dense<0.000000e+00> : vector<1x3xf32>
    %438 = tpu.matmul %435, %437, %cst_118 {dimension_numbers = #tpu.dot_dimension_numbers<[1], [0], [0], [1], [0, 0, 1, 1], [], []>} : vector<1x16xf32>, vector<16x3xf32>, vector<1x3xf32> -> vector<1x3xf32>
    %439 = arith.addf %419, %438 : vector<1x3xf32>
    %c2_119 = arith.constant 2 : index
    %440 = memref.load %arg3[%c2_119] : memref<4xi32, #tpu.memory_space<smem>>
    %441 = vector.broadcast %440 : i32 to vector<64x1xi32>
    %442 = arith.cmpi slt, %10, %441 : vector<64x1xi32>
    %cst_120 = arith.constant 1.000000e+00 : f32
    %cst_121 = arith.constant 0.000000e+00 : f32
    %443 = vector.broadcast %cst_120 : f32 to vector<64x1xf32>
    %444 = vector.broadcast %cst_121 : f32 to vector<64x1xf32>
    %445 = arith.select %442, %443, %444 : vector<64x1xi1>, vector<64x1xf32>
    %446 = arith.sitofp %440 : i32 to f32
    %cst_122 = arith.constant 1.000000e+00 : f32
    %447 = arith.maximumf %446, %cst_122 : f32
    %cst_123 = arith.constant 1.000000e+00 : f32
    %448 = arith.divf %cst_123, %447 : f32
    %449 = vector.extract_strided_slice %394 {offsets = [128, 0], sizes = [64, 16], strides = [1, 1]} : vector<256x16xf32> to vector<64x16xf32>
    %450 = vector.broadcast %448 : f32 to vector<64x1xf32>
    %451 = arith.mulf %445, %450 : vector<64x1xf32>
    %452 = vector.broadcast %451 : vector<64x1xf32> to vector<64x16xf32>
    %453 = arith.mulf %449, %452 : vector<64x16xf32>
    %cst_124 = arith.constant dense<0.000000e+00> : vector<16xf32>
    %454 = vector.multi_reduction <add>, %453, %cst_124 [0] : vector<64x16xf32> to vector<16xf32>
    %455 = vector.shape_cast %454 : vector<16xf32> to vector<1x16xf32>
    %c2_125 = arith.constant 2 : index
    %c0_126 = arith.constant 0 : index
    %c0_127 = arith.constant 0 : index
    %456 = vector.load %arg10[%c2_125, %c0_126, %c0_127] : memref<4x16x3xf32, #tpu.memory_space<vmem>>, vector<1x16x3xf32>
    %457 = vector.shape_cast %456 : vector<1x16x3xf32> to vector<16x3xf32>
    %cst_128 = arith.constant dense<0.000000e+00> : vector<1x3xf32>
    %458 = tpu.matmul %455, %457, %cst_128 {dimension_numbers = #tpu.dot_dimension_numbers<[1], [0], [0], [1], [0, 0, 1, 1], [], []>} : vector<1x16xf32>, vector<16x3xf32>, vector<1x3xf32> -> vector<1x3xf32>
    %459 = arith.addf %439, %458 : vector<1x3xf32>
    %c3_129 = arith.constant 3 : index
    %460 = memref.load %arg3[%c3_129] : memref<4xi32, #tpu.memory_space<smem>>
    %461 = vector.broadcast %460 : i32 to vector<64x1xi32>
    %462 = arith.cmpi slt, %10, %461 : vector<64x1xi32>
    %cst_130 = arith.constant 1.000000e+00 : f32
    %cst_131 = arith.constant 0.000000e+00 : f32
    %463 = vector.broadcast %cst_130 : f32 to vector<64x1xf32>
    %464 = vector.broadcast %cst_131 : f32 to vector<64x1xf32>
    %465 = arith.select %462, %463, %464 : vector<64x1xi1>, vector<64x1xf32>
    %466 = arith.sitofp %460 : i32 to f32
    %cst_132 = arith.constant 1.000000e+00 : f32
    %467 = arith.maximumf %466, %cst_132 : f32
    %cst_133 = arith.constant 1.000000e+00 : f32
    %468 = arith.divf %cst_133, %467 : f32
    %469 = vector.extract_strided_slice %394 {offsets = [192, 0], sizes = [64, 16], strides = [1, 1]} : vector<256x16xf32> to vector<64x16xf32>
    %470 = vector.broadcast %468 : f32 to vector<64x1xf32>
    %471 = arith.mulf %465, %470 : vector<64x1xf32>
    %472 = vector.broadcast %471 : vector<64x1xf32> to vector<64x16xf32>
    %473 = arith.mulf %469, %472 : vector<64x16xf32>
    %cst_134 = arith.constant dense<0.000000e+00> : vector<16xf32>
    %474 = vector.multi_reduction <add>, %473, %cst_134 [0] : vector<64x16xf32> to vector<16xf32>
    %475 = vector.shape_cast %474 : vector<16xf32> to vector<1x16xf32>
    %c3_135 = arith.constant 3 : index
    %c0_136 = arith.constant 0 : index
    %c0_137 = arith.constant 0 : index
    %476 = vector.load %arg10[%c3_135, %c0_136, %c0_137] : memref<4x16x3xf32, #tpu.memory_space<vmem>>, vector<1x16x3xf32>
    %477 = vector.shape_cast %476 : vector<1x16x3xf32> to vector<16x3xf32>
    %cst_138 = arith.constant dense<0.000000e+00> : vector<1x3xf32>
    %478 = tpu.matmul %475, %477, %cst_138 {dimension_numbers = #tpu.dot_dimension_numbers<[1], [0], [0], [1], [0, 0, 1, 1], [], []>} : vector<1x16xf32>, vector<16x3xf32>, vector<1x3xf32> -> vector<1x3xf32>
    %479 = arith.addf %459, %478 : vector<1x3xf32>
    %cst_139 = arith.constant dense<0xFF800000> : vector<1xf32>
    %480 = vector.multi_reduction <maximumf>, %479, %cst_139 [1] : vector<1x3xf32> to vector<1xf32>
    %481 = vector.shape_cast %480 : vector<1xf32> to vector<1x1xf32>
    %482 = vector.broadcast %481 : vector<1x1xf32> to vector<1x3xf32>
    %483 = arith.subf %479, %482 : vector<1x3xf32>
    %484 = math.exp %483 : vector<1x3xf32>
    %cst_140 = arith.constant dense<0.000000e+00> : vector<1xf32>
    %485 = vector.multi_reduction <add>, %484, %cst_140 [1] : vector<1x3xf32> to vector<1xf32>
    %486 = vector.shape_cast %485 : vector<1xf32> to vector<1x1xf32>
    %487 = math.log %486 : vector<1x1xf32>
    %488 = vector.broadcast %487 : vector<1x1xf32> to vector<1x3xf32>
    %489 = arith.subf %483, %488 : vector<1x3xf32>
    %c0_141 = arith.constant 0 : index
    %c0_142 = arith.constant 0 : index
    %490 = vector.load %arg13[%c0_141, %c0_142] : memref<1x3xf32, #tpu.memory_space<vmem>>, vector<1x3xf32>
    tpu.vector_store %arg13[%c0_141, %c0_142], %489 {strides = array<i32>} : memref<1x3xf32, #tpu.memory_space<vmem>>, vector<1x3xf32>,
    return
  }
}

</mosaic_0001>

<bundles_post_ra>
// kernel: squeeze.0
= control target key start
LH: loop header
LB: loop body
LE: loop exit
PB: predicated region body
PF: predicated region fallthrough
CT: control target
= control target key end

     0   :  { %s1091_s8 = smov 125   ;;  %s1092_s9 = smov 126   ;;  %vm8_vm0 = vcmask 7168   ;;  %s2190_s0 = inlined_call_operand.vmem [shape: s32[1,4,64], index: 0, kind: input, shape index: {}]   ;;  %s2191_s1 = inlined_call_operand.vmem [shape: s32[256,1], index: 1, kind: output, shape index: {}]  }
   0x1   :  { %v5_v0 = vld [vmem:[%s2190_s0] sm:$0xf]  ;;  %s1090_s0 = smov 127   ;;  %s1093_s10 = smov 124  }
   0x2   :  { %6 = vst [vmem:[#allocation0] sm:$0xf] %v5_v0  ;;  %s1094_s11 = smov 123   ;;  %s1095_s12 = smov 122  }
   0x3   :  { %s1096_s13 = smov 121   ;;  %s1097_s14 = smov 120  }
   0x4   :  { %s1098_s15 = smov 119   ;;  %s1099_s16 = smov 118  }
   0x5   :  { %s1100_s17 = smov 117   ;;  %s1101_s18 = smov 116  }
   0x6   :  { %s1102_s19 = smov 115   ;;  %s1103_s20 = smov 114  }
   0x7   :  { %s1104_s21 = smov 113   ;;  %s1105_s22 = smov 112  }
   0x8   :  { %s1106_s23 = smov 111   ;;  %s1107_s24 = smov 110  }
   0x9   :  { %v16_v1 = vld [vmem:[#allocation0] sm:$0xf]   ;;  %s1108_s25 = smov 109   ;;  %s1109_s26 = smov 108  }
   0xa   :  { %v40_v2 = vld [vmem:[#allocation0] sm:$0xf]   ;;  %17 = vrot.lane.b32.xlu0 %v16_v1, %s1090_s0  ;;  %s1110_s27 = smov 107   ;;  %s1111_s28 = smov 106  }
   0xb   :  { %41 = vrot.lane.b32.xlu1 %v40_v2, %s1091_s8  ;;  %v28_v3 = vld [vmem:[#allocation0] sm:$0xf]   ;;  %s1112_s29 = smov 105   ;;  %s1113_s30 = smov 104  }
   0xc   :  { %v52_v4 = vld [vmem:[#allocation0] sm:$0xf]   ;;  %s1114_s2 = smov 103   ;;  %s1115_s3 = smov 102  }
   0xd   :  { %v64_v5 = vld [vmem:[#allocation0] sm:$0xf]   ;;  %s1116_s4 = smov 101   ;;  %s1117_s5 = smov 100  }
   0xe   :  { %29 = vrot.lane.b32.xlu0 %v28_v3, %s1092_s9  ;;  %v76_v6 = vld [vmem:[#allocation0] sm:$0xf]   ;;  %s1118_s6 = smov 99   ;;  %s1119_s7 = smov 98  }
   0xf   :  { %53 = vrot.lane.b32.xlu1 %v52_v4, %s1093_s10  ;;  %v88_v7 = vld [vmem:[#allocation0] sm:$0xf]   ;;  %s1120_s0 = smov 97   ;;  %s1121_s8 = smov 96  }
  0x10   :  { %v100_v8 = vld [vmem:[#allocation0] sm:$0xf]   ;;  %s1122_s9 = smov 95   ;;  %s1123_s10 = smov 94  }
  0x11   :  { %v112_v9 = vld [vmem:[#allocation0] sm:$0xf]  }
  0x12   :  { %65 = vrot.lane.b32.xlu0 %v64_v5, %s1094_s11  ;;  %v124_v10 = vld [vmem:[#allocation0] sm:$0xf]   ;;  %s1124_s11 = smov 93  }
  0x13   :  { %77 = vrot.lane.b32.xlu1 %v76_v6, %s1095_s12  ;;  %v136_v11 = vld [vmem:[#allocation0] sm:$0xf]   ;;  %s1125_s12 = smov 92  }
  0x14   :  { %v148_v12 = vld [vmem:[#allocation0] sm:$0xf]  }
  0x15   :  { %v160_v13 = vld [vmem:[#allocation0] sm:$0xf]  }
  0x16   :  { %89 = vrot.lane.b32.xlu0 %v88_v7, %s1096_s13  ;;  %v172_v14 = vld [vmem:[#allocation0] sm:$0xf]   ;;  %s1126_s13 = smov 91  }
  0x17   :  { %101 = vrot.lane.b32.xlu1 %v100_v8, %s1097_s14  ;;  %v184_v15 = vld [vmem:[#allocation0] sm:$0xf]   ;;  %s1127_s14 = smov 90  }
  0x18   :  { %v196_v16 = vld [vmem:[#allocation0] sm:$0xf]  }
  0x19   :  { %v208_v17 = vld [vmem:[#allocation0] sm:$0xf]  }
  0x1a   :  { %113 = vrot.lane.b32.xlu0 %v112_v9, %s1098_s15  ;;  %v220_v18 = vld [vmem:[#allocation0] sm:$0xf]   ;;  %s1128_s15 = smov 89  }
  0x1b   :  { %125 = vrot.lane.b32.xlu1 %v124_v10, %s1099_s16  ;;  %v232_v19 = vld [vmem:[#allocation0] sm:$0xf]   ;;  %s1129_s16 = smov 88  }
  0x1c   :  { %v244_v20 = vld [vmem:[#allocation0] sm:$0xf]  }
  0x1d   :  { %v256_v21 = vld [vmem:[#allocation0] sm:$0xf]  }
  0x1e   :  { %137 = vrot.lane.b32.xlu0 %v136_v11, %s1100_s17  ;;  %v268_v22 = vld [vmem:[#allocation0] sm:$0xf]   ;;  %s1130_s17 = smov 87  }
  0x1f   :  { %149 = vrot.lane.b32.xlu1 %v148_v12, %s1101_s18  ;;  %v280_v23 = vld [vmem:[#allocation0] sm:$0xf]   ;;  %s1131_s18 = smov 86  }
  0x20   :  { %v292_v24 = vld [vmem:[#allocation0] sm:$0xf]  }
  0x21   :  { %v304_v25 = vld [vmem:[#allocation0] sm:$0xf]  }
  0x22   :  { %161 = vrot.lane.b32.xlu0 %v160_v13, %s1102_s19  ;;  %v316_v26 = vld [vmem:[#allocation0] sm:$0xf]   ;;  %s1132_s19 = smov 85  }
  0x23   :  { %173 = vrot.lane.b32.xlu1 %v172_v14, %s1103_s20  ;;  %v328_v27 = vld [vmem:[#allocation0] sm:$0xf]   ;;  %s1133_s20 = smov 84  }
  0x24   :  { %v340_v28 = vld [vmem:[#allocation0] sm:$0xf]  }
  0x25   :  { %v352_v29 = vld [vmem:[#allocation0] sm:$0xf]  }
  0x26   :  { %185 = vrot.lane.b32.xlu0 %v184_v15, %s1104_s21  ;;  %v364_v30 = vld [vmem:[#allocation0] sm:$0xf]   ;;  %s1134_s21 = smov 83  }
  0x27   :  { %197 = vrot.lane.b32.xlu1 %v196_v16, %s1105_s22  ;;  %v376_v31 = vld [vmem:[#allocation0] sm:$0xf]   ;;  %s1135_s22 = smov 82  }
  0x28   :  { %v388_v32 = vld [vmem:[#allocation0] sm:$0xf]  }
  0x29   :  { %v400_v33 = vld [vmem:[#allocation0] sm:$0xf]  }
  0x2a   :  { %209 = vrot.lane.b32.xlu0 %v208_v17, %s1106_s23  ;;  %v412_v34 = vld [vmem:[#allocation0] sm:$0xf]   ;;  %s1136_s23 = smov 81  }
  0x2b   :  { %221 = vrot.lane.b32.xlu1 %v220_v18, %s1107_s24  ;;  %v424_v35 = vld [vmem:[#allocation0] sm:$0xf]   ;;  %s1137_s24 = smov 80  }
  0x2c   :  { %v436_v36 = vld [vmem:[#allocation0] sm:$0xf]  }
  0x2d   :  { %v448_v37 = vld [vmem:[#allocation0] sm:$0xf]  }
  0x2e   :  { %233 = vrot.lane.b32.xlu0 %v232_v19, %s1108_s25  ;;  %v460_v38 = vld [vmem:[#allocation0] sm:$0xf]   ;;  %s1138_s25 = smov 79  }
  0x2f   :  { %245 = vrot.lane.b32.xlu1 %v244_v20, %s1109_s26  ;;  %v472_v39 = vld [vmem:[#allocation0] sm:$0xf]   ;;  %s1139_s26 = smov 78  }
  0x30   :  { %v484_v40 = vld [vmem:[#allocation0] sm:$0xf]  }
  0x31   :  { %v496_v41 = vld [vmem:[#allocation0] sm:$0xf]  }
  0x32   :  { %257 = vrot.lane.b32.xlu0 %v256_v21, %s1110_s27  ;;  %v508_v42 = vld [vmem:[#allocation0] sm:$0xf]   ;;  %s1140_s27 = smov 77  }
  0x33   :  { %269 = vrot.lane.b32.xlu1 %v268_v22, %s1111_s28  ;;  %v520_v43 = vld [vmem:[#allocation0] sm:$0xf]   ;;  %s1141_s28 = smov 76  }
  0x34   :  { %v532_v44 = vld [vmem:[#allocation0] sm:$0xf]  }
  0x35   :  { %v544_v45 = vld [vmem:[#allocation0] sm:$0xf]  }
  0x36   :  { %281 = vrot.lane.b32.xlu0 %v280_v23, %s1112_s29  ;;  %v556_v46 = vld [vmem:[#allocation0] sm:$0xf]   ;;  %s1142_s29 = smov 75  }
  0x37   :  { %293 = vrot.lane.b32.xlu1 %v292_v24, %s1113_s30  ;;  %v568_v47 = vld [vmem:[#allocation0] sm:$0xf]   ;;  %s1143_s30 = smov 74  }
  0x38   :  { %v580_v48 = vld [vmem:[#allocation0] sm:$0xf]  }
  0x39   :  { %v592_v49 = vld [vmem:[#allocation0] sm:$0xf]  }
  0x3a   :  { %305 = vrot.lane.b32.xlu0 %v304_v25, %s1114_s2  ;;  %v604_v50 = vld [vmem:[#allocation0] sm:$0xf]   ;;  %s1144_s2 = smov 73  }
  0x3b   :  { %317 = vrot.lane.b32.xlu1 %v316_v26, %s1115_s3  ;;  %v616_v51 = vld [vmem:[#allocation0] sm:$0xf]   ;;  %s1145_s3 = smov 72  }
  0x3c   :  { %v628_v52 = vld [vmem:[#allocation0] sm:$0xf]  }
  0x3d   :  { %v640_v53 = vld [vmem:[#allocation0] sm:$0xf]  }
  0x3e   :  { %329 = vrot.lane.b32.xlu0 %v328_v27, %s1116_s4  ;;  %v652_v54 = vld [vmem:[#allocation0] sm:$0xf]  }
  0x3f   :  { %341 = vrot.lane.b32.xlu1 %v340_v28, %s1117_s5  ;;  %v664_v55 = vld [vmem:[#allocation0] sm:$0xf]  }
  0x40   :  { %v676_v56 = vld [vmem:[#allocation0] sm:$0xf]  }
  0x41   :  { %v688_v57 = vld [vmem:[#allocation0] sm:$0xf]  }
  0x42   :  { %353 = vrot.lane.b32.xlu0 %v352_v29, %s1118_s6  ;;  %v700_v58 = vld [vmem:[#allocation0] sm:$0xf]   ;;  %s1152_s6 = smov 65  }
  0x43   :  { %365 = vrot.lane.b32.xlu1 %v364_v30, %s1119_s7  ;;  %v7_v59 = vld [vmem:[#allocation0] sm:$0xf]  }
  0x44   :  { %9 = vst.msk [vmem:[%s2191_s1] sm:$0x1] %vm8_vm0, %v7_v59   ;;  %772 = vst.msk [vmem:[%s2191_s1 + $0x3f] sm:$0x2] %vm8_vm0, %v7_v59   ;;  %v712_v60 = vld [vmem:[#allocation0] sm:$0xf]  }
  0x45   :  { %773 = vst.msk [vmem:[%s2191_s1 + $0x7e] sm:$0x4] %vm8_vm0, %v7_v59   ;;  %774 = vst.msk [vmem:[%s2191_s1 + $0xbd] sm:$0x8] %vm8_vm0, %v7_v59   ;;  %v724_v61 = vld [vmem:[#allocation0] sm:$0xf]  }
  0x46   :  { %377 = vrot.lane.b32.xlu0 %v376_v31, %s1120_s0  ;;  %v736_v0 = vld [vmem:[#allocation0] sm:$0xf]  }
  0x47   :  { %389 = vrot.lane.b32.xlu1 %v388_v32, %s1121_s8  ;;  %v748_v1 = vld [vmem:[#allocation0] sm:$0xf]  }
  0x48   :  { %v760_v4 = vld [vmem:[#allocation0] sm:$0xf]  }
  0x4a   :  { %401 = vrot.lane.b32.xlu0 %v400_v33, %s1122_s9 }
  0x4b   :  { %413 = vrot.lane.b32.xlu1 %v412_v34, %s1123_s10 }
  0x4e   :  { %425 = vrot.lane.b32.xlu0 %v424_v35, %s1124_s11  ;;  %s1146_s11 = smov 71  }
  0x4f   :  { %437 = vrot.lane.b32.xlu1 %v436_v36, %s1125_s12  ;;  %s1147_s12 = smov 70  }
  0x52   :  { %449 = vrot.lane.b32.xlu0 %v448_v37, %s1126_s13 }
  0x53   :  { %461 = vrot.lane.b32.xlu1 %v460_v38, %s1127_s14 }
  0x56   :  { %473 = vrot.lane.b32.xlu0 %v472_v39, %s1128_s15 }
  0x57   :  { %485 = vrot.lane.b32.xlu1 %v484_v40, %s1129_s16 }
  0x5a   :  { %497 = vrot.lane.b32.xlu0 %v496_v41, %s1130_s17  ;;  %s1150_s17 = smov 67  }
  0x5b   :  { %509 = vrot.lane.b32.xlu1 %v508_v42, %s1131_s18  ;;  %s1151_s18 = smov 66  }
  0x5e   :  { %521 = vrot.lane.b32.xlu0 %v520_v43, %s1132_s19 }
  0x5f   :  { %533 = vrot.lane.b32.xlu1 %v532_v44, %s1133_s20 }
  0x62   :  { %545 = vrot.lane.b32.xlu0 %v544_v45, %s1134_s21 }
  0x63   :  { %557 = vrot.lane.b32.xlu1 %v556_v46, %s1135_s22 }
  0x66   :  { %569 = vrot.lane.b32.xlu0 %v568_v47, %s1136_s23 }
  0x67   :  { %581 = vrot.lane.b32.xlu1 %v580_v48, %s1137_s24 }
  0x6a   :  { %593 = vrot.lane.b32.xlu0 %v592_v49, %s1138_s25 }
  0x6b   :  { %605 = vrot.lane.b32.xlu1 %v604_v50, %s1139_s26 }
  0x6e   :  { %617 = vrot.lane.b32.xlu0 %v616_v51, %s1140_s27 }
  0x6f   :  { %629 = vrot.lane.b32.xlu1 %v628_v52, %s1141_s28 }
  0x72   :  { %641 = vrot.lane.b32.xlu0 %v640_v53, %s1142_s29  ;;  %s1148_s29 = smov 69  }
  0x73   :  { %653 = vrot.lane.b32.xlu1 %v652_v54, %s1143_s30  ;;  %s1149_s30 = smov 68  }
  0x76   :  { %665 = vrot.lane.b32.xlu0 %v664_v55, %s1144_s2 }
  0x77   :  { %677 = vrot.lane.b32.xlu1 %v676_v56, %s1145_s3 }
  0x7a   :  { %689 = vrot.lane.b32.xlu0 %v688_v57, %s1146_s11 }
  0x7b   :  { %701 = vrot.lane.b32.xlu1 %v700_v58, %s1147_s12 }
  0x7c   :  { %v18_v62 = vpop.permute.xlu0 %17  }
  0x7d   :  { %v42_v63 = vpop.permute.xlu1 %41   ;;  %775 = vst.msk [vmem:[%s2191_s1 + $0x1] sm:$0x1] %vm8_vm0, %v18_v62   ;;  %776 = vst.msk [vmem:[%s2191_s1 + $0x40] sm:$0x2] %vm8_vm0, %v18_v62  }
  0x7e   :  { %777 = vst.msk [vmem:[%s2191_s1 + $0x7f] sm:$0x4] %vm8_vm0, %v18_v62   ;;  %778 = vst.msk [vmem:[%s2191_s1 + $0xbe] sm:$0x8] %vm8_vm0, %v18_v62   ;;  %713 = vrot.lane.b32.xlu0 %v712_v60, %s1148_s29 }
  0x7f   :  { %783 = vst.msk [vmem:[%s2191_s1 + $0x3] sm:$0x1] %vm8_vm0, %v42_v63   ;;  %784 = vst.msk [vmem:[%s2191_s1 + $0x42] sm:$0x2] %vm8_vm0, %v42_v63   ;;  %725 = vrot.lane.b32.xlu1 %v724_v61, %s1149_s30 }
  0x80   :  { %785 = vst.msk [vmem:[%s2191_s1 + $0x81] sm:$0x4] %vm8_vm0, %v42_v63   ;;  %786 = vst.msk [vmem:[%s2191_s1 + $0xc0] sm:$0x8] %vm8_vm0, %v42_v63   ;;  %v30_v2 = vpop.permute.xlu0 %29  }
  0x81   :  { %v54_v3 = vpop.permute.xlu1 %53   ;;  %779 = vst.msk [vmem:[%s2191_s1 + $0x2] sm:$0x1] %vm8_vm0, %v30_v2   ;;  %780 = vst.msk [vmem:[%s2191_s1 + $0x41] sm:$0x2] %vm8_vm0, %v30_v2  }
  0x82   :  { %781 = vst.msk [vmem:[%s2191_s1 + $0x80] sm:$0x4] %vm8_vm0, %v30_v2   ;;  %782 = vst.msk [vmem:[%s2191_s1 + $0xbf] sm:$0x8] %vm8_vm0, %v30_v2   ;;  %737 = vrot.lane.b32.xlu0 %v736_v0, %s1150_s17 }
  0x83   :  { %787 = vst.msk [vmem:[%s2191_s1 + $0x4] sm:$0x1] %vm8_vm0, %v54_v3   ;;  %788 = vst.msk [vmem:[%s2191_s1 + $0x43] sm:$0x2] %vm8_vm0, %v54_v3   ;;  %749 = vrot.lane.b32.xlu1 %v748_v1, %s1151_s18 }
  0x84   :  { %789 = vst.msk [vmem:[%s2191_s1 + $0x82] sm:$0x4] %vm8_vm0, %v54_v3   ;;  %790 = vst.msk [vmem:[%s2191_s1 + $0xc1] sm:$0x8] %vm8_vm0, %v54_v3   ;;  %v66_v5 = vpop.permute.xlu0 %65  }
  0x85   :  { %v78_v6 = vpop.permute.xlu1 %77   ;;  %791 = vst.msk [vmem:[%s2191_s1 + $0x5] sm:$0x1] %vm8_vm0, %v66_v5   ;;  %792 = vst.msk [vmem:[%s2191_s1 + $0x44] sm:$0x2] %vm8_vm0, %v66_v5  }
  0x86   :  { %793 = vst.msk [vmem:[%s2191_s1 + $0x83] sm:$0x4] %vm8_vm0, %v66_v5   ;;  %794 = vst.msk [vmem:[%s2191_s1 + $0xc2] sm:$0x8] %vm8_vm0, %v66_v5   ;;  %761 = vrot.lane.b32.xlu0 %v760_v4, %s1152_s6 }
  0x87   :  { %795 = vst.msk [vmem:[%s2191_s1 + $0x6] sm:$0x1] %vm8_vm0, %v78_v6   ;;  %796 = vst.msk [vmem:[%s2191_s1 + $0x45] sm:$0x2] %vm8_vm0, %v78_v6  }
  0x88   :  { %797 = vst.msk [vmem:[%s2191_s1 + $0x84] sm:$0x4] %vm8_vm0, %v78_v6   ;;  %798 = vst.msk [vmem:[%s2191_s1 + $0xc3] sm:$0x8] %vm8_vm0, %v78_v6   ;;  %v90_v7 = vpop.permute.xlu0 %89  }
  0x89   :  { %v102_v8 = vpop.permute.xlu1 %101   ;;  %799 = vst.msk [vmem:[%s2191_s1 + $0x7] sm:$0x1] %vm8_vm0, %v90_v7   ;;  %800 = vst.msk [vmem:[%s2191_s1 + $0x46] sm:$0x2] %vm8_vm0, %v90_v7  }
  0x8a   :  { %801 = vst.msk [vmem:[%s2191_s1 + $0x85] sm:$0x4] %vm8_vm0, %v90_v7   ;;  %802 = vst.msk [vmem:[%s2191_s1 + $0xc4] sm:$0x8] %vm8_vm0, %v90_v7  }
  0x8b   :  { %803 = vst.msk [vmem:[%s2191_s1 + $0x8] sm:$0x1] %vm8_vm0, %v102_v8   ;;  %804 = vst.msk [vmem:[%s2191_s1 + $0x47] sm:$0x2] %vm8_vm0, %v102_v8  }
  0x8c   :  { %805 = vst.msk [vmem:[%s2191_s1 + $0x86] sm:$0x4] %vm8_vm0, %v102_v8   ;;  %806 = vst.msk [vmem:[%s2191_s1 + $0xc5] sm:$0x8] %vm8_vm0, %v102_v8   ;;  %v114_v9 = vpop.permute.xlu0 %113  }
  0x8d   :  { %v126_v10 = vpop.permute.xlu1 %125   ;;  %807 = vst.msk [vmem:[%s2191_s1 + $0x9] sm:$0x1] %vm8_vm0, %v114_v9   ;;  %808 = vst.msk [vmem:[%s2191_s1 + $0x48] sm:$0x2] %vm8_vm0, %v114_v9  }
  0x8e   :  { %809 = vst.msk [vmem:[%s2191_s1 + $0x87] sm:$0x4] %vm8_vm0, %v114_v9   ;;  %810 = vst.msk [vmem:[%s2191_s1 + $0xc6] sm:$0x8] %vm8_vm0, %v114_v9  }
  0x8f   :  { %811 = vst.msk [vmem:[%s2191_s1 + $0xa] sm:$0x1] %vm8_vm0, %v126_v10   ;;  %812 = vst.msk [vmem:[%s2191_s1 + $0x49] sm:$0x2] %vm8_vm0, %v126_v10  }
  0x90   :  { %813 = vst.msk [vmem:[%s2191_s1 + $0x88] sm:$0x4] %vm8_vm0, %v126_v10   ;;  %814 = vst.msk [vmem:[%s2191_s1 + $0xc7] sm:$0x8] %vm8_vm0, %v126_v10   ;;  %v138_v11 = vpop.permute.xlu0 %137  }
  0x91   :  { %v150_v12 = vpop.permute.xlu1 %149   ;;  %815 = vst.msk [vmem:[%s2191_s1 + $0xb] sm:$0x1] %vm8_vm0, %v138_v11   ;;  %816 = vst.msk [vmem:[%s2191_s1 + $0x4a] sm:$0x2] %vm8_vm0, %v138_v11  }
  0x92   :  { %817 = vst.msk [vmem:[%s2191_s1 + $0x89] sm:$0x4] %vm8_vm0, %v138_v11   ;;  %818 = vst.msk [vmem:[%s2191_s1 + $0xc8] sm:$0x8] %vm8_vm0, %v138_v11  }
  0x93   :  { %819 = vst.msk [vmem:[%s2191_s1 + $0xc] sm:$0x1] %vm8_vm0, %v150_v12   ;;  %820 = vst.msk [vmem:[%s2191_s1 + $0x4b] sm:$0x2] %vm8_vm0, %v150_v12  }
  0x94   :  { %821 = vst.msk [vmem:[%s2191_s1 + $0x8a] sm:$0x4] %vm8_vm0, %v150_v12   ;;  %822 = vst.msk [vmem:[%s2191_s1 + $0xc9] sm:$0x8] %vm8_vm0, %v150_v12   ;;  %v162_v13 = vpop.permute.xlu0 %161  }
  0x95   :  { %v174_v14 = vpop.permute.xlu1 %173   ;;  %823 = vst.msk [vmem:[%s2191_s1 + $0xd] sm:$0x1] %vm8_vm0, %v162_v13   ;;  %824 = vst.msk [vmem:[%s2191_s1 + $0x4c] sm:$0x2] %vm8_vm0, %v162_v13  }
  0x96   :  { %825 = vst.msk [vmem:[%s2191_s1 + $0x8b] sm:$0x4] %vm8_vm0, %v162_v13   ;;  %826 = vst.msk [vmem:[%s2191_s1 + $0xca] sm:$0x8] %vm8_vm0, %v162_v13  }
  0x97   :  { %827 = vst.msk [vmem:[%s2191_s1 + $0xe] sm:$0x1] %vm8_vm0, %v174_v14   ;;  %828 = vst.msk [vmem:[%s2191_s1 + $0x4d] sm:$0x2] %vm8_vm0, %v174_v14  }
  0x98   :  { %829 = vst.msk [vmem:[%s2191_s1 + $0x8c] sm:$0x4] %vm8_vm0, %v174_v14   ;;  %830 = vst.msk [vmem:[%s2191_s1 + $0xcb] sm:$0x8] %vm8_vm0, %v174_v14   ;;  %v186_v15 = vpop.permute.xlu0 %185  }
  0x99   :  { %v198_v16 = vpop.permute.xlu1 %197   ;;  %831 = vst.msk [vmem:[%s2191_s1 + $0xf] sm:$0x1] %vm8_vm0, %v186_v15   ;;  %832 = vst.msk [vmem:[%s2191_s1 + $0x4e] sm:$0x2] %vm8_vm0, %v186_v15  }
  0x9a   :  { %833 = vst.msk [vmem:[%s2191_s1 + $0x8d] sm:$0x4] %vm8_vm0, %v186_v15   ;;  %834 = vst.msk [vmem:[%s2191_s1 + $0xcc] sm:$0x8] %vm8_vm0, %v186_v15  }
  0x9b   :  { %835 = vst.msk [vmem:[%s2191_s1 + $0x10] sm:$0x1] %vm8_vm0, %v198_v16   ;;  %836 = vst.msk [vmem:[%s2191_s1 + $0x4f] sm:$0x2] %vm8_vm0, %v198_v16  }
  0x9c   :  { %837 = vst.msk [vmem:[%s2191_s1 + $0x8e] sm:$0x4] %vm8_vm0, %v198_v16   ;;  %838 = vst.msk [vmem:[%s2191_s1 + $0xcd] sm:$0x8] %vm8_vm0, %v198_v16   ;;  %v210_v17 = vpop.permute.xlu0 %209  }
  0x9d   :  { %v222_v18 = vpop.permute.xlu1 %221   ;;  %839 = vst.msk [vmem:[%s2191_s1 + $0x11] sm:$0x1] %vm8_vm0, %v210_v17   ;;  %840 = vst.msk [vmem:[%s2191_s1 + $0x50] sm:$0x2] %vm8_vm0, %v210_v17  }
  0x9e   :  { %841 = vst.msk [vmem:[%s2191_s1 + $0x8f] sm:$0x4] %vm8_vm0, %v210_v17   ;;  %842 = vst.msk [vmem:[%s2191_s1 + $0xce] sm:$0x8] %vm8_vm0, %v210_v17  }
  0x9f   :  { %843 = vst.msk [vmem:[%s2191_s1 + $0x12] sm:$0x1] %vm8_vm0, %v222_v18   ;;  %844 = vst.msk [vmem:[%s2191_s1 + $0x51] sm:$0x2] %vm8_vm0, %v222_v18  }
  0xa0   :  { %845 = vst.msk [vmem:[%s2191_s1 + $0x90] sm:$0x4] %vm8_vm0, %v222_v18   ;;  %846 = vst.msk [vmem:[%s2191_s1 + $0xcf] sm:$0x8] %vm8_vm0, %v222_v18   ;;  %v234_v19 = vpop.permute.xlu0 %233  }
  0xa1   :  { %v246_v20 = vpop.permute.xlu1 %245   ;;  %847 = vst.msk [vmem:[%s2191_s1 + $0x13] sm:$0x1] %vm8_vm0, %v234_v19   ;;  %848 = vst.msk [vmem:[%s2191_s1 + $0x52] sm:$0x2] %vm8_vm0, %v234_v19  }
  0xa2   :  { %849 = vst.msk [vmem:[%s2191_s1 + $0x91] sm:$0x4] %vm8_vm0, %v234_v19   ;;  %850 = vst.msk [vmem:[%s2191_s1 + $0xd0] sm:$0x8] %vm8_vm0, %v234_v19  }
  0xa3   :  { %851 = vst.msk [vmem:[%s2191_s1 + $0x14] sm:$0x1] %vm8_vm0, %v246_v20   ;;  %852 = vst.msk [vmem:[%s2191_s1 + $0x53] sm:$0x2] %vm8_vm0, %v246_v20  }
  0xa4   :  { %853 = vst.msk [vmem:[%s2191_s1 + $0x92] sm:$0x4] %vm8_vm0, %v246_v20   ;;  %854 = vst.msk [vmem:[%s2191_s1 + $0xd1] sm:$0x8] %vm8_vm0, %v246_v20   ;;  %v258_v21 = vpop.permute.xlu0 %257  }
  0xa5   :  { %v270_v22 = vpop.permute.xlu1 %269   ;;  %855 = vst.msk [vmem:[%s2191_s1 + $0x15] sm:$0x1] %vm8_vm0, %v258_v21   ;;  %856 = vst.msk [vmem:[%s2191_s1 + $0x54] sm:$0x2] %vm8_vm0, %v258_v21  }
  0xa6   :  { %857 = vst.msk [vmem:[%s2191_s1 + $0x93] sm:$0x4] %vm8_vm0, %v258_v21   ;;  %858 = vst.msk [vmem:[%s2191_s1 + $0xd2] sm:$0x8] %vm8_vm0, %v258_v21  }
  0xa7   :  { %859 = vst.msk [vmem:[%s2191_s1 + $0x16] sm:$0x1] %vm8_vm0, %v270_v22   ;;  %860 = vst.msk [vmem:[%s2191_s1 + $0x55] sm:$0x2] %vm8_vm0, %v270_v22  }
  0xa8   :  { %861 = vst.msk [vmem:[%s2191_s1 + $0x94] sm:$0x4] %vm8_vm0, %v270_v22   ;;  %862 = vst.msk [vmem:[%s2191_s1 + $0xd3] sm:$0x8] %vm8_vm0, %v270_v22   ;;  %v282_v23 = vpop.permute.xlu0 %281  }
  0xa9   :  { %v294_v24 = vpop.permute.xlu1 %293   ;;  %863 = vst.msk [vmem:[%s2191_s1 + $0x17] sm:$0x1] %vm8_vm0, %v282_v23   ;;  %864 = vst.msk [vmem:[%s2191_s1 + $0x56] sm:$0x2] %vm8_vm0, %v282_v23  }
  0xaa   :  { %865 = vst.msk [vmem:[%s2191_s1 + $0x95] sm:$0x4] %vm8_vm0, %v282_v23   ;;  %866 = vst.msk [vmem:[%s2191_s1 + $0xd4] sm:$0x8] %vm8_vm0, %v282_v23  }
  0xab   :  { %867 = vst.msk [vmem:[%s2191_s1 + $0x18] sm:$0x1] %vm8_vm0, %v294_v24   ;;  %868 = vst.msk [vmem:[%s2191_s1 + $0x57] sm:$0x2] %vm8_vm0, %v294_v24  }
  0xac   :  { %869 = vst.msk [vmem:[%s2191_s1 + $0x96] sm:$0x4] %vm8_vm0, %v294_v24   ;;  %870 = vst.msk [vmem:[%s2191_s1 + $0xd5] sm:$0x8] %vm8_vm0, %v294_v24   ;;  %v306_v25 = vpop.permute.xlu0 %305  }
  0xad   :  { %v318_v26 = vpop.permute.xlu1 %317   ;;  %871 = vst.msk [vmem:[%s2191_s1 + $0x19] sm:$0x1] %vm8_vm0, %v306_v25   ;;  %872 = vst.msk [vmem:[%s2191_s1 + $0x58] sm:$0x2] %vm8_vm0, %v306_v25  }
  0xae   :  { %873 = vst.msk [vmem:[%s2191_s1 + $0x97] sm:$0x4] %vm8_vm0, %v306_v25   ;;  %874 = vst.msk [vmem:[%s2191_s1 + $0xd6] sm:$0x8] %vm8_vm0, %v306_v25  }
  0xaf   :  { %875 = vst.msk [vmem:[%s2191_s1 + $0x1a] sm:$0x1] %vm8_vm0, %v318_v26   ;;  %876 = vst.msk [vmem:[%s2191_s1 + $0x59] sm:$0x2] %vm8_vm0, %v318_v26  }
  0xb0   :  { %877 = vst.msk [vmem:[%s2191_s1 + $0x98] sm:$0x4] %vm8_vm0, %v318_v26   ;;  %878 = vst.msk [vmem:[%s2191_s1 + $0xd7] sm:$0x8] %vm8_vm0, %v318_v26   ;;  %v330_v27 = vpop.permute.xlu0 %329  }
  0xb1   :  { %v342_v28 = vpop.permute.xlu1 %341   ;;  %879 = vst.msk [vmem:[%s2191_s1 + $0x1b] sm:$0x1] %vm8_vm0, %v330_v27   ;;  %880 = vst.msk [vmem:[%s2191_s1 + $0x5a] sm:$0x2] %vm8_vm0, %v330_v27  }
  0xb2   :  { %881 = vst.msk [vmem:[%s2191_s1 + $0x99] sm:$0x4] %vm8_vm0, %v330_v27   ;;  %882 = vst.msk [vmem:[%s2191_s1 + $0xd8] sm:$0x8] %vm8_vm0, %v330_v27  }
  0xb3   :  { %883 = vst.msk [vmem:[%s2191_s1 + $0x1c] sm:$0x1] %vm8_vm0, %v342_v28   ;;  %884 = vst.msk [vmem:[%s2191_s1 + $0x5b] sm:$0x2] %vm8_vm0, %v342_v28  }
  0xb4   :  { %885 = vst.msk [vmem:[%s2191_s1 + $0x9a] sm:$0x4] %vm8_vm0, %v342_v28   ;;  %886 = vst.msk [vmem:[%s2191_s1 + $0xd9] sm:$0x8] %vm8_vm0, %v342_v28   ;;  %v354_v29 = vpop.permute.xlu0 %353  }
  0xb5   :  { %v366_v30 = vpop.permute.xlu1 %365   ;;  %887 = vst.msk [vmem:[%s2191_s1 + $0x1d] sm:$0x1] %vm8_vm0, %v354_v29   ;;  %888 = vst.msk [vmem:[%s2191_s1 + $0x5c] sm:$0x2] %vm8_vm0, %v354_v29  }
  0xb6   :  { %889 = vst.msk [vmem:[%s2191_s1 + $0x9b] sm:$0x4] %vm8_vm0, %v354_v29   ;;  %890 = vst.msk [vmem:[%s2191_s1 + $0xda] sm:$0x8] %vm8_vm0, %v354_v29  }
  0xb7   :  { %891 = vst.msk [vmem:[%s2191_s1 + $0x1e] sm:$0x1] %vm8_vm0, %v366_v30   ;;  %892 = vst.msk [vmem:[%s2191_s1 + $0x5d] sm:$0x2] %vm8_vm0, %v366_v30  }
  0xb8   :  { %893 = vst.msk [vmem:[%s2191_s1 + $0x9c] sm:$0x4] %vm8_vm0, %v366_v30   ;;  %894 = vst.msk [vmem:[%s2191_s1 + $0xdb] sm:$0x8] %vm8_vm0, %v366_v30   ;;  %v378_v31 = vpop.permute.xlu0 %377  }
  0xb9   :  { %v390_v32 = vpop.permute.xlu1 %389   ;;  %895 = vst.msk [vmem:[%s2191_s1 + $0x1f] sm:$0x1] %vm8_vm0, %v378_v31   ;;  %896 = vst.msk [vmem:[%s2191_s1 + $0x5e] sm:$0x2] %vm8_vm0, %v378_v31  }
  0xba   :  { %897 = vst.msk [vmem:[%s2191_s1 + $0x9d] sm:$0x4] %vm8_vm0, %v378_v31   ;;  %898 = vst.msk [vmem:[%s2191_s1 + $0xdc] sm:$0x8] %vm8_vm0, %v378_v31  }
  0xbb   :  { %899 = vst.msk [vmem:[%s2191_s1 + $0x20] sm:$0x1] %vm8_vm0, %v390_v32   ;;  %900 = vst.msk [vmem:[%s2191_s1 + $0x5f] sm:$0x2] %vm8_vm0, %v390_v32  }
  0xbc   :  { %901 = vst.msk [vmem:[%s2191_s1 + $0x9e] sm:$0x4] %vm8_vm0, %v390_v32   ;;  %902 = vst.msk [vmem:[%s2191_s1 + $0xdd] sm:$0x8] %vm8_vm0, %v390_v32   ;;  %v402_v33 = vpop.permute.xlu0 %401  }
  0xbd   :  { %v414_v34 = vpop.permute.xlu1 %413   ;;  %903 = vst.msk [vmem:[%s2191_s1 + $0x21] sm:$0x1] %vm8_vm0, %v402_v33   ;;  %904 = vst.msk [vmem:[%s2191_s1 + $0x60] sm:$0x2] %vm8_vm0, %v402_v33  }
  0xbe   :  { %905 = vst.msk [vmem:[%s2191_s1 + $0x9f] sm:$0x4] %vm8_vm0, %v402_v33   ;;  %906 = vst.msk [vmem:[%s2191_s1 + $0xde] sm:$0x8] %vm8_vm0, %v402_v33  }
  0xbf   :  { %907 = vst.msk [vmem:[%s2191_s1 + $0x22] sm:$0x1] %vm8_vm0, %v414_v34   ;;  %908 = vst.msk [vmem:[%s2191_s1 + $0x61] sm:$0x2] %vm8_vm0, %v414_v34  }
  0xc0   :  { %909 = vst.msk [vmem:[%s2191_s1 + $0xa0] sm:$0x4] %vm8_vm0, %v414_v34   ;;  %910 = vst.msk [vmem:[%s2191_s1 + $0xdf] sm:$0x8] %vm8_vm0, %v414_v34   ;;  %v426_v35 = vpop.permute.xlu0 %425  }
  0xc1   :  { %v438_v36 = vpop.permute.xlu1 %437   ;;  %911 = vst.msk [vmem:[%s2191_s1 + $0x23] sm:$0x1] %vm8_vm0, %v426_v35   ;;  %912 = vst.msk [vmem:[%s2191_s1 + $0x62] sm:$0x2] %vm8_vm0, %v426_v35  }
  0xc2   :  { %913 = vst.msk [vmem:[%s2191_s1 + $0xa1] sm:$0x4] %vm8_vm0, %v426_v35   ;;  %914 = vst.msk [vmem:[%s2191_s1 + $0xe0] sm:$0x8] %vm8_vm0, %v426_v35  }
  0xc3   :  { %915 = vst.msk [vmem:[%s2191_s1 + $0x24] sm:$0x1] %vm8_vm0, %v438_v36   ;;  %916 = vst.msk [vmem:[%s2191_s1 + $0x63] sm:$0x2] %vm8_vm0, %v438_v36  }
  0xc4   :  { %917 = vst.msk [vmem:[%s2191_s1 + $0xa2] sm:$0x4] %vm8_vm0, %v438_v36   ;;  %918 = vst.msk [vmem:[%s2191_s1 + $0xe1] sm:$0x8] %vm8_vm0, %v438_v36   ;;  %v450_v37 = vpop.permute.xlu0 %449  }
  0xc5   :  { %v462_v38 = vpop.permute.xlu1 %461   ;;  %919 = vst.msk [vmem:[%s2191_s1 + $0x25] sm:$0x1] %vm8_vm0, %v450_v37   ;;  %920 = vst.msk [vmem:[%s2191_s1 + $0x64] sm:$0x2] %vm8_vm0, %v450_v37  }
  0xc6   :  { %921 = vst.msk [vmem:[%s2191_s1 + $0xa3] sm:$0x4] %vm8_vm0, %v450_v37   ;;  %922 = vst.msk [vmem:[%s2191_s1 + $0xe2] sm:$0x8] %vm8_vm0, %v450_v37  }
  0xc7   :  { %923 = vst.msk [vmem:[%s2191_s1 + $0x26] sm:$0x1] %vm8_vm0, %v462_v38   ;;  %924 = vst.msk [vmem:[%s2191_s1 + $0x65] sm:$0x2] %vm8_vm0, %v462_v38  }
  0xc8   :  { %925 = vst.msk [vmem:[%s2191_s1 + $0xa4] sm:$0x4] %vm8_vm0, %v462_v38   ;;  %926 = vst.msk [vmem:[%s2191_s1 + $0xe3] sm:$0x8] %vm8_vm0, %v462_v38   ;;  %v474_v39 = vpop.permute.xlu0 %473  }
  0xc9   :  { %v486_v40 = vpop.permute.xlu1 %485   ;;  %927 = vst.msk [vmem:[%s2191_s1 + $0x27] sm:$0x1] %vm8_vm0, %v474_v39   ;;  %928 = vst.msk [vmem:[%s2191_s1 + $0x66] sm:$0x2] %vm8_vm0, %v474_v39  }
  0xca   :  { %929 = vst.msk [vmem:[%s2191_s1 + $0xa5] sm:$0x4] %vm8_vm0, %v474_v39   ;;  %930 = vst.msk [vmem:[%s2191_s1 + $0xe4] sm:$0x8] %vm8_vm0, %v474_v39  }
  0xcb   :  { %931 = vst.msk [vmem:[%s2191_s1 + $0x28] sm:$0x1] %vm8_vm0, %v486_v40   ;;  %932 = vst.msk [vmem:[%s2191_s1 + $0x67] sm:$0x2] %vm8_vm0, %v486_v40  }
  0xcc   :  { %933 = vst.msk [vmem:[%s2191_s1 + $0xa6] sm:$0x4] %vm8_vm0, %v486_v40   ;;  %934 = vst.msk [vmem:[%s2191_s1 + $0xe5] sm:$0x8] %vm8_vm0, %v486_v40   ;;  %v498_v41 = vpop.permute.xlu0 %497  }
  0xcd   :  { %v510_v42 = vpop.permute.xlu1 %509   ;;  %935 = vst.msk [vmem:[%s2191_s1 + $0x29] sm:$0x1] %vm8_vm0, %v498_v41   ;;  %936 = vst.msk [vmem:[%s2191_s1 + $0x68] sm:$0x2] %vm8_vm0, %v498_v41  }
  0xce   :  { %937 = vst.msk [vmem:[%s2191_s1 + $0xa7] sm:$0x4] %vm8_vm0, %v498_v41   ;;  %938 = vst.msk [vmem:[%s2191_s1 + $0xe6] sm:$0x8] %vm8_vm0, %v498_v41  }
  0xcf   :  { %939 = vst.msk [vmem:[%s2191_s1 + $0x2a] sm:$0x1] %vm8_vm0, %v510_v42   ;;  %940 = vst.msk [vmem:[%s2191_s1 + $0x69] sm:$0x2] %vm8_vm0, %v510_v42  }
  0xd0   :  { %941 = vst.msk [vmem:[%s2191_s1 + $0xa8] sm:$0x4] %vm8_vm0, %v510_v42   ;;  %942 = vst.msk [vmem:[%s2191_s1 + $0xe7] sm:$0x8] %vm8_vm0, %v510_v42   ;;  %v522_v43 = vpop.permute.xlu0 %521  }
  0xd1   :  { %v534_v44 = vpop.permute.xlu1 %533   ;;  %943 = vst.msk [vmem:[%s2191_s1 + $0x2b] sm:$0x1] %vm8_vm0, %v522_v43   ;;  %944 = vst.msk [vmem:[%s2191_s1 + $0x6a] sm:$0x2] %vm8_vm0, %v522_v43  }
  0xd2   :  { %945 = vst.msk [vmem:[%s2191_s1 + $0xa9] sm:$0x4] %vm8_vm0, %v522_v43   ;;  %946 = vst.msk [vmem:[%s2191_s1 + $0xe8] sm:$0x8] %vm8_vm0, %v522_v43  }
  0xd3   :  { %947 = vst.msk [vmem:[%s2191_s1 + $0x2c] sm:$0x1] %vm8_vm0, %v534_v44   ;;  %948 = vst.msk [vmem:[%s2191_s1 + $0x6b] sm:$0x2] %vm8_vm0, %v534_v44  }
  0xd4   :  { %949 = vst.msk [vmem:[%s2191_s1 + $0xaa] sm:$0x4] %vm8_vm0, %v534_v44   ;;  %950 = vst.msk [vmem:[%s2191_s1 + $0xe9] sm:$0x8] %vm8_vm0, %v534_v44   ;;  %v546_v45 = vpop.permute.xlu0 %545  }
  0xd5   :  { %v558_v46 = vpop.permute.xlu1 %557   ;;  %951 = vst.msk [vmem:[%s2191_s1 + $0x2d] sm:$0x1] %vm8_vm0, %v546_v45   ;;  %952 = vst.msk [vmem:[%s2191_s1 + $0x6c] sm:$0x2] %vm8_vm0, %v546_v45  }
  0xd6   :  { %953 = vst.msk [vmem:[%s2191_s1 + $0xab] sm:$0x4] %vm8_vm0, %v546_v45   ;;  %954 = vst.msk [vmem:[%s2191_s1 + $0xea] sm:$0x8] %vm8_vm0, %v546_v45  }
  0xd7   :  { %955 = vst.msk [vmem:[%s2191_s1 + $0x2e] sm:$0x1] %vm8_vm0, %v558_v46   ;;  %956 = vst.msk [vmem:[%s2191_s1 + $0x6d] sm:$0x2] %vm8_vm0, %v558_v46  }
  0xd8   :  { %957 = vst.msk [vmem:[%s2191_s1 + $0xac] sm:$0x4] %vm8_vm0, %v558_v46   ;;  %958 = vst.msk [vmem:[%s2191_s1 + $0xeb] sm:$0x8] %vm8_vm0, %v558_v46   ;;  %v570_v47 = vpop.permute.xlu0 %569  }
  0xd9   :  { %v582_v48 = vpop.permute.xlu1 %581   ;;  %959 = vst.msk [vmem:[%s2191_s1 + $0x2f] sm:$0x1] %vm8_vm0, %v570_v47   ;;  %960 = vst.msk [vmem:[%s2191_s1 + $0x6e] sm:$0x2] %vm8_vm0, %v570_v47  }
  0xda   :  { %961 = vst.msk [vmem:[%s2191_s1 + $0xad] sm:$0x4] %vm8_vm0, %v570_v47   ;;  %962 = vst.msk [vmem:[%s2191_s1 + $0xec] sm:$0x8] %vm8_vm0, %v570_v47  }
  0xdb   :  { %963 = vst.msk [vmem:[%s2191_s1 + $0x30] sm:$0x1] %vm8_vm0, %v582_v48   ;;  %964 = vst.msk [vmem:[%s2191_s1 + $0x6f] sm:$0x2] %vm8_vm0, %v582_v48  }
  0xdc   :  { %965 = vst.msk [vmem:[%s2191_s1 + $0xae] sm:$0x4] %vm8_vm0, %v582_v48   ;;  %966 = vst.msk [vmem:[%s2191_s1 + $0xed] sm:$0x8] %vm8_vm0, %v582_v48   ;;  %v594_v49 = vpop.permute.xlu0 %593  }
  0xdd   :  { %v606_v50 = vpop.permute.xlu1 %605   ;;  %967 = vst.msk [vmem:[%s2191_s1 + $0x31] sm:$0x1] %vm8_vm0, %v594_v49   ;;  %968 = vst.msk [vmem:[%s2191_s1 + $0x70] sm:$0x2] %vm8_vm0, %v594_v49  }
  0xde   :  { %969 = vst.msk [vmem:[%s2191_s1 + $0xaf] sm:$0x4] %vm8_vm0, %v594_v49   ;;  %970 = vst.msk [vmem:[%s2191_s1 + $0xee] sm:$0x8] %vm8_vm0, %v594_v49  }
  0xdf   :  { %971 = vst.msk [vmem:[%s2191_s1 + $0x32] sm:$0x1] %vm8_vm0, %v606_v50   ;;  %972 = vst.msk [vmem:[%s2191_s1 + $0x71] sm:$0x2] %vm8_vm0, %v606_v50  }
  0xe0   :  { %973 = vst.msk [vmem:[%s2191_s1 + $0xb0] sm:$0x4] %vm8_vm0, %v606_v50   ;;  %974 = vst.msk [vmem:[%s2191_s1 + $0xef] sm:$0x8] %vm8_vm0, %v606_v50   ;;  %v618_v51 = vpop.permute.xlu0 %617  }
  0xe1   :  { %v630_v52 = vpop.permute.xlu1 %629   ;;  %975 = vst.msk [vmem:[%s2191_s1 + $0x33] sm:$0x1] %vm8_vm0, %v618_v51   ;;  %976 = vst.msk [vmem:[%s2191_s1 + $0x72] sm:$0x2] %vm8_vm0, %v618_v51  }
  0xe2   :  { %977 = vst.msk [vmem:[%s2191_s1 + $0xb1] sm:$0x4] %vm8_vm0, %v618_v51   ;;  %978 = vst.msk [vmem:[%s2191_s1 + $0xf0] sm:$0x8] %vm8_vm0, %v618_v51  }
  0xe3   :  { %979 = vst.msk [vmem:[%s2191_s1 + $0x34] sm:$0x1] %vm8_vm0, %v630_v52   ;;  %980 = vst.msk [vmem:[%s2191_s1 + $0x73] sm:$0x2] %vm8_vm0, %v630_v52  }
  0xe4   :  { %981 = vst.msk [vmem:[%s2191_s1 + $0xb2] sm:$0x4] %vm8_vm0, %v630_v52   ;;  %982 = vst.msk [vmem:[%s2191_s1 + $0xf1] sm:$0x8] %vm8_vm0, %v630_v52   ;;  %v642_v53 = vpop.permute.xlu0 %641  }
  0xe5   :  { %v654_v54 = vpop.permute.xlu1 %653   ;;  %983 = vst.msk [vmem:[%s2191_s1 + $0x35] sm:$0x1] %vm8_vm0, %v642_v53   ;;  %984 = vst.msk [vmem:[%s2191_s1 + $0x74] sm:$0x2] %vm8_vm0, %v642_v53  }
  0xe6   :  { %985 = vst.msk [vmem:[%s2191_s1 + $0xb3] sm:$0x4] %vm8_vm0, %v642_v53   ;;  %986 = vst.msk [vmem:[%s2191_s1 + $0xf2] sm:$0x8] %vm8_vm0, %v642_v53  }
  0xe7   :  { %987 = vst.msk [vmem:[%s2191_s1 + $0x36] sm:$0x1] %vm8_vm0, %v654_v54   ;;  %988 = vst.msk [vmem:[%s2191_s1 + $0x75] sm:$0x2] %vm8_vm0, %v654_v54  }
  0xe8   :  { %989 = vst.msk [vmem:[%s2191_s1 + $0xb4] sm:$0x4] %vm8_vm0, %v654_v54   ;;  %990 = vst.msk [vmem:[%s2191_s1 + $0xf3] sm:$0x8] %vm8_vm0, %v654_v54   ;;  %v666_v55 = vpop.permute.xlu0 %665  }
  0xe9   :  { %v678_v56 = vpop.permute.xlu1 %677   ;;  %991 = vst.msk [vmem:[%s2191_s1 + $0x37] sm:$0x1] %vm8_vm0, %v666_v55   ;;  %992 = vst.msk [vmem:[%s2191_s1 + $0x76] sm:$0x2] %vm8_vm0, %v666_v55  }
  0xea   :  { %993 = vst.msk [vmem:[%s2191_s1 + $0xb5] sm:$0x4] %vm8_vm0, %v666_v55   ;;  %994 = vst.msk [vmem:[%s2191_s1 + $0xf4] sm:$0x8] %vm8_vm0, %v666_v55  }
  0xeb   :  { %995 = vst.msk [vmem:[%s2191_s1 + $0x38] sm:$0x1] %vm8_vm0, %v678_v56   ;;  %996 = vst.msk [vmem:[%s2191_s1 + $0x77] sm:$0x2] %vm8_vm0, %v678_v56  }
  0xec   :  { %997 = vst.msk [vmem:[%s2191_s1 + $0xb6] sm:$0x4] %vm8_vm0, %v678_v56   ;;  %998 = vst.msk [vmem:[%s2191_s1 + $0xf5] sm:$0x8] %vm8_vm0, %v678_v56   ;;  %v690_v57 = vpop.permute.xlu0 %689  }
  0xed   :  { %v702_v58 = vpop.permute.xlu1 %701   ;;  %999 = vst.msk [vmem:[%s2191_s1 + $0x39] sm:$0x1] %vm8_vm0, %v690_v57   ;;  %1000 = vst.msk [vmem:[%s2191_s1 + $0x78] sm:$0x2] %vm8_vm0, %v690_v57  }
  0xee   :  { %1001 = vst.msk [vmem:[%s2191_s1 + $0xb7] sm:$0x4] %vm8_vm0, %v690_v57   ;;  %1002 = vst.msk [vmem:[%s2191_s1 + $0xf6] sm:$0x8] %vm8_vm0, %v690_v57  }
  0xef   :  { %1003 = vst.msk [vmem:[%s2191_s1 + $0x3a] sm:$0x1] %vm8_vm0, %v702_v58   ;;  %1004 = vst.msk [vmem:[%s2191_s1 + $0x79] sm:$0x2] %vm8_vm0, %v702_v58  }
  0xf0   :  { %1005 = vst.msk [vmem:[%s2191_s1 + $0xb8] sm:$0x4] %vm8_vm0, %v702_v58   ;;  %1006 = vst.msk [vmem:[%s2191_s1 + $0xf7] sm:$0x8] %vm8_vm0, %v702_v58   ;;  %v714_v59 = vpop.permute.xlu0 %713  }
  0xf1   :  { %v726_v60 = vpop.permute.xlu1 %725   ;;  %1007 = vst.msk [vmem:[%s2191_s1 + $0x3b] sm:$0x1] %vm8_vm0, %v714_v59   ;;  %1008 = vst.msk [vmem:[%s2191_s1 + $0x7a] sm:$0x2] %vm8_vm0, %v714_v59  }
  0xf2   :  { %1009 = vst.msk [vmem:[%s2191_s1 + $0xb9] sm:$0x4] %vm8_vm0, %v714_v59   ;;  %1010 = vst.msk [vmem:[%s2191_s1 + $0xf8] sm:$0x8] %vm8_vm0, %v714_v59  }
  0xf3   :  { %1011 = vst.msk [vmem:[%s2191_s1 + $0x3c] sm:$0x1] %vm8_vm0, %v726_v60   ;;  %1012 = vst.msk [vmem:[%s2191_s1 + $0x7b] sm:$0x2] %vm8_vm0, %v726_v60  }
  0xf4   :  { %1013 = vst.msk [vmem:[%s2191_s1 + $0xba] sm:$0x4] %vm8_vm0, %v726_v60   ;;  %1014 = vst.msk [vmem:[%s2191_s1 + $0xf9] sm:$0x8] %vm8_vm0, %v726_v60   ;;  %v738_v61 = vpop.permute.xlu0 %737  }
  0xf5   :  { %v750_v62 = vpop.permute.xlu1 %749   ;;  %1015 = vst.msk [vmem:[%s2191_s1 + $0x3d] sm:$0x1] %vm8_vm0, %v738_v61   ;;  %1016 = vst.msk [vmem:[%s2191_s1 + $0x7c] sm:$0x2] %vm8_vm0, %v738_v61  }
  0xf6   :  { %1017 = vst.msk [vmem:[%s2191_s1 + $0xbb] sm:$0x4] %vm8_vm0, %v738_v61   ;;  %1018 = vst.msk [vmem:[%s2191_s1 + $0xfa] sm:$0x8] %vm8_vm0, %v738_v61  }
  0xf7   :  { %1019 = vst.msk [vmem:[%s2191_s1 + $0x3e] sm:$0x1] %vm8_vm0, %v750_v62   ;;  %1020 = vst.msk [vmem:[%s2191_s1 + $0x7d] sm:$0x2] %vm8_vm0, %v750_v62  }
  0xf8   :  { %1021 = vst.msk [vmem:[%s2191_s1 + $0xbc] sm:$0x4] %vm8_vm0, %v750_v62   ;;  %1022 = vst.msk [vmem:[%s2191_s1 + $0xfb] sm:$0x8] %vm8_vm0, %v750_v62   ;;  %v762_v63 = vpop.permute.xlu0 %761  }
  0xf9   :  { %1023 = vst.msk [vmem:[%s2191_s1 + $0x3f] sm:$0x1] %vm8_vm0, %v762_v63   ;;  %1024 = vst.msk [vmem:[%s2191_s1 + $0x7e] sm:$0x2] %vm8_vm0, %v762_v63  }
  0xfa   :  { %1025 = vst.msk [vmem:[%s2191_s1 + $0xbd] sm:$0x4] %vm8_vm0, %v762_v63   ;;  %1026 = vst.msk [vmem:[%s2191_s1 + $0xfc] sm:$0x8] %vm8_vm0, %v762_v63  }

// kernel: graph_series_forward.1
= control target key start
LH: loop header
LB: loop body
LE: loop exit
PB: predicated region body
PF: predicated region fallthrough
CT: control target
= control target key end

     0   :  { %18 = vsyncpa [#allocation4], 0  ;;  %s11489_s0 = inlined_call_operand.vmem [shape: s32[256,1], index: 0, kind: input, shape index: {}]   ;;  %s11490_s1 = inlined_call_operand.vmem [shape: s32[4,64,8], index: 1, kind: input, shape index: {}]   ;;  %s11491_s2 = inlined_call_operand.vmem [shape: f32[4,64,8], index: 2, kind: input, shape index: {}]   ;;  %s11492_s3 = inlined_call_operand.vmem [shape: s32[4], index: 3, kind: input, shape index: {}]   ;;  %s11493_s4 = inlined_call_operand.vmem [shape: bf16[100,32], index: 4, kind: input, shape index: {}]   ;;  %s11494_s5 = inlined_call_operand.vmem [shape: bf16[64,32], index: 5, kind: input, shape index: {}]   ;;  %s11495_s6 = inlined_call_operand.vmem [shape: f32[1,32], index: 6, kind: input, shape index: {}]   ;;  %s11496_s7 = inlined_call_operand.vmem [shape: bf16[32,16], index: 7, kind: input, shape index: {}]   ;;  %s11497_s8 = inlined_call_operand.vmem [shape: f32[1,16], index: 8, kind: input, shape index: {}]   ;;  %s11498_s9 = inlined_call_operand.vmem [shape: f32[1,8], index: 9, kind: input, shape index: {}]   ;;  %s11499_s10 = inlined_call_operand.vmem [shape: f32[4,16,3], index: 10, kind: input, shape index: {}]   ;;  %s11500_s11 = inlined_call_operand.vmem [shape: f32[8,3], index: 11, kind: input, shape index: {}]   ;;  %s11501_s12 = inlined_call_operand.vmem [shape: f32[1,3], index: 12, kind: input, shape index: {}]   ;;  %s11502_s13 = inlined_call_operand.hbm [shape: f32[1,3], index: 13, kind: output, shape index: {}]  }
   0x1   :  { %19 = vsyncpa [#allocation3], 0  ;;  %s32_s27 = sshll.u32 %s11492_s3, 4  ;;  %s33_s27 = int_to_ptr.vmem [resolvable:$true] %s32_s27 }
   0x2   :  { %s6290_s28 = scalar_lea.vmem %s33_s27, 16  ;;  %p6295_p1 = scmp.lt.s32.totalorder %s33_s27, %s33_s27 }
   0x3   :  { %p6291_p0 = scmp.ne.s32.totalorder %s33_s27, %s6290_s28  ;;  %p6296_p2 = scmp.lt.s32.totalorder %s6290_s28, %s6290_s28 }
   0x5   :  { %p6297_p3 = por %p6296_p2, %p6295_p1 }
   0x7   :  { %p6298_p4 = pnand %p6297_p3, %p6291_p0 }
   0x9   :  { %6301 = shalt.err (!%p6298_p4)
}
   0xa   :  { %s6326_s29 = smov [#allocation2]  }
   0xb   :  { %35 = dma.vmem_to_smem %s33_s27, 16, %s6326_s29, [#allocation4]  }
   0xc   :  { %6322 = dma.done.wait [#allocation4], 16  }
   0xd   :  { %6323 = vsyncadd [#allocation4], 4294967280 }
   0xe   :  { %57 = sfence }
   0xf   :  { %v6416_v0 = vld [vmem:[%s11490_s1] sm:$0xff]  ;;  %v61_v1 = vld [vmem:[%s11489_s0 + $0x10] sm:$0xff]  ;;  %v11505_v2 = vmov 1   ;;  %v11507_v3 = vmov 0   ;;  %v6427_v4 = vld [vmem:[%s11490_s1 + $0x18] sm:$0xff]  ;;  %vm370_vm0 = vcmask 1041408  }
  0x10   :  { %5913 = vset.pattern.permute.xlu0 %v11505_v2  ;;  %5912 = vset.pattern.permute.xlu1 %v11507_v3  ;;  %v62_v5 = vld [vmem:[%s11489_s0 + $0x18] sm:$0xff]  ;;  %v6436_v6 = vld [vmem:[%s11490_s1 + $0x28] sm:$0xff]  ;;  %v6490_v18 = vld [vmem:[%s11490_s1 + $0x40] sm:$0xff]  ;;  %vm321_vm5 = vcmask 818176   ;;  %s7126_s22 = sld [smem:[#allocation2 + $0x1]]  ;;  %s6336_s14 = smov 32  }
  0x11   :  { %675 = vperm.xlu0 %5913, %v6416_v0   ;;  %100 = vperm.xlu1 %5912, %v61_v1   ;;  %v64_v7 = vld [vmem:[%s11489_s0 + $0x28] sm:$0xff]  ;;  %v6445_v8 = vld [vmem:[%s11490_s1 + $0x38] sm:$0xff]  ;;  %v6562_v34 = vld [vmem:[%s11490_s1 + $0x90] sm:$0xff]  ;;  %s7439_s25 = sld [smem:[#allocation2]]  ;;  %s6337_s30 = smov 1.0  }
  0x12   :  { %v66_v9 = vld [vmem:[%s11489_s0 + $0x38] sm:$0xff]  ;;  %v6454_v10 = vld [vmem:[%s11491_s2 + $0x8] sm:$0xff]  ;;  %v6102_v37 = vld [vmem:[%s11493_s4 + $0x30] ss:$0 sps:$4 sm:$0x33]   ;;  %s8584_s18 = sld [smem:[#allocation2 + $0x2]] }
  0x13   :  { %v68_v11 = vld [vmem:[%s11489_s0 + $0x48] sm:$0xff]  ;;  %v6463_v12 = vld [vmem:[%s11491_s2 + $0x18] sm:$0xff]  ;;  %5889 = vmatprep.subr.msk.bf16.mxu0 %vm370_vm0, %v6102_v37  ;;  %v372_v39 = vsel %vm370_vm0, %v6102_v37, 0  ;;  %v5494_v41 = vld [vmem:[%s11490_s1 + $0xd0] sm:$0xff]  ;;  %s8678_s21 = sld [smem:[#allocation2 + $0x3]] }
  0x14   :  { %v70_v13 = vld [vmem:[%s11489_s0 + $0x58] sm:$0xff]  ;;  %v6471_v14 = vld [vmem:[%s11491_s2 + $0x28] sm:$0xff]  ;;  %5671 = vmatpush3.bf16.msra.mxu0 %v372_v39  ;;  %v6104_v42 = vld [vmem:[%s11493_s4 + $0x20] sm:$0xff]  }
  0x15   :  { %684 = vperm.xlu0 %5913, %v6427_v4   ;;  %103 = vperm.xlu1 %5912, %v62_v5   ;;  %v72_v15 = vld [vmem:[%s11489_s0 + $0x68] sm:$0xff]  ;;  %v6480_v16 = vld [vmem:[%s11491_s2 + $0x38] sm:$0xff]  ;;  %v6106_v46 = vld [vmem:[%s11493_s4 + $0x10] sm:$0xff]  }
  0x16   :  { %v74_v17 = vld [vmem:[%s11489_s0 + $0x78] sm:$0xff]  ;;  %v76_v19 = vld [vmem:[%s11489_s0 + $0x88] sm:$0xff]  ;;  %v59_v49 = vld [vmem:[%s11489_s0] sm:$0xff] }
  0x17   :  { %v6499_v20 = vld [vmem:[%s11490_s1 + $0x58] sm:$0xff]  ;;  %v6508_v22 = vld [vmem:[%s11490_s1 + $0x68] sm:$0xff]  ;;  %v6108_v50 = vld [vmem:[%s11493_s4] sm:$0xff]  }
  0x18   :  { %v78_v21 = vld [vmem:[%s11489_s0 + $0x98] sm:$0xff]  ;;  %v80_v23 = vld [vmem:[%s11489_s0 + $0xa8] sm:$0xff]  ;;  %v6632_v52 = vld [vmem:[%s11490_s1 + $0x10] sm:$0xff]  ;;  %s5153_s15 = scvt.s32.f32 %s8584_s18 }
  0x19   :  { %690 = vperm.xlu0 %5913, %v6436_v6   ;;  %109 = vperm.xlu1 %5912, %v64_v7   ;;  %v6517_v24 = vld [vmem:[%s11490_s1 + $0x78] sm:$0xff]  ;;  %v6526_v26 = vld [vmem:[%s11491_s2 + $0x48] sm:$0xff]  ;;  %v63_v53 = vld [vmem:[%s11489_s0 + $0x20] sm:$0xff]  ;;  %s5273_s3 = scvt.s32.f32 %s8678_s21 }
  0x1a   :  { %v82_v25 = vld [vmem:[%s11489_s0 + $0xb8] sm:$0xff]  ;;  %v84_v27 = vld [vmem:[%s11489_s0 + $0xc8] sm:$0xff]  ;;  %v6641_v54 = vld [vmem:[%s11490_s1 + $0x20] sm:$0xff] }
  0x1b   :  { %v6535_v28 = vld [vmem:[%s11491_s2 + $0x58] sm:$0xff]  ;;  %v6544_v30 = vld [vmem:[%s11491_s2 + $0x68] sm:$0xff]  ;;  %v65_v55 = vld [vmem:[%s11489_s0 + $0x30] sm:$0xff] }
  0x1c   :  { %v86_v29 = vld [vmem:[%s11489_s0 + $0xd8] sm:$0xff]  ;;  %v88_v31 = vld [vmem:[%s11489_s0 + $0xe8] sm:$0xff]  ;;  %v6650_v56 = vld [vmem:[%s11490_s1 + $0x30] sm:$0xff] }
  0x1d   :  { %696 = vperm.xlu0 %5913, %v6445_v8   ;;  %115 = vperm.xlu1 %5912, %v66_v9   ;;  %v6553_v32 = vld [vmem:[%s11491_s2 + $0x78] sm:$0xff]  ;;  %v6567_v35 = vld [vmem:[%s11490_s1 + $0x8] sm:$0xff]  ;;  %v67_v57 = vld [vmem:[%s11489_s0 + $0x40] sm:$0xff] }
  0x1e   :  { %v90_v33 = vld [vmem:[%s11489_s0 + $0xf8] sm:$0xff]  ;;  %v6574_v36 = vld [vmem:[%s11491_s2 + $0x88] sm:$0xff]  ;;  %v6659_v58 = vld [vmem:[%s11491_s2] sm:$0xff] }
  0x1f   :  { %v5478_v38 = vld [vmem:[%s11490_s1 + $0xb8] sm:$0xff]  ;;  %v6103_v40 = vld [vmem:[%s11493_s4 + $0x28] sm:$0xff]   ;;  %v69_v59 = vld [vmem:[%s11489_s0 + $0x50] sm:$0xff] }
  0x20   :  { %5672 = vmatprep.subr.bf16.mxu0 %v6103_v40  ;;  %v5501_v43 = vld [vmem:[%s11491_s2 + $0xc8] sm:$0xff]  ;;  %v6105_v44 = vld [vmem:[%s11493_s4 + $0x18] sm:$0xff]   ;;  %v6668_v60 = vld [vmem:[%s11491_s2 + $0x10] sm:$0xff] }
  0x21   :  { %711 = vperm.xlu0 %5913, %v6454_v10   ;;  %121 = vperm.xlu1 %5912, %v68_v11   ;;  %v5503_v45 = vld [vmem:[%s11491_s2 + $0xd8] sm:$0xff]  ;;  %v6107_v48 = vld [vmem:[%s11493_s4 + $0x8] sm:$0xff]   ;;  %v71_v61 = vld [vmem:[%s11489_s0 + $0x60] sm:$0xff] }
  0x22   :  { %5673 = vmatpush3.bf16.msra.mxu0 %v6103_v40  ;;  %v5499_v47 = vld [vmem:[%s11490_s1 + $0xf8] sm:$0xff]  ;;  %v60_v51 = vld [vmem:[%s11489_s0 + $0x8] sm:$0xff]  ;;  %v6677_v62 = vld [vmem:[%s11491_s2 + $0x20] sm:$0xff] }
  0x23   :  { %5674 = vmatprep.subr.bf16.mxu0 %v6104_v42  ;;  %v73_v63 = vld [vmem:[%s11489_s0 + $0x70] sm:$0xff]  ;;  %v75_v5 = vld [vmem:[%s11489_s0 + $0x80] sm:$0xff] }
  0x24   :  { %v6686_v1 = vld [vmem:[%s11491_s2 + $0x30] sm:$0xff] }
  0x25   :  { %719 = vperm.xlu0 %5913, %v6463_v12   ;;  %127 = vperm.xlu1 %5912, %v70_v13   ;;  %v77_v11 = vld [vmem:[%s11489_s0 + $0x90] sm:$0xff] }
  0x26   :  { %5675 = vmatpush3.bf16.msra.mxu0 %v6104_v42 }
  0x27   :  { %5676 = vmatprep.subr.bf16.mxu0 %v6105_v44 }
  0x29   :  { %727 = vperm.xlu0 %5913, %v6471_v14   ;;  %133 = vperm.xlu1 %5912, %v72_v15  }
  0x2a   :  { %5677 = vmatpush3.bf16.msra.mxu0 %v6105_v44  ;;  %v89_v44 = vld [vmem:[%s11489_s0 + $0xf0] sm:$0xff] }
  0x2b   :  { %5678 = vmatprep.subr.bf16.mxu0 %v6106_v46 }
  0x2d   :  { %735 = vperm.xlu0 %5913, %v6480_v16   ;;  %139 = vperm.xlu1 %5912, %v74_v17   ;;  %v11509_v17 = vmov 2  }
  0x2e   :  { %5679 = vmatpush3.bf16.msra.mxu0 %v6106_v46 }
  0x2f   :  { %5680 = vmatprep.subr.bf16.mxu0 %v6107_v48 }
  0x31   :  { %1453 = vperm.xlu0 %5913, %v6490_v18   ;;  %145 = vperm.xlu1 %5912, %v76_v19   ;;  %v79_v19 = vld [vmem:[%s11489_s0 + $0xa0] sm:$0xff] }
  0x32   :  { %5681 = vmatpush3.bf16.msra.mxu0 %v6107_v48 }
  0x33   :  { %5682 = vmatprep.subr.bf16.mxu0 %v6108_v50 }
  0x35   :  { %1462 = vperm.xlu0 %5913, %v6499_v20   ;;  %151 = vperm.xlu1 %5912, %v78_v21  }
  0x36   :  { %5683 = vmatpush3.bf16.msra.mxu0 %v6108_v50 }
  0x39   :  { %1468 = vperm.xlu0 %5913, %v6508_v22   ;;  %157 = vperm.xlu1 %5912, %v80_v23  }
  0x3d   :  { %1474 = vperm.xlu0 %5913, %v6517_v24   ;;  %163 = vperm.xlu1 %5912, %v82_v25   ;;  %v81_v25 = vld [vmem:[%s11489_s0 + $0xb0] sm:$0xff] }
  0x41   :  { %1489 = vperm.xlu0 %5913, %v6526_v26   ;;  %169 = vperm.xlu1 %5912, %v84_v27  }
  0x45   :  { %1497 = vperm.xlu0 %5913, %v6535_v28   ;;  %175 = vperm.xlu1 %5912, %v86_v29  }
  0x49   :  { %1505 = vperm.xlu0 %5913, %v6544_v30   ;;  %181 = vperm.xlu1 %5912, %v88_v31   ;;  %v83_v31 = vld [vmem:[%s11489_s0 + $0xc0] sm:$0xff] }
  0x4d   :  { %1513 = vperm.xlu0 %5913, %v6553_v32   ;;  %187 = vperm.xlu1 %5912, %v90_v33  }
  0x51   :  { %2236 = vperm.xlu0 %5913, %v6562_v34   ;;  %590 = vperm.xlu1 %5912, %v6567_v35  }
  0x55   :  { %2266 = vperm.xlu0 %5913, %v6574_v36   ;;  %596 = vperm.xlu1 %5912, %v6427_v4  }
  0x59   :  { %2251 = vperm.xlu0 %5913, %v5478_v38   ;;  %602 = vperm.xlu1 %5912, %v6436_v6   ;;  %v85_v38 = vld [vmem:[%s11489_s0 + $0xd0] sm:$0xff] }
  0x5d   :  { %3013 = vperm.xlu0 %5913, %v5494_v41   ;;  %608 = vperm.xlu1 %5912, %v6445_v8   ;;  %v87_v41 = vld [vmem:[%s11489_s0 + $0xe0] sm:$0xff] }
  0x61   :  { %3043 = vperm.xlu0 %5913, %v5501_v43   ;;  %625 = vperm.xlu1 %5912, %v6454_v10  }
  0x65   :  { %3051 = vperm.xlu0 %5913, %v5503_v45   ;;  %635 = vperm.xlu1 %5912, %v6463_v12  }
  0x69   :  { %3028 = vperm.xlu0 %5913, %v5499_v47   ;;  %645 = vperm.xlu1 %5912, %v6471_v14  }
  0x6d   :  { %5994 = vset.pattern.permute.xlu0 %v11507_v3  ;;  %655 = vperm.xlu1 %5912, %v6480_v16  }
  0x6e   :  { %94 = vperm.xlu0 %5994, %v59_v49  }
  0x71   :  { %5914 = vset.pattern.permute.xlu1 %v11505_v2  ;;  %v6815_v2 = vld [vmem:[%s11490_s1 + $0x60] sm:$0xff] }
  0x72   :  { %678 = vperm.xlu1 %5914, %v6567_v35   ;;  %97 = vperm.xlu0 %5994, %v60_v51  }
  0x76   :  { %681 = vperm.xlu1 %5914, %v6632_v52   ;;  %106 = vperm.xlu0 %5994, %v63_v53  }
  0x7a   :  { %687 = vperm.xlu1 %5914, %v6641_v54   ;;  %112 = vperm.xlu0 %5994, %v65_v55   ;;  %v11503_v55 = vmov 3  }
  0x7e   :  { %693 = vperm.xlu1 %5914, %v6650_v56   ;;  %118 = vperm.xlu0 %5994, %v67_v57  }
  0x82   :  { %707 = vperm.xlu1 %5914, %v6659_v58   ;;  %124 = vperm.xlu0 %5994, %v69_v59  }
  0x86   :  { %715 = vperm.xlu1 %5914, %v6668_v60   ;;  %130 = vperm.xlu0 %5994, %v71_v61  }
  0x8a   :  { %723 = vperm.xlu1 %5914, %v6677_v62   ;;  %136 = vperm.xlu0 %5994, %v73_v63  }
  0x8c   :  { %v6691_v7 = vpop.permute.xlu1 %100  ;;  %v6693_v9 = vpop.permute.xlu0 %675 }
  0x8d   :  { %11711 = vst [vmem:[#allocation8_spill] sm:$0xff] %v6693_v9 }
  0x8e   :  { %731 = vperm.xlu1 %5914, %v6686_v1   ;;  %142 = vperm.xlu0 %5994, %v75_v5  }
  0x90   :  { %v6699_v13 = vpop.permute.xlu1 %103  ;;  %v6701_v15 = vpop.permute.xlu0 %684 }
  0x91   :  { %11712 = vst [vmem:[#allocation9_spill] sm:$0xff] %v6701_v15 }
  0x92   :  { %5915 = vset.pattern.permute.xlu1 %v11509_v17  ;;  %148 = vperm.xlu0 %5994, %v77_v11  }
  0x93   :  { %755 = vperm.xlu1 %5915, %v6416_v0  }
  0x94   :  { %v6708_v21 = vpop.permute.xlu1 %109  ;;  %v6710_v23 = vpop.permute.xlu0 %690 }
  0x95   :  { %11713 = vst [vmem:[#allocation10_spill] sm:$0xff] %v6710_v23 }
  0x96   :  { %154 = vperm.xlu0 %5994, %v79_v19  }
  0x97   :  { %761 = vperm.xlu1 %5915, %v6632_v52  }
  0x98   :  { %v6716_v27 = vpop.permute.xlu1 %115  ;;  %v6718_v29 = vpop.permute.xlu0 %696 }
  0x99   :  { %11714 = vst [vmem:[#allocation11_spill] sm:$0xff] %v6718_v29 }
  0x9a   :  { %160 = vperm.xlu0 %5994, %v81_v25  }
  0x9b   :  { %764 = vperm.xlu1 %5915, %v6427_v4  }
  0x9c   :  { %v6724_v33 = vpop.permute.xlu1 %121  ;;  %v6726_v37 = vpop.permute.xlu0 %711 }
  0x9d   :  { %11715 = vst [vmem:[#allocation12_spill] sm:$0xff] %v6726_v37 }
  0x9e   :  { %166 = vperm.xlu0 %5994, %v83_v31  }
  0x9f   :  { %770 = vperm.xlu1 %5915, %v6436_v6  }
  0xa0   :  { %v6732_v39 = vpop.permute.xlu1 %127  ;;  %v6734_v40 = vpop.permute.xlu0 %719 }
  0xa1   :  { %11716 = vst [vmem:[#allocation13_spill] sm:$0xff] %v6734_v40 }
  0xa2   :  { %172 = vperm.xlu0 %5994, %v85_v38  }
  0xa3   :  { %776 = vperm.xlu1 %5915, %v6445_v8  }
  0xa4   :  { %v6740_v42 = vpop.permute.xlu1 %133  ;;  %v6742_v43 = vpop.permute.xlu0 %727 }
  0xa5   :  { %11717 = vst [vmem:[#allocation14_spill] sm:$0xff] %v6742_v43 }
  0xa6   :  { %178 = vperm.xlu0 %5994, %v87_v41   ;;  %v6804_v41 = vld [vmem:[%s11490_s1 + $0x48] sm:$0xff] }
  0xa7   :  { %791 = vperm.xlu1 %5915, %v6454_v10  }
  0xa8   :  { %v6748_v45 = vpop.permute.xlu1 %139  ;;  %v6750_v46 = vpop.permute.xlu0 %735 }
  0xa9   :  { %11718 = vst [vmem:[#allocation15_spill] sm:$0xff] %v6750_v46 }
  0xaa   :  { %184 = vperm.xlu0 %5994, %v89_v44  }
  0xab   :  { %799 = vperm.xlu1 %5915, %v6463_v12  }
  0xac   :  { %v6753_v47 = vpop.permute.xlu1 %145  ;;  %v6755_v48 = vpop.permute.xlu0 %1453 }
  0xad   :  { %11719 = vst [vmem:[#allocation16_spill] sm:$0xff] %v6755_v48 }
  0xae   :  { %587 = vperm.xlu0 %5994, %v6416_v0  }
  0xaf   :  { %807 = vperm.xlu1 %5915, %v6471_v14  }
  0xb0   :  { %v6759_v49 = vpop.permute.xlu1 %151  ;;  %v6761_v50 = vpop.permute.xlu0 %1462 }
  0xb1   :  { %11720 = vst [vmem:[#allocation17_spill] sm:$0xff] %v6761_v50 }
  0xb2   :  { %593 = vperm.xlu0 %5994, %v6632_v52  }
  0xb3   :  { %815 = vperm.xlu1 %5915, %v6480_v16  }
  0xb4   :  { %v6765_v51 = vpop.permute.xlu1 %157  ;;  %v6767_v53 = vpop.permute.xlu0 %1468 }
  0xb5   :  { %11721 = vst [vmem:[#allocation18_spill] sm:$0xff] %v6767_v53 }
  0xb6   :  { %599 = vperm.xlu0 %5994, %v6641_v54  }
  0xb7   :  { %5916 = vset.pattern.permute.xlu1 %v11503_v55 }
  0xb8   :  { %838 = vperm.xlu1 %5916, %v6567_v35   ;;  %v6772_v57 = vpop.permute.xlu1 %163  ;;  %v6774_v59 = vpop.permute.xlu0 %1474 }
  0xb9   :  { %11722 = vst [vmem:[#allocation19_spill] sm:$0xff] %v6774_v59 }
  0xba   :  { %605 = vperm.xlu0 %5994, %v6650_v56  }
  0xbc   :  { %841 = vperm.xlu1 %5916, %v6632_v52   ;;  %v6778_v61 = vpop.permute.xlu1 %169  ;;  %v6780_v63 = vpop.permute.xlu0 %1489 }
  0xbd   :  { %11723 = vst [vmem:[#allocation20_spill] sm:$0xff] %v6780_v63  ;;  %v6826_v63 = vld [vmem:[%s11490_s1 + $0x70] sm:$0xff] }
  0xbe   :  { %620 = vperm.xlu0 %5994, %v6659_v58  }
  0xc0   :  { %847 = vperm.xlu1 %5916, %v6641_v54   ;;  %v6784_v5 = vpop.permute.xlu1 %175  ;;  %v6786_v11 = vpop.permute.xlu0 %1497 }
  0xc1   :  { %11724 = vst [vmem:[#allocation21_spill] sm:$0xff] %v6786_v11 }
  0xc2   :  { %630 = vperm.xlu0 %5994, %v6668_v60  }
  0xc4   :  { %853 = vperm.xlu1 %5916, %v6650_v56   ;;  %v6790_v19 = vpop.permute.xlu1 %181  ;;  %v6792_v25 = vpop.permute.xlu0 %1505 }
  0xc5   :  { %11725 = vst [vmem:[#allocation22_spill] sm:$0xff] %v6792_v25 }
  0xc6   :  { %640 = vperm.xlu0 %5994, %v6677_v62  }
  0xc8   :  { %867 = vperm.xlu1 %5916, %v6659_v58   ;;  %v6796_v31 = vpop.permute.xlu1 %187  ;;  %v6798_v38 = vpop.permute.xlu0 %1513 }
  0xc9   :  { %11726 = vst [vmem:[#allocation23_spill] sm:$0xff] %v6798_v38  ;;  %v6837_v38 = vld [vmem:[%s11491_s2 + $0x40] sm:$0xff] }
  0xca   :  { %650 = vperm.xlu0 %5994, %v6686_v1  }
  0xcc   :  { %875 = vperm.xlu1 %5916, %v6668_v60   ;;  %v6807_v44 = vpop.permute.xlu1 %590  ;;  %v6809_v55 = vpop.permute.xlu0 %2236 }
  0xcd   :  { %11727 = vst [vmem:[#allocation24_spill] sm:$0xff] %v6807_v44  ;;  %11728 = vst [vmem:[#allocation25_spill] sm:$0xff] %v6809_v55 }
  0xce   :  { %1368 = vperm.xlu0 %5994, %v6804_v41  }
  0xd0   :  { %883 = vperm.xlu1 %5916, %v6677_v62   ;;  %v6818_v3 = vpop.permute.xlu1 %596  ;;  %v6820_v17 = vpop.permute.xlu0 %2266 }
  0xd1   :  { %11729 = vst [vmem:[#allocation26_spill] sm:$0xff] %v6818_v3  ;;  %11730 = vst [vmem:[#allocation27_spill] sm:$0xff] %v6820_v17  ;;  %v11514_v17 = vmov 4  }
  0xd2   :  { %1377 = vperm.xlu0 %5994, %v6815_v2  }
  0xd4   :  { %891 = vperm.xlu1 %5916, %v6686_v1   ;;  %v6829_v55 = vpop.permute.xlu1 %602  ;;  %v6831_v48 = vpop.permute.xlu0 %2251 }
  0xd5   :  { %11731 = vst [vmem:[#allocation28_spill] sm:$0xff] %v6829_v55  ;;  %11732 = vst [vmem:[#allocation29_spill] sm:$0xff] %v6831_v48  ;;  %v6849_v48 = vld [vmem:[%s11491_s2 + $0x50] sm:$0xff] }
  0xd6   :  { %1383 = vperm.xlu0 %5994, %v6826_v63  }
  0xd8   :  { %5917 = vset.pattern.permute.xlu1 %v11514_v17  ;;  %v6840_v25 = vpop.permute.xlu1 %608  ;;  %v6842_v11 = vpop.permute.xlu0 %3013  ;;  %v6860_v17 = vld [vmem:[%s11491_s2 + $0x60] sm:$0xff] }
  0xd9   :  { %11733 = vst [vmem:[#allocation30_spill] sm:$0xff] %v6840_v25  ;;  %11734 = vst [vmem:[#allocation31_spill] sm:$0xff] %v6842_v11  ;;  %915 = vperm.xlu1 %5917, %v6416_v0  }
  0xda   :  { %1398 = vperm.xlu0 %5994, %v6837_v38  }
  0xdc   :  { %v6851_v44 = vpop.permute.xlu1 %625  ;;  %v6853_v9 = vpop.permute.xlu0 %3043 }
  0xdd   :  { %11735 = vst [vmem:[#allocation32_spill] sm:$0xff] %v6851_v44  ;;  %11736 = vst [vmem:[#allocation33_spill] sm:$0xff] %v6853_v9  ;;  %921 = vperm.xlu1 %5917, %v6632_v52   ;;  %v6871_v9 = vld [vmem:[%s11491_s2 + $0x70] sm:$0xff]  ;;  %v11516_v44 = vlaneseq }
  0xde   :  { %1408 = vperm.xlu0 %5994, %v6849_v48  }
  0xe0   :  { %v6862_v11 = vpop.permute.xlu1 %635  ;;  %v6864_v37 = vpop.permute.xlu0 %3051 }
  0xe1   :  { %11737 = vst [vmem:[#allocation34_spill] sm:$0xff] %v6862_v11  ;;  %11738 = vst [vmem:[#allocation35_spill] sm:$0xff] %v6864_v37  ;;  %924 = vperm.xlu1 %5917, %v6427_v4   ;;  %v6882_v37 = vld [vmem:[%s11490_s1 + $0x88] sm:$0xff]  ;;  %v6885_v11 = vand.u32 127, %v11516_v44 }
  0xe2   :  { %1418 = vperm.xlu0 %5994, %v6860_v17  }
  0xe3   :  { %11741 = vst [vmem:[#allocation38_spill] sm:$0xff] %v6885_v11  ;;  %vm192_vm2 = vcmp.eq.s32.totalorder %v6699_v13, %v6885_v11  ;;  %vm191_vm3 = vcmp.eq.s32.totalorder %v6691_v7, %v6885_v11  ;;  %v6906_v13 = vld [vmem:[%s11491_s2 + $0x80] sm:$0xff]  ;;  %vm194_vm6 = vcmp.eq.s32.totalorder %v6708_v21, %v6885_v11  ;;  %vm196_vm8 = vcmp.eq.s32.totalorder %v6716_v27, %v6885_v11  ;;  %v6939_v27 = vld [vmem:[%s11490_s1 + $0xa8] sm:$0xff] }
  0xe4   :  { %v6873_v25 = vpop.permute.xlu1 %645  ;;  %v6875_v55 = vpop.permute.xlu0 %3028  ;;  %vm198_vm10 = vcmp.eq.s32.totalorder %v6724_v33, %v6885_v11  ;;  %v5483_v33 = vld [vmem:[%s11491_s2 + $0xa0] sm:$0xff]  ;;  %vm200_vm12 = vcmp.eq.s32.totalorder %v6732_v39, %v6885_v11  ;;  %v6967_v39 = vld [vmem:[%s11491_s2 + $0xb8] sm:$0xff]  ;;  %vm202_vm14 = vcmp.eq.s32.totalorder %v6740_v42, %v6885_v11  ;;  %v5493_v42 = vld [vmem:[%s11490_s1 + $0xc8] sm:$0xff]  ;;  %vm204_vm0 = vcmp.eq.s32.totalorder %v6748_v45, %v6885_v11 }
  0xe5   :  { %11739 = vst [vmem:[#allocation36_spill] sm:$0xff] %v6873_v25  ;;  %11740 = vst [vmem:[#allocation37_spill] sm:$0xff] %v6875_v55  ;;  %930 = vperm.xlu1 %5917, %v6436_v6   ;;  %v11526_v25 = vmov 0.0  }
  0xe6   :  { %1428 = vperm.xlu0 %5994, %v6871_v9   ;;  %v224_v53 = vsel %vm192_vm2, 1.0, %v11526_v25  ;;  %v226_v43 = vsel %vm194_vm6, 1.0, %v11526_v25  ;;  %vm206_vm2 = vcmp.eq.s32.totalorder %v6753_v47, %v6885_v11  ;;  %v7009_v47 = vld [vmem:[%s11491_s2 + $0xd0] sm:$0xff] }
  0xe8   :  { %v6887_v3 = vpop.permute.xlu1 %655 }
  0xe9   :  { %11742 = vst [vmem:[#allocation39_spill] sm:$0xff] %v6887_v3  ;;  %936 = vperm.xlu1 %5917, %v6445_v8   ;;  %v95_v59 = vpop.permute.xlu0 %94 }
  0xea   :  { %vm189_vm1 = vcmp.eq.s32.totalorder %v95_v59, %v6885_v11  ;;  %2145 = vperm.xlu0 %5994, %v6882_v37   ;;  %v223_v59 = vsel %vm191_vm3, 1.0, %v11526_v25 }
  0xeb   :  { %v221_v3 = vsel %vm189_vm1, 1.0, %v11526_v25  ;;  %v254_v46 = vpack.c.bf16 %v224_v53, %v223_v59 }
  0xed   :  { %951 = vperm.xlu1 %5917, %v6454_v10   ;;  %v6897_v55 = vpop.permute.xlu1 %678  ;;  %v98_v44 = vpop.permute.xlu0 %97 }
  0xee   :  { %11743 = vst [vmem:[#allocation40_spill] sm:$0xff] %v6897_v55  ;;  %vm190_vm4 = vcmp.eq.s32.totalorder %v98_v44, %v6885_v11  ;;  %2148 = vperm.xlu0 %5994, %v6562_v34  }
  0xef   :  { %v222_v7 = vsel %vm190_vm4, 1.0, %v11526_v25  ;;  %vm208_vm4 = vcmp.eq.s32.totalorder %v6759_v49, %v6885_v11  ;;  %v7024_v49 = vld [vmem:[%s11490_s1 + $0xe8] sm:$0xff] }
  0xf0   :  { %v253_v50 = vpack.c.bf16 %v222_v7, %v221_v3  ;;  %v6924_v3 = vld [vmem:[%s11491_s2 + $0x98] sm:$0xff] }
  0xf1   :  { %959 = vperm.xlu1 %5917, %v6463_v12   ;;  %v6913_v44 = vpop.permute.xlu1 %681  ;;  %v107_v34 = vpop.permute.xlu0 %106 }
  0xf2   :  { %11744 = vst [vmem:[#allocation41_spill] sm:$0xff] %v6913_v44  ;;  %vm193_vm7 = vcmp.eq.s32.totalorder %v107_v34, %v6885_v11  ;;  %2175 = vperm.xlu0 %5994, %v6906_v13   ;;  %5684 = vmatprep.mubr.msk.bf16.mxu0 %vm321_vm5, %v253_v50  ;;  %v230_v34 = vsel %vm198_vm10, 1.0, %v11526_v25 }
  0xf3   :  { %v225_v55 = vsel %vm193_vm7, 1.0, %v11526_v25  ;;  %5685 = vmatmul.mubr.msk.bf16.vlgmr.msra.gmra.mxu0 %vm321_vm5, %v254_v46  ;;  %v228_v46 = vsel %vm196_vm8, 1.0, %v11526_v25  ;;  %vm210_vm7 = vcmp.eq.s32.totalorder %v6765_v51, %v6885_v11  ;;  %v5504_v51 = vld [vmem:[%s11491_s2 + $0xe0] sm:$0xff] }
  0xf4   :  { %v255_v21 = vpack.c.bf16 %v226_v43, %v225_v55 }
  0xf5   :  { %967 = vperm.xlu1 %5917, %v6471_v14   ;;  %v6929_v53 = vpop.permute.xlu1 %687  ;;  %v113_v50 = vpop.permute.xlu0 %112 }
  0xf6   :  { %11745 = vst [vmem:[#allocation42_spill] sm:$0xff] %v6929_v53  ;;  %vm195_vm9 = vcmp.eq.s32.totalorder %v113_v50, %v6885_v11  ;;  %2190 = vperm.xlu0 %5994, %v6924_v3   ;;  %5688 = vmatprep.mubr.msk.bf16.mxu0 %vm321_vm5, %v255_v21 }
  0xf7   :  { %v227_v7 = vsel %vm195_vm9, 1.0, %v11526_v25  ;;  %vm212_vm9 = vcmp.eq.s32.totalorder %v6772_v57, %v6885_v11 }
  0xf8   :  { %v256_v43 = vpack.c.bf16 %v228_v46, %v227_v7  ;;  %v11520_v46 = vmov 5  }
  0xf9   :  { %975 = vperm.xlu1 %5917, %v6480_v16   ;;  %v6944_v55 = vpop.permute.xlu1 %693  ;;  %v119_v59 = vpop.permute.xlu0 %118 }
  0xfa   :  { %11746 = vst [vmem:[#allocation43_spill] sm:$0xff] %v6944_v55  ;;  %vm197_vm11 = vcmp.eq.s32.totalorder %v119_v59, %v6885_v11  ;;  %2157 = vperm.xlu0 %5994, %v6939_v27  }
  0xfb   :  { %v229_v21 = vsel %vm197_vm11, 1.0, %v11526_v25  ;;  %5689 = vmatmul.mubr.msk.bf16.gmra.mxu0 %vm321_vm5, %v256_v43  ;;  %v232_v43 = vsel %vm200_vm12, 1.0, %v11526_v25  ;;  %vm214_vm11 = vcmp.eq.s32.totalorder %v6778_v61, %v6885_v11 }
  0xfc   :  { %v257_v50 = vpack.c.bf16 %v230_v34, %v229_v21 }
  0xfd   :  { %5918 = vset.pattern.permute.xlu1 %v11520_v46  ;;  %v6957_v7 = vpop.permute.xlu1 %707  ;;  %v125_v59 = vpop.permute.xlu0 %124  ;;  %v236_v46 = vsel %vm204_vm0, 1.0, %v11526_v25 }
  0xfe   :  { %11747 = vst [vmem:[#allocation44_spill] sm:$0xff] %v6957_v7  ;;  %vm199_vm13 = vcmp.eq.s32.totalorder %v125_v59, %v6885_v11  ;;  %998 = vperm.xlu1 %5918, %v6567_v35   ;;  %2195 = vperm.xlu0 %5994, %v5483_v33   ;;  %v234_v33 = vsel %vm202_vm14, 1.0, %v11526_v25 }
  0xff   :  { %v231_v55 = vsel %vm199_vm13, 1.0, %v11526_v25  ;;  %5692 = vmatprep.mubr.msk.bf16.mxu0 %vm321_vm5, %v257_v50  ;;  %vm216_vm13 = vcmp.eq.s32.totalorder %v6784_v5, %v6885_v11 }
 0x100   :  { %v258_v34 = vpack.c.bf16 %v232_v43, %v231_v55 }
 0x101   :  { %v6971_v21 = vpop.permute.xlu1 %715  ;;  %v131_v59 = vpop.permute.xlu0 %130 }
 0x102   :  { %11748 = vst [vmem:[#allocation45_spill] sm:$0xff] %v6971_v21  ;;  %vm201_vm15 = vcmp.eq.s32.totalorder %v131_v59, %v6885_v11  ;;  %1001 = vperm.xlu1 %5918, %v6632_v52   ;;  %2210 = vperm.xlu0 %5994, %v6967_v39   ;;  %v6994_v21 = vld [vmem:[%s11490_s1 + $0xd8] sm:$0xff] }
 0x103   :  { %v233_v50 = vsel %vm201_vm15, 1.0, %v11526_v25  ;;  %5693 = vmatmul.mubr.msk.bf16.gmra.mxu0 %vm321_vm5, %v258_v34  ;;  %vm218_vm15 = vcmp.eq.s32.totalorder %v6790_v19, %v6885_v11 }
 0x104   :  { %v259_v55 = vpack.c.bf16 %v234_v33, %v233_v50 }
 0x105   :  { %v6984_v43 = vpop.permute.xlu1 %723  ;;  %v137_v59 = vpop.permute.xlu0 %136 }
 0x106   :  { %11749 = vst [vmem:[#allocation46_spill] sm:$0xff] %v6984_v43  ;;  %vm203_vm1 = vcmp.eq.s32.totalorder %v137_v59, %v6885_v11  ;;  %1007 = vperm.xlu1 %5918, %v6641_v54   ;;  %2922 = vperm.xlu0 %5994, %v5493_v42   ;;  %v238_v42 = vsel %vm206_vm2, 1.0, %v11526_v25  ;;  %v248_v43 = vsel %vm216_vm13, 1.0, %v11526_v25 }
 0x107   :  { %v235_v34 = vsel %vm203_vm1, 1.0, %v11526_v25  ;;  %5696 = vmatprep.mubr.msk.bf16.mxu0 %vm321_vm5, %v259_v55  ;;  %vm220_vm1 = vcmp.eq.s32.totalorder %v6796_v31, %v6885_v11 }
 0x108   :  { %v260_v45 = vpack.c.bf16 %v236_v46, %v235_v34 }
 0x109   :  { %v6998_v33 = vpop.permute.xlu1 %731  ;;  %v143_v50 = vpop.permute.xlu0 %142 }
 0x10a   :  { %11750 = vst [vmem:[#allocation47_spill] sm:$0xff] %v6998_v33  ;;  %vm205_vm3 = vcmp.eq.s32.totalorder %v143_v50, %v6885_v11  ;;  %1013 = vperm.xlu1 %5918, %v6650_v56   ;;  %2928 = vperm.xlu0 %5994, %v6994_v21   ;;  %v7051_v33 = vld [vmem:[%s11491_s2 + $0xf8] sm:$0xff] }
 0x10b   :  { %v237_v55 = vsel %vm205_vm3, 1.0, %v11526_v25  ;;  %5697 = vmatmul.mubr.msk.bf16.gmra.mxu0 %vm321_vm5, %v260_v45  ;;  %v240_v45 = vsel %vm208_vm4, 1.0, %v11526_v25 }
 0x10c   :  { %v261_v46 = vpack.c.bf16 %v238_v42, %v237_v55 }
 0x10d   :  { %v149_v59 = vpop.permute.xlu0 %148 }
 0x10e   :  { %vm207_vm6 = vcmp.eq.s32.totalorder %v149_v59, %v6885_v11  ;;  %1027 = vperm.xlu1 %5918, %v6659_v58   ;;  %v7015_v34 = vpop.permute.xlu1 %755  ;;  %2962 = vperm.xlu0 %5994, %v7009_v47  }
 0x10f   :  { %11751 = vst [vmem:[#allocation48_spill] sm:$0xff] %v7015_v34  ;;  %v239_v50 = vsel %vm207_vm6, 1.0, %v11526_v25  ;;  %5700 = vmatprep.mubr.msk.bf16.mxu0 %vm321_vm5, %v261_v46  ;;  %v242_v46 = vsel %vm210_vm7, 1.0, %v11526_v25 }
 0x110   :  { %v262_v42 = vpack.c.bf16 %v240_v45, %v239_v50 }
 0x111   :  { %v155_v55 = vpop.permute.xlu0 %154 }
 0x112   :  { %vm209_vm8 = vcmp.eq.s32.totalorder %v155_v55, %v6885_v11  ;;  %1035 = vperm.xlu1 %5918, %v6668_v60   ;;  %v7030_v59 = vpop.permute.xlu1 %761  ;;  %2934 = vperm.xlu0 %5994, %v7024_v49  }
 0x113   :  { %11752 = vst [vmem:[#allocation49_spill] sm:$0xff] %v7030_v59  ;;  %v241_v34 = vsel %vm209_vm8, 1.0, %v11526_v25  ;;  %5701 = vmatmul.mubr.msk.bf16.gmra.mxu0 %vm321_vm5, %v262_v42  ;;  %v244_v59 = vsel %vm212_vm9, 1.0, %v11526_v25 }
 0x114   :  { %v263_v45 = vpack.c.bf16 %v242_v46, %v241_v34 }
 0x115   :  { %v161_v50 = vpop.permute.xlu0 %160 }
 0x116   :  { %vm211_vm10 = vcmp.eq.s32.totalorder %v161_v50, %v6885_v11  ;;  %1043 = vperm.xlu1 %5918, %v6677_v62   ;;  %v7043_v55 = vpop.permute.xlu1 %764  ;;  %2972 = vperm.xlu0 %5994, %v5504_v51   ;;  %v246_v51 = vsel %vm214_vm11, 1.0, %v11526_v25  ;;  %v11524_v50 = vmov 6  }
 0x117   :  { %11753 = vst [vmem:[#allocation50_spill] sm:$0xff] %v7043_v55  ;;  %v243_v42 = vsel %vm211_vm10, 1.0, %v11526_v25  ;;  %5704 = vmatprep.mubr.msk.bf16.mxu0 %vm321_vm5, %v263_v45  ;;  %v7469_v55 = vld [vmem:[%s11490_s1 + $0x78] sm:$0xff] }
 0x118   :  { %v264_v57 = vpack.c.bf16 %v244_v59, %v243_v42 }
 0x119   :  { %v167_v34 = vpop.permute.xlu0 %166 }
 0x11a   :  { %vm213_vm12 = vcmp.eq.s32.totalorder %v167_v34, %v6885_v11  ;;  %1051 = vperm.xlu1 %5918, %v6686_v1   ;;  %v7057_v46 = vpop.permute.xlu1 %770  ;;  %2987 = vperm.xlu0 %5994, %v7051_v33   ;;  %v11756_v34 = vmov 2  }
 0x11b   :  { %11754 = vst [vmem:[#allocation51_spill] sm:$0xff] %v7057_v46  ;;  %v245_v45 = vsel %vm213_vm12, 1.0, %v11526_v25  ;;  %5705 = vmatmul.mubr.msk.bf16.gmra.mxu0 %vm321_vm5, %v264_v57 }
 0x11c   :  { %v265_v61 = vpack.c.bf16 %v246_v51, %v245_v45  ;;  %v250_v45 = vsel %vm218_vm15, 1.0, %v11526_v25 }
 0x11d   :  { %v173_v59 = vpop.permute.xlu0 %172 }
 0x11e   :  { %vm215_vm14 = vcmp.eq.s32.totalorder %v173_v59, %v6885_v11  ;;  %5919 = vset.pattern.permute.xlu1 %v11524_v50  ;;  %v7067_v42 = vpop.permute.xlu1 %776  ;;  %5997 = vset.pattern.permute.xlu0 %v11756_v34 }
 0x11f   :  { %11755 = vst [vmem:[#allocation52_spill] sm:$0xff] %v7067_v42  ;;  %v247_v7 = vsel %vm215_vm14, 1.0, %v11526_v25  ;;  %5708 = vmatprep.mubr.msk.bf16.mxu0 %vm321_vm5, %v265_v61  ;;  %1075 = vperm.xlu1 %5919, %v6416_v0  }
 0x120   :  { %v266_v5 = vpack.c.bf16 %v248_v43, %v247_v7  ;;  %758 = vperm.xlu0 %5997, %v6567_v35   ;;  %v252_v43 = vsel %vm220_vm1, 1.0, %v11526_v25 }
 0x121   :  { %v179_v57 = vpop.permute.xlu0 %178 }
 0x122   :  { %vm217_vm0 = vcmp.eq.s32.totalorder %v179_v57, %v6885_v11  ;;  %v7078_v51 = vpop.permute.xlu1 %791 }
 0x123   :  { %11757 = vst [vmem:[#allocation53_spill] sm:$0xff] %v7078_v51  ;;  %v249_v59 = vsel %vm217_vm0, 1.0, %v11526_v25  ;;  %1081 = vperm.xlu1 %5919, %v6632_v52   ;;  %5709 = vmatmul.mubr.msk.bf16.gmra.mxu0 %vm321_vm5, %v266_v5 }
 0x124   :  { %v267_v0 = vpack.c.bf16 %v250_v45, %v249_v59  ;;  %767 = vperm.xlu0 %5997, %v6641_v54  }
 0x125   :  { %v185_v19 = vpop.permute.xlu0 %184 }
 0x126   :  { %vm219_vm2 = vcmp.eq.s32.totalorder %v185_v19, %v6885_v11  ;;  %v7088_v7 = vpop.permute.xlu1 %799  ;;  %5712 = vmatprep.mubr.msk.bf16.mxu0 %vm321_vm5, %v267_v0 }
 0x127   :  { %11758 = vst [vmem:[#allocation54_spill] sm:$0xff] %v7088_v7  ;;  %v251_v61 = vsel %vm219_vm2, 1.0, %v11526_v25  ;;  %1084 = vperm.xlu1 %5919, %v6427_v4   ;;  %v7143_v25 = vstv %s7126_s22 }
 0x128   :  { %v268_v5 = vpack.c.bf16 %v252_v43, %v251_v61  ;;  %773 = vperm.xlu0 %5997, %v6650_v56   ;;  %v11770_v61 = vlaneseq }
 0x129   :  { %v7095_v31 = vpop.permute.xlu0 %587 }
 0x12a   :  { %11759 = vst [vmem:[#allocation55_spill] sm:$0xff] %v7095_v31  ;;  %v7097_v57 = vpop.permute.xlu1 %807  ;;  %v545_v31 = vstv %s7439_s25 }
 0x12b   :  { %11760 = vst [vmem:[#allocation56_spill] sm:$0xff] %v7097_v57  ;;  %1090 = vperm.xlu1 %5919, %v6436_v6   ;;  %5713 = vmatmul.mubr.msk.bf16.gmra.mxu0 %vm321_vm5, %v268_v5  ;;  %v7131_v5 = vshrl.u32 %v11770_v61, 7  ;;  %v7424_v57 = vld [vmem:[%s11490_s1 + $0x40] sm:$0xff] }
 0x12c   :  { %787 = vperm.xlu0 %5997, %v6659_v58  }
 0x12d   :  { %v7102_v45 = vpop.permute.xlu0 %593  ;;  %11771 = vst [vmem:[#allocation66_spill] sm:$0xff] %v7131_v5  ;;  %v7155_v61 = vadd.s32 24, %v7131_v5  ;;  %vm1322_vm3 = vcmp.lt.s32.totalorder %v7131_v5, %v7143_v25  ;;  %v7457_v42 = vadd.s32 48, %v7131_v5  ;;  %vm546_vm0 = vcmp.lt.s32.totalorder %v7131_v5, %v545_v31 }
 0x12e   :  { %11761 = vst [vmem:[#allocation57_spill] sm:$0xff] %v7102_v45  ;;  %v7104_v59 = vpop.permute.xlu1 %815 }
 0x12f   :  { %11762 = vst [vmem:[#allocation58_spill] sm:$0xff] %v7104_v59  ;;  %1096 = vperm.xlu1 %5919, %v6445_v8   ;;  %11777 = vst [vmem:[#allocation72_spill] sm:$0xff] %v7155_v61  ;;  %vm1325_vm4 = vcmp.lt.s32.totalorder %v7155_v61, %v7143_v25  ;;  %v7413_v59 = vld [vmem:[%s11491_s2 + $0x38] sm:$0xff]  ;;  %vm552_vm9 = vcmp.lt.s32.totalorder %v7457_v42, %v545_v31  ;;  %vm549_vm13 = vcmp.lt.s32.totalorder %v7155_v61, %v545_v31 }
 0x130   :  { %795 = vperm.xlu0 %5997, %v6668_v60   ;;  %vm1328_vm1 = vcmp.lt.s32.totalorder %v7457_v42, %v7143_v25 }
 0x131   :  { %v7108_v4 = vpop.permute.xlu0 %599 }
 0x132   :  { %11763 = vst [vmem:[#allocation59_spill] sm:$0xff] %v7108_v4 }
 0x133   :  { %1111 = vperm.xlu1 %5919, %v6454_v10   ;;  %v7111_v0 = vpop.permute.xlu1 %838 }
 0x134   :  { %11764 = vst [vmem:[#allocation60_spill] sm:$0xff] %v7111_v0  ;;  %803 = vperm.xlu0 %5997, %v6677_v62   ;;  %v11530_v0 = vmov 7  }
 0x135   :  { %v7114_v6 = vpop.permute.xlu0 %605 }
 0x136   :  { %11765 = vst [vmem:[#allocation61_spill] sm:$0xff] %v7114_v6  ;;  %v7402_v6 = vld [vmem:[%s11491_s2 + $0x28] sm:$0xff] }
 0x137   :  { %1119 = vperm.xlu1 %5919, %v6463_v12   ;;  %v7117_v19 = vpop.permute.xlu1 %841 }
 0x138   :  { %11766 = vst [vmem:[#allocation62_spill] sm:$0xff] %v7117_v19  ;;  %811 = vperm.xlu0 %5997, %v6686_v1  }
 0x139   :  { %v7120_v43 = vpop.permute.xlu0 %620 }
 0x13a   :  { %11767 = vst [vmem:[#allocation63_spill] sm:$0xff] %v7120_v43  ;;  %v7391_v43 = vld [vmem:[%s11491_s2 + $0x18] sm:$0xff] }
 0x13b   :  { %1127 = vperm.xlu1 %5919, %v6471_v14   ;;  %v7123_v8 = vpop.permute.xlu1 %847  ;;  %v7140_v14 = vadd.s32 16, %v7131_v5 }
 0x13c   :  { %11768 = vst [vmem:[#allocation64_spill] sm:$0xff] %v7123_v8  ;;  %1536 = vperm.xlu0 %5997, %v6804_v41   ;;  %v7175_v8 = vadd.s32 32, %v7131_v5 }
 0x13d   :  { %v7128_v10 = vpop.permute.xlu0 %630  ;;  %11774 = vst [vmem:[#allocation69_spill] sm:$0xff] %v7140_v14  ;;  %vm1324_vm5 = vcmp.lt.s32.totalorder %v7140_v14, %v7143_v25  ;;  %vm548_vm14 = vcmp.lt.s32.totalorder %v7140_v14, %v545_v31 }
 0x13e   :  { %11769 = vst [vmem:[#allocation65_spill] sm:$0xff] %v7128_v10  ;;  %11782 = vst [vmem:[#allocation77_spill] sm:$0xff] %v7175_v8  ;;  %vm1326_vm7 = vcmp.lt.s32.totalorder %v7175_v8, %v7143_v25  ;;  %vm550_vm11 = vcmp.lt.s32.totalorder %v7175_v8, %v545_v31 }
 0x13f   :  { %1135 = vperm.xlu1 %5919, %v6480_v16   ;;  %v7134_v12 = vpop.permute.xlu1 %853 }
 0x140   :  { %11772 = vst [vmem:[#allocation67_spill] sm:$0xff] %v7134_v12  ;;  %1545 = vperm.xlu0 %5997, %v6815_v2  }
 0x141   :  { %v7137_v50 = vpop.permute.xlu0 %640 }
 0x142   :  { %11773 = vst [vmem:[#allocation68_spill] sm:$0xff] %v7137_v50 }
 0x143   :  { %5920 = vset.pattern.permute.xlu1 %v11530_v0  ;;  %v7146_v51 = vpop.permute.xlu1 %867  ;;  %v7162_v0 = vadd.s32 8, %v7131_v5 }
 0x144   :  { %11775 = vst [vmem:[#allocation70_spill] sm:$0xff] %v7146_v51  ;;  %1551 = vperm.xlu0 %5997, %v6826_v63   ;;  %1158 = vperm.xlu1 %5920, %v6567_v35  }
 0x145   :  { %v7152_v16 = vpop.permute.xlu0 %650  ;;  %11779 = vst [vmem:[#allocation74_spill] sm:$0xff] %v7162_v0  ;;  %vm1323_vm6 = vcmp.lt.s32.totalorder %v7162_v0, %v7143_v25  ;;  %vm547_vm15 = vcmp.lt.s32.totalorder %v7162_v0, %v545_v31 }
 0x146   :  { %11776 = vst [vmem:[#allocation71_spill] sm:$0xff] %v7152_v16 }
 0x147   :  { %v7159_v12 = vpop.permute.xlu1 %875 }
 0x148   :  { %11778 = vst [vmem:[#allocation73_spill] sm:$0xff] %v7159_v12  ;;  %1565 = vperm.xlu0 %5997, %v6837_v38   ;;  %1161 = vperm.xlu1 %5920, %v6632_v52  }
 0x149   :  { %v7168_v35 = vpop.permute.xlu0 %1368 }
 0x14a   :  { %11780 = vst [vmem:[#allocation75_spill] sm:$0xff] %v7168_v35  ;;  %v7186_v35 = vadd.s32 40, %v7131_v5 }
 0x14b   :  { %v7172_v51 = vpop.permute.xlu1 %883 }
 0x14c   :  { %11781 = vst [vmem:[#allocation76_spill] sm:$0xff] %v7172_v51  ;;  %1573 = vperm.xlu0 %5997, %v6849_v48   ;;  %1167 = vperm.xlu1 %5920, %v6641_v54   ;;  %11785 = vst [vmem:[#allocation80_spill] sm:$0xff] %v7186_v35  ;;  %vm551_vm12 = vcmp.lt.s32.totalorder %v7186_v35, %v545_v31 }
 0x14d   :  { %v7179_v12 = vpop.permute.xlu0 %1377 }
 0x14e   :  { %11783 = vst [vmem:[#allocation78_spill] sm:$0xff] %v7179_v12 }
 0x14f   :  { %v7183_v52 = vpop.permute.xlu1 %891 }
 0x150   :  { %11784 = vst [vmem:[#allocation79_spill] sm:$0xff] %v7183_v52  ;;  %1581 = vperm.xlu0 %5997, %v6860_v17   ;;  %1173 = vperm.xlu1 %5920, %v6650_v56   ;;  %v7203_v52 = vld [vmem:[%s11490_s1 + $0x80] sm:$0xff] }
 0x151   :  { %v7190_v51 = vpop.permute.xlu0 %1383 }
 0x152   :  { %11786 = vst [vmem:[#allocation81_spill] sm:$0xff] %v7190_v51 }
 0x154   :  { %1589 = vperm.xlu0 %5997, %v6871_v9   ;;  %1187 = vperm.xlu1 %5920, %v6659_v58   ;;  %v7196_v54 = vpop.permute.xlu1 %915  ;;  %v7214_v58 = vld [vmem:[%s11490_s1 + $0x98] sm:$0xff] }
 0x155   :  { %11787 = vst [vmem:[#allocation82_spill] sm:$0xff] %v7196_v54  ;;  %v7198_v12 = vpop.permute.xlu0 %1398 }
 0x156   :  { %11788 = vst [vmem:[#allocation83_spill] sm:$0xff] %v7198_v12 }
 0x158   :  { %2310 = vperm.xlu0 %5997, %v7203_v52   ;;  %1195 = vperm.xlu1 %5920, %v6668_v60   ;;  %v7207_v56 = vpop.permute.xlu1 %921 }
 0x159   :  { %11789 = vst [vmem:[#allocation84_spill] sm:$0xff] %v7207_v56  ;;  %v7209_v51 = vpop.permute.xlu0 %1408 }
 0x15a   :  { %11790 = vst [vmem:[#allocation85_spill] sm:$0xff] %v7209_v51  ;;  %v11795_v51 = vmov 0  }
 0x15c   :  { %2319 = vperm.xlu0 %5997, %v7214_v58   ;;  %1203 = vperm.xlu1 %5920, %v6677_v62   ;;  %v7218_v54 = vpop.permute.xlu1 %924 }
 0x15d   :  { %11791 = vst [vmem:[#allocation86_spill] sm:$0xff] %v7218_v54  ;;  %v7220_v12 = vpop.permute.xlu0 %1418 }
 0x15e   :  { %11792 = vst [vmem:[#allocation87_spill] sm:$0xff] %v7220_v12 }
 0x160   :  { %2346 = vperm.xlu0 %5997, %v6574_v36   ;;  %1211 = vperm.xlu1 %5920, %v6686_v1   ;;  %v7224_v60 = vpop.permute.xlu1 %930  ;;  %v7238_v36 = vld [vmem:[%s11490_s1 + $0xa0] sm:$0xff]  ;;  %v7243_v1 = vld [vmem:[%s11490_s1 + $0x50] sm:$0xff] }
 0x161   :  { %11793 = vst [vmem:[#allocation88_spill] sm:$0xff] %v7224_v60  ;;  %v7226_v56 = vpop.permute.xlu0 %1428 }
 0x162   :  { %11794 = vst [vmem:[#allocation89_spill] sm:$0xff] %v7226_v56 }
 0x164   :  { %2354 = vperm.xlu0 %5997, %v6924_v3   ;;  %5921 = vset.pattern.permute.xlu1 %v11795_v51  ;;  %v7230_v19 = vpop.permute.xlu1 %936 }
 0x165   :  { %11796 = vst [vmem:[#allocation90_spill] sm:$0xff] %v7230_v19  ;;  %1365 = vperm.xlu1 %5921, %v6490_v18   ;;  %v7233_v62 = vpop.permute.xlu0 %2145  ;;  %v7254_v18 = vld [vmem:[%s11490_s1 + $0xb0] sm:$0xff] }
 0x166   :  { %11797 = vst [vmem:[#allocation91_spill] sm:$0xff] %v7233_v62  ;;  %11800 = vst [vmem:[#allocation94_spill] sm:$0xff] %v7254_v18 }
 0x168   :  { %2322 = vperm.xlu0 %5997, %v7238_v36   ;;  %v7246_v56 = vpop.permute.xlu1 %951 }
 0x169   :  { %11798 = vst [vmem:[#allocation92_spill] sm:$0xff] %v7246_v56  ;;  %1371 = vperm.xlu1 %5921, %v7243_v1   ;;  %v7249_v19 = vpop.permute.xlu0 %2148  ;;  %v7265_v56 = vld [vmem:[%s11491_s2 + $0xa8] sm:$0xff] }
 0x16a   :  { %11799 = vst [vmem:[#allocation93_spill] sm:$0xff] %v7249_v19  ;;  %11803 = vst [vmem:[#allocation97_spill] sm:$0xff] %v7265_v56 }
 0x16c   :  { %2328 = vperm.xlu0 %5997, %v7254_v18   ;;  %v7257_v62 = vpop.permute.xlu1 %959 }
 0x16d   :  { %11801 = vst [vmem:[#allocation95_spill] sm:$0xff] %v7257_v62  ;;  %1374 = vperm.xlu1 %5921, %v6499_v20   ;;  %v7260_v60 = vpop.permute.xlu0 %2175  ;;  %v7276_v62 = vld [vmem:[%s11491_s2 + $0xb0] sm:$0xff] }
 0x16e   :  { %11802 = vst [vmem:[#allocation96_spill] sm:$0xff] %v7260_v60 }
 0x170   :  { %2362 = vperm.xlu0 %5997, %v7265_v56   ;;  %v7268_v19 = vpop.permute.xlu1 %967 }
 0x171   :  { %11804 = vst [vmem:[#allocation98_spill] sm:$0xff] %v7268_v19  ;;  %1380 = vperm.xlu1 %5921, %v6508_v22   ;;  %v7271_v12 = vpop.permute.xlu0 %2190  ;;  %v7293_v19 = vld [vmem:[%s11490_s1 + $0xe0] sm:$0xff] }
 0x172   :  { %11805 = vst [vmem:[#allocation99_spill] sm:$0xff] %v7271_v12  ;;  %11810 = vst [vmem:[#allocation104_spill] sm:$0xff] %v7293_v19 }
 0x174   :  { %2366 = vperm.xlu0 %5997, %v7276_v62   ;;  %v7279_v20 = vpop.permute.xlu1 %975 }
 0x175   :  { %11806 = vst [vmem:[#allocation100_spill] sm:$0xff] %v7279_v20  ;;  %1386 = vperm.xlu1 %5921, %v6517_v24   ;;  %v7282_v60 = vpop.permute.xlu0 %2157  ;;  %v7312_v20 = vld [vmem:[%s11491_s2 + $0xe8] sm:$0xff] }
 0x176   :  { %11807 = vst [vmem:[#allocation101_spill] sm:$0xff] %v7282_v60  ;;  %11815 = vst [vmem:[#allocation109_spill] sm:$0xff] %v7312_v20 }
 0x178   :  { %3096 = vperm.xlu0 %5997, %v6994_v21  }
 0x179   :  { %1403 = vperm.xlu1 %5921, %v6526_v26   ;;  %v7286_v22 = vpop.permute.xlu1 %998  ;;  %v7288_v12 = vpop.permute.xlu0 %2195  ;;  %v5498_v26 = vld [vmem:[%s11490_s1 + $0xf0] sm:$0xff] }
 0x17a   :  { %11808 = vst [vmem:[#allocation102_spill] sm:$0xff] %v7286_v22  ;;  %11809 = vst [vmem:[#allocation103_spill] sm:$0xff] %v7288_v12 }
 0x17c   :  { %3099 = vperm.xlu0 %5997, %v7293_v19  }
 0x17d   :  { %1413 = vperm.xlu1 %5921, %v6535_v28   ;;  %v7297_v24 = vpop.permute.xlu1 %1001  ;;  %v7299_v60 = vpop.permute.xlu0 %2210 }
 0x17e   :  { %11811 = vst [vmem:[#allocation105_spill] sm:$0xff] %v7297_v24  ;;  %11812 = vst [vmem:[#allocation106_spill] sm:$0xff] %v7299_v60 }
 0x180   :  { %3105 = vperm.xlu0 %5997, %v5498_v26   ;;  %v11818_v26 = vmov 1  }
 0x181   :  { %1423 = vperm.xlu1 %5921, %v6544_v30   ;;  %v7305_v12 = vpop.permute.xlu1 %1007  ;;  %v7307_v22 = vpop.permute.xlu0 %2922  ;;  %v7323_v30 = vld [vmem:[%s11491_s2 + $0xf0] sm:$0xff] }
 0x182   :  { %11813 = vst [vmem:[#allocation107_spill] sm:$0xff] %v7305_v12  ;;  %11814 = vst [vmem:[#allocation108_spill] sm:$0xff] %v7307_v22 }
 0x184   :  { %3139 = vperm.xlu0 %5997, %v7312_v20  }
 0x185   :  { %1433 = vperm.xlu1 %5921, %v6553_v32   ;;  %v7316_v28 = vpop.permute.xlu1 %1013  ;;  %v7318_v60 = vpop.permute.xlu0 %2928  ;;  %v11821_v32 = vmov 3  }
 0x186   :  { %11816 = vst [vmem:[#allocation110_spill] sm:$0xff] %v7316_v28  ;;  %11817 = vst [vmem:[#allocation111_spill] sm:$0xff] %v7318_v60  ;;  %v7336_v60 = vld [vmem:[%s11490_s1] sm:$0xff] }
 0x188   :  { %3143 = vperm.xlu0 %5997, %v7323_v30  }
 0x189   :  { %5922 = vset.pattern.permute.xlu1 %v11818_v26  ;;  %v7327_v22 = vpop.permute.xlu1 %1027  ;;  %v7329_v12 = vpop.permute.xlu0 %2962 }
 0x18a   :  { %11819 = vst [vmem:[#allocation112_spill] sm:$0xff] %v7327_v22  ;;  %11820 = vst [vmem:[#allocation113_spill] sm:$0xff] %v7329_v12  ;;  %1456 = vperm.xlu1 %5922, %v6804_v41   ;;  %v7347_v12 = vld [vmem:[%s11490_s1 + $0x18] sm:$0xff] }
 0x18c   :  { %6004 = vset.pattern.permute.xlu0 %v11821_v32 }
 0x18d   :  { %835 = vperm.xlu0 %6004, %v7336_v60   ;;  %v7339_v28 = vpop.permute.xlu1 %1035  ;;  %v7341_v24 = vpop.permute.xlu0 %2934 }
 0x18e   :  { %11822 = vst [vmem:[#allocation114_spill] sm:$0xff] %v7339_v28  ;;  %11823 = vst [vmem:[#allocation115_spill] sm:$0xff] %v7341_v24  ;;  %1459 = vperm.xlu1 %5922, %v7243_v1   ;;  %v7358_v28 = vld [vmem:[%s11490_s1 + $0x28] sm:$0xff] }
 0x191   :  { %844 = vperm.xlu0 %6004, %v7347_v12   ;;  %v7350_v22 = vpop.permute.xlu1 %1043  ;;  %v7352_v54 = vpop.permute.xlu0 %2972 }
 0x192   :  { %11824 = vst [vmem:[#allocation116_spill] sm:$0xff] %v7350_v22  ;;  %11825 = vst [vmem:[#allocation117_spill] sm:$0xff] %v7352_v54  ;;  %1465 = vperm.xlu1 %5922, %v6815_v2   ;;  %v7369_v22 = vld [vmem:[%s11490_s1 + $0x38] sm:$0xff] }
 0x195   :  { %850 = vperm.xlu0 %6004, %v7358_v28   ;;  %v7361_v24 = vpop.permute.xlu1 %1051  ;;  %v7363_v16 = vpop.permute.xlu0 %2987 }
 0x196   :  { %11826 = vst [vmem:[#allocation118_spill] sm:$0xff] %v7361_v24  ;;  %11827 = vst [vmem:[#allocation119_spill] sm:$0xff] %v7363_v16  ;;  %1471 = vperm.xlu1 %5922, %v6826_v63   ;;  %v7380_v24 = vld [vmem:[%s11491_s2 + $0x8] sm:$0xff] }
 0x199   :  { %856 = vperm.xlu0 %6004, %v7369_v22  }
 0x19a   :  { %1485 = vperm.xlu1 %5922, %v6837_v38   ;;  %v7373_v54 = vpop.permute.xlu1 %1075 }
 0x19b   :  { %11828 = vst [vmem:[#allocation120_spill] sm:$0xff] %v7373_v54  ;;  %v7375_v50 = vpop.permute.xlu0 %758 }
 0x19c   :  { %11829 = vst [vmem:[#allocation121_spill] sm:$0xff] %v7375_v50 }
 0x19d   :  { %871 = vperm.xlu0 %6004, %v7380_v24  }
 0x19e   :  { %1493 = vperm.xlu1 %5922, %v6849_v48   ;;  %v7384_v16 = vpop.permute.xlu1 %1081 }
 0x19f   :  { %11830 = vst [vmem:[#allocation122_spill] sm:$0xff] %v7384_v16  ;;  %v7386_v10 = vpop.permute.xlu0 %767 }
 0x1a0   :  { %11831 = vst [vmem:[#allocation123_spill] sm:$0xff] %v7386_v10 }
 0x1a1   :  { %879 = vperm.xlu0 %6004, %v7391_v43  }
 0x1a2   :  { %1501 = vperm.xlu1 %5922, %v6860_v17   ;;  %v7395_v54 = vpop.permute.xlu1 %1084 }
 0x1a3   :  { %11832 = vst [vmem:[#allocation124_spill] sm:$0xff] %v7395_v54  ;;  %v7397_v50 = vpop.permute.xlu0 %773 }
 0x1a4   :  { %11833 = vst [vmem:[#allocation125_spill] sm:$0xff] %v7397_v50 }
 0x1a5   :  { %887 = vperm.xlu0 %6004, %v7402_v6  }
 0x1a6   :  { %1509 = vperm.xlu1 %5922, %v6871_v9   ;;  %v7406_v16 = vpop.permute.xlu1 %1090 }
 0x1a7   :  { %11834 = vst [vmem:[#allocation126_spill] sm:$0xff] %v7406_v16  ;;  %v7408_v10 = vpop.permute.xlu0 %787 }
 0x1a8   :  { %11835 = vst [vmem:[#allocation127_spill] sm:$0xff] %v7408_v10 }
 0x1a9   :  { %895 = vperm.xlu0 %6004, %v7413_v59  }
 0x1aa   :  { %5923 = vset.pattern.permute.xlu1 %v11756_v34  ;;  %v7417_v54 = vpop.permute.xlu1 %1096 }
 0x1ab   :  { %11836 = vst [vmem:[#allocation128_spill] sm:$0xff] %v7417_v54  ;;  %v7419_v50 = vpop.permute.xlu0 %795  ;;  %1533 = vperm.xlu1 %5923, %v7424_v57   ;;  %v7436_v54 = vld [vmem:[%s11490_s1 + $0x58] sm:$0xff] }
 0x1ac   :  { %11837 = vst [vmem:[#allocation129_spill] sm:$0xff] %v7419_v50 }
 0x1ad   :  { %1613 = vperm.xlu0 %6004, %v7424_v57  }
 0x1ae   :  { %v7428_v16 = vpop.permute.xlu1 %1111 }
 0x1af   :  { %11838 = vst [vmem:[#allocation130_spill] sm:$0xff] %v7428_v16  ;;  %v7430_v10 = vpop.permute.xlu0 %803  ;;  %1539 = vperm.xlu1 %5923, %v7243_v1  }
 0x1b0   :  { %11839 = vst [vmem:[#allocation131_spill] sm:$0xff] %v7430_v10  ;;  %v7449_v10 = vld [vmem:[%s11490_s1 + $0x68] sm:$0xff] }
 0x1b1   :  { %1622 = vperm.xlu0 %6004, %v7436_v54  }
 0x1b2   :  { %v7441_v50 = vpop.permute.xlu1 %1119 }
 0x1b3   :  { %11840 = vst [vmem:[#allocation132_spill] sm:$0xff] %v7441_v50  ;;  %v7443_v7 = vpop.permute.xlu0 %811  ;;  %1542 = vperm.xlu1 %5923, %v7436_v54   ;;  %v5686_v16 = vpop.f32.mrf.mxu0  ;;  %v7460_v50 = vadd.s32 56, %v7131_v5 }
 0x1b4   :  { %11841 = vst [vmem:[#allocation133_spill] sm:$0xff] %v7443_v7 }
 0x1b5   :  { %1628 = vperm.xlu0 %6004, %v7449_v10   ;;  %v7452_v4 = vpop.f32.mrf.mxu0  ;;  %11843 = vst [vmem:[#allocation135_spill] sm:$0xff] %v7460_v50  ;;  %vm553_vm10 = vcmp.lt.s32.totalorder %v7460_v50, %v545_v31  ;;  %vm1329_vm2 = vcmp.lt.s32.totalorder %v7460_v50, %v7143_v25 }
 0x1b6   :  { %v7454_v45 = vpop.permute.xlu1 %1127 }
 0x1b7   :  { %11842 = vst [vmem:[#allocation134_spill] sm:$0xff] %v7454_v45  ;;  %1548 = vperm.xlu1 %5923, %v7449_v10   ;;  %v5687_v7 = vpop.f32.mrf.mxu0  ;;  %v7463_v46 = vpop.permute.xlu0 %1536 }
 0x1b8   :  { %11844 = vst [vmem:[#allocation136_spill] sm:$0xff] %v7463_v46  ;;  %v11847_v46 = vmov 0.0  }
 0x1b9   :  { %1634 = vperm.xlu0 %6004, %v7469_v55   ;;  %v411_v45 = vpop.f32.mrf.mxu0  ;;  %v7482_v29 = vsel %vm552_vm9, 1.0, %v11847_v46  ;;  %v7491_v15 = vsel %vm553_vm10, 1.0, %v11847_v46  ;;  %v7501_v11 = vsel %vm551_vm12, 1.0, %v11847_v46  ;;  %v7513_v56 = vsel %vm549_vm13, 1.0, %v11847_v46 }
 0x1ba   :  { %v7472_v53 = vpop.permute.xlu1 %1135  ;;  %11848 = vst [vmem:[#allocation139_spill] sm:$0xff] %v7482_v29  ;;  %11849 = vst [vmem:[#allocation140_spill] sm:$0xff] %v7491_v15 }
 0x1bb   :  { %11845 = vst [vmem:[#allocation137_spill] sm:$0xff] %v7472_v53  ;;  %1554 = vperm.xlu1 %5923, %v7469_v55   ;;  %v5690_v44 = vpop.f32.mrf.mxu0  ;;  %v7477_v40 = vpop.permute.xlu0 %1545  ;;  %v7487_v53 = vld [vmem:[%s11491_s2 + $0x48] sm:$0xff]  ;;  %11852 = vst [vmem:[#allocation143_spill] sm:$0xff] %v7501_v11 }
 0x1bc   :  { %11846 = vst [vmem:[#allocation138_spill] sm:$0xff] %v7477_v40  ;;  %v7495_v40 = vsel %vm550_vm11, 1.0, %v11847_v46  ;;  %v7505_v20 = vmul.f32 %v5690_v44, %v7482_v29  ;;  %11856 = vst [vmem:[#allocation147_spill] sm:$0xff] %v7513_v56  ;;  %v7531_v29 = vsel %vm548_vm14, 1.0, %v11847_v46 }
 0x1bd   :  { %1649 = vperm.xlu0 %6004, %v7487_v53   ;;  %v424_v23 = vpop.f32.mrf.mxu0  ;;  %11850 = vst [vmem:[#allocation141_spill] sm:$0xff] %v7495_v40  ;;  %11859 = vst [vmem:[#allocation150_spill] sm:$0xff] %v7531_v29 }
 0x1be   :  { %11853 = vst [vmem:[#allocation144_spill] sm:$0xff] %v7505_v20  ;;  %v7523_v44 = vmul.f32 %v7495_v40, %v424_v23  ;;  %v7540_v23 = vmul.f32 %v5687_v7, %v7513_v56  ;;  %v7547_v40 = vsel %vm547_vm15, 1.0, %v11847_v46  ;;  %v7558_v7 = vmul.f32 %v5686_v16, %v7531_v29  ;;  %v7578_v16 = vld [vmem:[%s11491_s2 + $0x78] sm:$0xff] }
 0x1bf   :  { %1569 = vperm.xlu1 %5923, %v7487_v53   ;;  %v7498_v35 = vpop.permute.xlu1 %1158  ;;  %v5691_v8 = vpop.f32.mrf.mxu0  ;;  %11864 = vst [vmem:[#allocation155_spill] sm:$0xff] %v7547_v40  ;;  %v7561_v56 = vsel %vm546_vm0, 1.0, %v11847_v46 }
 0x1c0   :  { %11851 = vst [vmem:[#allocation142_spill] sm:$0xff] %v7498_v35  ;;  %v7508_v19 = vmul.f32 %v5691_v8, %v7491_v15  ;;  %v7510_v61 = vpop.permute.xlu0 %1551  ;;  %v7518_v35 = vld [vmem:[%s11491_s2 + $0x58] sm:$0xff]  ;;  %11857 = vst [vmem:[#allocation148_spill] sm:$0xff] %v7523_v44 }
 0x1c1   :  { %11855 = vst [vmem:[#allocation146_spill] sm:$0xff] %v7510_v61  ;;  %1657 = vperm.xlu0 %6004, %v7518_v35   ;;  %v427_v18 = vpop.f32.mrf.mxu0  ;;  %11862 = vst [vmem:[#allocation153_spill] sm:$0xff] %v7540_v23 }
 0x1c2   :  { %11854 = vst [vmem:[#allocation145_spill] sm:$0xff] %v7508_v19  ;;  %v7526_v8 = vmul.f32 %v7501_v11, %v427_v18  ;;  %v1241_v15 = vpack.c.bf16 %v7508_v19, %v7505_v20  ;;  %v7552_v20 = vld [vmem:[%s11491_s2 + $0x68] sm:$0xff]  ;;  %11866 = vst [vmem:[#allocation157_spill] sm:$0xff] %v7558_v7 }
 0x1c3   :  { %1577 = vperm.xlu1 %5923, %v7518_v35   ;;  %v7534_v61 = vpop.permute.xlu1 %1161  ;;  %v7536_v14 = vpop.f32.mrf.mxu0  ;;  %11867 = vst [vmem:[#allocation158_spill] sm:$0xff] %v7561_v56 }
 0x1c4   :  { %11858 = vst [vmem:[#allocation149_spill] sm:$0xff] %v7526_v8  ;;  %11860 = vst [vmem:[#allocation151_spill] sm:$0xff] %v7534_v61  ;;  %v1240_v18 = vpack.c.bf16 %v7526_v8, %v7523_v44  ;;  %v7544_v11 = vpop.permute.xlu0 %1565  ;;  %5716 = vmatprep.subr.bf16.mxu1 %v1241_v15  ;;  %v1239_v8 = vpack.c.bf16 %v7540_v23, %v7558_v7  ;;  %v7605_v23 = vsel %vm1329_vm2, 1.0, %v11847_v46 }
 0x1c5   :  { %11861 = vst [vmem:[#allocation152_spill] sm:$0xff] %v7536_v14  ;;  %11863 = vst [vmem:[#allocation154_spill] sm:$0xff] %v7544_v11  ;;  %1665 = vperm.xlu0 %6004, %v7552_v20   ;;  %v7555_v31 = vpop.f32.mrf.mxu0  ;;  %5717 = vmatpush3.bf16.msra.mxu1 %v1241_v15  ;;  %v7571_v11 = vmul.f32 %v7547_v40, %v411_v45 }
 0x1c6   :  { %11865 = vst [vmem:[#allocation156_spill] sm:$0xff] %v7555_v31  ;;  %5718 = vmatprep.subr.bf16.mxu1 %v1240_v18  ;;  %11878 = vst [vmem:[#allocation169_spill] sm:$0xff] %v7605_v23  ;;  %v11935_v31 = vmov 6  }
 0x1c7   :  { %1585 = vperm.xlu1 %5923, %v7552_v20   ;;  %v7564_v19 = vpop.permute.xlu1 %1167  ;;  %v7566_v44 = vpop.f32.mrf.mxu0  ;;  %11870 = vst [vmem:[#allocation161_spill] sm:$0xff] %v7571_v11 }
 0x1c8   :  { %11868 = vst [vmem:[#allocation159_spill] sm:$0xff] %v7564_v19  ;;  %11869 = vst [vmem:[#allocation160_spill] sm:$0xff] %v7566_v44  ;;  %v7573_v15 = vpop.permute.xlu0 %1573  ;;  %v7585_v19 = vmul.f32 %v7561_v56, %v7452_v4  ;;  %v7599_v4 = vsel %vm1328_vm1, 1.0, %v11847_v46 }
 0x1c9   :  { %11871 = vst [vmem:[#allocation162_spill] sm:$0xff] %v7573_v15  ;;  %1673 = vperm.xlu0 %6004, %v7578_v16   ;;  %v7581_v29 = vpop.f32.mrf.mxu0  ;;  %5719 = vmatpush3.bf16.msra.mxu1 %v1240_v18  ;;  %11876 = vst [vmem:[#allocation167_spill] sm:$0xff] %v7599_v4 }
 0x1ca   :  { %11872 = vst [vmem:[#allocation163_spill] sm:$0xff] %v7581_v29  ;;  %11873 = vst [vmem:[#allocation164_spill] sm:$0xff] %v7585_v19  ;;  %5720 = vmatprep.subr.bf16.mxu1 %v1239_v8  ;;  %v1238_v7 = vpack.c.bf16 %v7571_v11, %v7585_v19 }
 0x1cb   :  { %1593 = vperm.xlu1 %5923, %v7578_v16   ;;  %v7592_v45 = vpop.permute.xlu1 %1173  ;;  %v5698_v40 = vpop.f32.mrf.mxu0 }
 0x1cc   :  { %11874 = vst [vmem:[#allocation165_spill] sm:$0xff] %v7592_v45  ;;  %v7596_v18 = vpop.permute.xlu0 %1581  ;;  %v7611_v19 = vmul.f32 %v5698_v40, %v7599_v4 }
 0x1cd   :  { %11875 = vst [vmem:[#allocation166_spill] sm:$0xff] %v7596_v18  ;;  %2393 = vperm.xlu0 %6004, %v6882_v37   ;;  %v7602_v56 = vpop.f32.mrf.mxu0  ;;  %5721 = vmatpush3.bf16.msra.mxu1 %v1239_v8  ;;  %v7622_v37 = vld [vmem:[%s11490_s1 + $0x90] sm:$0xff] }
 0x1ce   :  { %11877 = vst [vmem:[#allocation168_spill] sm:$0xff] %v7602_v56  ;;  %5722 = vmatprep.subr.bf16.mxu1 %v1238_v7  ;;  %11880 = vst [vmem:[#allocation171_spill] sm:$0xff] %v7611_v19 }
 0x1cf   :  { %5924 = vset.pattern.permute.xlu1 %v11821_v32  ;;  %v7608_v15 = vpop.permute.xlu1 %1187  ;;  %v5699_v45 = vpop.f32.mrf.mxu0 }
 0x1d0   :  { %11879 = vst [vmem:[#allocation170_spill] sm:$0xff] %v7608_v15  ;;  %v7614_v11 = vmul.f32 %v5699_v45, %v7605_v23  ;;  %v7616_v18 = vpop.permute.xlu0 %1589  ;;  %1616 = vperm.xlu1 %5924, %v6804_v41   ;;  %v7731_v15 = vld [vmem:[%s11490_s1 + $0x8] sm:$0xff] }
 0x1d1   :  { %11882 = vst [vmem:[#allocation173_spill] sm:$0xff] %v7616_v18  ;;  %2396 = vperm.xlu0 %6004, %v7622_v37   ;;  %5723 = vmatpush3.bf16.msra.mxu1 %v1238_v7 }
 0x1d2   :  { %11881 = vst [vmem:[#allocation172_spill] sm:$0xff] %v7614_v11  ;;  %v7627_v8 = vpack.c.bf16 %v7614_v11, %v7611_v19 }
 0x1d3   :  { %v7629_v40 = vpop.permute.xlu1 %1195 }
 0x1d4   :  { %11883 = vst [vmem:[#allocation174_spill] sm:$0xff] %v7627_v8  ;;  %11884 = vst [vmem:[#allocation175_spill] sm:$0xff] %v7629_v40  ;;  %v7631_v45 = vpop.permute.xlu0 %2310  ;;  %1619 = vperm.xlu1 %5924, %v7243_v1   ;;  %5732 = vmatprep.subr.bf16.mxu1 %v7627_v8  ;;  %v7834_v40 = vld [vmem:[%s11491_s2 + $0x40] sm:$0xff] }
 0x1d5   :  { %11885 = vst [vmem:[#allocation176_spill] sm:$0xff] %v7631_v45  ;;  %2422 = vperm.xlu0 %6004, %v6906_v13   ;;  %v7712_v45 = vld [vmem:[%s11490_s1 + $0xf8] sm:$0xff] }
 0x1d7   :  { %v7636_v41 = vpop.permute.xlu1 %1203 }
 0x1d8   :  { %11886 = vst [vmem:[#allocation177_spill] sm:$0xff] %v7636_v41  ;;  %v7638_v23 = vpop.permute.xlu0 %2319  ;;  %1625 = vperm.xlu1 %5924, %v6815_v2   ;;  %v7656_v2 = vld [vmem:[%s11490_s1 + $0xb8] sm:$0xff] }
 0x1d9   :  { %11887 = vst [vmem:[#allocation178_spill] sm:$0xff] %v7638_v23  ;;  %2434 = vperm.xlu0 %6004, %v6924_v3  }
 0x1db   :  { %v7642_v7 = vpop.permute.xlu1 %1211 }
 0x1dc   :  { %11888 = vst [vmem:[#allocation179_spill] sm:$0xff] %v7642_v7  ;;  %v7644_v4 = vpop.permute.xlu0 %2346  ;;  %1631 = vperm.xlu1 %5924, %v6826_v63  }
 0x1dd   :  { %11889 = vst [vmem:[#allocation180_spill] sm:$0xff] %v7644_v4  ;;  %2405 = vperm.xlu0 %6004, %v6939_v27  }
 0x1e0   :  { %v7648_v19 = vpop.permute.xlu0 %2354  ;;  %1645 = vperm.xlu1 %5924, %v6837_v38   ;;  %v7651_v13 = vpop.permute.xlu1 %1365  ;;  %v7668_v38 = vld [vmem:[%s11490_s1 + $0xc0] sm:$0xff] }
 0x1e1   :  { %11890 = vst [vmem:[#allocation181_spill] sm:$0xff] %v7648_v19  ;;  %11891 = vst [vmem:[#allocation182_spill] sm:$0xff] %v7651_v13  ;;  %2411 = vperm.xlu0 %6004, %v7656_v2   ;;  %v7845_v13 = vld [vmem:[%s11491_s2 + $0x50] sm:$0xff] }
 0x1e4   :  { %v7659_v3 = vpop.permute.xlu0 %2322  ;;  %1653 = vperm.xlu1 %5924, %v6849_v48   ;;  %v7662_v63 = vpop.permute.xlu1 %1371 }
 0x1e5   :  { %11892 = vst [vmem:[#allocation183_spill] sm:$0xff] %v7659_v3  ;;  %11893 = vst [vmem:[#allocation184_spill] sm:$0xff] %v7662_v63  ;;  %2450 = vperm.xlu0 %6004, %v6967_v39   ;;  %v7684_v39 = vld [vmem:[%s11490_s1 + $0xd0] sm:$0xff] }
 0x1e8   :  { %v7670_v27 = vpop.permute.xlu0 %2328  ;;  %1661 = vperm.xlu1 %5924, %v6860_v17   ;;  %v7673_v11 = vpop.permute.xlu1 %1374  ;;  %v11899_v17 = vmov 4  }
 0x1e9   :  { %11894 = vst [vmem:[#allocation185_spill] sm:$0xff] %v7670_v27  ;;  %11895 = vst [vmem:[#allocation186_spill] sm:$0xff] %v7673_v11  ;;  %3167 = vperm.xlu0 %6004, %v7668_v38  }
 0x1ec   :  { %v7676_v3 = vpop.permute.xlu0 %2362  ;;  %1669 = vperm.xlu1 %5924, %v6871_v9   ;;  %v7679_v48 = vpop.permute.xlu1 %1380 }
 0x1ed   :  { %11896 = vst [vmem:[#allocation187_spill] sm:$0xff] %v7676_v3  ;;  %11897 = vst [vmem:[#allocation188_spill] sm:$0xff] %v7679_v48  ;;  %3173 = vperm.xlu0 %6004, %v7684_v39   ;;  %v7695_v3 = vld [vmem:[%s11491_s2 + $0xc8] sm:$0xff]  ;;  %v11918_v48 = vmov 5  }
 0x1f0   :  { %v7687_v27 = vpop.permute.xlu0 %2366  ;;  %5925 = vset.pattern.permute.xlu1 %v11899_v17  ;;  %v7690_v19 = vpop.permute.xlu1 %1386 }
 0x1f1   :  { %11898 = vst [vmem:[#allocation189_spill] sm:$0xff] %v7687_v27  ;;  %11900 = vst [vmem:[#allocation190_spill] sm:$0xff] %v7690_v19  ;;  %3203 = vperm.xlu0 %6004, %v7695_v3   ;;  %1693 = vperm.xlu1 %5925, %v7424_v57   ;;  %v7775_v19 = vld [vmem:[%s11491_s2 + $0x10] sm:$0xff] }
 0x1f4   :  { %v7699_v9 = vpop.permute.xlu0 %3096  ;;  %v7701_v23 = vpop.permute.xlu1 %1403 }
 0x1f5   :  { %11901 = vst [vmem:[#allocation191_spill] sm:$0xff] %v7699_v9  ;;  %11902 = vst [vmem:[#allocation192_spill] sm:$0xff] %v7701_v23  ;;  %3182 = vperm.xlu0 %6004, %v7024_v49   ;;  %1699 = vperm.xlu1 %5925, %v7243_v1  }
 0x1f8   :  { %v7705_v27 = vpop.permute.xlu0 %3099  ;;  %v7707_v4 = vpop.permute.xlu1 %1413 }
 0x1f9   :  { %11903 = vst [vmem:[#allocation193_spill] sm:$0xff] %v7705_v27  ;;  %11904 = vst [vmem:[#allocation194_spill] sm:$0xff] %v7707_v4  ;;  %3188 = vperm.xlu0 %6004, %v7712_v45   ;;  %1702 = vperm.xlu1 %5925, %v7436_v54  }
 0x1fc   :  { %v7716_v9 = vpop.permute.xlu0 %3105  ;;  %v7718_v8 = vpop.permute.xlu1 %1423 }
 0x1fd   :  { %11905 = vst [vmem:[#allocation195_spill] sm:$0xff] %v7716_v9  ;;  %11906 = vst [vmem:[#allocation196_spill] sm:$0xff] %v7718_v8  ;;  %3227 = vperm.xlu0 %6004, %v7051_v33   ;;  %1708 = vperm.xlu1 %5925, %v7449_v10  }
 0x200   :  { %v7722_v49 = vpop.permute.xlu0 %3139  ;;  %v7724_v27 = vpop.permute.xlu1 %1433 }
 0x201   :  { %11907 = vst [vmem:[#allocation197_spill] sm:$0xff] %v7722_v49  ;;  %11908 = vst [vmem:[#allocation198_spill] sm:$0xff] %v7724_v27  ;;  %6012 = vset.pattern.permute.xlu0 %v11899_v17  ;;  %1714 = vperm.xlu1 %5925, %v7469_v55   ;;  %v7742_v49 = vld [vmem:[%s11490_s1 + $0x20] sm:$0xff] }
 0x202   :  { %918 = vperm.xlu0 %6012, %v7731_v15  }
 0x204   :  { %v7734_v9 = vpop.permute.xlu0 %3143 }
 0x205   :  { %11909 = vst [vmem:[#allocation199_spill] sm:$0xff] %v7734_v9  ;;  %1729 = vperm.xlu1 %5925, %v7487_v53   ;;  %v7737_v33 = vpop.permute.xlu1 %1456  ;;  %v7753_v9 = vld [vmem:[%s11490_s1 + $0x30] sm:$0xff] }
 0x206   :  { %11910 = vst [vmem:[#allocation200_spill] sm:$0xff] %v7737_v33  ;;  %927 = vperm.xlu0 %6012, %v7742_v49  }
 0x208   :  { %v7745_v27 = vpop.permute.xlu0 %835 }
 0x209   :  { %11911 = vst [vmem:[#allocation201_spill] sm:$0xff] %v7745_v27  ;;  %1737 = vperm.xlu1 %5925, %v7518_v35   ;;  %v7748_v8 = vpop.permute.xlu1 %1459  ;;  %v7764_v27 = vld [vmem:[%s11491_s2] sm:$0xff] }
 0x20a   :  { %11912 = vst [vmem:[#allocation202_spill] sm:$0xff] %v7748_v8  ;;  %933 = vperm.xlu0 %6012, %v7753_v9  }
 0x20c   :  { %v7756_v33 = vpop.permute.xlu0 %844 }
 0x20d   :  { %11913 = vst [vmem:[#allocation203_spill] sm:$0xff] %v7756_v33  ;;  %1745 = vperm.xlu1 %5925, %v7552_v20   ;;  %v7759_v4 = vpop.permute.xlu1 %1465 }
 0x20e   :  { %11914 = vst [vmem:[#allocation204_spill] sm:$0xff] %v7759_v4  ;;  %947 = vperm.xlu0 %6012, %v7764_v27  }
 0x210   :  { %v7767_v8 = vpop.permute.xlu0 %850 }
 0x211   :  { %11915 = vst [vmem:[#allocation205_spill] sm:$0xff] %v7767_v8  ;;  %1753 = vperm.xlu1 %5925, %v7578_v16   ;;  %v7770_v23 = vpop.permute.xlu1 %1471  ;;  %v7786_v8 = vld [vmem:[%s11491_s2 + $0x20] sm:$0xff] }
 0x212   :  { %11916 = vst [vmem:[#allocation206_spill] sm:$0xff] %v7770_v23  ;;  %955 = vperm.xlu0 %6012, %v7775_v19   ;;  %v7792_v23 = vld [vmem:[%s11490_s1 + $0x48] sm:$0xff] }
 0x214   :  { %v7778_v4 = vpop.permute.xlu0 %856 }
 0x215   :  { %11917 = vst [vmem:[#allocation207_spill] sm:$0xff] %v7778_v4  ;;  %5926 = vset.pattern.permute.xlu1 %v11918_v48  ;;  %v7781_v33 = vpop.permute.xlu1 %1485 }
 0x216   :  { %11919 = vst [vmem:[#allocation208_spill] sm:$0xff] %v7781_v33  ;;  %963 = vperm.xlu0 %6012, %v7786_v8   ;;  %1776 = vperm.xlu1 %5926, %v7792_v23   ;;  %v7802_v33 = vld [vmem:[%s11491_s2 + $0x30] sm:$0xff] }
 0x218   :  { %v7795_v11 = vpop.permute.xlu0 %871 }
 0x219   :  { %11920 = vst [vmem:[#allocation209_spill] sm:$0xff] %v7795_v11  ;;  %v7797_v4 = vpop.permute.xlu1 %1493  ;;  %v7814_v11 = vld [vmem:[%s11490_s1 + $0x60] sm:$0xff] }
 0x21a   :  { %11921 = vst [vmem:[#allocation210_spill] sm:$0xff] %v7797_v4  ;;  %971 = vperm.xlu0 %6012, %v7802_v33   ;;  %1779 = vperm.xlu1 %5926, %v7243_v1  }
 0x21c   :  { %v7806_v7 = vpop.permute.xlu0 %879 }
 0x21d   :  { %11922 = vst [vmem:[#allocation211_spill] sm:$0xff] %v7806_v7  ;;  %v7808_v41 = vpop.permute.xlu1 %1501  ;;  %v7825_v7 = vld [vmem:[%s11490_s1 + $0x70] sm:$0xff] }
 0x21e   :  { %11923 = vst [vmem:[#allocation212_spill] sm:$0xff] %v7808_v41  ;;  %1696 = vperm.xlu0 %6012, %v7792_v23   ;;  %1785 = vperm.xlu1 %5926, %v7814_v11  }
 0x220   :  { %v7817_v4 = vpop.permute.xlu0 %887 }
 0x221   :  { %11924 = vst [vmem:[#allocation213_spill] sm:$0xff] %v7817_v4  ;;  %v7819_v63 = vpop.permute.xlu1 %1509 }
 0x222   :  { %11925 = vst [vmem:[#allocation214_spill] sm:$0xff] %v7819_v63  ;;  %1705 = vperm.xlu0 %6012, %v7814_v11   ;;  %1791 = vperm.xlu1 %5926, %v7825_v7  }
 0x224   :  { %v7828_v41 = vpop.permute.xlu0 %895 }
 0x225   :  { %11926 = vst [vmem:[#allocation215_spill] sm:$0xff] %v7828_v41 }
 0x226   :  { %1711 = vperm.xlu0 %6012, %v7825_v7   ;;  %1805 = vperm.xlu1 %5926, %v7834_v40   ;;  %v7837_v63 = vpop.permute.xlu1 %1533 }
 0x227   :  { %11927 = vst [vmem:[#allocation216_spill] sm:$0xff] %v7837_v63  ;;  %v7856_v63 = vld [vmem:[%s11491_s2 + $0x60] sm:$0xff] }
 0x228   :  { %v7839_v4 = vpop.permute.xlu0 %1613 }
 0x229   :  { %11928 = vst [vmem:[#allocation217_spill] sm:$0xff] %v7839_v4 }
 0x22a   :  { %1725 = vperm.xlu0 %6012, %v7834_v40   ;;  %1813 = vperm.xlu1 %5926, %v7845_v13   ;;  %v7848_v41 = vpop.permute.xlu1 %1539 }
 0x22b   :  { %11929 = vst [vmem:[#allocation218_spill] sm:$0xff] %v7848_v41  ;;  %v7867_v41 = vld [vmem:[%s11491_s2 + $0x70] sm:$0xff] }
 0x22c   :  { %v7850_v18 = vpop.permute.xlu0 %1622 }
 0x22d   :  { %11930 = vst [vmem:[#allocation219_spill] sm:$0xff] %v7850_v18 }
 0x22e   :  { %1733 = vperm.xlu0 %6012, %v7845_v13   ;;  %1821 = vperm.xlu1 %5926, %v7856_v63   ;;  %v7859_v4 = vpop.permute.xlu1 %1542 }
 0x22f   :  { %11931 = vst [vmem:[#allocation220_spill] sm:$0xff] %v7859_v4 }
 0x230   :  { %v7861_v56 = vpop.permute.xlu0 %1628 }
 0x231   :  { %11932 = vst [vmem:[#allocation221_spill] sm:$0xff] %v7861_v56 }
 0x232   :  { %1741 = vperm.xlu0 %6012, %v7856_v63   ;;  %1829 = vperm.xlu1 %5926, %v7867_v41   ;;  %v7870_v18 = vpop.permute.xlu1 %1548 }
 0x233   :  { %11933 = vst [vmem:[#allocation222_spill] sm:$0xff] %v7870_v18 }
 0x234   :  { %v7872_v61 = vpop.permute.xlu0 %1634 }
 0x235   :  { %11934 = vst [vmem:[#allocation223_spill] sm:$0xff] %v7872_v61  ;;  %v7890_v61 = vld [vmem:[%s11491_s2 + $0x88] sm:$0xff] }
 0x236   :  { %1749 = vperm.xlu0 %6012, %v7867_v41   ;;  %5927 = vset.pattern.permute.xlu1 %v11935_v31  ;;  %v7876_v4 = vpop.permute.xlu1 %1554 }
 0x237   :  { %11936 = vst [vmem:[#allocation224_spill] sm:$0xff] %v7876_v4  ;;  %1853 = vperm.xlu1 %5927, %v7424_v57  }
 0x238   :  { %v7879_v56 = vpop.permute.xlu0 %1649 }
 0x239   :  { %11937 = vst [vmem:[#allocation225_spill] sm:$0xff] %v7879_v56  ;;  %v7899_v56 = vld [vmem:[%s11491_s2 + $0x90] sm:$0xff] }
 0x23a   :  { %2476 = vperm.xlu0 %6012, %v7622_v37   ;;  %v7882_v14 = vpop.permute.xlu1 %1569 }
 0x23b   :  { %11938 = vst [vmem:[#allocation226_spill] sm:$0xff] %v7882_v14  ;;  %1859 = vperm.xlu1 %5927, %v7243_v1  }
 0x23c   :  { %v7885_v29 = vpop.permute.xlu0 %1657 }
 0x23d   :  { %11939 = vst [vmem:[#allocation227_spill] sm:$0xff] %v7885_v29 }
 0x23e   :  { %2506 = vperm.xlu0 %6012, %v7890_v61   ;;  %v7893_v4 = vpop.permute.xlu1 %1577 }
 0x23f   :  { %11940 = vst [vmem:[#allocation228_spill] sm:$0xff] %v7893_v4  ;;  %1862 = vperm.xlu1 %5927, %v7436_v54  }
 0x240   :  { %v7901_v18 = vpop.permute.xlu0 %1665 }
 0x241   :  { %11941 = vst [vmem:[#allocation229_spill] sm:$0xff] %v7901_v18 }
 0x242   :  { %2510 = vperm.xlu0 %6012, %v7899_v56   ;;  %v7904_v29 = vpop.permute.xlu1 %1585 }
 0x243   :  { %11942 = vst [vmem:[#allocation230_spill] sm:$0xff] %v7904_v29  ;;  %1868 = vperm.xlu1 %5927, %v7449_v10  }
 0x244   :  { %v7907_v14 = vpop.permute.xlu0 %1673 }
 0x245   :  { %11943 = vst [vmem:[#allocation231_spill] sm:$0xff] %v7907_v14 }
 0x246   :  { %2491 = vperm.xlu0 %6012, %v7656_v2   ;;  %v7910_v4 = vpop.permute.xlu1 %1593 }
 0x247   :  { %11944 = vst [vmem:[#allocation232_spill] sm:$0xff] %v7910_v4  ;;  %1874 = vperm.xlu1 %5927, %v7469_v55  }
 0x248   :  { %v7913_v44 = vpop.permute.xlu0 %2393 }
 0x249   :  { %11945 = vst [vmem:[#allocation233_spill] sm:$0xff] %v7913_v44 }
 0x24a   :  { %2526 = vperm.xlu0 %6012, %v7276_v62  }
 0x24b   :  { %1889 = vperm.xlu1 %5927, %v7487_v53   ;;  %v7917_v18 = vpop.permute.xlu1 %1616 }
 0x24c   :  { %11946 = vst [vmem:[#allocation234_spill] sm:$0xff] %v7917_v18  ;;  %v7919_v50 = vpop.permute.xlu0 %2396 }
 0x24d   :  { %11947 = vst [vmem:[#allocation235_spill] sm:$0xff] %v7919_v50 }
 0x24e   :  { %3247 = vperm.xlu0 %6012, %v7668_v38  }
 0x24f   :  { %1897 = vperm.xlu1 %5927, %v7518_v35   ;;  %v7923_v14 = vpop.permute.xlu1 %1619 }
 0x250   :  { %11948 = vst [vmem:[#allocation236_spill] sm:$0xff] %v7923_v14  ;;  %v7925_v29 = vpop.permute.xlu0 %2422  ;;  %v11954_v14 = vmov 7  }
 0x251   :  { %11949 = vst [vmem:[#allocation237_spill] sm:$0xff] %v7925_v29 }
 0x252   :  { %3256 = vperm.xlu0 %6012, %v6994_v21  }
 0x253   :  { %1905 = vperm.xlu1 %5927, %v7552_v20   ;;  %v7929_v44 = vpop.permute.xlu1 %1625 }
 0x254   :  { %11950 = vst [vmem:[#allocation238_spill] sm:$0xff] %v7929_v44  ;;  %v7931_v62 = vpop.permute.xlu0 %2434 }
 0x255   :  { %11951 = vst [vmem:[#allocation239_spill] sm:$0xff] %v7931_v62 }
 0x256   :  { %3283 = vperm.xlu0 %6012, %v7695_v3  }
 0x257   :  { %1913 = vperm.xlu1 %5927, %v7578_v16   ;;  %v7935_v50 = vpop.permute.xlu1 %1631 }
 0x258   :  { %11952 = vst [vmem:[#allocation240_spill] sm:$0xff] %v7935_v50  ;;  %v7937_v38 = vpop.permute.xlu0 %2405  ;;  %v12126_v50 = vld [vmem:[#allocation12_spill] sm:$0xff] }
 0x259   :  { %11953 = vst [vmem:[#allocation241_spill] sm:$0xff] %v7937_v38 }
 0x25a   :  { %3287 = vperm.xlu0 %6012, %v7009_v47  }
 0x25b   :  { %5928 = vset.pattern.permute.xlu1 %v11954_v14  ;;  %v7941_v29 = vpop.permute.xlu1 %1645 }
 0x25c   :  { %11955 = vst [vmem:[#allocation242_spill] sm:$0xff] %v7941_v29  ;;  %1936 = vperm.xlu1 %5928, %v7792_v23   ;;  %v7944_v21 = vpop.permute.xlu0 %2411 }
 0x25d   :  { %11956 = vst [vmem:[#allocation243_spill] sm:$0xff] %v7944_v21 }
 0x25e   :  { %3268 = vperm.xlu0 %6012, %v7712_v45  }
 0x25f   :  { %v7947_v62 = vpop.permute.xlu1 %1653 }
 0x260   :  { %11957 = vst [vmem:[#allocation244_spill] sm:$0xff] %v7947_v62  ;;  %1939 = vperm.xlu1 %5928, %v7243_v1   ;;  %v7950_v44 = vpop.permute.xlu0 %2450  ;;  %v12132_v62 = vld [vmem:[#allocation32_spill] sm:$0xff] }
 0x261   :  { %11958 = vst [vmem:[#allocation245_spill] sm:$0xff] %v7950_v44 }
 0x262   :  { %3303 = vperm.xlu0 %6012, %v7323_v30  }
 0x263   :  { %v7953_v38 = vpop.permute.xlu1 %1661 }
 0x264   :  { %11959 = vst [vmem:[#allocation246_spill] sm:$0xff] %v7953_v38  ;;  %1945 = vperm.xlu1 %5928, %v7814_v11   ;;  %v7956_v47 = vpop.permute.xlu0 %3167  ;;  %v12125_v38 = vld [vmem:[#allocation39_spill] sm:$0xff] }
 0x265   :  { %11960 = vst [vmem:[#allocation247_spill] sm:$0xff] %v7956_v47 }
 0x266   :  { %6016 = vset.pattern.permute.xlu0 %v11918_v48 }
 0x267   :  { %995 = vperm.xlu0 %6016, %v7336_v60   ;;  %v7960_v21 = vpop.permute.xlu1 %1669 }
 0x268   :  { %11961 = vst [vmem:[#allocation248_spill] sm:$0xff] %v7960_v21  ;;  %1951 = vperm.xlu1 %5928, %v7825_v7   ;;  %v7963_v29 = vpop.permute.xlu0 %3173 }
 0x269   :  { %11962 = vst [vmem:[#allocation249_spill] sm:$0xff] %v7963_v29 }
 0x26b   :  { %1004 = vperm.xlu0 %6016, %v7347_v12  }
 0x26c   :  { %1965 = vperm.xlu1 %5928, %v7834_v40   ;;  %v7967_v1 = vpop.permute.xlu1 %1693  ;;  %v7969_v30 = vpop.permute.xlu0 %3203 }
 0x26d   :  { %11963 = vst [vmem:[#allocation250_spill] sm:$0xff] %v7967_v1  ;;  %11964 = vst [vmem:[#allocation251_spill] sm:$0xff] %v7969_v30 }
 0x26f   :  { %1010 = vperm.xlu0 %6016, %v7358_v28  }
 0x270   :  { %1973 = vperm.xlu1 %5928, %v7845_v13   ;;  %v7973_v47 = vpop.permute.xlu1 %1699  ;;  %v7975_v60 = vpop.permute.xlu0 %3182 }
 0x271   :  { %11965 = vst [vmem:[#allocation252_spill] sm:$0xff] %v7973_v47  ;;  %11966 = vst [vmem:[#allocation253_spill] sm:$0xff] %v7975_v60 }
 0x273   :  { %1016 = vperm.xlu0 %6016, %v7369_v22  }
 0x274   :  { %5929 = vset.pattern.permute.xlu1 %v11795_v51  ;;  %v7979_v29 = vpop.permute.xlu1 %1702  ;;  %v7981_v12 = vpop.permute.xlu0 %3188 }
 0x275   :  { %11967 = vst [vmem:[#allocation254_spill] sm:$0xff] %v7979_v29  ;;  %11968 = vst [vmem:[#allocation255_spill] sm:$0xff] %v7981_v12  ;;  %2142 = vperm.xlu1 %5929, %v7203_v52   ;;  %v7999_v12 = vld [vmem:[%s11490_s1 + $0x88] sm:$0xff] }
 0x277   :  { %1031 = vperm.xlu0 %6016, %v7380_v24  }
 0x278   :  { %v7985_v30 = vpop.permute.xlu1 %1708  ;;  %v7987_v28 = vpop.permute.xlu0 %3227 }
 0x279   :  { %11969 = vst [vmem:[#allocation256_spill] sm:$0xff] %v7985_v30  ;;  %11970 = vst [vmem:[#allocation257_spill] sm:$0xff] %v7987_v28  ;;  %5930 = vset.pattern.permute.xlu1 %v11818_v26 }
 0x27a   :  { %2230 = vperm.xlu1 %5930, %v7203_v52  }
 0x27b   :  { %1039 = vperm.xlu0 %6016, %v7391_v43  }
 0x27c   :  { %v7992_v22 = vpop.permute.xlu1 %1714 }
 0x27d   :  { %11971 = vst [vmem:[#allocation258_spill] sm:$0xff] %v7992_v22  ;;  %v7994_v60 = vpop.permute.xlu0 %918 }
 0x27e   :  { %2233 = vperm.xlu1 %5930, %v7999_v12  }
 0x27f   :  { %1047 = vperm.xlu0 %6016, %v7402_v6  }
 0x280   :  { %v8003_v24 = vpop.permute.xlu1 %1729 }
 0x281   :  { %11972 = vst [vmem:[#allocation259_spill] sm:$0xff] %v8003_v24  ;;  %v8005_v28 = vpop.permute.xlu0 %927 }
 0x282   :  { %11973 = vst [vmem:[#allocation260_spill] sm:$0xff] %v8005_v28  ;;  %5931 = vset.pattern.permute.xlu1 %v11795_v51  ;;  %v12210_v28 = vld [vmem:[#allocation95_spill] sm:$0xff] }
 0x283   :  { %1055 = vperm.xlu0 %6016, %v7413_v59   ;;  %2151 = vperm.xlu1 %5931, %v7214_v58  }
 0x284   :  { %v8010_v43 = vpop.permute.xlu1 %1737 }
 0x285   :  { %11974 = vst [vmem:[#allocation261_spill] sm:$0xff] %v8010_v43  ;;  %v8012_v44 = vpop.permute.xlu0 %933 }
 0x286   :  { %11975 = vst [vmem:[#allocation262_spill] sm:$0xff] %v8012_v44  ;;  %v12197_v44 = vld [vmem:[#allocation87_spill] sm:$0xff] }
 0x287   :  { %1773 = vperm.xlu0 %6016, %v7424_v57   ;;  %2180 = vperm.xlu1 %5931, %v7890_v61   ;;  %v8031_v57 = vld [vmem:[%s11491_s2 + $0x80] sm:$0xff] }
 0x288   :  { %v8016_v1 = vpop.permute.xlu1 %1745 }
 0x289   :  { %11976 = vst [vmem:[#allocation263_spill] sm:$0xff] %v8016_v1  ;;  %v8018_v6 = vpop.permute.xlu0 %947 }
 0x28a   :  { %11977 = vst [vmem:[#allocation264_spill] sm:$0xff] %v8018_v6 }
 0x28b   :  { %1782 = vperm.xlu0 %6016, %v7436_v54   ;;  %5932 = vset.pattern.permute.xlu1 %v11818_v26 }
 0x28c   :  { %2239 = vperm.xlu1 %5932, %v7214_v58   ;;  %v8023_v59 = vpop.permute.xlu1 %1753 }
 0x28d   :  { %11978 = vst [vmem:[#allocation265_spill] sm:$0xff] %v8023_v59  ;;  %v8025_v24 = vpop.permute.xlu0 %955 }
 0x28e   :  { %11979 = vst [vmem:[#allocation266_spill] sm:$0xff] %v8025_v24 }
 0x28f   :  { %1788 = vperm.xlu0 %6016, %v7449_v10  }
 0x290   :  { %2262 = vperm.xlu1 %5932, %v8031_v57  }
 0x291   :  { %v8034_v1 = vpop.permute.xlu0 %963  ;;  %v8036_v54 = vpop.permute.xlu1 %1776 }
 0x292   :  { %11980 = vst [vmem:[#allocation267_spill] sm:$0xff] %v8034_v1  ;;  %11981 = vst [vmem:[#allocation268_spill] sm:$0xff] %v8036_v54  ;;  %v12195_v1 = vld [vmem:[#allocation125_spill] sm:$0xff] }
 0x293   :  { %1794 = vperm.xlu0 %6016, %v7469_v55  }
 0x294   :  { %5933 = vset.pattern.permute.xlu1 %v11795_v51 }
 0x295   :  { %v8040_v59 = vpop.permute.xlu0 %971  ;;  %2185 = vperm.xlu1 %5933, %v7899_v56   ;;  %v8043_v10 = vpop.permute.xlu1 %1779 }
 0x296   :  { %11982 = vst [vmem:[#allocation269_spill] sm:$0xff] %v8040_v59  ;;  %11983 = vst [vmem:[#allocation270_spill] sm:$0xff] %v8043_v10  ;;  %v8060_v10 = vld [vmem:[%s11491_s2 + $0x98] sm:$0xff]  ;;  %v12182_v59 = vld [vmem:[#allocation80_spill] sm:$0xff] }
 0x297   :  { %1809 = vperm.xlu0 %6016, %v7487_v53  }
 0x299   :  { %v8046_v43 = vpop.permute.xlu0 %1696  ;;  %5934 = vset.pattern.permute.xlu1 %v11818_v26  ;;  %v8049_v22 = vpop.permute.xlu1 %1785 }
 0x29a   :  { %11984 = vst [vmem:[#allocation271_spill] sm:$0xff] %v8046_v43  ;;  %11985 = vst [vmem:[#allocation272_spill] sm:$0xff] %v8049_v22  ;;  %2270 = vperm.xlu1 %5934, %v7899_v56  }
 0x29b   :  { %1817 = vperm.xlu0 %6016, %v7518_v35  }
 0x29d   :  { %v8053_v55 = vpop.permute.xlu0 %1705  ;;  %v8055_v54 = vpop.permute.xlu1 %1791 }
 0x29e   :  { %11986 = vst [vmem:[#allocation273_spill] sm:$0xff] %v8053_v55  ;;  %11987 = vst [vmem:[#allocation274_spill] sm:$0xff] %v8055_v54  ;;  %2274 = vperm.xlu1 %5934, %v8060_v10  }
 0x29f   :  { %1825 = vperm.xlu0 %6016, %v7552_v20  }
 0x2a1   :  { %v8064_v43 = vpop.permute.xlu0 %1711  ;;  %v8066_v22 = vpop.permute.xlu1 %1805 }
 0x2a2   :  { %11988 = vst [vmem:[#allocation275_spill] sm:$0xff] %v8064_v43  ;;  %11989 = vst [vmem:[#allocation276_spill] sm:$0xff] %v8066_v22  ;;  %5935 = vset.pattern.permute.xlu1 %v11756_v34 }
 0x2a3   :  { %1833 = vperm.xlu0 %6016, %v7578_v16   ;;  %2313 = vperm.xlu1 %5935, %v7999_v12  }
 0x2a5   :  { %v8071_v54 = vpop.permute.xlu0 %1725  ;;  %v8073_v30 = vpop.permute.xlu1 %1813 }
 0x2a6   :  { %11990 = vst [vmem:[#allocation277_spill] sm:$0xff] %v8071_v54  ;;  %11991 = vst [vmem:[#allocation278_spill] sm:$0xff] %v8073_v30 }
 0x2a7   :  { %2553 = vperm.xlu0 %6016, %v7999_v12   ;;  %2316 = vperm.xlu1 %5935, %v7622_v37  }
 0x2a9   :  { %v8077_v29 = vpop.permute.xlu0 %1733  ;;  %v8079_v47 = vpop.permute.xlu1 %1821 }
 0x2aa   :  { %11992 = vst [vmem:[#allocation279_spill] sm:$0xff] %v8077_v29  ;;  %11993 = vst [vmem:[#allocation280_spill] sm:$0xff] %v8079_v47 }
 0x2ab   :  { %2556 = vperm.xlu0 %6016, %v7622_v37   ;;  %2342 = vperm.xlu1 %5935, %v8031_v57  }
 0x2ad   :  { %v8083_v22 = vpop.permute.xlu0 %1741  ;;  %v8085_v43 = vpop.permute.xlu1 %1829 }
 0x2ae   :  { %11994 = vst [vmem:[#allocation281_spill] sm:$0xff] %v8083_v22  ;;  %11995 = vst [vmem:[#allocation282_spill] sm:$0xff] %v8085_v43 }
 0x2af   :  { %2586 = vperm.xlu0 %6016, %v7890_v61   ;;  %2350 = vperm.xlu1 %5935, %v7899_v56  }
 0x2b1   :  { %v8089_v30 = vpop.permute.xlu0 %1749 }
 0x2b2   :  { %11996 = vst [vmem:[#allocation283_spill] sm:$0xff] %v8089_v30  ;;  %v8091_v54 = vpop.permute.xlu1 %1853 }
 0x2b3   :  { %11997 = vst [vmem:[#allocation284_spill] sm:$0xff] %v8091_v54  ;;  %2594 = vperm.xlu0 %6016, %v8060_v10   ;;  %5936 = vset.pattern.permute.xlu1 %v11821_v32  ;;  %v12002_v54 = vld [vmem:[#allocation94_spill] sm:$0xff] }
 0x2b4   :  { %2390 = vperm.xlu1 %5936, %v7203_v52  }
 0x2b5   :  { %v8096_v47 = vpop.permute.xlu0 %2476 }
 0x2b6   :  { %11998 = vst [vmem:[#allocation285_spill] sm:$0xff] %v8096_v47  ;;  %v8098_v29 = vpop.permute.xlu1 %1859  ;;  %v12005_v47 = vld [vmem:[#allocation97_spill] sm:$0xff] }
 0x2b7   :  { %11999 = vst [vmem:[#allocation286_spill] sm:$0xff] %v8098_v29  ;;  %2562 = vperm.xlu0 %6016, %v7238_v36  }
 0x2b8   :  { %5937 = vset.pattern.permute.xlu1 %v11954_v14 }
 0x2b9   :  { %1981 = vperm.xlu1 %5937, %v7856_v63   ;;  %v8103_v43 = vpop.permute.xlu0 %2506 }
 0x2ba   :  { %12000 = vst [vmem:[#allocation287_spill] sm:$0xff] %v8103_v43  ;;  %v8105_v30 = vpop.permute.xlu1 %1862  ;;  %v8123_v43 = vld [vmem:[%s11491_s2 + $0xb8] sm:$0xff] }
 0x2bb   :  { %12001 = vst [vmem:[#allocation288_spill] sm:$0xff] %v8105_v30  ;;  %2568 = vperm.xlu0 %6016, %v12002_v54  }
 0x2bd   :  { %1985 = vperm.xlu1 %5937, %v7552_v20   ;;  %v8109_v22 = vpop.permute.xlu0 %2510 }
 0x2be   :  { %12003 = vst [vmem:[#allocation94_spill] sm:$0xff] %v8109_v22  ;;  %v8111_v55 = vpop.permute.xlu1 %1868 }
 0x2bf   :  { %12004 = vst [vmem:[#allocation289_spill] sm:$0xff] %v8111_v55  ;;  %2602 = vperm.xlu0 %6016, %v12005_v47  }
 0x2c1   :  { %5938 = vset.pattern.permute.xlu1 %v11821_v32  ;;  %v8115_v29 = vpop.permute.xlu0 %2491 }
 0x2c2   :  { %12006 = vst [vmem:[#allocation97_spill] sm:$0xff] %v8115_v29  ;;  %2399 = vperm.xlu1 %5938, %v7214_v58   ;;  %v8118_v21 = vpop.permute.xlu1 %1874  ;;  %v8134_v29 = vld [vmem:[%s11490_s1 + $0xc8] sm:$0xff] }
 0x2c3   :  { %12007 = vst [vmem:[#allocation290_spill] sm:$0xff] %v8118_v21  ;;  %2610 = vperm.xlu0 %6016, %v8123_v43  }
 0x2c5   :  { %v8126_v20 = vpop.permute.xlu0 %2526 }
 0x2c6   :  { %12008 = vst [vmem:[#allocation291_spill] sm:$0xff] %v8126_v20  ;;  %2426 = vperm.xlu1 %5938, %v7890_v61   ;;  %v8129_v22 = vpop.permute.xlu1 %1889 }
 0x2c7   :  { %12009 = vst [vmem:[#allocation292_spill] sm:$0xff] %v8129_v22  ;;  %3330 = vperm.xlu0 %6016, %v8134_v29  }
 0x2c9   :  { %v8137_v21 = vpop.permute.xlu0 %3247 }
 0x2ca   :  { %12010 = vst [vmem:[#allocation293_spill] sm:$0xff] %v8137_v21  ;;  %5939 = vset.pattern.permute.xlu1 %v11954_v14  ;;  %v8140_v55 = vpop.permute.xlu1 %1897 }
 0x2cb   :  { %12011 = vst [vmem:[#allocation294_spill] sm:$0xff] %v8140_v55  ;;  %3333 = vperm.xlu0 %6016, %v7684_v39   ;;  %1993 = vperm.xlu1 %5939, %v7578_v16   ;;  %v6232_v39 = vld [vmem:[%s11491_s2 + $0xd8] sm:$0xff] }
 0x2cd   :  { %v8144_v20 = vpop.permute.xlu0 %3256 }
 0x2ce   :  { %12012 = vst [vmem:[#allocation295_spill] sm:$0xff] %v8144_v20  ;;  %v8146_v22 = vpop.permute.xlu1 %1905 }
 0x2cf   :  { %12013 = vst [vmem:[#allocation296_spill] sm:$0xff] %v8146_v22  ;;  %3363 = vperm.xlu0 %6016, %v7695_v3   ;;  %5940 = vset.pattern.permute.xlu1 %v11821_v32  ;;  %v12017_v3 = vld [vmem:[#allocation104_spill] sm:$0xff]  ;;  %v12022_v22 = vld [vmem:[#allocation109_spill] sm:$0xff] }
 0x2d0   :  { %2430 = vperm.xlu1 %5940, %v7899_v56  }
 0x2d1   :  { %v8151_v30 = vpop.permute.xlu0 %3283 }
 0x2d2   :  { %12014 = vst [vmem:[#allocation297_spill] sm:$0xff] %v8151_v30  ;;  %v8153_v21 = vpop.permute.xlu1 %1913 }
 0x2d3   :  { %12015 = vst [vmem:[#allocation298_spill] sm:$0xff] %v8153_v21  ;;  %3371 = vperm.xlu0 %6016, %v6232_v39  }
 0x2d4   :  { %5941 = vset.pattern.permute.xlu1 %v11899_v17 }
 0x2d5   :  { %2470 = vperm.xlu1 %5941, %v7203_v52   ;;  %v8160_v16 = vpop.permute.xlu0 %3287 }
 0x2d6   :  { %12016 = vst [vmem:[#allocation299_spill] sm:$0xff] %v8160_v16 }
 0x2d7   :  { %3339 = vperm.xlu0 %6016, %v12017_v3   ;;  %v8163_v20 = vpop.permute.xlu1 %1936 }
 0x2d8   :  { %12018 = vst [vmem:[#allocation104_spill] sm:$0xff] %v8163_v20 }
 0x2d9   :  { %2473 = vperm.xlu1 %5941, %v7999_v12   ;;  %v8166_v30 = vpop.permute.xlu0 %3268 }
 0x2da   :  { %12019 = vst [vmem:[#allocation300_spill] sm:$0xff] %v8166_v30  ;;  %v8183_v30 = vld [vmem:[%s11491_s2 + $0xf8] sm:$0xff] }
 0x2db   :  { %3348 = vperm.xlu0 %6016, %v7712_v45   ;;  %v8169_v21 = vpop.permute.xlu1 %1939 }
 0x2dc   :  { %12020 = vst [vmem:[#allocation301_spill] sm:$0xff] %v8169_v21 }
 0x2dd   :  { %2479 = vperm.xlu1 %5941, %v7214_v58   ;;  %v8172_v39 = vpop.permute.xlu0 %3303 }
 0x2de   :  { %12021 = vst [vmem:[#allocation302_spill] sm:$0xff] %v8172_v39 }
 0x2df   :  { %3379 = vperm.xlu0 %6016, %v12022_v22   ;;  %v8175_v55 = vpop.permute.xlu1 %1945 }
 0x2e0   :  { %12023 = vst [vmem:[#allocation109_spill] sm:$0xff] %v8175_v55  ;;  %v8208_v55 = vld [vmem:[%s11490_s1 + $0xa8] sm:$0xff] }
 0x2e1   :  { %2502 = vperm.xlu1 %5941, %v8031_v57  }
 0x2e2   :  { %v8178_v3 = vpop.permute.xlu0 %995 }
 0x2e3   :  { %12024 = vst [vmem:[#allocation303_spill] sm:$0xff] %v8178_v3  ;;  %3387 = vperm.xlu0 %6016, %v8183_v30   ;;  %v8186_v45 = vpop.permute.xlu1 %1951  ;;  %v12212_v3 = vld [vmem:[#allocation53_spill] sm:$0xff] }
 0x2e4   :  { %12025 = vst [vmem:[#allocation304_spill] sm:$0xff] %v8186_v45 }
 0x2e5   :  { %5942 = vset.pattern.permute.xlu1 %v11795_v51 }
 0x2e6   :  { %v8189_v58 = vpop.permute.xlu0 %1004  ;;  %2154 = vperm.xlu1 %5942, %v7238_v36  }
 0x2e7   :  { %12026 = vst [vmem:[#allocation305_spill] sm:$0xff] %v8189_v58  ;;  %6018 = vset.pattern.permute.xlu0 %v11935_v31  ;;  %v8193_v22 = vpop.permute.xlu1 %1965 }
 0x2e8   :  { %12027 = vst [vmem:[#allocation306_spill] sm:$0xff] %v8193_v22  ;;  %1078 = vperm.xlu0 %6018, %v7731_v15  }
 0x2ea   :  { %v8196_v39 = vpop.permute.xlu0 %1010  ;;  %5943 = vset.pattern.permute.xlu1 %v11818_v26 }
 0x2eb   :  { %12028 = vst [vmem:[#allocation307_spill] sm:$0xff] %v8196_v39  ;;  %2242 = vperm.xlu1 %5943, %v7238_v36   ;;  %v8200_v16 = vpop.permute.xlu1 %1973 }
 0x2ec   :  { %12029 = vst [vmem:[#allocation308_spill] sm:$0xff] %v8200_v16  ;;  %1087 = vperm.xlu0 %6018, %v7742_v49  }
 0x2ee   :  { %v8203_v45 = vpop.permute.xlu0 %1016 }
 0x2ef   :  { %12030 = vst [vmem:[#allocation309_spill] sm:$0xff] %v8203_v45  ;;  %2245 = vperm.xlu1 %5943, %v8208_v55  }
 0x2f0   :  { %1093 = vperm.xlu0 %6018, %v7753_v9   ;;  %v8212_v15 = vpop.permute.xlu1 %2142 }
 0x2f1   :  { %12031 = vst [vmem:[#allocation310_spill] sm:$0xff] %v8212_v15  ;;  %v12120_v15 = vld [vmem:[#allocation26_spill] sm:$0xff] }
 0x2f2   :  { %v8214_v22 = vpop.permute.xlu0 %1031 }
 0x2f3   :  { %12032 = vst [vmem:[#allocation311_spill] sm:$0xff] %v8214_v22  ;;  %5944 = vset.pattern.permute.xlu1 %v11899_v17 }
 0x2f4   :  { %1107 = vperm.xlu0 %6018, %v7764_v27   ;;  %2514 = vperm.xlu1 %5944, %v8060_v10  }
 0x2f5   :  { %v8219_v36 = vpop.permute.xlu1 %2230 }
 0x2f6   :  { %12033 = vst [vmem:[#allocation312_spill] sm:$0xff] %v8219_v36  ;;  %v8221_v49 = vpop.permute.xlu0 %1039 }
 0x2f7   :  { %12034 = vst [vmem:[#allocation313_spill] sm:$0xff] %v8221_v49 }
 0x2f8   :  { %1115 = vperm.xlu0 %6018, %v7775_v19   ;;  %5945 = vset.pattern.permute.xlu1 %v11918_v48 }
 0x2f9   :  { %2550 = vperm.xlu1 %5945, %v7203_v52   ;;  %v8226_v9 = vpop.permute.xlu1 %2233 }
 0x2fa   :  { %12035 = vst [vmem:[#allocation314_spill] sm:$0xff] %v8226_v9  ;;  %v8228_v16 = vpop.permute.xlu0 %1047 }
 0x2fb   :  { %12036 = vst [vmem:[#allocation315_spill] sm:$0xff] %v8228_v16  ;;  %v12155_v16 = vld [vmem:[#allocation65_spill] sm:$0xff] }
 0x2fc   :  { %1123 = vperm.xlu0 %6018, %v7786_v8  }
 0x2fd   :  { %5946 = vset.pattern.permute.xlu1 %v11795_v51 }
 0x2fe   :  { %v8232_v27 = vpop.permute.xlu0 %1055  ;;  %2160 = vperm.xlu1 %5946, %v12002_v54   ;;  %v8235_v36 = vpop.permute.xlu1 %2151 }
 0x2ff   :  { %12037 = vst [vmem:[#allocation316_spill] sm:$0xff] %v8232_v27  ;;  %12038 = vst [vmem:[#allocation317_spill] sm:$0xff] %v8235_v36 }
 0x300   :  { %1131 = vperm.xlu0 %6018, %v7802_v33  }
 0x302   :  { %v8238_v19 = vpop.permute.xlu0 %1773  ;;  %2163 = vperm.xlu1 %5946, %v7656_v2   ;;  %v8241_v52 = vpop.permute.xlu1 %2180 }
 0x303   :  { %12039 = vst [vmem:[#allocation318_spill] sm:$0xff] %v8238_v19  ;;  %12040 = vst [vmem:[#allocation319_spill] sm:$0xff] %v8241_v52 }
 0x304   :  { %1856 = vperm.xlu0 %6018, %v7792_v23   ;;  %v8262_v23 = vld [vmem:[%s11491_s2 + $0xa0] sm:$0xff] }
 0x306   :  { %v8244_v9 = vpop.permute.xlu0 %1782  ;;  %2200 = vperm.xlu1 %5946, %v12005_v47  }
 0x307   :  { %12041 = vst [vmem:[#allocation320_spill] sm:$0xff] %v8244_v9  ;;  %v8247_v8 = vpop.permute.xlu1 %2239 }
 0x308   :  { %12042 = vst [vmem:[#allocation321_spill] sm:$0xff] %v8247_v8  ;;  %1865 = vperm.xlu0 %6018, %v7814_v11  }
 0x30a   :  { %v8250_v20 = vpop.permute.xlu0 %1788  ;;  %5947 = vset.pattern.permute.xlu1 %v11818_v26 }
 0x30b   :  { %12043 = vst [vmem:[#allocation322_spill] sm:$0xff] %v8250_v20  ;;  %2248 = vperm.xlu1 %5947, %v12002_v54   ;;  %v8254_v33 = vpop.permute.xlu1 %2262 }
 0x30c   :  { %12044 = vst [vmem:[#allocation323_spill] sm:$0xff] %v8254_v33  ;;  %1871 = vperm.xlu0 %6018, %v7825_v7  }
 0x30e   :  { %v8257_v36 = vpop.permute.xlu0 %1794 }
 0x30f   :  { %12045 = vst [vmem:[#allocation324_spill] sm:$0xff] %v8257_v36  ;;  %2278 = vperm.xlu1 %5947, %v8262_v23  }
 0x310   :  { %1885 = vperm.xlu0 %6018, %v7834_v40   ;;  %v8266_v11 = vpop.permute.xlu1 %2185  ;;  %v8281_v40 = vld [vmem:[%s11490_s1 + $0x98] sm:$0xff] }
 0x311   :  { %12046 = vst [vmem:[#allocation325_spill] sm:$0xff] %v8266_v11 }
 0x312   :  { %v8268_v8 = vpop.permute.xlu0 %1809 }
 0x313   :  { %12047 = vst [vmem:[#allocation326_spill] sm:$0xff] %v8268_v8  ;;  %2282 = vperm.xlu1 %5947, %v12005_v47   ;;  %v8362_v8 = vld [vmem:[%s11490_s1 + $0x80] sm:$0xff] }
 0x314   :  { %1893 = vperm.xlu0 %6018, %v7845_v13  }
 0x315   :  { %v8272_v7 = vpop.permute.xlu1 %2270 }
 0x316   :  { %12048 = vst [vmem:[#allocation327_spill] sm:$0xff] %v8272_v7  ;;  %v8274_v54 = vpop.permute.xlu0 %1817 }
 0x317   :  { %12049 = vst [vmem:[#allocation328_spill] sm:$0xff] %v8274_v54  ;;  %5948 = vset.pattern.permute.xlu1 %v11918_v48  ;;  %v8339_v54 = vld [vmem:[%s11490_s1 + $0xd8] sm:$0xff] }
 0x318   :  { %1901 = vperm.xlu0 %6018, %v7856_v63   ;;  %2559 = vperm.xlu1 %5948, %v8281_v40   ;;  %v8299_v63 = vld [vmem:[%s11491_s2 + $0xb0] sm:$0xff]  ;;  %12062 = vst [vmem:[#allocation341_spill] sm:$0xff] %v8339_v54 }
 0x319   :  { %v8284_v11 = vpop.permute.xlu1 %2274 }
 0x31a   :  { %12050 = vst [vmem:[#allocation329_spill] sm:$0xff] %v8284_v11  ;;  %v8286_v47 = vpop.permute.xlu0 %1825 }
 0x31b   :  { %12051 = vst [vmem:[#allocation330_spill] sm:$0xff] %v8286_v47  ;;  %v6242_v47 = vld [vmem:[%s11491_s2 + $0xe0] sm:$0xff] }
 0x31c   :  { %1909 = vperm.xlu0 %6018, %v7867_v41   ;;  %2582 = vperm.xlu1 %5948, %v8031_v57  }
 0x31e   :  { %v8290_v13 = vpop.permute.xlu0 %1833  ;;  %v8292_v7 = vpop.permute.xlu1 %2313 }
 0x31f   :  { %12052 = vst [vmem:[#allocation331_spill] sm:$0xff] %v8290_v13  ;;  %12053 = vst [vmem:[#allocation332_spill] sm:$0xff] %v8292_v7  ;;  %v8309_v13 = vld [vmem:[%s11490_s1 + $0xb0] sm:$0xff] }
 0x320   :  { %2639 = vperm.xlu0 %6018, %v8281_v40   ;;  %5949 = vset.pattern.permute.xlu1 %v11795_v51 }
 0x321   :  { %2205 = vperm.xlu1 %5949, %v8299_v63  }
 0x322   :  { %v8302_v11 = vpop.permute.xlu1 %2316  ;;  %v8304_v33 = vpop.permute.xlu0 %2553 }
 0x323   :  { %12054 = vst [vmem:[#allocation333_spill] sm:$0xff] %v8302_v11  ;;  %12055 = vst [vmem:[#allocation334_spill] sm:$0xff] %v8304_v33  ;;  %v8321_v11 = vld [vmem:[%s11491_s2 + $0xa8] sm:$0xff] }
 0x324   :  { %2648 = vperm.xlu0 %6018, %v8309_v13  }
 0x325   :  { %5950 = vset.pattern.permute.xlu1 %v11818_v26 }
 0x326   :  { %2286 = vperm.xlu1 %5950, %v8299_v63   ;;  %v8314_v7 = vpop.permute.xlu1 %2342  ;;  %v8316_v52 = vpop.permute.xlu0 %2556 }
 0x327   :  { %12056 = vst [vmem:[#allocation335_spill] sm:$0xff] %v8314_v7  ;;  %12057 = vst [vmem:[#allocation336_spill] sm:$0xff] %v8316_v52 }
 0x328   :  { %2682 = vperm.xlu0 %6018, %v8321_v11  }
 0x32a   :  { %2290 = vperm.xlu1 %5950, %v8123_v43   ;;  %v8325_v33 = vpop.permute.xlu1 %2350  ;;  %v8327_v36 = vpop.permute.xlu0 %2586 }
 0x32b   :  { %12058 = vst [vmem:[#allocation337_spill] sm:$0xff] %v8325_v33  ;;  %12059 = vst [vmem:[#allocation338_spill] sm:$0xff] %v8327_v36  ;;  %v6241_v36 = vld [vmem:[%s11490_s1 + $0xe8] sm:$0xff] }
 0x32c   :  { %2686 = vperm.xlu0 %6018, %v8299_v63  }
 0x32e   :  { %5951 = vset.pattern.permute.xlu1 %v11756_v34  ;;  %v8331_v7 = vpop.permute.xlu0 %2594 }
 0x32f   :  { %12060 = vst [vmem:[#allocation339_spill] sm:$0xff] %v8331_v7  ;;  %2325 = vperm.xlu1 %5951, %v8208_v55   ;;  %v8334_v52 = vpop.permute.xlu1 %2390 }
 0x330   :  { %12061 = vst [vmem:[#allocation340_spill] sm:$0xff] %v8334_v52  ;;  %3416 = vperm.xlu0 %6018, %v8339_v54  }
 0x332   :  { %v8342_v33 = vpop.permute.xlu0 %2562 }
 0x333   :  { %12063 = vst [vmem:[#allocation342_spill] sm:$0xff] %v8342_v33  ;;  %5952 = vset.pattern.permute.xlu1 %v11918_v48 }
 0x334   :  { %3422 = vperm.xlu0 %6018, %v6241_v36   ;;  %2590 = vperm.xlu1 %5952, %v7899_v56   ;;  %v8349_v7 = vpop.permute.xlu1 %1981 }
 0x335   :  { %12064 = vst [vmem:[#allocation343_spill] sm:$0xff] %v8349_v7 }
 0x336   :  { %v8351_v52 = vpop.permute.xlu0 %2568 }
 0x337   :  { %12065 = vst [vmem:[#allocation344_spill] sm:$0xff] %v8351_v52  ;;  %v6244_v52 = vld [vmem:[%s11491_s2 + $0xf0] sm:$0xff] }
 0x338   :  { %3455 = vperm.xlu0 %6018, %v6242_v47   ;;  %5953 = vset.pattern.permute.xlu1 %v11935_v31  ;;  %v8357_v33 = vpop.permute.xlu1 %1985 }
 0x339   :  { %12066 = vst [vmem:[#allocation345_spill] sm:$0xff] %v8357_v33  ;;  %2630 = vperm.xlu1 %5953, %v8362_v8   ;;  %v6245_v33 = vld [vmem:[%s11490_s1] sm:$0xff] }
 0x33a   :  { %v8365_v36 = vpop.permute.xlu0 %2602 }
 0x33b   :  { %12067 = vst [vmem:[#allocation346_spill] sm:$0xff] %v8365_v36 }
 0x33c   :  { %3463 = vperm.xlu0 %6018, %v6244_v52  }
 0x33d   :  { %2633 = vperm.xlu1 %5953, %v7999_v12   ;;  %v8371_v47 = vpop.permute.xlu1 %2399 }
 0x33e   :  { %12068 = vst [vmem:[#allocation347_spill] sm:$0xff] %v8371_v47  ;;  %v8373_v7 = vpop.permute.xlu0 %2610  ;;  %v6246_v47 = vld [vmem:[%s11490_s1 + $0x18] sm:$0xff] }
 0x33f   :  { %12069 = vst [vmem:[#allocation348_spill] sm:$0xff] %v8373_v7 }
 0x340   :  { %6020 = vset.pattern.permute.xlu0 %v11954_v14 }
 0x341   :  { %1155 = vperm.xlu0 %6020, %v6245_v33   ;;  %5954 = vset.pattern.permute.xlu1 %v11756_v34  ;;  %v8380_v36 = vpop.permute.xlu1 %2426  ;;  %v6247_v33 = vld [vmem:[%s11490_s1 + $0x28] sm:$0xff] }
 0x342   :  { %12070 = vst [vmem:[#allocation349_spill] sm:$0xff] %v8380_v36  ;;  %2331 = vperm.xlu1 %5954, %v7656_v2   ;;  %v8383_v52 = vpop.permute.xlu0 %3330 }
 0x343   :  { %12071 = vst [vmem:[#allocation350_spill] sm:$0xff] %v8383_v52 }
 0x345   :  { %1164 = vperm.xlu0 %6020, %v6246_v47   ;;  %v6248_v47 = vld [vmem:[%s11490_s1 + $0x38] sm:$0xff] }
 0x346   :  { %2358 = vperm.xlu1 %5954, %v8262_v23   ;;  %v8389_v7 = vpop.permute.xlu1 %1993  ;;  %v8391_v21 = vpop.permute.xlu0 %3333 }
 0x347   :  { %12072 = vst [vmem:[#allocation351_spill] sm:$0xff] %v8389_v7  ;;  %12073 = vst [vmem:[#allocation352_spill] sm:$0xff] %v8391_v21 }
 0x349   :  { %1170 = vperm.xlu0 %6020, %v6247_v33   ;;  %v6249_v33 = vld [vmem:[%s11491_s2 + $0x8] sm:$0xff] }
 0x34a   :  { %5955 = vset.pattern.permute.xlu1 %v11935_v31  ;;  %v8397_v36 = vpop.permute.xlu0 %3363 }
 0x34b   :  { %12074 = vst [vmem:[#allocation353_spill] sm:$0xff] %v8397_v36  ;;  %2636 = vperm.xlu1 %5955, %v7622_v37   ;;  %v8400_v52 = vpop.permute.xlu1 %2430 }
 0x34c   :  { %12075 = vst [vmem:[#allocation354_spill] sm:$0xff] %v8400_v52 }
 0x34d   :  { %1176 = vperm.xlu0 %6020, %v6248_v47   ;;  %v6250_v47 = vld [vmem:[%s11491_s2 + $0x18] sm:$0xff] }
 0x34e   :  { %v8405_v7 = vpop.permute.xlu0 %3371 }
 0x34f   :  { %12076 = vst [vmem:[#allocation355_spill] sm:$0xff] %v8405_v7  ;;  %2662 = vperm.xlu1 %5955, %v8031_v57  }
 0x350   :  { %v8408_v21 = vpop.permute.xlu1 %2470 }
 0x351   :  { %12077 = vst [vmem:[#allocation356_spill] sm:$0xff] %v8408_v21  ;;  %1191 = vperm.xlu0 %6020, %v6249_v33   ;;  %v6251_v33 = vld [vmem:[%s11491_s2 + $0x28] sm:$0xff] }
 0x352   :  { %v8413_v36 = vpop.permute.xlu0 %3339 }
 0x353   :  { %12078 = vst [vmem:[#allocation357_spill] sm:$0xff] %v8413_v36  ;;  %2666 = vperm.xlu1 %5955, %v7890_v61  }
 0x354   :  { %v8416_v52 = vpop.permute.xlu1 %2473 }
 0x355   :  { %12079 = vst [vmem:[#allocation358_spill] sm:$0xff] %v8416_v52  ;;  %1199 = vperm.xlu0 %6020, %v6250_v47   ;;  %v6252_v47 = vld [vmem:[%s11491_s2 + $0x38] sm:$0xff] }
 0x356   :  { %v8421_v7 = vpop.permute.xlu0 %3348 }
 0x357   :  { %12080 = vst [vmem:[#allocation359_spill] sm:$0xff] %v8421_v7  ;;  %5956 = vset.pattern.permute.xlu1 %v11756_v34  ;;  %v8441_v7 = vld [vmem:[%s11490_s1 + $0xa0] sm:$0xff] }
 0x358   :  { %2370 = vperm.xlu1 %5956, %v8123_v43   ;;  %v8425_v21 = vpop.permute.xlu1 %2479  ;;  %12084 = vst [vmem:[#allocation363_spill] sm:$0xff] %v8441_v7 }
 0x359   :  { %12081 = vst [vmem:[#allocation360_spill] sm:$0xff] %v8425_v21  ;;  %1207 = vperm.xlu0 %6020, %v6251_v33   ;;  %v6254_v33 = vld [vmem:[%s11490_s1 + $0x40] sm:$0xff] }
 0x35a   :  { %v8430_v36 = vpop.permute.xlu0 %3379 }
 0x35b   :  { %12082 = vst [vmem:[#allocation361_spill] sm:$0xff] %v8430_v36 }
 0x35c   :  { %5957 = vset.pattern.permute.xlu1 %v11821_v32  ;;  %v8433_v52 = vpop.permute.xlu1 %2502 }
 0x35d   :  { %12083 = vst [vmem:[#allocation362_spill] sm:$0xff] %v8433_v52  ;;  %1215 = vperm.xlu0 %6020, %v6252_v47   ;;  %2402 = vperm.xlu1 %5957, %v8441_v7   ;;  %v6255_v52 = vld [vmem:[%s11490_s1 + $0x58] sm:$0xff] }
 0x35e   :  { %v8444_v21 = vpop.permute.xlu0 %3387 }
 0x35f   :  { %12085 = vst [vmem:[#allocation364_spill] sm:$0xff] %v8444_v21 }
 0x361   :  { %1933 = vperm.xlu0 %6020, %v6254_v33   ;;  %5958 = vset.pattern.permute.xlu1 %v11935_v31  ;;  %v8450_v36 = vpop.permute.xlu1 %2154  ;;  %v6256_v33 = vld [vmem:[%s11490_s1 + $0x68] sm:$0xff] }
 0x362   :  { %12086 = vst [vmem:[#allocation365_spill] sm:$0xff] %v8450_v36  ;;  %2670 = vperm.xlu1 %5958, %v7899_v56  }
 0x363   :  { %v8453_v47 = vpop.permute.xlu0 %1078 }
 0x364   :  { %12087 = vst [vmem:[#allocation366_spill] sm:$0xff] %v8453_v47  ;;  %v12201_v47 = vld [vmem:[#allocation89_spill] sm:$0xff] }
 0x365   :  { %1942 = vperm.xlu0 %6020, %v6255_v52   ;;  %v6257_v52 = vld [vmem:[%s11490_s1 + $0x78] sm:$0xff] }
 0x366   :  { %2674 = vperm.xlu1 %5958, %v8060_v10   ;;  %v8459_v21 = vpop.permute.xlu1 %2242 }
 0x367   :  { %12088 = vst [vmem:[#allocation367_spill] sm:$0xff] %v8459_v21  ;;  %v8461_v34 = vpop.permute.xlu0 %1087 }
 0x368   :  { %12089 = vst [vmem:[#allocation368_spill] sm:$0xff] %v8461_v34  ;;  %v12176_v34 = vld [vmem:[#allocation78_spill] sm:$0xff] }
 0x369   :  { %1948 = vperm.xlu0 %6020, %v6256_v33  }
 0x36a   :  { %5959 = vset.pattern.permute.xlu1 %v11954_v14  ;;  %v8467_v36 = vpop.permute.xlu1 %2245 }
 0x36b   :  { %12090 = vst [vmem:[#allocation369_spill] sm:$0xff] %v8467_v36  ;;  %v8469_v9 = vpop.permute.xlu0 %1093  ;;  %2713 = vperm.xlu1 %5959, %v7999_v12  }
 0x36c   :  { %12091 = vst [vmem:[#allocation370_spill] sm:$0xff] %v8469_v9 }
 0x36d   :  { %1954 = vperm.xlu0 %6020, %v6257_v52  }
 0x36f   :  { %v8475_v21 = vpop.permute.xlu0 %1107  ;;  %5960 = vset.pattern.permute.xlu1 %v11821_v32  ;;  %v8478_v20 = vpop.permute.xlu1 %2514 }
 0x370   :  { %12092 = vst [vmem:[#allocation371_spill] sm:$0xff] %v8475_v21  ;;  %12093 = vst [vmem:[#allocation372_spill] sm:$0xff] %v8478_v20  ;;  %2408 = vperm.xlu1 %5960, %v8309_v13   ;;  %v12190_v21 = vld [vmem:[#allocation86_spill] sm:$0xff] }
 0x371   :  { %1969 = vperm.xlu0 %6020, %v7487_v53  }
 0x373   :  { %v8482_v33 = vpop.permute.xlu0 %1115 }
 0x374   :  { %12094 = vst [vmem:[#allocation373_spill] sm:$0xff] %v8482_v33  ;;  %2438 = vperm.xlu1 %5960, %v8262_v23   ;;  %v8485_v12 = vpop.permute.xlu1 %2550 }
 0x375   :  { %12095 = vst [vmem:[#allocation374_spill] sm:$0xff] %v8485_v12  ;;  %1977 = vperm.xlu0 %6020, %v7518_v35  }
 0x377   :  { %v8488_v36 = vpop.permute.xlu0 %1123 }
 0x378   :  { %12096 = vst [vmem:[#allocation375_spill] sm:$0xff] %v8488_v36  ;;  %2442 = vperm.xlu1 %5960, %v8321_v11   ;;  %v12150_v36 = vld [vmem:[#allocation44_spill] sm:$0xff] }
 0x379   :  { %1989 = vperm.xlu0 %6020, %v7867_v41   ;;  %v8492_v52 = vpop.permute.xlu1 %2160 }
 0x37a   :  { %12097 = vst [vmem:[#allocation376_spill] sm:$0xff] %v8492_v52  ;;  %v12107_v52 = vld [vmem:[#allocation9_spill] sm:$0xff] }
 0x37b   :  { %v8494_v20 = vpop.permute.xlu0 %1131 }
 0x37c   :  { %12098 = vst [vmem:[#allocation377_spill] sm:$0xff] %v8494_v20  ;;  %5961 = vset.pattern.permute.xlu1 %v11954_v14 }
 0x37d   :  { %2710 = vperm.xlu0 %6020, %v8362_v8   ;;  %2719 = vperm.xlu1 %5961, %v8281_v40   ;;  %v8499_v53 = vpop.permute.xlu1 %2163 }
 0x37e   :  { %12099 = vst [vmem:[#allocation378_spill] sm:$0xff] %v8499_v53 }
 0x37f   :  { %v8501_v12 = vpop.permute.xlu0 %1856 }
 0x380   :  { %12100 = vst [vmem:[#allocation379_spill] sm:$0xff] %v8501_v12 }
 0x381   :  { %2716 = vperm.xlu0 %6020, %v7622_v37   ;;  %2742 = vperm.xlu1 %5961, %v8031_v57   ;;  %v8505_v35 = vpop.permute.xlu1 %2200  ;;  %v12106_v57 = vld [vmem:[#allocation38_spill] sm:$0xff] }
 0x382   :  { %12101 = vst [vmem:[#allocation380_spill] sm:$0xff] %v8505_v35  ;;  %vm701_vm9 = vcmp.eq.s32.totalorder %v12107_v52, %v12106_v57  ;;  %v12112_v35 = vld [vmem:[#allocation40_spill] sm:$0xff]  ;;  %vm613_vm0 = vcmp.eq.s32.totalorder %v12120_v15, %v12106_v57 }
 0x383   :  { %v8507_v41 = vpop.permute.xlu0 %1865  ;;  %vm699_vm12 = vcmp.eq.s32.totalorder %v12112_v35, %v12106_v57  ;;  %v12127_v15 = vld [vmem:[#allocation8_spill] sm:$0xff] }
 0x384   :  { %12102 = vst [vmem:[#allocation381_spill] sm:$0xff] %v8507_v41 }
 0x385   :  { %2746 = vperm.xlu0 %6020, %v7890_v61   ;;  %5962 = vset.pattern.permute.xlu1 %v11821_v32  ;;  %v12109_v61 = vld [vmem:[#allocation10_spill] sm:$0xff] }
 0x386   :  { %2446 = vperm.xlu1 %5962, %v8299_v63   ;;  %v8512_v8 = vpop.permute.xlu1 %2248  ;;  %vm703_vm10 = vcmp.eq.s32.totalorder %v12109_v61, %v12106_v57  ;;  %v12110_v63 = vld [vmem:[#allocation11_spill] sm:$0xff]  ;;  %v12114_v32 = vld [vmem:[#allocation14_spill] sm:$0xff]  ;;  %v12116_v61 = vld [vmem:[#allocation17_spill] sm:$0xff] }
 0x387   :  { %12103 = vst [vmem:[#allocation382_spill] sm:$0xff] %v8512_v8  ;;  %v8514_v40 = vpop.permute.xlu0 %1871  ;;  %vm705_vm11 = vcmp.eq.s32.totalorder %v12110_v63, %v12106_v57  ;;  %vm1479_vm13 = vcmp.eq.s32.totalorder %v12116_v61, %v12106_v57  ;;  %v12117_v63 = vld [vmem:[#allocation18_spill] sm:$0xff] }
 0x388   :  { %12104 = vst [vmem:[#allocation383_spill] sm:$0xff] %v8514_v40  ;;  %v743_v40 = vsel %vm703_vm10, %v12114_v32, 0.0  ;;  %vm1481_vm14 = vcmp.eq.s32.totalorder %v12117_v63, %v12106_v57  ;;  %v12121_v32 = vld [vmem:[#allocation28_spill] sm:$0xff]  ;;  %v12135_v63 = vld [vmem:[#allocation41_spill] sm:$0xff] }
 0x389   :  { %2750 = vperm.xlu0 %6020, %v7899_v56   ;;  %v12111_v56 = vld [vmem:[#allocation13_spill] sm:$0xff]  ;;  %vm615_vm1 = vcmp.eq.s32.totalorder %v12121_v32, %v12106_v57  ;;  %v12128_v32 = vld [vmem:[#allocation24_spill] sm:$0xff] }
 0x38a   :  { %5963 = vset.pattern.permute.xlu1 %v11899_v17  ;;  %v8518_v37 = vpop.permute.xlu1 %2278  ;;  %v741_v8 = vsel %vm701_vm9, %v12111_v56, 0.0  ;;  %v12119_v56 = vld [vmem:[#allocation19_spill] sm:$0xff]  ;;  %vm698_vm9 = vcmp.eq.s32.totalorder %v12127_v15, %v12106_v57  ;;  %vm611_vm10 = vcmp.eq.s32.totalorder %v12128_v32, %v12106_v57 }
 0x38b   :  { %12105 = vst [vmem:[#allocation384_spill] sm:$0xff] %v8518_v37  ;;  %v8522_v53 = vpop.permute.xlu0 %1885  ;;  %2482 = vperm.xlu1 %5963, %v8441_v7   ;;  %v8533_v37 = vpop.f32.mrf.mxu0  ;;  %vm1483_vm15 = vcmp.eq.s32.totalorder %v12119_v56, %v12106_v57  ;;  %v12124_v7 = vld [vmem:[#allocation36_spill] sm:$0xff]  ;;  %v739_v56 = vsel %vm699_vm12, %v12126_v50, 0.0  ;;  %v659_v54 = vsel %vm611_vm10, %v12132_v62, 0.0  ;;  %v12136_v62 = vld [vmem:[#allocation42_spill] sm:$0xff]  ;;  %v738_v45 = vsel %vm698_vm9, %v12150_v36, 0.0 }
 0x38c   :  { %12108 = vst [vmem:[#allocation38_spill] sm:$0xff] %v8522_v53  ;;  %v12115_v53 = vld [vmem:[#allocation15_spill] sm:$0xff]  ;;  %v663_v31 = vsel %vm615_vm1, %v12124_v7, 0.0  ;;  %v12130_v7 = vld [vmem:[#allocation22_spill] sm:$0xff]  ;;  %v8591_v9 = vadd.f32 %v739_v56, %v659_v54  ;;  %vm702_vm12 = vcmp.eq.s32.totalorder %v12136_v62, %v12106_v57 }
 0x38d   :  { %2725 = vperm.xlu0 %6020, %v8208_v55   ;;  %v745_v41 = vsel %vm705_vm11, %v12115_v53, 0.0  ;;  %v12122_v53 = vld [vmem:[#allocation30_spill] sm:$0xff]  ;;  %v8578_v50 = vsel %vm1481_vm14, %v12130_v7, 0.0  ;;  %v751_v20 = vadd.f32 %v743_v40, %v663_v31  ;;  %vm700_vm11 = vcmp.eq.s32.totalorder %v12135_v63, %v12106_v57  ;;  %v12139_v31 = vld [vmem:[#allocation51_spill] sm:$0xff]  ;;  %v12144_v40 = vld [vmem:[#allocation56_spill] sm:$0xff] }
 0x38e   :  { %v8535_v52 = vpop.permute.xlu1 %2282  ;;  %vm617_vm2 = vcmp.eq.s32.totalorder %v12122_v53, %v12106_v57  ;;  %v8566_v53 = vpop.f32.mrf.mxu0  ;;  %v12137_v7 = vld [vmem:[#allocation50_spill] sm:$0xff]  ;;  %v12142_v54 = vld [vmem:[#allocation59_spill] sm:$0xff] }
 0x38f   :  { %12113 = vst [vmem:[#allocation9_spill] sm:$0xff] %v8535_v52  ;;  %v8543_v12 = vpop.permute.xlu0 %1893  ;;  %2485 = vperm.xlu1 %5963, %v8208_v55   ;;  %v12123_v52 = vld [vmem:[#allocation34_spill] sm:$0xff]  ;;  %v12154_v15 = vld [vmem:[#allocation47_spill] sm:$0xff] }
 0x390   :  { %12118 = vst [vmem:[#allocation10_spill] sm:$0xff] %v8543_v12  ;;  %v661_v19 = vsel %vm613_vm0, %v12123_v52, 0.0  ;;  %v665_v12 = vsel %vm617_vm2, %v12125_v38, 0.0  ;;  %v12129_v52 = vld [vmem:[#allocation21_spill] sm:$0xff]  ;;  %vm614_vm2 = vcmp.eq.s32.totalorder %v12142_v54, %v12106_v57  ;;  %v8654_v62 = vld [vmem:[%s11490_s1 + $0xc0] sm:$0xff] }
 0x391   :  { %2731 = vperm.xlu0 %6020, %v7656_v2   ;;  %v8572_v38 = vsel %vm1479_vm13, %v12129_v52, 0.0  ;;  %v12131_v2 = vld [vmem:[#allocation23_spill] sm:$0xff]  ;;  %v749_v52 = vadd.f32 %v741_v8, %v661_v19  ;;  %v753_v27 = vadd.f32 %v745_v41, %v665_v12  ;;  %vm781_vm13 = vcmp.eq.s32.totalorder %v12137_v7, %v12106_v57  ;;  %v12140_v19 = vld [vmem:[#allocation52_spill] sm:$0xff]  ;;  %v8611_v12 = vpop.f32.mrf.mxu0  ;;  %v12143_v41 = vld [vmem:[#allocation54_spill] sm:$0xff]  ;;  %12157 = vst [vmem:[#allocation15_spill] sm:$0xff] %v8654_v62 }
 0x392   :  { %v8581_v35 = vsel %vm1483_vm15, %v12131_v2, 0.0  ;;  %v12138_v2 = vld [vmem:[#allocation55_spill] sm:$0xff]  ;;  %vm783_vm15 = vcmp.eq.s32.totalorder %v12139_v31, %v12106_v57  ;;  %vm785_vm0 = vcmp.eq.s32.totalorder %v12140_v19, %v12106_v57  ;;  %v821_v8 = vsel %vm781_vm13, %v12143_v41, 0.0  ;;  %v12145_v7 = vld [vmem:[#allocation58_spill] sm:$0xff]  ;;  %v12151_v41 = vld [vmem:[#allocation45_spill] sm:$0xff] }
 0x393   :  { %v8586_v32 = vpop.permute.xlu0 %1901  ;;  %5964 = vset.pattern.permute.xlu1 %v11954_v14  ;;  %v8589_v61 = vpop.permute.xlu1 %2559  ;;  %vm610_vm14 = vcmp.eq.s32.totalorder %v12138_v2, %v12106_v57  ;;  %v823_v56 = vsel %vm783_vm15, %v12144_v40, 0.0  ;;  %v825_v14 = vsel %vm785_vm0, %v12145_v7, 0.0  ;;  %v740_v40 = vsel %vm700_vm11, %v12151_v41, 0.0  ;;  %v12152_v7 = vld [vmem:[#allocation63_spill] sm:$0xff]  ;;  %v12156_v41 = vld [vmem:[#allocation68_spill] sm:$0xff] }
 0x394   :  { %12133 = vst [vmem:[#allocation11_spill] sm:$0xff] %v8586_v32  ;;  %12134 = vst [vmem:[#allocation13_spill] sm:$0xff] %v8589_v61  ;;  %2754 = vperm.xlu1 %5964, %v8060_v10   ;;  %v12141_v10 = vld [vmem:[#allocation57_spill] sm:$0xff]  ;;  %v12149_v32 = vld [vmem:[#allocation43_spill] sm:$0xff]  ;;  %v662_v2 = vsel %vm614_vm2, %v12156_v41, 0.0  ;;  %vm941_vm2 = vcmp.eq.s32.totalorder %v12190_v21, %v12106_v57 }
 0x395   :  { %2770 = vperm.xlu0 %6020, %v8123_v43   ;;  %vm612_vm1 = vcmp.eq.s32.totalorder %v12141_v10, %v12106_v57  ;;  %v12146_v61 = vld [vmem:[#allocation61_spill] sm:$0xff]  ;;  %vm704_vm8 = vcmp.eq.s32.totalorder %v12149_v32, %v12106_v57  ;;  %v8661_v10 = vadd.f32 %v825_v14, %v753_v27 }
 0x396   :  { %vm616_vm10 = vcmp.eq.s32.totalorder %v12146_v61, %v12106_v57  ;;  %v744_v36 = vsel %vm704_vm8, %v12154_v15, 0.0  ;;  %v660_v63 = vsel %vm612_vm1, %v12155_v16, 0.0  ;;  %v12158_v16 = vld [vmem:[#allocation71_spill] sm:$0xff]  ;;  %v8667_v15 = vpop.f32.mrf.mxu0  ;;  %vm12183_vm1 = vcmp.lt.s32.totalorder %v12182_v59, %v7143_v25  ;;  %v8789_v25 = vld [vmem:[%s11491_s2 + $0xc8] sm:$0xff] }
 0x397   :  { %v8618_v31 = vpop.permute.xlu0 %1909  ;;  %v8620_v19 = vpop.permute.xlu1 %2582  ;;  %v664_v54 = vsel %vm616_vm10, %v12158_v16, 0.0  ;;  %v8684_v27 = vadd.f32 %v740_v40, %v660_v63  ;;  %v12163_v61 = vld [vmem:[#allocation67_spill] sm:$0xff]  ;;  %v8707_v40 = vsel %vm1322_vm3, 1.0, %v11847_v46  ;;  %v8713_v63 = vsel %vm1325_vm4, 1.0, %v11847_v46  ;;  %12189 = vst [vmem:[#allocation32_spill] sm:$0xff] %v8789_v25  ;;  %v12215_v21 = vld [vmem:[#allocation105_spill] sm:$0xff] }
 0x398   :  { %12147 = vst [vmem:[#allocation40_spill] sm:$0xff] %v8618_v31  ;;  %12148 = vst [vmem:[#allocation14_spill] sm:$0xff] %v8620_v19  ;;  %v658_v31 = vsel %vm610_vm14, %v12152_v7, 0.0  ;;  %5965 = vset.pattern.permute.xlu1 %v11899_v17  ;;  %v12153_v19 = vld [vmem:[#allocation46_spill] sm:$0xff]  ;;  %v8659_v7 = vadd.f32 %v823_v56, %v751_v20  ;;  %v12160_v17 = vld [vmem:[#allocation64_spill] sm:$0xff]  ;;  %v8694_v56 = vsel %vm1324_vm5, 1.0, %v11847_v46  ;;  %v8698_v16 = vadd.f32 %v744_v36, %v664_v54  ;;  %v8734_v54 = vpop.f32.mrf.mxu0 }
 0x399   :  { %v742_v32 = vsel %vm702_vm12, %v12153_v19, 0.0  ;;  %2488 = vperm.xlu1 %5965, %v8309_v13   ;;  %3487 = vperm.xlu0 %6020, %v8654_v62   ;;  %v8657_v19 = vadd.f32 %v821_v8, %v749_v52  ;;  %v12159_v13 = vld [vmem:[#allocation62_spill] sm:$0xff]  ;;  %v8671_v41 = vadd.f32 %v738_v45, %v658_v31  ;;  %vm862_vm9 = vcmp.eq.s32.totalorder %v12160_v17, %v12106_v57  ;;  %v12162_v20 = vld [vmem:[#allocation49_spill] sm:$0xff] }
 0x39a   :  { %vm860_vm8 = vcmp.eq.s32.totalorder %v12159_v13, %v12106_v57  ;;  %v8676_v52 = vstv %s8584_s18  ;;  %vm780_vm11 = vcmp.eq.s32.totalorder %v12162_v20, %v12106_v57  ;;  %vm864_vm12 = vcmp.eq.s32.totalorder %v12163_v61, %v12106_v57  ;;  %v12164_v45 = vld [vmem:[#allocation69_spill] sm:$0xff]  ;;  %12165 = vst [vmem:[#allocation18_spill] sm:$0xff] %v8694_v56  ;;  %12168 = vst [vmem:[#allocation26_spill] sm:$0xff] %v8707_v40  ;;  %v8800_v4 = vpop.f32.mrf.mxu0  ;;  %s5274_s18 = smax.f32 %s6337_s30, %s5273_s3 }
 0x39b   :  { %v8680_v14 = vpop.permute.xlu0 %2639  ;;  %v8688_v8 = vadd.f32 %v742_v32, %v662_v2  ;;  %v12167_v13 = vld [vmem:[#allocation73_spill] sm:$0xff]  ;;  %v12169_v32 = vld [vmem:[#allocation72_spill] sm:$0xff]  ;;  %12170 = vst [vmem:[#allocation28_spill] sm:$0xff] %v8713_v63  ;;  %v8726_v2 = vsel %vm1323_vm6, 1.0, %v11847_v46  ;;  %vm2101_vm5 = vcmp.lt.s32.totalorder %v12164_v45, %v8676_v52  ;;  %vm2099_vm3 = vcmp.lt.s32.totalorder %v7131_v5, %v8676_v52  ;;  %12173 = vst [vmem:[#allocation36_spill] sm:$0xff] %v8734_v54 }
 0x39c   :  { %12161 = vst [vmem:[#allocation17_spill] sm:$0xff] %v8680_v14  ;;  %v8696_v31 = vpop.permute.xlu1 %2205  ;;  %v8701_v14 = vsel %vm860_vm8, %v12167_v13, 0.0  ;;  %v8719_v36 = vld [vmem:[%s11490_s1 + $0xd0] sm:$0xff]  ;;  %12172 = vst [vmem:[#allocation34_spill] sm:$0xff] %v8726_v2  ;;  %vm2102_vm4 = vcmp.lt.s32.totalorder %v12169_v32, %v8676_v52  ;;  %v12174_v13 = vld [vmem:[#allocation48_spill] sm:$0xff]  ;;  %vm1392_vm6 = vcmp.eq.s32.totalorder %v12176_v34, %v12106_v57  ;;  %vm2100_vm14 = vcmp.lt.s32.totalorder %v7162_v0, %v8676_v52 }
 0x39d   :  { %12166 = vst [vmem:[#allocation19_spill] sm:$0xff] %v8696_v31  ;;  %2518 = vperm.xlu1 %5965, %v8262_v23   ;;  %12171 = vst [vmem:[#allocation30_spill] sm:$0xff] %v8719_v36  ;;  %3493 = vperm.xlu0 %6020, %v8719_v36   ;;  %vm778_vm13 = vcmp.eq.s32.totalorder %v12174_v13, %v12106_v57  ;;  %v12175_v31 = vld [vmem:[#allocation76_spill] sm:$0xff]  ;;  %vm2105_vm15 = vcmp.lt.s32.totalorder %v7457_v42, %v8676_v52  ;;  %v12178_v45 = vld [vmem:[#allocation79_spill] sm:$0xff]  ;;  %v8764_v54 = vsel %vm1326_vm7, 1.0, %v11847_v46 }
 0x39e   :  { %v8742_v18 = vsel %vm862_vm9, %v12175_v31, 0.0  ;;  %v8756_v32 = vsel %vm864_vm12, %v12178_v45, 0.0  ;;  %v12179_v17 = vld [vmem:[#allocation81_spill] sm:$0xff]  ;;  %12181 = vst [vmem:[#allocation12_spill] sm:$0xff] %v8764_v54  ;;  %v8773_v33 = vsel %vm2101_vm5, 1.0, %v11847_v46  ;;  %v8776_v61 = vsel %vm2099_vm3, 1.0, %v11847_v46 }
 0x39f   :  { %v8750_v5 = vpop.permute.xlu0 %2648  ;;  %vm1394_vm0 = vcmp.eq.s32.totalorder %v12179_v17, %v12106_v57  ;;  %v12180_v31 = vld [vmem:[#allocation77_spill] sm:$0xff]  ;;  %12185 = vst [vmem:[#allocation24_spill] sm:$0xff] %v8773_v33  ;;  %12186 = vst [vmem:[#allocation21_spill] sm:$0xff] %v8776_v61  ;;  %v8779_v45 = vsel %vm2102_vm4, 1.0, %v11847_v46  ;;  %v8798_v49 = vsel %vm2100_vm14, 1.0, %v11847_v46  ;;  %vm784_vm9 = vcmp.eq.s32.totalorder %v12195_v1, %v12106_v57  ;;  %v12207_v17 = vld [vmem:[#allocation131_spill] sm:$0xff] }
 0x3a0   :  { %12177 = vst [vmem:[#allocation39_spill] sm:$0xff] %v8750_v5  ;;  %v8770_v5 = vsel %vm12183_vm1, 1.0, %v11847_v46  ;;  %12187 = vst [vmem:[#allocation22_spill] sm:$0xff] %v8779_v45  ;;  %vm2103_vm7 = vcmp.lt.s32.totalorder %v12180_v31, %v8676_v52  ;;  %vm2104_vm12 = vcmp.lt.s32.totalorder %v12182_v59, %v8676_v52  ;;  %v8817_v0 = vstv %s8678_s21  ;;  %v12218_v59 = vld [vmem:[#allocation100_spill] sm:$0xff]  ;;  %v12220_v13 = vld [vmem:[#allocation114_spill] sm:$0xff] }
 0x3a1   :  { %12184 = vst [vmem:[#allocation8_spill] sm:$0xff] %v8770_v5  ;;  %2522 = vperm.xlu1 %5965, %v8321_v11   ;;  %v8784_v39 = vpop.permute.xlu1 %2286  ;;  %3523 = vperm.xlu0 %6020, %v8789_v25   ;;  %12191 = vst [vmem:[#allocation41_spill] sm:$0xff] %v8798_v49  ;;  %v8806_v11 = vsel %vm2105_vm15, 1.0, %v11847_v46  ;;  %v12194_v25 = vld [vmem:[#allocation123_spill] sm:$0xff]  ;;  %v8825_v22 = vsel %vm1392_vm6, %v12197_v44, 0.0  ;;  %v8833_v36 = vsel %vm2103_vm7, 1.0, %v11847_v46  ;;  %vm2882_vm3 = vcmp.lt.s32.totalorder %v7457_v42, %v8817_v0 }
 0x3a2   :  { %12188 = vst [vmem:[#allocation23_spill] sm:$0xff] %v8784_v39  ;;  %12192 = vst [vmem:[#allocation42_spill] sm:$0xff] %v8806_v11  ;;  %v12193_v39 = vld [vmem:[#allocation135_spill] sm:$0xff]  ;;  %vm782_vm8 = vcmp.eq.s32.totalorder %v12194_v25, %v12106_v57  ;;  %v8843_v34 = vsel %vm1394_vm0, %v12201_v47, 0.0  ;;  %v12202_v44 = vld [vmem:[#allocation129_spill] sm:$0xff] }
 0x3a3   :  { %vm2106_vm10 = vcmp.lt.s32.totalorder %v12193_v39, %v8676_v52  ;;  %v8819_v49 = vpop.permute.xlu0 %2682  ;;  %v12198_v39 = vld [vmem:[#allocation121_spill] sm:$0xff]  ;;  %12199 = vst [vmem:[#allocation55_spill] sm:$0xff] %v8833_v36  ;;  %v820_v58 = vsel %vm780_vm11, %v12202_v44, 0.0  ;;  %v12206_v47 = vld [vmem:[#allocation90_spill] sm:$0xff]  ;;  %v822_v20 = vsel %vm782_vm8, %v12207_v17, 0.0  ;;  %v8896_v52 = vsel %vm2882_vm3, 1.0, %v11847_v46 }
 0x3a4   :  { %12196 = vst [vmem:[#allocation50_spill] sm:$0xff] %v8819_v49  ;;  %vm779_vm5 = vcmp.eq.s32.totalorder %v12198_v39, %v12106_v57  ;;  %v12200_v49 = vld [vmem:[#allocation88_spill] sm:$0xff]  ;;  %v8850_v31 = vsel %vm2106_vm10, 1.0, %v11847_v46  ;;  %vm945_vm6 = vcmp.eq.s32.totalorder %v12206_v47, %v12106_v57  ;;  %v12208_v44 = vld [vmem:[#allocation133_spill] sm:$0xff]  ;;  %v8883_v47 = vsel %vm941_vm2, %v12210_v28, 0.0  ;;  %v12211_v25 = vld [vmem:[#allocation98_spill] sm:$0xff] }
 0x3a5   :  { %vm943_vm4 = vcmp.eq.s32.totalorder %v12200_v49, %v12106_v57  ;;  %12203 = vst [vmem:[#allocation51_spill] sm:$0xff] %v8850_v31  ;;  %2530 = vperm.xlu1 %5965, %v8123_v43   ;;  %v8853_v6 = vpop.permute.xlu1 %2290  ;;  %v8858_v49 = vld [vmem:[%s11491_s2 + $0xd0] sm:$0xff]  ;;  %v824_v43 = vsel %vm784_vm9, %v12208_v44, 0.0  ;;  %v819_v1 = vsel %vm779_vm5, %v12212_v3, 0.0  ;;  %12213 = vst [vmem:[#allocation54_spill] sm:$0xff] %v8896_v52  ;;  %vm1020_vm11 = vcmp.eq.s32.totalorder %v12215_v21, %v12106_v57  ;;  %v12216_v28 = vld [vmem:[#allocation107_spill] sm:$0xff] }
 0x3a6   :  { %12204 = vst [vmem:[#allocation52_spill] sm:$0xff] %v8853_v6  ;;  %12205 = vst [vmem:[#allocation57_spill] sm:$0xff] %v8858_v49  ;;  %3527 = vperm.xlu0 %6020, %v8858_v49   ;;  %v8871_v6 = vpop.f32.mrf.mxu0  ;;  %v8877_v49 = vsel %vm2104_vm12, 1.0, %v11847_v46  ;;  %v8886_v17 = vsel %vm943_vm4, %v12211_v25, 0.0  ;;  %vm1022_vm14 = vcmp.eq.s32.totalorder %v12216_v28, %v12106_v57  ;;  %v12217_v25 = vld [vmem:[#allocation127_spill] sm:$0xff]  ;;  %v828_v3 = vadd.f32 %v820_v58, %v8684_v27  ;;  %v12219_v42 = vld [vmem:[#allocation110_spill] sm:$0xff] }
 0x3a7   :  { %12209 = vst [vmem:[#allocation59_spill] sm:$0xff] %v8877_v49  ;;  %v8898_v44 = vpop.permute.xlu0 %2686  ;;  %v818_v39 = vsel %vm778_vm13, %v12217_v25, 0.0  ;;  %v8910_v24 = vsel %vm945_vm6, %v12218_v59, 0.0  ;;  %vm1024_vm15 = vcmp.eq.s32.totalorder %v12219_v42, %v12106_v57  ;;  %v832_v21 = vadd.f32 %v824_v43, %v8698_v16  ;;  %v6262_v28 = vld [vmem:[%s11490_s1 + $0xe0] sm:$0xff]  ;;  %v12222_v27 = vld [vmem:[#allocation118_spill] sm:$0xff] }
 0x3a8   :  { %12214 = vst [vmem:[#allocation56_spill] sm:$0xff] %v8898_v44  ;;  %v830_v44 = vadd.f32 %v822_v20, %v8688_v8  ;;  %v8921_v25 = vsel %vm1020_vm11, %v12220_v13, 0.0  ;;  %v12221_v58 = vld [vmem:[#allocation116_spill] sm:$0xff]  ;;  %v8927_v52 = vsel %vm1024_vm15, %v12222_v27, 0.0  ;;  %v8930_v8 = vadd.f32 %v819_v1, %v8591_v9  ;;  %v5707_v16 = vpop.f32.mrf.mxu0  ;;  %v12224_v43 = vld [vmem:[#allocation75_spill] sm:$0xff] }
 0x3a9   :  { %5966 = vset.pattern.permute.xlu1 %v11918_v48  ;;  %v8924_v59 = vsel %vm1022_vm14, %v12221_v58, 0.0  ;;  %vm1389_vm13 = vcmp.eq.s32.totalorder %v12224_v43, %v12106_v57  ;;  %v12225_v42 = vld [vmem:[#allocation124_spill] sm:$0xff]  ;;  %v8942_v13 = vadd.f32 %v818_v39, %v8671_v41  ;;  %v12232_v46 = vld [vmem:[#allocation163_spill] sm:$0xff]  ;;  %v12234_v41 = vld [vmem:[#allocation134_spill] sm:$0xff] }
 0x3aa   :  { %3499 = vperm.xlu0 %6020, %v6262_v28   ;;  %2565 = vperm.xlu1 %5966, %v8208_v55   ;;  %v8933_v20 = vpop.permute.xlu1 %2325  ;;  %vm1101_vm0 = vcmp.eq.s32.totalorder %v12225_v42, %v12106_v57  ;;  %v12226_v28 = vld [vmem:[#allocation126_spill] sm:$0xff]  ;;  %v12227_v9 = vld [vmem:[#allocation160_spill] sm:$0xff]  ;;  %v8957_v42 = vmul.f32 %v8726_v2, %v12232_v46  ;;  %v12244_v2 = vld [vmem:[#allocation159_spill] sm:$0xff] }
 0x3ab   :  { %12223 = vst [vmem:[#allocation58_spill] sm:$0xff] %v8933_v20  ;;  %vm1103_vm1 = vcmp.eq.s32.totalorder %v12226_v28, %v12106_v57  ;;  %v8946_v1 = vmul.f32 %v12227_v9, %v8713_v63  ;;  %v8948_v58 = vpop.permute.xlu0 %3416  ;;  %v12230_v55 = vld [vmem:[#allocation128_spill] sm:$0xff]  ;;  %v8960_v28 = vadd.f32 %v8701_v14, %v828_v3  ;;  %v6263_v46 = vld [vmem:[%s11490_s1 + $0xf8] sm:$0xff]  ;;  %vm1182_vm9 = vcmp.eq.s32.totalorder %v12244_v2, %v12106_v57 }
 0x3ac   :  { %12229 = vst [vmem:[#allocation43_spill] sm:$0xff] %v8948_v58  ;;  %vm1105_vm7 = vcmp.eq.s32.totalorder %v12230_v55, %v12106_v57  ;;  %v12231_v27 = vld [vmem:[#allocation132_spill] sm:$0xff]  ;;  %12233 = vst [vmem:[#allocation44_spill] sm:$0xff] %v8957_v42  ;;  %v8963_v39 = vsel %vm1103_vm1, %v12234_v41, 0.0  ;;  %v8970_v58 = vadd.f32 %v8742_v18, %v830_v44  ;;  %v12237_v14 = vld [vmem:[#allocation138_spill] sm:$0xff]  ;;  %v8988_v18 = vmul.f32 %v8770_v5, %v8533_v37 }
 0x3ad   :  { %12228 = vst [vmem:[#allocation61_spill] sm:$0xff] %v8946_v1  ;;  %v8953_v20 = vsel %vm1101_vm0, %v12231_v27, 0.0  ;;  %v12235_v9 = vld [vmem:[#allocation152_spill] sm:$0xff]  ;;  %v8973_v27 = vadd.f32 %v8756_v32, %v832_v21  ;;  %vm1560_vm2 = vcmp.eq.s32.totalorder %v12237_v14, %v12106_v57  ;;  %v12238_v3 = vld [vmem:[#allocation146_spill] sm:$0xff]  ;;  %v491_v32 = vpop.f32.mrf.mxu0  ;;  %v12242_v44 = vld [vmem:[#allocation137_spill] sm:$0xff] }
 0x3ae   :  { %v8967_v63 = vmul.f32 %v12235_v9, %v8694_v56  ;;  %3508 = vperm.xlu0 %6020, %v6263_v46   ;;  %vm1562_vm10 = vcmp.eq.s32.totalorder %v12238_v3, %v12106_v57  ;;  %v12239_v41 = vld [vmem:[#allocation156_spill] sm:$0xff]  ;;  %12241 = vst [vmem:[#allocation46_spill] sm:$0xff] %v8988_v18  ;;  %5967 = vset.pattern.permute.xlu1 %v11795_v51  ;;  %v8995_v21 = vsel %vm1105_vm7, %v12242_v44, 0.0  ;;  %v12243_v46 = vld [vmem:[#allocation151_spill] sm:$0xff]  ;;  %v12287_v43 = vld [vmem:[#allocation206_spill] sm:$0xff] }
 0x3af   :  { %v8984_v9 = vmul.f32 %v8707_v40, %v12239_v41  ;;  %vm1180_vm8 = vcmp.eq.s32.totalorder %v12243_v46, %v12106_v57  ;;  %2919 = vperm.xlu1 %5967, %v8654_v62   ;;  %v9006_v37 = vpop.permute.xlu1 %2590  ;;  %v9008_v5 = vpop.permute.xlu0 %3422  ;;  %v12248_v55 = vld [vmem:[#allocation16_spill] sm:$0xff]  ;;  %v12249_v40 = vld [vmem:[#allocation165_spill] sm:$0xff]  ;;  %v12258_v3 = vld [vmem:[#allocation175_spill] sm:$0xff] }
 0x3b0   :  { %12236 = vst [vmem:[#allocation45_spill] sm:$0xff] %v8967_v63  ;;  %v9003_v41 = vpack.c.bf16 %v8946_v1, %v8967_v63  ;;  %12246 = vst [vmem:[#allocation65_spill] sm:$0xff] %v9006_v37  ;;  %vm1476_vm12 = vcmp.eq.s32.totalorder %v12248_v55, %v12106_v57  ;;  %vm1184_vm5 = vcmp.eq.s32.totalorder %v12249_v40, %v12106_v57  ;;  %v12250_v56 = vld [vmem:[#allocation168_spill] sm:$0xff]  ;;  %v12253_v37 = vld [vmem:[#allocation166_spill] sm:$0xff] }
 0x3b1   :  { %12240 = vst [vmem:[#allocation63_spill] sm:$0xff] %v8984_v9  ;;  %12247 = vst [vmem:[#allocation68_spill] sm:$0xff] %v9008_v5  ;;  %v9014_v44 = vpack.c.bf16 %v8957_v42, %v8984_v9  ;;  %v9020_v63 = vmul.f32 %v8764_v54, %v12250_v56  ;;  %v9023_v1 = vmul.f32 %v5707_v16, %v8850_v31  ;;  %v9029_v5 = vsel %vm1560_vm2, %v12253_v37, 0.0  ;;  %v12255_v42 = vld [vmem:[#allocation182_spill] sm:$0xff]  ;;  %v6264_v16 = vld [vmem:[%s11491_s2 + $0xe8] sm:$0xff] }
 0x3b2   :  { %12245 = vst [vmem:[#allocation47_spill] sm:$0xff] %v9003_v41  ;;  %v12254_v41 = vld [vmem:[#allocation173_spill] sm:$0xff]  ;;  %vm1388_vm3 = vcmp.eq.s32.totalorder %v12255_v42, %v12106_v57  ;;  %v9040_v56 = vmul.f32 %v8877_v49, %v491_v32  ;;  %3539 = vperm.xlu0 %6020, %v6264_v16   ;;  %v12257_v14 = vld [vmem:[#allocation60_spill] sm:$0xff]  ;;  %v9059_v32 = vmul.f32 %v8800_v4, %v8806_v11 }
 0x3b3   :  { %12251 = vst [vmem:[#allocation71_spill] sm:$0xff] %v9020_v63  ;;  %12252 = vst [vmem:[#allocation62_spill] sm:$0xff] %v9023_v1  ;;  %v9035_v9 = vsel %vm1562_vm10, %v12254_v41, 0.0  ;;  %vm859_vm4 = vcmp.eq.s32.totalorder %v12257_v14, %v12106_v57  ;;  %v9049_v37 = vpack.c.bf16 %v8988_v18, %v9020_v63  ;;  %v9055_v41 = vsel %vm1180_vm8, %v12258_v3, 0.0  ;;  %v12260_v31 = vld [vmem:[#allocation184_spill] sm:$0xff]  ;;  %v12263_v54 = vld [vmem:[#allocation177_spill] sm:$0xff]  ;;  %5968 = vset.pattern.permute.xlu1 %v11818_v26 }
 0x3b4   :  { %12256 = vst [vmem:[#allocation64_spill] sm:$0xff] %v9040_v56  ;;  %12259 = vst [vmem:[#allocation49_spill] sm:$0xff] %v9059_v32  ;;  %vm1390_vm6 = vcmp.eq.s32.totalorder %v12260_v31, %v12106_v57  ;;  %v9065_v16 = vmul.f32 %v8566_v53, %v8773_v33  ;;  %v9069_v49 = vmul.f32 %v8776_v61, %v8611_v12  ;;  %v9075_v46 = vsel %vm1182_vm9, %v12263_v54, 0.0  ;;  %v9082_v31 = vpop.permute.xlu0 %3455  ;;  %v12267_v12 = vld [vmem:[#allocation179_spill] sm:$0xff]  ;;  %v9103_v11 = vpop.permute.xlu1 %2630  ;;  %v12272_v40 = vld [vmem:[#allocation85_spill] sm:$0xff] }
 0x3b5   :  { %v9079_v4 = vmul.f32 %v8833_v36, %v8871_v6  ;;  %12265 = vst [vmem:[#allocation76_spill] sm:$0xff] %v9082_v31  ;;  %v9086_v53 = vmul.f32 %v8667_v15, %v8779_v45  ;;  %v9092_v3 = vsel %vm1184_vm5, %v12267_v12, 0.0  ;;  %v9096_v2 = vpack.c.bf16 %v9023_v1, %v9059_v32  ;;  %v12269_v6 = vld [vmem:[#allocation83_spill] sm:$0xff]  ;;  %3007 = vperm.xlu1 %5968, %v8654_v62   ;;  %v12273_v36 = vld [vmem:[#allocation186_spill] sm:$0xff]  ;;  %v12275_v42 = vld [vmem:[#allocation136_spill] sm:$0xff] }
 0x3b6   :  { %12261 = vst [vmem:[#allocation67_spill] sm:$0xff] %v9065_v16  ;;  %12262 = vst [vmem:[#allocation73_spill] sm:$0xff] %v9069_v49  ;;  %v1436_v54 = vsel %vm1388_vm3, %v12269_v6, 0.0  ;;  %v1438_v12 = vsel %vm1390_vm6, %v12272_v40, 0.0  ;;  %vm1391_vm11 = vcmp.eq.s32.totalorder %v12273_v36, %v12106_v57  ;;  %v12274_v45 = vld [vmem:[#allocation203_spill] sm:$0xff]  ;;  %3547 = vperm.xlu0 %6020, %v8183_v30   ;;  %vm1557_vm15 = vcmp.eq.s32.totalorder %v12275_v42, %v12106_v57  ;;  %v12276_v6 = vld [vmem:[#allocation188_spill] sm:$0xff] }
 0x3b7   :  { %12264 = vst [vmem:[#allocation48_spill] sm:$0xff] %v9079_v4  ;;  %12266 = vst [vmem:[#allocation78_spill] sm:$0xff] %v9086_v53  ;;  %v9107_v15 = vpack.c.bf16 %v9040_v56, %v9079_v4  ;;  %vm861_vm14 = vcmp.eq.s32.totalorder %v12274_v45, %v12106_v57  ;;  %vm1393_vm0 = vcmp.eq.s32.totalorder %v12276_v6, %v12106_v57  ;;  %v12277_v33 = vld [vmem:[#allocation190_spill] sm:$0xff]  ;;  %v12278_v61 = vld [vmem:[#allocation192_spill] sm:$0xff] }
 0x3b8   :  { %12268 = vst [vmem:[#allocation79_spill] sm:$0xff] %v9096_v2  ;;  %12270 = vst [vmem:[#allocation81_spill] sm:$0xff] %v9103_v11  ;;  %vm1395_vm1 = vcmp.eq.s32.totalorder %v12277_v33, %v12106_v57  ;;  %v1437_v40 = vsel %vm1389_vm13, %v12278_v61, 0.0  ;;  %v12279_v36 = vld [vmem:[#allocation205_spill] sm:$0xff]  ;;  %v12280_v45 = vld [vmem:[#allocation194_spill] sm:$0xff]  ;;  %v9134_v33 = vpop.permute.xlu0 %3463  ;;  %vm1482_vm9 = vcmp.eq.s32.totalorder %v12287_v43, %v12106_v57 }
 0x3b9   :  { %12271 = vst [vmem:[#allocation86_spill] sm:$0xff] %v9107_v15  ;;  %vm863_vm7 = vcmp.eq.s32.totalorder %v12279_v36, %v12106_v57  ;;  %v1439_v4 = vsel %vm1391_vm11, %v12280_v45, 0.0  ;;  %v12281_v30 = vld [vmem:[#allocation200_spill] sm:$0xff]  ;;  %v12282_v56 = vld [vmem:[#allocation201_spill] sm:$0xff]  ;;  %v12283_v6 = vld [vmem:[#allocation207_spill] sm:$0xff]  ;;  %3010 = vperm.xlu1 %5968, %v8134_v29  }
 0x3ba   :  { %vm1477_vm2 = vcmp.eq.s32.totalorder %v12281_v30, %v12106_v57  ;;  %vm858_vm10 = vcmp.eq.s32.totalorder %v12282_v56, %v12106_v57  ;;  %vm865_vm8 = vcmp.eq.s32.totalorder %v12283_v6, %v12106_v57  ;;  %12284 = vst [vmem:[#allocation123_spill] sm:$0xff] %v9134_v33  ;;  %v12285_v32 = vld [vmem:[#allocation196_spill] sm:$0xff]  ;;  %v12288_v36 = vld [vmem:[#allocation211_spill] sm:$0xff]  ;;  %v9143_v30 = vpop.permute.xlu1 %2633  ;;  %v12290_v56 = vld [vmem:[#allocation198_spill] sm:$0xff]  ;;  %v1527_v14 = vadd.f32 %v8572_v38, %v1439_v4 }
 0x3bb   :  { %v1441_v1 = vsel %vm1393_vm0, %v12285_v32, 0.0  ;;  %v12286_v61 = vld [vmem:[#allocation204_spill] sm:$0xff]  ;;  %v901_v45 = vsel %vm861_vm14, %v12288_v36, 0.0  ;;  %12289 = vst [vmem:[#allocation125_spill] sm:$0xff] %v9143_v30  ;;  %v1443_v63 = vsel %vm1395_vm1, %v12290_v56, 0.0  ;;  %v12292_v31 = vld [vmem:[#allocation213_spill] sm:$0xff] }
 0x3bc   :  { %vm1480_vm13 = vcmp.eq.s32.totalorder %v12286_v61, %v12106_v57  ;;  %v12291_v18 = vld [vmem:[#allocation212_spill] sm:$0xff]  ;;  %v903_v33 = vsel %vm863_vm7, %v12292_v31, 0.0  ;;  %v12293_v49 = vld [vmem:[#allocation214_spill] sm:$0xff]  ;;  %v12297_v36 = vld [vmem:[#allocation215_spill] sm:$0xff]  ;;  %v9192_v38 = vadd.f32 %v8581_v35, %v1443_v63  ;;  %vm939_vm7 = vcmp.eq.s32.totalorder %v7994_v60, %v12106_v57 }
 0x3bd   :  { %v1520_v6 = vsel %vm1480_vm13, %v12291_v18, 0.0  ;;  %v1522_v32 = vsel %vm1482_vm9, %v12293_v49, 0.0  ;;  %v12294_v11 = vld [vmem:[#allocation20_spill] sm:$0xff]  ;;  %v12295_v61 = vld [vmem:[#allocation70_spill] sm:$0xff]  ;;  %v905_v15 = vsel %vm865_vm8, %v12297_v36, 0.0  ;;  %v12300_v31 = vld [vmem:[#allocation209_spill] sm:$0xff]  ;;  %v911_v62 = vadd.f32 %v903_v33, %v8659_v7  ;;  %5969 = vset.pattern.permute.xlu1 %v11918_v48 }
 0x3be   :  { %v1517_v53 = vsel %vm1477_vm2, %v12294_v11, 0.0  ;;  %v898_v16 = vsel %vm858_vm10, %v12295_v61, 0.0  ;;  %v12296_v43 = vld [vmem:[#allocation202_spill] sm:$0xff]  ;;  %v12298_v29 = vld [vmem:[#allocation84_spill] sm:$0xff]  ;;  %v899_v11 = vsel %vm859_vm4, %v12300_v31, 0.0  ;;  %v909_v61 = vadd.f32 %v901_v45, %v8657_v19  ;;  %v9187_v7 = vpop.permute.xlu1 %2331  ;;  %v12316_v60 = vld [vmem:[#allocation221_spill] sm:$0xff] }
 0x3bf   :  { %vm1478_vm5 = vcmp.eq.s32.totalorder %v12296_v43, %v12106_v57  ;;  %vm940_vm3 = vcmp.eq.s32.totalorder %v12298_v29, %v12106_v57  ;;  %v12299_v30 = vld [vmem:[#allocation208_spill] sm:$0xff]  ;;  %v12301_v49 = vld [vmem:[#allocation210_spill] sm:$0xff]  ;;  %v1528_v36 = vadd.f32 %v1520_v6, %v8825_v22  ;;  %v1530_v2 = vadd.f32 %v1522_v32, %v8843_v34  ;;  %12305 = vst [vmem:[#allocation87_spill] sm:$0xff] %v9187_v7  ;;  %v12326_v29 = vld [vmem:[#allocation229_spill] sm:$0xff] }
 0x3c0   :  { %v1516_v18 = vsel %vm1476_vm12, %v12299_v30, 0.0  ;;  %v1518_v56 = vsel %vm1478_vm5, %v12301_v49, 0.0  ;;  %v12302_v43 = vld [vmem:[#allocation82_spill] sm:$0xff]  ;;  %v12303_v55 = vld [vmem:[#allocation216_spill] sm:$0xff]  ;;  %v9173_v30 = vpop.permute.xlu0 %1155  ;;  %v1529_v19 = vadd.f32 %v8578_v50, %v1441_v1  ;;  %v913_v45 = vadd.f32 %v905_v15, %v8661_v10 }
 0x3c1   :  { %vm938_vm6 = vcmp.eq.s32.totalorder %v12302_v43, %v12106_v57  ;;  %vm1556_vm12 = vcmp.eq.s32.totalorder %v12303_v55, %v12106_v57  ;;  %v12304_v31 = vld [vmem:[#allocation218_spill] sm:$0xff]  ;;  %v1525_v50 = vadd.f32 %v1517_v53, %v1437_v40  ;;  %v906_v10 = vadd.f32 %v898_v16, %v8942_v13  ;;  %v12308_v49 = vld [vmem:[#allocation120_spill] sm:$0xff]  ;;  %v12330_v43 = vld [vmem:[#allocation223_spill] sm:$0xff] }
 0x3c2   :  { %vm1558_vm4 = vcmp.eq.s32.totalorder %v12304_v31, %v12106_v57  ;;  %v9184_v22 = vld [vmem:[%s11490_s1 + $0xb8] sm:$0xff]  ;;  %v1524_v1 = vadd.f32 %v1516_v18, %v1436_v54  ;;  %v907_v4 = vadd.f32 %v899_v11, %v8930_v8  ;;  %v1526_v15 = vadd.f32 %v1518_v56, %v1438_v12  ;;  %v12315_v42 = vld [vmem:[#allocation228_spill] sm:$0xff] }
 0x3c3   :  { %2571 = vperm.xlu1 %5969, %v9184_v22   ;;  %v12306_v34 = vld [vmem:[#allocation102_spill] sm:$0xff]  ;;  %v9201_v32 = vadd.f32 %v8883_v47, %v909_v61  ;;  %vm1098_vm14 = vcmp.eq.s32.totalorder %v12308_v49, %v12106_v57  ;;  %v9207_v53 = vadd.f32 %v9029_v5, %v1528_v36  ;;  %v9210_v13 = vadd.f32 %v9035_v9, %v1530_v2  ;;  %v12311_v47 = vld [vmem:[#allocation220_spill] sm:$0xff]  ;;  %v12313_v2 = vld [vmem:[#allocation219_spill] sm:$0xff] }
 0x3c4   :  { %vm1019_vm11 = vcmp.eq.s32.totalorder %v12306_v34, %v12106_v57  ;;  %v12307_v33 = vld [vmem:[#allocation154_spill] sm:$0xff]  ;;  %v9213_v8 = vadd.f32 %v8886_v17, %v911_v62  ;;  %v9215_v16 = vpop.permute.xlu0 %1164  ;;  %vm1559_vm1 = vcmp.eq.s32.totalorder %v12311_v47, %v12106_v57  ;;  %v9228_v9 = vadd.f32 %v8910_v24, %v913_v45  ;;  %v9231_v62 = vpop.permute.xlu1 %2358  ;;  %v12317_v24 = vld [vmem:[#allocation224_spill] sm:$0xff] }
 0x3c5   :  { %v1596_v6 = vsel %vm1556_vm12, %v12307_v33, 0.0  ;;  %v12309_v35 = vld [vmem:[#allocation162_spill] sm:$0xff]  ;;  %vm1639_vm2 = vcmp.eq.s32.totalorder %v12313_v2, %v12106_v57  ;;  %v1599_v18 = vsel %vm1559_vm1, %v12315_v42, 0.0  ;;  %vm1563_vm8 = vcmp.eq.s32.totalorder %v12317_v24, %v12106_v57  ;;  %v12320_v55 = vld [vmem:[#allocation92_spill] sm:$0xff] }
 0x3c6   :  { %v1598_v63 = vsel %vm1558_vm4, %v12309_v35, 0.0  ;;  %v12310_v54 = vld [vmem:[#allocation122_spill] sm:$0xff]  ;;  %v9233_v17 = vadd.f32 %v1596_v6, %v1524_v1  ;;  %v979_v45 = vsel %vm939_vm7, %v12320_v55, 0.0  ;;  %v12323_v6 = vld [vmem:[#allocation227_spill] sm:$0xff]  ;;  %v12325_v47 = vld [vmem:[#allocation264_spill] sm:$0xff]  ;;  %vm1178_vm1 = vcmp.eq.s32.totalorder %v9173_v30, %v12106_v57 }
 0x3c7   :  { %vm1100_vm0 = vcmp.eq.s32.totalorder %v12310_v54, %v12106_v57  ;;  %v12312_v12 = vld [vmem:[#allocation226_spill] sm:$0xff]  ;;  %2598 = vperm.xlu1 %5969, %v8262_v23   ;;  %v9240_v11 = vadd.f32 %v1598_v63, %v1526_v15  ;;  %v12322_v15 = vld [vmem:[#allocation303_spill] sm:$0xff]  ;;  %v9261_v35 = vsel %vm1639_vm2, %v12323_v6, 0.0  ;;  %v9263_v63 = vadd.f32 %v1599_v18, %v1527_v14  ;;  %v12331_v55 = vld [vmem:[#allocation112_spill] sm:$0xff] }
 0x3c8   :  { %v1597_v5 = vsel %vm1557_vm15, %v12312_v12, 0.0  ;;  %v12314_v40 = vld [vmem:[#allocation222_spill] sm:$0xff]  ;;  %vm1641_vm15 = vcmp.eq.s32.totalorder %v12316_v60, %v12106_v57  ;;  %vm1018_vm9 = vcmp.eq.s32.totalorder %v12322_v15, %v12106_v57  ;;  %v9258_v33 = vpop.permute.xlu0 %1170  ;;  %v978_v12 = vsel %vm938_vm6, %v12325_v47, 0.0  ;;  %v9282_v18 = vpop.permute.xlu1 %2636  ;;  %v9298_v6 = vld [vmem:[%s11491_s2 + $0xc0] sm:$0xff] }
 0x3c9   :  { %vm1561_vm10 = vcmp.eq.s32.totalorder %v12314_v40, %v12106_v57  ;;  %v12318_v23 = vld [vmem:[#allocation230_spill] sm:$0xff]  ;;  %v9249_v36 = vadd.f32 %v1597_v5, %v1525_v50  ;;  %v12324_v50 = vld [vmem:[#allocation260_spill] sm:$0xff]  ;;  %v9273_v5 = vsel %vm1641_vm15, %v12326_v29, 0.0  ;;  %v12327_v40 = vld [vmem:[#allocation305_spill] sm:$0xff]  ;;  %vm1643_vm6 = vcmp.eq.s32.totalorder %v12330_v43, %v12106_v57 }
 0x3ca   :  { %v1601_v56 = vsel %vm1561_vm10, %v12318_v23, 0.0  ;;  %v12319_v61 = vld [vmem:[#allocation142_spill] sm:$0xff]  ;;  %vm942_vm5 = vcmp.eq.s32.totalorder %v12324_v50, %v12106_v57  ;;  %v987_v60 = vadd.f32 %v979_v45, %v907_v4  ;;  %v986_v4 = vadd.f32 %v978_v12, %v906_v10  ;;  %v12335_v34 = vld [vmem:[#allocation232_spill] sm:$0xff]  ;;  %v12336_v29 = vld [vmem:[#allocation313_spill] sm:$0xff] }
 0x3cb   :  { %vm1179_vm13 = vcmp.eq.s32.totalorder %v12319_v61, %v12106_v57  ;;  %v12321_v31 = vld [vmem:[#allocation266_spill] sm:$0xff]  ;;  %5970 = vset.pattern.permute.xlu1 %v11795_v51  ;;  %v9275_v2 = vadd.f32 %v1601_v56, %v1529_v19  ;;  %v1058_v19 = vsel %vm1018_vm9, %v12331_v55, 0.0  ;;  %v12332_v56 = vld [vmem:[#allocation311_spill] sm:$0xff]  ;;  %v1603_v15 = vsel %vm1563_vm8, %v12335_v34, 0.0 }
 0x3cc   :  { %v980_v1 = vsel %vm940_vm3, %v12321_v31, 0.0  ;;  %vm1021_vm3 = vcmp.eq.s32.totalorder %v12327_v40, %v12106_v57  ;;  %v12328_v14 = vld [vmem:[#allocation366_spill] sm:$0xff]  ;;  %v1059_v31 = vsel %vm1019_vm11, %v12332_v56, 0.0  ;;  %v1066_v55 = vadd.f32 %v1058_v19, %v986_v4  ;;  %v12339_v56 = vld [vmem:[#allocation307_spill] sm:$0xff]  ;;  %v9333_v34 = vpop.permute.xlu1 %2662 }
 0x3cd   :  { %vm1099_vm12 = vcmp.eq.s32.totalorder %v12328_v14, %v12106_v57  ;;  %v12329_v42 = vld [vmem:[#allocation30_spill] sm:$0xff]  ;;  %v988_v23 = vadd.f32 %v980_v1, %v8960_v28  ;;  %v12334_v28 = vld [vmem:[#allocation267_spill] sm:$0xff]  ;;  %v9308_v1 = vpop.permute.xlu0 %1176  ;;  %v1061_v10 = vsel %vm1021_vm3, %v12336_v29, 0.0  ;;  %vm1023_vm11 = vcmp.eq.s32.totalorder %v12339_v56, %v12106_v57  ;;  %v12341_v29 = vld [vmem:[#allocation269_spill] sm:$0xff] }
 0x3ce   :  { %2925 = vperm.xlu1 %5970, %v12329_v42   ;;  %v12333_v47 = vld [vmem:[#allocation262_spill] sm:$0xff]  ;;  %v982_v45 = vsel %vm942_vm5, %v12334_v28, 0.0  ;;  %v12338_v42 = vld [vmem:[#allocation371_spill] sm:$0xff]  ;;  %v1067_v24 = vadd.f32 %v1059_v31, %v987_v60  ;;  %v12340_v28 = vld [vmem:[#allocation373_spill] sm:$0xff]  ;;  %v1069_v54 = vadd.f32 %v1061_v10, %v9201_v32  ;;  %vm1181_vm10 = vcmp.eq.s32.totalorder %v9215_v16, %v12106_v57 }
 0x3cf   :  { %vm944_vm4 = vcmp.eq.s32.totalorder %v12333_v47, %v12106_v57  ;;  %v12337_v12 = vld [vmem:[#allocation130_spill] sm:$0xff]  ;;  %v1138_v30 = vsel %vm1098_vm14, %v12338_v42, 0.0  ;;  %v1140_v40 = vsel %vm1100_vm0, %v12340_v28, 0.0  ;;  %v990_v14 = vadd.f32 %v982_v45, %v8970_v58  ;;  %v12343_v31 = vld [vmem:[#allocation217_spill] sm:$0xff]  ;;  %v12344_v42 = vld [vmem:[#allocation368_spill] sm:$0xff] }
 0x3d0   :  { %v1139_v50 = vsel %vm1099_vm12, %v12337_v12, 0.0  ;;  %v984_v49 = vsel %vm944_vm4, %v12341_v29, 0.0  ;;  %v1068_v19 = vadd.f32 %v8921_v25, %v988_v23  ;;  %v12342_v4 = vld [vmem:[#allocation170_spill] sm:$0xff]  ;;  %vm1636_vm14 = vcmp.eq.s32.totalorder %v12343_v31, %v12106_v57  ;;  %v12346_v47 = vld [vmem:[#allocation315_spill] sm:$0xff]  ;;  %v12347_v32 = vld [vmem:[#allocation309_spill] sm:$0xff] }
 0x3d1   :  { %v1218_v60 = vsel %vm1178_vm1, %v12342_v4, 0.0  ;;  %v1147_v12 = vadd.f32 %v1139_v50, %v1067_v24  ;;  %vm1102_vm0 = vcmp.eq.s32.totalorder %v12344_v42, %v12106_v57  ;;  %v1146_v28 = vadd.f32 %v1138_v30, %v1066_v55  ;;  %v1192_v58 = vpop.permute.xlu0 %1191  ;;  %v12345_v45 = vld [vmem:[#allocation234_spill] sm:$0xff]  ;;  %v12348_v50 = vld [vmem:[#allocation32_spill] sm:$0xff]  ;;  %v9361_v30 = vpop.permute.xlu1 %2666  ;;  %v12367_v31 = vld [vmem:[#allocation273_spill] sm:$0xff] }
 0x3d2   :  { %2952 = vperm.xlu1 %5970, %v9298_v6   ;;  %vm1637_vm7 = vcmp.eq.s32.totalorder %v12345_v45, %v12106_v57  ;;  %v1063_v25 = vsel %vm1023_vm11, %v12346_v47, 0.0  ;;  %v1148_v23 = vadd.f32 %v1140_v40, %v1068_v19  ;;  %v1219_v29 = vsel %vm1179_vm13, %v1192_v58, 0.0  ;;  %v12349_v40 = vld [vmem:[#allocation375_spill] sm:$0xff]  ;;  %v12350_v4 = vld [vmem:[#allocation370_spill] sm:$0xff]  ;;  %v12354_v16 = vld [vmem:[#allocation236_spill] sm:$0xff] }
 0x3d3   :  { %vm1025_vm2 = vcmp.eq.s32.totalorder %v12347_v32, %v12106_v57  ;;  %v1227_v10 = vadd.f32 %v1219_v29, %v1147_v12  ;;  %v1226_v55 = vadd.f32 %v1218_v60, %v1146_v28  ;;  %v992_v56 = vadd.f32 %v984_v49, %v8973_v27  ;;  %v12351_v29 = vld [vmem:[#allocation316_spill] sm:$0xff]  ;;  %v12356_v28 = vld [vmem:[#allocation341_spill] sm:$0xff] }
 0x3d4   :  { %v1070_v24 = vadd.f32 %v8924_v59, %v990_v14  ;;  %v1142_v19 = vsel %vm1102_vm0, %v12349_v40, 0.0  ;;  %vm1242_vm15 = vcmask 523264   ;;  %v1071_v61 = vadd.f32 %v1063_v25, %v9213_v8  ;;  %v12352_v14 = vld [vmem:[#allocation231_spill] sm:$0xff] }
 0x3d5   :  { %vm1104_vm8 = vcmp.eq.s32.totalorder %v12350_v4, %v12106_v57  ;;  %v1149_v42 = vadd.f32 %v8953_v20, %v1069_v54  ;;  %v1200_v12 = vpop.permute.xlu0 %1199  ;;  %v1234_v58 = vpack.c.bf16 %v1227_v10, %v1226_v55  ;;  %v1611_v47 = vadd.f32 %v1603_v15, %v9192_v38  ;;  %v12353_v38 = vld [vmem:[#allocation225_spill] sm:$0xff]  ;;  %v9400_v25 = vpop.permute.xlu1 %2370  ;;  %v12358_v55 = vld [vmem:[#allocation135_spill] sm:$0xff] }
 0x3d6   :  { %2957 = vperm.xlu1 %5970, %v12348_v50   ;;  %v1065_v27 = vsel %vm1025_vm2, %v12351_v29, 0.0  ;;  %v1228_v59 = vadd.f32 %v9055_v41, %v1148_v23  ;;  %v1221_v8 = vsel %vm1181_vm10, %v1200_v12, 0.0  ;;  %v1683_v20 = vsel %vm1643_vm6, %v12352_v14, 0.0  ;;  %v12355_v15 = vld [vmem:[#allocation377_spill] sm:$0xff]  ;;  %12357 = vst [vmem:[#allocation121_spill] sm:$0xff] %v9400_v25  ;;  %v12369_v14 = vld [vmem:[#allocation252_spill] sm:$0xff] }
 0x3d7   :  { %v1150_v49 = vadd.f32 %v1142_v19, %v1070_v24  ;;  %v1229_v60 = vadd.f32 %v1221_v8, %v1149_v42  ;;  %5724 = vmatprep.mubr.msk.bf16.mxu1 %vm1242_vm15, %v1234_v58  ;;  %vm1183_vm13 = vcmp.eq.s32.totalorder %v9258_v33, %v12106_v57  ;;  %v1677_v41 = vsel %vm1637_vm7, %v12353_v38, 0.0  ;;  %v12363_v33 = vld [vmem:[#allocation174_spill] sm:$0xff]  ;;  %v12368_v8 = vld [vmem:[#allocation275_spill] sm:$0xff] }
 0x3d8   :  { %vm1638_vm9 = vcmp.eq.s32.totalorder %v12354_v16, %v12106_v57  ;;  %v1687_v43 = vadd.f32 %v9261_v35, %v9263_v63  ;;  %v1144_v54 = vsel %vm1104_vm8, %v12355_v15, 0.0  ;;  %v1073_v23 = vadd.f32 %v1065_v27, %v9228_v9  ;;  %v12359_v35 = vld [vmem:[#allocation244_spill] sm:$0xff]  ;;  %v12364_v42 = vld [vmem:[#allocation246_spill] sm:$0xff]  ;;  %v12374_v16 = vld [vmem:[#allocation271_spill] sm:$0xff] }
 0x3d9   :  { %v1072_v45 = vadd.f32 %v8927_v52, %v992_v56  ;;  %v1235_v32 = vpack.c.bf16 %v1229_v60, %v1228_v59  ;;  %v1151_v10 = vadd.f32 %v8963_v39, %v1071_v61  ;;  %v1208_v50 = vpop.permute.xlu0 %1207  ;;  %vm2883_vm5 = vcmp.lt.s32.totalorder %v12358_v55, %v8817_v0  ;;  %v12360_v61 = vld [vmem:[#allocation238_spill] sm:$0xff]  ;;  %v9432_v29 = vpop.permute.xlu1 %2402  ;;  %v12366_v27 = vld [vmem:[#allocation248_spill] sm:$0xff]  ;;  %v12375_v15 = vld [vmem:[#allocation279_spill] sm:$0xff] }
 0x3da   :  { %5971 = vset.pattern.permute.xlu1 %v11818_v26  ;;  %v1678_v63 = vsel %vm1638_vm9, %v12359_v35, 0.0  ;;  %v1689_v24 = vadd.f32 %v9273_v5, %v9275_v2  ;;  %v1691_v40 = vadd.f32 %v1683_v20, %v1611_v47  ;;  %v1223_v19 = vsel %vm1183_vm13, %v1208_v50, 0.0  ;;  %v12361_v5 = vld [vmem:[#allocation240_spill] sm:$0xff]  ;;  %v12362_v2 = vld [vmem:[#allocation242_spill] sm:$0xff]  ;;  %12365 = vst [vmem:[#allocation88_spill] sm:$0xff] %v9432_v29 }
 0x3db   :  { %3016 = vperm.xlu1 %5971, %v12356_v28   ;;  %v1230_v9 = vadd.f32 %v9075_v46, %v1150_v49  ;;  %v1152_v52 = vadd.f32 %v1144_v54, %v1072_v45  ;;  %v1231_v56 = vadd.f32 %v1223_v19, %v1151_v10  ;;  %5725 = vmatmul.mubr.msk.bf16.vlgmr.msra.gmra.mxu1 %vm1242_vm15, %v1235_v32  ;;  %v1676_v46 = vsel %vm1636_vm14, %v12362_v2, 0.0  ;;  %v12371_v60 = vld [vmem:[#allocation256_spill] sm:$0xff]  ;;  %v12372_v38 = vld [vmem:[#allocation258_spill] sm:$0xff]  ;;  %v12376_v54 = vld [vmem:[#allocation281_spill] sm:$0xff] }
 0x3dc   :  { %vm1185_vm3 = vcmp.eq.s32.totalorder %v9308_v1, %v12106_v57  ;;  %v1685_v39 = vadd.f32 %v1677_v41, %v9249_v36  ;;  %vm1640_vm12 = vcmp.eq.s32.totalorder %v12360_v61, %v12106_v57  ;;  %vm1642_vm6 = vcmp.eq.s32.totalorder %v12361_v5, %v12106_v57  ;;  %5733 = vmatpush3.bf16.msra.mxu1 %v12363_v33  ;;  %v12373_v41 = vld [vmem:[#allocation261_spill] sm:$0xff]  ;;  %v12378_v10 = vld [vmem:[#allocation47_spill] sm:$0xff]  ;;  %v12381_v2 = vld [vmem:[#allocation250_spill] sm:$0xff] }
 0x3dd   :  { %v1686_v4 = vadd.f32 %v1678_v63, %v9240_v11  ;;  %v1680_v12 = vsel %vm1640_vm12, %v12364_v42, 0.0  ;;  %v1236_v36 = vpack.c.bf16 %v1231_v56, %v1230_v9  ;;  %5734 = vmatprep.subr.bf16.mxu1 %v9049_v37  ;;  %v1153_v58 = vadd.f32 %v8995_v21, %v1073_v23  ;;  %v1216_v47 = vpop.permute.xlu0 %1215  ;;  %v12370_v21 = vld [vmem:[#allocation254_spill] sm:$0xff]  ;;  %v12377_v23 = vld [vmem:[#allocation283_spill] sm:$0xff]  ;;  %v9479_v61 = vpop.permute.xlu1 %2670  ;;  %v12389_v55 = vld [vmem:[#allocation272_spill] sm:$0xff] }
 0x3de   :  { %v1682_v59 = vsel %vm1642_vm6, %v12366_v27, 0.0  ;;  %vm1720_vm4 = vcmp.eq.s32.totalorder %v12367_v31, %v12106_v57  ;;  %vm1722_vm1 = vcmp.eq.s32.totalorder %v12368_v8, %v12106_v57  ;;  %v1225_v11 = vsel %vm1185_vm3, %v1216_v47, 0.0  ;;  %v9466_v35 = vld [vmem:[%s11491_s2 + $0xb0] sm:$0xff]  ;;  %v12379_v19 = vld [vmem:[#allocation263_spill] sm:$0xff]  ;;  %v9491_v42 = vpop.f32.mrf.mxu0  ;;  %v12386_v31 = vld [vmem:[#allocation268_spill] sm:$0xff] }
 0x3df   :  { %3039 = vperm.xlu1 %5971, %v9298_v6   ;;  %vm1718_vm11 = vcmp.eq.s32.totalorder %v12369_v14, %v12106_v57  ;;  %vm1719_vm14 = vcmp.eq.s32.totalorder %v12370_v21, %v12106_v57  ;;  %v1232_v20 = vadd.f32 %v9092_v3, %v1152_v52  ;;  %v1233_v49 = vadd.f32 %v1225_v11, %v1153_v58  ;;  %v12380_v52 = vld [vmem:[#allocation265_spill] sm:$0xff]  ;;  %v12388_v11 = vld [vmem:[#allocation270_spill] sm:$0xff] }
 0x3e0   :  { %5728 = vmatprep.mubr.msk.bf16.mxu1 %vm1242_vm15, %v1236_v36  ;;  %vm1721_vm0 = vcmp.eq.s32.totalorder %v12371_v60, %v12106_v57  ;;  %vm1723_vm7 = vcmp.eq.s32.totalorder %v12372_v38, %v12106_v57  ;;  %v1759_v1 = vsel %vm1719_vm14, %v12373_v41, 0.0  ;;  %vm1717_vm2 = vcmp.eq.s32.totalorder %v12374_v16, %v12106_v57  ;;  %5735 = vmatpush3.bf16.msra.mxu1 %v9049_v37  ;;  %v12393_v38 = vld [vmem:[#allocation280_spill] sm:$0xff] }
 0x3e1   :  { %v1758_v3 = vsel %vm1718_vm11, %v12375_v15, 0.0  ;;  %v1760_v28 = vsel %vm1720_vm4, %v12376_v54, 0.0  ;;  %v1762_v45 = vsel %vm1722_vm1, %v12377_v23, 0.0  ;;  %v1237_v32 = vpack.c.bf16 %v1233_v49, %v1232_v20  ;;  %5736 = vmatprep.subr.bf16.mxu1 %v12378_v10  ;;  %v9461_v50 = vpop.permute.xlu0 %1933  ;;  %v9518_v21 = vpop.permute.xlu1 %2674  ;;  %v12392_v49 = vld [vmem:[#allocation278_spill] sm:$0xff]  ;;  %v12396_v23 = vld [vmem:[#allocation91_spill] sm:$0xff] }
 0x3e2   :  { %v1688_v37 = vadd.f32 %v1680_v12, %v9207_v53  ;;  %v1690_v63 = vadd.f32 %v1682_v59, %v9210_v13  ;;  %v1761_v9 = vsel %vm1721_vm0, %v12379_v19, 0.0  ;;  %v1763_v56 = vsel %vm1723_vm7, %v12380_v52, 0.0  ;;  %v12382_v13 = vld [vmem:[#allocation259_spill] sm:$0xff]  ;;  %v12383_v12 = vld [vmem:[#allocation277_spill] sm:$0xff]  ;;  %v9523_v15 = vpop.f32.mrf.mxu0 }
 0x3e3   :  { %5972 = vset.pattern.permute.xlu1 %v11918_v48  ;;  %v1684_v5 = vadd.f32 %v1676_v46, %v9233_v17  ;;  %vm1716_vm10 = vcmp.eq.s32.totalorder %v12381_v2, %v12106_v57  ;;  %v9484_v53 = vadd.f32 %v1759_v1, %v1687_v43  ;;  %v1757_v33 = vsel %vm1717_vm2, %v12382_v13, 0.0  ;;  %5729 = vmatmul.mubr.msk.bf16.gmra.mxu1 %vm1242_vm15, %v1237_v32  ;;  %v12394_v1 = vld [vmem:[#allocation282_spill] sm:$0xff]  ;;  %v12398_v32 = vld [vmem:[#allocation288_spill] sm:$0xff] }
 0x3e4   :  { %2606 = vperm.xlu1 %5972, %v9466_v35   ;;  %v1756_v36 = vsel %vm1716_vm10, %v12383_v12, 0.0  ;;  %v1766_v58 = vadd.f32 %v1758_v3, %v1686_v4  ;;  %v1768_v47 = vadd.f32 %v1760_v28, %v1688_v37  ;;  %v1770_v27 = vadd.f32 %v1762_v45, %v1690_v63  ;;  %5737 = vmatpush3.bf16.msra.mxu1 %v12378_v10  ;;  %v12397_v45 = vld [vmem:[#allocation286_spill] sm:$0xff]  ;;  %v12399_v10 = vld [vmem:[#allocation289_spill] sm:$0xff]  ;;  %v12401_v63 = vld [vmem:[#allocation79_spill] sm:$0xff] }
 0x3e5   :  { %v12384_v17 = vmov 0.0   ;;  %v9501_v46 = vadd.f32 %v1761_v9, %v1689_v24  ;;  %v9503_v59 = vadd.f32 %v1763_v56, %v1691_v40  ;;  %vm1797_vm8 = vcmp.eq.s32.totalorder %v12386_v31, %v12106_v57  ;;  %5738 = vmatprep.subr.bf16.mxu1 %v9014_v44  ;;  %v9508_v4 = vpop.permute.xlu0 %1942  ;;  %v12390_v24 = vld [vmem:[#allocation274_spill] sm:$0xff]  ;;  %v12391_v40 = vld [vmem:[#allocation363_spill] sm:$0xff]  ;;  %v6267_v2 = vld [vmem:[%s11490_s1 + $0xa8] sm:$0xff] }
 0x3e6   :  { %v9499_v43 = vsel %vm2883_vm5, 1.0, %v12384_v17  ;;  %v12387_v8 = vmov 6   ;;  %vm1798_vm13 = vcmp.eq.s32.totalorder %v12388_v11, %v12106_v57  ;;  %v1765_v14 = vadd.f32 %v1757_v33, %v1685_v39  ;;  %v12395_v39 = vld [vmem:[#allocation284_spill] sm:$0xff]  ;;  %v12400_v37 = vld [vmem:[#allocation318_spill] sm:$0xff]  ;;  %v9565_v11 = vpop.f32.mrf.mxu0  ;;  %v12418_v31 = vld [vmem:[#allocation109_spill] sm:$0xff] }
 0x3e7   :  { %12385 = vst [vmem:[#allocation89_spill] sm:$0xff] %v9499_v43  ;;  %vm1800_vm9 = vcmp.eq.s32.totalorder %v12389_v55, %v12106_v57  ;;  %vm1802_vm5 = vcmp.eq.s32.totalorder %v12390_v24, %v12106_v57  ;;  %v1764_v20 = vadd.f32 %v1756_v36, %v1684_v5  ;;  %v1838_v60 = vsel %vm1798_vm13, %v12392_v49, 0.0  ;;  %v12403_v9 = vld [vmem:[#allocation294_spill] sm:$0xff]  ;;  %v12406_v13 = vld [vmem:[#allocation296_spill] sm:$0xff]  ;;  %v12410_v55 = vld [vmem:[#allocation301_spill] sm:$0xff] }
 0x3e8   :  { %5973 = vset.pattern.permute.xlu1 %v12387_v8  ;;  %v1840_v41 = vsel %vm1800_vm9, %v12393_v38, 0.0  ;;  %v1842_v16 = vsel %vm1802_vm5, %v12394_v1, 0.0  ;;  %vm1876_vm3 = vcmp.eq.s32.totalorder %v12395_v39, %v12106_v57  ;;  %v1846_v3 = vadd.f32 %v1838_v60, %v1766_v58  ;;  %5739 = vmatpush3.bf16.msra.mxu1 %v9014_v44  ;;  %v12402_v44 = vld [vmem:[#allocation290_spill] sm:$0xff]  ;;  %v12408_v58 = vld [vmem:[#allocation320_spill] sm:$0xff] }
 0x3e9   :  { %2642 = vperm.xlu1 %5973, %v12391_v40   ;;  %v9527_v54 = vadd.f32 %v1840_v41, %v1768_v47  ;;  %v9529_v28 = vadd.f32 %v1842_v16, %v1770_v27  ;;  %vm2166_vm12 = vcmp.eq.s32.totalorder %v12396_v23, %v12106_v57  ;;  %vm1878_vm6 = vcmp.eq.s32.totalorder %v12397_v45, %v12106_v57  ;;  %v1949_v19 = vpop.permute.xlu0 %1948  ;;  %v12404_v56 = vld [vmem:[#allocation310_spill] sm:$0xff]  ;;  %v12409_v47 = vld [vmem:[#allocation379_spill] sm:$0xff]  ;;  %v9563_v27 = vpop.permute.xlu1 %2713  ;;  %v12411_v24 = vld [vmem:[#allocation276_spill] sm:$0xff] }
 0x3ea   :  { %vm1879_vm4 = vcmp.eq.s32.totalorder %v12398_v32, %v12106_v57  ;;  %vm1881_vm1 = vcmp.eq.s32.totalorder %v12399_v10, %v12106_v57  ;;  %vm1796_vm11 = vcmp.eq.s32.totalorder %v12400_v37, %v12106_v57  ;;  %5748 = vmatprep.subr.bf16.mxu1 %v12401_v63  ;;  %vm1883_vm14 = vcmp.eq.s32.totalorder %v12402_v44, %v12106_v57  ;;  %v12405_v5 = vld [vmem:[#allocation322_spill] sm:$0xff]  ;;  %v12413_v38 = vld [vmem:[#allocation104_spill] sm:$0xff]  ;;  %v12434_v23 = vld [vmem:[#allocation331_spill] sm:$0xff] }
 0x3eb   :  { %v9546_v52 = vsel %vm1879_vm4, %v12403_v9, 0.0  ;;  %vm2165_vm0 = vcmp.eq.s32.totalorder %v12404_v56, %v12106_v57  ;;  %vm1801_vm7 = vcmp.eq.s32.totalorder %v12405_v5, %v12106_v57  ;;  %v1921_v33 = vsel %vm1881_vm1, %v12406_v13, 0.0  ;;  %v12407_v12 = vld [vmem:[#allocation298_spill] sm:$0xff]  ;;  %v12414_v41 = vld [vmem:[#allocation308_spill] sm:$0xff] }
 0x3ec   :  { %v9557_v36 = vsel %vm1883_vm14, %v12407_v12, 0.0  ;;  %vm1799_vm2 = vcmp.eq.s32.totalorder %v12408_v58, %v12106_v57  ;;  %vm1877_vm10 = vcmp.eq.s32.totalorder %v12409_v47, %v12106_v57  ;;  %vm1958_vm13 = vcmp.eq.s32.totalorder %v12410_v55, %v12106_v57  ;;  %v12412_v49 = vld [vmem:[#allocation326_spill] sm:$0xff]  ;;  %v12415_v16 = vld [vmem:[#allocation96_spill] sm:$0xff]  ;;  %v12421_v12 = vld [vmem:[#allocation381_spill] sm:$0xff] }
 0x3ed   :  { %2645 = vperm.xlu1 %5973, %v6267_v2   ;;  %v1836_v40 = vsel %vm1796_vm11, %v12411_v24, 0.0  ;;  %v1837_v60 = vsel %vm1797_vm8, %v12412_v49, 0.0  ;;  %vm1957_vm9 = vcmp.eq.s32.totalorder %v12413_v38, %v12106_v57  ;;  %v1998_v1 = vsel %vm1958_vm13, %v12414_v41, 0.0  ;;  %v12416_v10 = vld [vmem:[#allocation330_spill] sm:$0xff]  ;;  %v9586_v37 = vpop.permute.xlu0 %1954  ;;  %v12417_v9 = vld [vmem:[#allocation176_spill] sm:$0xff]  ;;  %v12423_v55 = vld [vmem:[#allocation233_spill] sm:$0xff] }
 0x3ee   :  { %v9581_v32 = vsel %vm2165_vm0, %v12415_v16, 0.0  ;;  %v1841_v44 = vsel %vm1801_vm7, %v12416_v10, 0.0  ;;  %vm1956_vm5 = vcmp.eq.s32.totalorder %v9461_v50, %v12106_v57  ;;  %vm2333_vm4 = vcmp.eq.s32.totalorder %v12417_v9, %v12106_v57  ;;  %v12419_v56 = vld [vmem:[#allocation328_spill] sm:$0xff]  ;;  %v12422_v58 = vld [vmem:[#allocation38_spill] sm:$0xff] }
 0x3ef   :  { %vm1960_vm8 = vcmp.eq.s32.totalorder %v12418_v31, %v12106_v57  ;;  %v1839_v5 = vsel %vm1799_vm2, %v12419_v56, 0.0  ;;  %v12420_v2 = vld [vmem:[#allocation292_spill] sm:$0xff]  ;;  %vm1880_vm1 = vcmp.eq.s32.totalorder %v12421_v12, %v12106_v57  ;;  %v1916_v47 = vsel %vm1876_vm3, %v12422_v58, 0.0  ;;  %v12424_v24 = vld [vmem:[#allocation314_spill] sm:$0xff]  ;;  %v9615_v56 = vpop.f32.mrf.mxu0 }
 0x3f0   :  { %v1917_v13 = vsel %vm1877_vm10, %v12420_v2, 0.0  ;;  %vm2414_vm11 = vcmp.eq.s32.totalorder %v12423_v55, %v12106_v57  ;;  %vm2254_vm14 = vcmp.eq.s32.totalorder %v12424_v24, %v12106_v57  ;;  %v1844_v49 = vadd.f32 %v1836_v40, %v1764_v20  ;;  %v12425_v16 = vld [vmem:[#allocation10_spill] sm:$0xff]  ;;  %v12426_v2 = vld [vmem:[#allocation324_spill] sm:$0xff]  ;;  %v9625_v40 = vpop.permute.xlu1 %2408  ;;  %v12449_v55 = vld [vmem:[#allocation25_spill] sm:$0xff] }
 0x3f1   :  { %5974 = vset.pattern.permute.xlu1 %v11795_v51  ;;  %v1845_v41 = vadd.f32 %v1837_v60, %v1765_v14  ;;  %v1918_v10 = vsel %vm1878_vm6, %v12425_v16, 0.0  ;;  %v9612_v39 = vld [vmem:[%s11491_s2 + $0xd8] sm:$0xff]  ;;  %vm1803_vm3 = vcmp.eq.s32.totalorder %v12426_v2, %v12106_v57  ;;  %v1849_v20 = vadd.f32 %v1841_v44, %v9501_v46  ;;  %v1970_v29 = vpop.permute.xlu0 %1969  ;;  %v12429_v46 = vld [vmem:[#allocation304_spill] sm:$0xff] }
 0x3f2   :  { %2967 = vperm.xlu1 %5974, %v9612_v39   ;;  %v12427_v14 = vld [vmem:[#allocation306_spill] sm:$0xff]  ;;  %vm1961_vm6 = vcmp.eq.s32.totalorder %v1949_v19, %v12106_v57  ;;  %v1847_v60 = vadd.f32 %v1839_v5, %v9484_v53  ;;  %v1924_v58 = vadd.f32 %v1916_v47, %v1844_v49  ;;  %v12428_v16 = vld [vmem:[#allocation11_spill] sm:$0xff]  ;;  %vm1962_vm0 = vcmp.eq.s32.totalorder %v12429_v46, %v12106_v57  ;;  %v12430_v50 = vld [vmem:[#allocation312_spill] sm:$0xff] }
 0x3f3   :  { %v1996_v45 = vsel %vm1956_vm5, %v12427_v14, 0.0  ;;  %v1920_v25 = vsel %vm1880_vm1, %v12428_v16, 0.0  ;;  %v1925_v7 = vadd.f32 %v1917_v13, %v1845_v41  ;;  %vm2253_vm7 = vcmp.eq.s32.totalorder %v12430_v50, %v12106_v57  ;;  %v12431_v44 = vld [vmem:[#allocation319_spill] sm:$0xff]  ;;  %v12432_v13 = vld [vmem:[#allocation345_spill] sm:$0xff]  ;;  %v9647_v41 = vpop.f32.mrf.mxu0  ;;  %v12440_v50 = vld [vmem:[#allocation180_spill] sm:$0xff] }
 0x3f4   :  { %v2214_v19 = vsel %vm2166_vm12, %v12431_v44, 0.0  ;;  %v1926_v53 = vadd.f32 %v1918_v10, %v1846_v3  ;;  %v1997_v5 = vsel %vm1957_vm9, %v1970_v29, 0.0  ;;  %v2004_v12 = vadd.f32 %v1996_v45, %v1924_v58  ;;  %v12433_v14 = vld [vmem:[#allocation27_spill] sm:$0xff]  ;;  %v12435_v45 = vld [vmem:[#allocation57_spill] sm:$0xff]  ;;  %v12436_v58 = vld [vmem:[#allocation332_spill] sm:$0xff] }
 0x3f5   :  { %vm1959_vm2 = vcmp.eq.s32.totalorder %v9508_v4, %v12106_v57  ;;  %v2001_v47 = vsel %vm1961_vm6, %v12432_v13, 0.0  ;;  %v2005_v49 = vadd.f32 %v1997_v5, %v1925_v7  ;;  %v2294_v3 = vsel %vm2254_vm14, %v12433_v14, 0.0  ;;  %v9659_v7 = vpop.permute.xlu1 %2438  ;;  %v12437_v16 = vld [vmem:[#allocation383_spill] sm:$0xff]  ;;  %v1978_v5 = vpop.permute.xlu0 %1977  ;;  %v12450_v46 = vld [vmem:[#allocation356_spill] sm:$0xff] }
 0x3f6   :  { %5975 = vset.pattern.permute.xlu1 %v11818_v26  ;;  %v1843_v29 = vsel %vm1803_vm3, %v12434_v23, 0.0  ;;  %v1928_v38 = vadd.f32 %v1920_v25, %v9527_v54  ;;  %v1929_v10 = vadd.f32 %v1921_v33, %v1849_v20  ;;  %vm2334_vm12 = vcmp.eq.s32.totalorder %v12436_v58, %v12106_v57  ;;  %v12438_v2 = vld [vmem:[#allocation323_spill] sm:$0xff] }
 0x3f7   :  { %3047 = vperm.xlu1 %5975, %v12435_v45   ;;  %vm1882_vm10 = vcmp.eq.s32.totalorder %v12437_v16, %v12106_v57  ;;  %v2012_v24 = vpack.c.bf16 %v2005_v49, %v2004_v12  ;;  %v1927_v44 = vadd.f32 %v9546_v52, %v1847_v60  ;;  %v2302_v13 = vadd.f32 %v2294_v3, %v2214_v19  ;;  %v12439_v14 = vld [vmem:[#allocation343_spill] sm:$0xff]  ;;  %v9679_v19 = vpop.f32.mrf.mxu0  ;;  %v12442_v3 = vld [vmem:[#allocation40_spill] sm:$0xff]  ;;  %v12447_v16 = vld [vmem:[#allocation349_spill] sm:$0xff] }
 0x3f8   :  { %v2293_v25 = vsel %vm2253_vm7, %v12438_v2, 0.0  ;;  %v2009_v54 = vadd.f32 %v2001_v47, %v1929_v10  ;;  %v1999_v33 = vsel %vm1959_vm2, %v1978_v5, 0.0  ;;  %v1851_v20 = vadd.f32 %v1843_v29, %v9503_v59  ;;  %v12441_v47 = vld [vmem:[#allocation340_spill] sm:$0xff]  ;;  %v12445_v29 = vld [vmem:[#allocation358_spill] sm:$0xff]  ;;  %v12446_v45 = vld [vmem:[#allocation15_spill] sm:$0xff] }
 0x3f9   :  { %v2000_v12 = vsel %vm1960_vm8, %v12439_v14, 0.0  ;;  %v2006_v52 = vadd.f32 %v1998_v1, %v1926_v53  ;;  %v2007_v60 = vadd.f32 %v1999_v33, %v1927_v44  ;;  %5740 = vmatprep.mubr.msk.bf16.mxu1 %vm1242_vm15, %v2012_v24  ;;  %v2374_v49 = vsel %vm2334_vm12, %v12440_v50, 0.0  ;;  %v9689_v31 = vpop.permute.xlu1 %2442  ;;  %v12444_v1 = vld [vmem:[#allocation335_spill] sm:$0xff]  ;;  %v1990_v10 = vpop.permute.xlu0 %1989  ;;  %v12448_v2 = vld [vmem:[#allocation237_spill] sm:$0xff]  ;;  %v12455_v50 = vld [vmem:[#allocation362_spill] sm:$0xff] }
 0x3fa   :  { %vm2413_vm13 = vcmp.eq.s32.totalorder %v12441_v47, %v12106_v57  ;;  %v2008_v4 = vadd.f32 %v2000_v12, %v1928_v38  ;;  %v1922_v59 = vsel %vm1882_vm10, %v12442_v3, 0.0  ;;  %v12443_v23 = vmov 2  }
 0x3fb   :  { %5976 = vset.pattern.permute.xlu1 %v12443_v23  ;;  %v2373_v53 = vsel %vm2333_vm4, %v12444_v1, 0.0  ;;  %vm2494_vm9 = vcmp.eq.s32.totalorder %v12445_v29, %v12106_v57  ;;  %vm1963_vm5 = vcmp.eq.s32.totalorder %v9586_v37, %v12106_v57  ;;  %v2013_v38 = vpack.c.bf16 %v2007_v60, %v2006_v52  ;;  %v12452_v52 = vld [vmem:[#allocation351_spill] sm:$0xff]  ;;  %v9738_v37 = vld [vmem:[%s11490_s1 + $0xc8] sm:$0xff]  ;;  %v12458_v1 = vld [vmem:[#allocation78_spill] sm:$0xff] }
 0x3fc   :  { %3087 = vperm.xlu1 %5976, %v12446_v45   ;;  %v2301_v58 = vadd.f32 %v2293_v25, %v9581_v32  ;;  %v2454_v24 = vsel %vm2414_vm11, %v12447_v16, 0.0  ;;  %v2014_v44 = vpack.c.bf16 %v2009_v54, %v2008_v4  ;;  %v2002_v9 = vsel %vm1962_vm0, %v1990_v10, 0.0  ;;  %v5715_v25 = vpop.f32.mrf.mxu0  ;;  %v12456_v4 = vld [vmem:[#allocation86_spill] sm:$0xff]  ;;  %v12461_v10 = vld [vmem:[#allocation41_spill] sm:$0xff] }
 0x3fd   :  { %v2382_v5 = vadd.f32 %v2374_v49, %v2302_v13  ;;  %v2453_v33 = vsel %vm2413_vm13, %v12448_v2, 0.0  ;;  %v1930_v14 = vadd.f32 %v1922_v59, %v9529_v28  ;;  %v1931_v32 = vadd.f32 %v9557_v36, %v1851_v20  ;;  %5741 = vmatmul.mubr.msk.bf16.vlgmr.msra.gmra.mxu1 %vm1242_vm15, %v2013_v38  ;;  %v12451_v13 = vld [vmem:[#allocation287_spill] sm:$0xff]  ;;  %v12453_v36 = vld [vmem:[#allocation93_spill] sm:$0xff]  ;;  %v12454_v20 = vld [vmem:[#allocation334_spill] sm:$0xff]  ;;  %v2711_v3 = vpop.permute.xlu0 %2710 }
 0x3fe   :  { %vm2255_vm4 = vcmp.eq.s32.totalorder %v12449_v55, %v12106_v57  ;;  %v2381_v54 = vadd.f32 %v2373_v53, %v2301_v58  ;;  %vm2493_vm8 = vcmp.eq.s32.totalorder %v12450_v46, %v12106_v57  ;;  %v2534_v12 = vsel %vm2494_vm9, %v12451_v13, 0.0  ;;  %5749 = vmatpush3.bf16.msra.mxu1 %v12401_v63  ;;  %5744 = vmatprep.mubr.msk.bf16.mxu1 %vm1242_vm15, %v2014_v44  ;;  %v9741_v63 = vpop.permute.xlu1 %2719  ;;  %v12457_v59 = vld [vmem:[#allocation67_spill] sm:$0xff]  ;;  %v12459_v29 = vld [vmem:[#allocation178_spill] sm:$0xff]  ;;  %v12460_v38 = vld [vmem:[#allocation36_spill] sm:$0xff] }
 0x3ff   :  { %v2003_v28 = vsel %vm1963_vm5, %v12452_v52, 0.0  ;;  %vm2167_vm1 = vcmp.eq.s32.totalorder %v12453_v36, %v12106_v57  ;;  %vm2574_vm11 = vcmp.eq.s32.totalorder %v12454_v20, %v12106_v57  ;;  %v2462_v60 = vadd.f32 %v2454_v24, %v2382_v5  ;;  %5750 = vmatprep.subr.bf16.mxu1 %v12456_v4  ;;  %v12464_v44 = vld [vmem:[#allocation374_spill] sm:$0xff]  ;;  %v12467_v52 = vld [vmem:[#allocation81_spill] sm:$0xff] }
 0x400   :  { %v2533_v49 = vsel %vm2493_vm8, %v12455_v50, 0.0  ;;  %v2010_v47 = vadd.f32 %v2002_v9, %v1930_v14  ;;  %3090 = vperm.xlu1 %5976, %v9738_v37   ;;  %v2794_v53 = vpack.c.bf16 %v12458_v1, %v12457_v59  ;;  %vm2336_vm14 = vcmp.eq.s32.totalorder %v12459_v29, %v12106_v57  ;;  %v12465_v5 = vld [vmem:[#allocation338_spill] sm:$0xff]  ;;  %v12479_v55 = vld [vmem:[#allocation333_spill] sm:$0xff] }
 0x401   :  { %v9749_v45 = vmul.f32 %v12461_v10, %v12460_v38  ;;  %v2461_v58 = vadd.f32 %v2453_v33, %v2381_v54  ;;  %v9752_v16 = vmul.f32 %v5715_v25, %v9499_v43  ;;  %v2542_v24 = vadd.f32 %v2534_v12, %v2462_v60  ;;  %v12466_v46 = vld [vmem:[#allocation14_spill] sm:$0xff]  ;;  %v12468_v33 = vld [vmem:[#allocation125_spill] sm:$0xff] }
 0x402   :  { %vm2573_vm3 = vcmp.eq.s32.totalorder %v12464_v44, %v12106_v57  ;;  %v2011_v9 = vadd.f32 %v2003_v28, %v1931_v32  ;;  %v2614_v2 = vsel %vm2574_vm11, %v12465_v5, 0.0  ;;  %vm2653_vm6 = vcmp.eq.s32.totalorder %v12467_v52, %v12106_v57  ;;  %5751 = vmatpush3.bf16.msra.mxu1 %v12456_v4  ;;  %v9767_v32 = vpop.permute.xlu0 %2716  ;;  %v2743_v54 = vpop.permute.xlu1 %2742  ;;  %v12469_v12 = vld [vmem:[#allocation73_spill] sm:$0xff]  ;;  %v12470_v20 = vld [vmem:[#allocation54_spill] sm:$0xff] }
 0x403   :  { %12462 = vst [vmem:[#allocation129_spill] sm:$0xff] %v9749_v45  ;;  %12463 = vst [vmem:[#allocation90_spill] sm:$0xff] %v9752_v16  ;;  %v2541_v14 = vadd.f32 %v2533_v49, %v2461_v58  ;;  %v2613_v13 = vsel %vm2573_vm3, %v12466_v46, 0.0  ;;  %vm2654_vm0 = vcmp.eq.s32.totalorder %v12468_v33, %v12106_v57  ;;  %vm2733_vm7 = vcmp.eq.s32.totalorder %v2711_v3, %v12106_v57  ;;  %v12473_v4 = vld [vmem:[#allocation321_spill] sm:$0xff]  ;;  %v12477_v46 = vld [vmem:[#allocation99_spill] sm:$0xff] }
 0x404   :  { %v2015_v25 = vpack.c.bf16 %v2011_v9, %v2010_v47  ;;  %5752 = vmatprep.subr.bf16.mxu1 %v2794_v53  ;;  %5977 = vset.pattern.permute.xlu1 %v12387_v8  ;;  %v2793_v28 = vpack.c.bf16 %v9749_v45, %v12469_v12  ;;  %v9774_v60 = vmul.f32 %v9647_v41, %v12470_v20  ;;  %v2693_v50 = vsel %vm2653_vm6, %v9333_v34, 0.0  ;;  %v12472_v47 = vld [vmem:[#allocation317_spill] sm:$0xff]  ;;  %v12474_v34 = vld [vmem:[#allocation235_spill] sm:$0xff] }
 0x405   :  { %v2694_v49 = vsel %vm2654_vm0, %v9361_v30, 0.0  ;;  %2651 = vperm.xlu1 %5977, %v9184_v22   ;;  %vm2168_vm2 = vcmp.eq.s32.totalorder %v12472_v47, %v12106_v57  ;;  %vm2256_vm12 = vcmp.eq.s32.totalorder %v12473_v4, %v12106_v57  ;;  %v2621_v38 = vadd.f32 %v2613_v13, %v2541_v14  ;;  %v12475_v30 = vld [vmem:[#allocation329_spill] sm:$0xff]  ;;  %v12476_v9 = vld [vmem:[#allocation327_spill] sm:$0xff] }
 0x406   :  { %12471 = vst [vmem:[#allocation131_spill] sm:$0xff] %v9774_v60  ;;  %v2622_v58 = vadd.f32 %v2614_v2, %v2542_v24  ;;  %5745 = vmatmul.mubr.msk.bf16.gmra.mxu1 %vm1242_vm15, %v2015_v25  ;;  %v9786_v41 = vpack.c.bf16 %v9752_v16, %v9774_v60  ;;  %vm2415_vm10 = vcmp.eq.s32.totalorder %v12474_v34, %v12106_v57  ;;  %v2296_v44 = vsel %vm2256_vm12, %v12475_v30, 0.0  ;;  %v2747_v14 = vpop.permute.xlu0 %2746  ;;  %v12478_v3 = vld [vmem:[#allocation325_spill] sm:$0xff]  ;;  %v9812_v33 = vld [vmem:[%s11491_s2 + $0xa0] sm:$0xff]  ;;  %v12483_v30 = vld [vmem:[#allocation354_spill] sm:$0xff] }
 0x407   :  { %v2773_v22 = vsel %vm2733_vm7, %v2743_v54, 0.0  ;;  %5753 = vmatpush3.bf16.msra.mxu1 %v2794_v53  ;;  %v2295_v24 = vsel %vm2255_vm4, %v12476_v9, 0.0  ;;  %v2701_v5 = vadd.f32 %v2693_v50, %v2621_v38  ;;  %vm2734_vm13 = vcmp.eq.s32.totalorder %v9563_v27, %v12106_v57  ;;  %v9815_v27 = vpop.permute.xlu1 %2446  ;;  %v12480_v54 = vld [vmem:[#allocation337_spill] sm:$0xff]  ;;  %v10076_v16 = vld [vmem:[%s11491_s2 + $0xe0] sm:$0xff] }
 0x408   :  { %v2702_v2 = vadd.f32 %v2694_v49, %v2622_v58  ;;  %5754 = vmatprep.subr.bf16.mxu1 %v2793_v28  ;;  %v2216_v13 = vsel %vm2168_vm2, %v12477_v46, 0.0  ;;  %v2215_v53 = vsel %vm2167_vm1, %v12478_v3, 0.0  ;;  %vm2335_vm9 = vcmp.eq.s32.totalorder %v12479_v55, %v12106_v57  ;;  %v12481_v36 = vld [vmem:[#allocation181_spill] sm:$0xff]  ;;  %v12482_v58 = vld [vmem:[#allocation347_spill] sm:$0xff] }
 0x409   :  { %v2774_v52 = vsel %vm2734_vm13, %v2747_v14, 0.0  ;;  %2678 = vperm.xlu1 %5977, %v9812_v33   ;;  %v2304_v25 = vadd.f32 %v2296_v44, %v2216_v13  ;;  %v2375_v50 = vsel %vm2335_vm9, %v12480_v54, 0.0  ;;  %v2781_v49 = vadd.f32 %v2773_v22, %v2701_v5  ;;  %v12484_v22 = vld [vmem:[#allocation285_spill] sm:$0xff]  ;;  %v12486_v14 = vld [vmem:[#allocation336_spill] sm:$0xff] }
 0x40a   :  { %v2782_v47 = vadd.f32 %v2774_v52, %v2702_v2  ;;  %v2376_v4 = vsel %vm2336_vm14, %v12481_v36, 0.0  ;;  %v2303_v38 = vadd.f32 %v2295_v24, %v2215_v53  ;;  %vm2416_vm5 = vcmp.eq.s32.totalorder %v12482_v58, %v12106_v57  ;;  %v12485_v24 = vld [vmem:[#allocation239_spill] sm:$0xff]  ;;  %v12487_v13 = vld [vmem:[#allocation360_spill] sm:$0xff]  ;;  %v12488_v3 = vld [vmem:[#allocation13_spill] sm:$0xff] }
 0x40b   :  { %5755 = vmatpush3.bf16.msra.mxu1 %v2793_v28  ;;  %v2455_v9 = vsel %vm2415_vm10, %v12483_v30, 0.0  ;;  %vm2495_vm4 = vcmp.eq.s32.totalorder %v12484_v22, %v12106_v57  ;;  %v2384_v29 = vadd.f32 %v2376_v4, %v2304_v25  ;;  %v2456_v2 = vsel %vm2416_vm5, %v12485_v24, 0.0  ;;  %v9837_v28 = vld [vmem:[%s11490_s1 + $0xd0] sm:$0xff]  ;;  %v9840_v34 = vpop.permute.xlu1 %2482  ;;  %v12490_v52 = vld [vmem:[#allocation372_spill] sm:$0xff] }
 0x40c   :  { %v2789_v44 = vpack.c.bf16 %v2782_v47, %v2781_v49  ;;  %5764 = vmatprep.subr.bf16.mxu1 %v9786_v41  ;;  %v2383_v5 = vadd.f32 %v2375_v50, %v2303_v38  ;;  %vm2575_vm8 = vcmp.eq.s32.totalorder %v12486_v14, %v12106_v57  ;;  %vm2496_vm1 = vcmp.eq.s32.totalorder %v12487_v13, %v12106_v57  ;;  %v12489_v53 = vld [vmem:[#allocation94_spill] sm:$0xff]  ;;  %v12491_v50 = vld [vmem:[#allocation17_spill] sm:$0xff]  ;;  %v12492_v49 = vld [vmem:[#allocation80_spill] sm:$0xff]  ;;  %v523_v14 = vpop.f32.mrf.mxu0 }
 0x40d   :  { %5978 = vset.pattern.permute.xlu1 %v12443_v23  ;;  %vm2576_vm11 = vcmp.eq.s32.totalorder %v12488_v3, %v12106_v57  ;;  %v2535_v55 = vsel %vm2495_vm4, %v12489_v53, 0.0  ;;  %v2536_v25 = vsel %vm2496_vm1, %v12490_v52, 0.0  ;;  %v2464_v54 = vadd.f32 %v2456_v2, %v2384_v29  ;;  %v12493_v47 = vld [vmem:[#allocation339_spill] sm:$0xff]  ;;  %v12494_v4 = vld [vmem:[#allocation65_spill] sm:$0xff] }
 0x40e   :  { %5756 = vmatprep.mubr.msk.bf16.mxu1 %vm1242_vm15, %v2789_v44  ;;  %3093 = vperm.xlu1 %5978, %v9837_v28   ;;  %v2463_v46 = vadd.f32 %v2455_v9, %v2383_v5  ;;  %vm2656_vm14 = vcmp.eq.s32.totalorder %v12491_v50, %v12106_v57  ;;  %vm2881_vm3 = vcmp.lt.s32.totalorder %v12492_v49, %v8817_v0  ;;  %v2616_v36 = vsel %vm2576_vm11, %v12493_v47, 0.0  ;;  %v2751_v44 = vpop.permute.xlu0 %2750  ;;  %v12495_v29 = vld [vmem:[#allocation77_spill] sm:$0xff] }
 0x40f   :  { %v2615_v38 = vsel %vm2575_vm8, %v12494_v4, 0.0  ;;  %v9857_v58 = vpop.permute.xlu1 %2485  ;;  %v2544_v30 = vadd.f32 %v2536_v25, %v2464_v54  ;;  %vm2655_vm6 = vcmp.eq.s32.totalorder %v9282_v18, %v12106_v57  ;;  %vm2735_vm0 = vcmp.eq.s32.totalorder %v9767_v32, %v12106_v57  ;;  %v9876_v32 = vld [vmem:[%s11491_s2 + $0xc8] sm:$0xff]  ;;  %v6273_v4 = vld [vmem:[%s11491_s2 + $0xb8] sm:$0xff]  ;;  %v10095_v1 = vld [vmem:[%s11491_s2 + $0xf0] sm:$0xff] }
 0x410   :  { %v2543_v9 = vadd.f32 %v2535_v55, %v2463_v46  ;;  %v2695_v22 = vsel %vm2655_vm6, %v9479_v61, 0.0  ;;  %v2696_v5 = vsel %vm2656_vm14, %v9518_v21, 0.0  ;;  %vm2880_vm7 = vcmp.lt.s32.totalorder %v12495_v29, %v8817_v0  ;;  %v12497_v61 = vld [vmem:[#allocation72_spill] sm:$0xff]  ;;  %v12499_v52 = vld [vmem:[#allocation69_spill] sm:$0xff] }
 0x411   :  { %v2624_v24 = vadd.f32 %v2616_v36, %v2544_v30  ;;  %v9871_v46 = vsel %vm2881_vm3, 1.0, %v12384_v17  ;;  %v2775_v18 = vsel %vm2735_vm0, %v2751_v44, 0.0  ;;  %vm2879_vm2 = vcmp.lt.s32.totalorder %v12497_v61, %v8817_v0  ;;  %v6274_v29 = vld [vmem:[%s11490_s1 + $0xa0] sm:$0xff]  ;;  %v9953_v61 = vld [vmem:[%s11491_s2 + $0xd0] sm:$0xff]  ;;  %v10026_v43 = vld [vmem:[%s11490_s1 + $0xe8] sm:$0xff] }
 0x412   :  { %3119 = vperm.xlu1 %5978, %v9298_v6   ;;  %v2623_v2 = vadd.f32 %v2615_v38, %v2543_v9  ;;  %12496 = vst [vmem:[#allocation133_spill] sm:$0xff] %v9871_v46  ;;  %vm2736_vm12 = vcmp.eq.s32.totalorder %v9741_v63, %v12106_v57  ;;  %v9884_v53 = vsel %vm2880_vm7, 1.0, %v12384_v17  ;;  %vm2878_vm10 = vcmp.lt.s32.totalorder %v12499_v52, %v8817_v0  ;;  %v12502_v63 = vld [vmem:[#allocation74_spill] sm:$0xff]  ;;  %v6277_v52 = vld [vmem:[%s11491_s2 + $0xa8] sm:$0xff] }
 0x413   :  { %v2704_v13 = vadd.f32 %v2696_v5, %v2624_v24  ;;  %v2755_v3 = vpop.permute.xlu1 %2754  ;;  %12498 = vst [vmem:[#allocation95_spill] sm:$0xff] %v9884_v53  ;;  %v9889_v25 = vmul.f32 %v9871_v46, %v523_v14  ;;  %v9892_v49 = vsel %vm2879_vm2, 1.0, %v12384_v17  ;;  %vm2877_vm13 = vcmp.lt.s32.totalorder %v12502_v63, %v8817_v0  ;;  %v12505_v9 = vld [vmem:[#allocation66_spill] sm:$0xff] }
 0x414   :  { %v2703_v21 = vadd.f32 %v2695_v22, %v2623_v2  ;;  %v2776_v55 = vsel %vm2736_vm12, %v2755_v3, 0.0  ;;  %12501 = vst [vmem:[#allocation53_spill] sm:$0xff] %v9892_v49  ;;  %v9899_v47 = vmul.f32 %v9884_v53, %v9679_v19  ;;  %v9905_v38 = vsel %vm2878_vm10, 1.0, %v12384_v17  ;;  %v6276_v3 = vld [vmem:[%s11490_s1 + $0xb0] sm:$0xff]  ;;  %v10039_v53 = vld [vmem:[%s11490_s1 + $0xc0] sm:$0xff] }
 0x415   :  { %12500 = vst [vmem:[#allocation98_spill] sm:$0xff] %v9889_v25  ;;  %v2784_v50 = vadd.f32 %v2776_v55, %v2704_v13  ;;  %12504 = vst [vmem:[#allocation107_spill] sm:$0xff] %v9905_v38  ;;  %vm2876_vm9 = vcmp.lt.s32.totalorder %v12505_v9, %v8817_v0  ;;  %v9913_v44 = vmul.f32 %v9565_v11, %v9892_v49  ;;  %v9919_v22 = vsel %vm2877_vm13, 1.0, %v12384_v17 }
 0x416   :  { %3123 = vperm.xlu1 %5978, %v9876_v32   ;;  %v2783_v54 = vadd.f32 %v2775_v18, %v2703_v21  ;;  %12503 = vst [vmem:[#allocation105_spill] sm:$0xff] %v9899_v47  ;;  %v3572_v19 = vpack.c.bf16 %v9889_v25, %v9899_v47  ;;  %12507 = vst [vmem:[#allocation100_spill] sm:$0xff] %v9919_v22  ;;  %v9924_v5 = vmul.f32 %v9491_v42, %v9905_v38  ;;  %v12509_v0 = vmov 7   ;;  %v10056_v38 = vld [vmem:[%s11490_s1 + $0xf8] sm:$0xff]  ;;  %v10064_v47 = vld [vmem:[%s11491_s2 + $0xe8] sm:$0xff] }
 0x417   :  { %v9907_v30 = vpop.permute.xlu1 %2488  ;;  %12506 = vst [vmem:[#allocation127_spill] sm:$0xff] %v9913_v44  ;;  %v9928_v11 = vsel %vm2876_vm9, 1.0, %v12384_v17  ;;  %v9939_v42 = vmul.f32 %v9919_v22, %v9615_v56  ;;  %vm2497_vm2 = vcmp.eq.s32.totalorder %v9840_v34, %v12106_v57  ;;  %vm2498_vm12 = vcmp.eq.s32.totalorder %v9857_v58, %v12106_v57 }
 0x418   :  { %v2790_v36 = vpack.c.bf16 %v2784_v50, %v2783_v54  ;;  %12508 = vst [vmem:[#allocation110_spill] sm:$0xff] %v9924_v5  ;;  %12510 = vst [vmem:[#allocation114_spill] sm:$0xff] %v9928_v11  ;;  %v9943_v2 = vmul.f32 %v9928_v11, %v9523_v15  ;;  %v12513_v15 = vmov 3   ;;  %v9981_v50 = vld [vmem:[%s11490_s1 + $0xd8] sm:$0xff]  ;;  %v10050_v11 = vld [vmem:[%s11490_s1 + $0xf0] sm:$0xff] }
 0x419   :  { %12511 = vst [vmem:[#allocation116_spill] sm:$0xff] %v9939_v42 }
 0x41a   :  { %5979 = vset.pattern.permute.xlu1 %v12387_v8  ;;  %5757 = vmatmul.mubr.msk.bf16.vlgmr.msra.gmra.mxu1 %vm1242_vm15, %v2790_v36  ;;  %12512 = vst [vmem:[#allocation118_spill] sm:$0xff] %v9943_v2  ;;  %v3570_v18 = vpack.c.bf16 %v9939_v42, %v9943_v2 }
 0x41b   :  { %2690 = vperm.xlu1 %5979, %v6273_v4   ;;  %5765 = vmatpush3.bf16.msra.mxu1 %v9786_v41  ;;  %v9933_v24 = vpop.permute.xlu1 %2518  ;;  %v3571_v41 = vpack.c.bf16 %v9913_v44, %v9924_v5 }
 0x41c   :  { %5766 = vmatprep.subr.bf16.mxu1 %v3572_v19 }
 0x41f   :  { %5980 = vset.pattern.permute.xlu1 %v12509_v0  ;;  %5767 = vmatpush3.bf16.msra.mxu1 %v3572_v19  ;;  %v9946_v14 = vpop.permute.xlu1 %2522  ;;  %v12520_v19 = vmov 4  }
 0x420   :  { %2722 = vperm.xlu1 %5980, %v6274_v29   ;;  %5768 = vmatprep.subr.bf16.mxu1 %v3571_v41 }
 0x423   :  { %5769 = vmatpush3.bf16.msra.mxu1 %v3571_v41  ;;  %v9956_v56 = vpop.permute.xlu1 %2530 }
 0x424   :  { %5981 = vset.pattern.permute.xlu1 %v12443_v23  ;;  %5770 = vmatprep.subr.bf16.mxu1 %v3570_v18 }
 0x425   :  { %3127 = vperm.xlu1 %5981, %v9953_v61  }
 0x427   :  { %5771 = vmatpush3.bf16.msra.mxu1 %v3570_v18  ;;  %v9960_v21 = vpop.permute.xlu1 %2565  ;;  %v10014_v18 = vld [vmem:[%s11490_s1 + $0xe0] sm:$0xff] }
 0x428   :  { %vm2578_vm10 = vcmp.eq.s32.totalorder %v9960_v21, %v12106_v57  ;;  %v12551_v21 = vld [vmem:[#allocation382_spill] sm:$0xff] }
 0x429   :  { %3131 = vperm.xlu1 %5981, %v9612_v39  }
 0x42b   :  { %v9964_v13 = vpop.permute.xlu1 %2919 }
 0x42c   :  { %12514 = vst [vmem:[#allocation75_spill] sm:$0xff] %v9964_v13 }
 0x42d   :  { %5982 = vset.pattern.permute.xlu1 %v12513_v15 }
 0x42e   :  { %3170 = vperm.xlu1 %5982, %v9738_v37  }
 0x430   :  { %v9970_v55 = vpop.permute.xlu1 %3007 }
 0x431   :  { %12515 = vst [vmem:[#allocation124_spill] sm:$0xff] %v9970_v55 }
 0x432   :  { %5983 = vset.pattern.permute.xlu1 %v12509_v0 }
 0x433   :  { %2728 = vperm.xlu1 %5983, %v6276_v3  }
 0x434   :  { %v9975_v54 = vpop.permute.xlu1 %3010 }
 0x435   :  { %12516 = vst [vmem:[#allocation126_spill] sm:$0xff] %v9975_v54  ;;  %v12547_v54 = vld [vmem:[#allocation88_spill] sm:$0xff] }
 0x436   :  { %vm2417_vm7 = vcmp.eq.s32.totalorder %v12547_v54, %v12106_v57  ;;  %v12550_v54 = vld [vmem:[#allocation106_spill] sm:$0xff] }
 0x437   :  { %2758 = vperm.xlu1 %5983, %v9812_v33  }
 0x43b   :  { %2762 = vperm.xlu1 %5983, %v6277_v52  }
 0x43e   :  { %v9984_v63 = vpop.permute.xlu1 %2571 }
 0x43f   :  { %5984 = vset.pattern.permute.xlu1 %v12513_v15 }
 0x440   :  { %3176 = vperm.xlu1 %5984, %v9981_v50  }
 0x442   :  { %v9987_v33 = vpop.permute.xlu1 %2598 }
 0x444   :  { %3199 = vperm.xlu1 %5984, %v9298_v6  }
 0x448   :  { %5985 = vset.pattern.permute.xlu1 %v12509_v0 }
 0x449   :  { %2766 = vperm.xlu1 %5985, %v9466_v35   ;;  %v9991_v36 = vpop.permute.xlu1 %2925 }
 0x44a   :  { %12517 = vst [vmem:[#allocation160_spill] sm:$0xff] %v9991_v36 }
 0x44d   :  { %5986 = vset.pattern.permute.xlu1 %v12513_v15  ;;  %v9994_v4 = vpop.permute.xlu1 %2952 }
 0x44e   :  { %12518 = vst [vmem:[#allocation128_spill] sm:$0xff] %v9994_v4  ;;  %3207 = vperm.xlu1 %5986, %v9953_v61  }
 0x451   :  { %v9997_v9 = vpop.permute.xlu1 %2957 }
 0x452   :  { %12519 = vst [vmem:[#allocation132_spill] sm:$0xff] %v9997_v9  ;;  %3211 = vperm.xlu1 %5986, %v9612_v39  }
 0x456   :  { %5987 = vset.pattern.permute.xlu1 %v12520_v19  ;;  %v10001_v29 = vpop.permute.xlu1 %3016 }
 0x457   :  { %12521 = vst [vmem:[#allocation163_spill] sm:$0xff] %v10001_v29  ;;  %3250 = vperm.xlu1 %5987, %v9738_v37  }
 0x45a   :  { %v10004_v41 = vpop.permute.xlu1 %3039 }
 0x45b   :  { %12522 = vst [vmem:[#allocation134_spill] sm:$0xff] %v10004_v41  ;;  %3253 = vperm.xlu1 %5987, %v9837_v28   ;;  %v12544_v41 = vld [vmem:[#allocation103_spill] sm:$0xff] }
 0x45f   :  { %3279 = vperm.xlu1 %5987, %v9298_v6   ;;  %v10008_v35 = vpop.permute.xlu1 %2606 }
 0x463   :  { %5988 = vset.pattern.permute.xlu1 %v11795_v51 }
 0x464   :  { %2931 = vperm.xlu1 %5988, %v10014_v18   ;;  %v10017_v3 = vpop.permute.xlu1 %2642 }
 0x468   :  { %5989 = vset.pattern.permute.xlu1 %v11818_v26  ;;  %v10020_v52 = vpop.permute.xlu1 %2645 }
 0x469   :  { %3019 = vperm.xlu1 %5989, %v10014_v18  }
 0x46d   :  { %3022 = vperm.xlu1 %5989, %v10026_v43   ;;  %v10029_v20 = vpop.permute.xlu1 %2967 }
 0x46e   :  { %12523 = vst [vmem:[#allocation152_spill] sm:$0xff] %v10029_v20 }
 0x471   :  { %5990 = vset.pattern.permute.xlu1 %v12520_v19 }
 0x472   :  { %3291 = vperm.xlu1 %5990, %v9612_v39   ;;  %v10033_v46 = vpop.permute.xlu1 %3047 }
 0x473   :  { %12524 = vst [vmem:[#allocation138_spill] sm:$0xff] %v10033_v46  ;;  %v12532_v46 = vld [vmem:[#allocation369_spill] sm:$0xff] }
 0x474   :  { %vm2258_vm5 = vcmp.eq.s32.totalorder %v12532_v46, %v12106_v57  ;;  %v12537_v46 = vld [vmem:[#allocation101_spill] sm:$0xff] }
 0x475   :  { %vm2170_vm11 = vcmp.eq.s32.totalorder %v12537_v46, %v12106_v57 }
 0x476   :  { %5991 = vset.pattern.permute.xlu1 %v11918_v48 }
 0x477   :  { %3327 = vperm.xlu1 %5991, %v10039_v53   ;;  %v10042_v22 = vpop.permute.xlu1 %3087 }
 0x478   :  { %12525 = vst [vmem:[#allocation146_spill] sm:$0xff] %v10042_v22  ;;  %v12543_v22 = vld [vmem:[#allocation187_spill] sm:$0xff] }
 0x47b   :  { %5992 = vset.pattern.permute.xlu1 %v11795_v51  ;;  %v10045_v49 = vpop.permute.xlu1 %3090 }
 0x47c   :  { %12526 = vst [vmem:[#allocation156_spill] sm:$0xff] %v10045_v49  ;;  %2937 = vperm.xlu1 %5992, %v10050_v11  }
 0x480   :  { %2940 = vperm.xlu1 %5992, %v10056_v38   ;;  %v10059_v10 = vpop.permute.xlu1 %2651 }
 0x484   :  { %2977 = vperm.xlu1 %5992, %v10064_v47   ;;  %v10067_v25 = vpop.permute.xlu1 %2678 }
 0x488   :  { %5993 = vset.pattern.permute.xlu1 %v11818_v26 }
 0x489   :  { %3025 = vperm.xlu1 %5993, %v10050_v11   ;;  %v10071_v60 = vpop.permute.xlu1 %3093 }
 0x48a   :  { %12527 = vst [vmem:[#allocation137_spill] sm:$0xff] %v10071_v60 }
 0x48d   :  { %3055 = vperm.xlu1 %5993, %v10076_v16   ;;  %v10079_v2 = vpop.permute.xlu1 %3119 }
 0x48e   :  { %12528 = vst [vmem:[#allocation151_spill] sm:$0xff] %v10079_v2  ;;  %v12542_v2 = vld [vmem:[#allocation380_spill] sm:$0xff] }
 0x48f   :  { %v2218_v4 = vsel %vm2170_vm11, %v12542_v2, 0.0 }
 0x491   :  { %3059 = vperm.xlu1 %5993, %v10064_v47   ;;  %v10082_v42 = vpop.permute.xlu1 %3123 }
 0x492   :  { %12529 = vst [vmem:[#allocation159_spill] sm:$0xff] %v10082_v42 }
 0x495   :  { %5995 = vset.pattern.permute.xlu1 %v11918_v48 }
 0x496   :  { %3336 = vperm.xlu1 %5995, %v9981_v50   ;;  %v10086_v5 = vpop.permute.xlu1 %2690 }
 0x49a   :  { %3359 = vperm.xlu1 %5995, %v9298_v6  }
 0x49b   :  { %v10089_v44 = vpop.permute.xlu1 %2722  ;;  %v5726_v59 = vpop.f32.mrf.mxu1 }
 0x49d   :  { %v10098_v12 = vpop.f32.mrf.mxu1 }
 0x49e   :  { %5996 = vset.pattern.permute.xlu1 %v11795_v51 }
 0x49f   :  { %2982 = vperm.xlu1 %5996, %v10095_v1   ;;  %v5727_v17 = vpop.f32.mrf.mxu1 }
 0x4a0   :  { %v10100_v45 = vpop.permute.xlu1 %3127  ;;  %v6027_v20 = vpack.i.bf16 %v5727_v17, %v5726_v59  ;;  %v12533_v17 = vld [vmem:[#allocation58_spill] sm:$0xff]  ;;  %v12535_v59 = vld [vmem:[#allocation367_spill] sm:$0xff] }
 0x4a1   :  { %12530 = vst [vmem:[#allocation16_spill] sm:$0xff] %v10100_v45  ;;  %v10103_v6 = vpop.f32.mrf.mxu1  ;;  %vm2338_vm4 = vcmp.eq.s32.totalorder %v12533_v17, %v12106_v57  ;;  %vm2257_vm1 = vcmp.eq.s32.totalorder %v12535_v59, %v12106_v57  ;;  %v12538_v17 = vld [vmem:[#allocation384_spill] sm:$0xff]  ;;  %v12540_v59 = vld [vmem:[#allocation183_spill] sm:$0xff] }
 0x4a2   :  { %6028 = vrot.lane.b32.xlu0 %v6027_v20, %s6336_s14  ;;  %v10125_v20 = vld [vmem:[%s11491_s2 + $0xf8] sm:$0xff]  ;;  %v2297_v60 = vsel %vm2257_vm1, %v12538_v17, 0.0  ;;  %vm2337_vm14 = vcmp.eq.s32.totalorder %v12540_v59, %v12106_v57  ;;  %v2378_v13 = vsel %vm2338_vm4, %v12543_v22, 0.0  ;;  %vm2259_vm4 = vcmp.eq.s32.totalorder %v12551_v21, %v12106_v57 }
 0x4a3   :  { %5998 = vset.pattern.permute.xlu1 %v11818_v26  ;;  %v5730_v29 = vpop.f32.mrf.mxu1  ;;  %v12534_v26 = vld [vmem:[#allocation365_spill] sm:$0xff]  ;;  %v2377_v46 = vsel %vm2337_vm14, %v9231_v62, 0.0  ;;  %v12545_v17 = vld [vmem:[#allocation342_spill] sm:$0xff]  ;;  %vm2657_vm1 = vcmp.eq.s32.totalorder %v10017_v3, %v12106_v57  ;;  %vm2737_vm14 = vcmp.eq.s32.totalorder %v10089_v44, %v12106_v57  ;;  %v12558_v3 = vld [vmem:[#allocation19_spill] sm:$0xff] }
 0x4a4   :  { %3063 = vperm.xlu1 %5998, %v10095_v1   ;;  %v10106_v51 = vpop.permute.xlu1 %3131  ;;  %vm2169_vm8 = vcmp.eq.s32.totalorder %v12534_v26, %v12106_v57  ;;  %vm2577_vm6 = vcmp.eq.s32.totalorder %v12545_v17, %v12106_v57 }
 0x4a5   :  { %12531 = vst [vmem:[#allocation165_spill] sm:$0xff] %v10106_v51  ;;  %v12536_v51 = vld [vmem:[#allocation9_spill] sm:$0xff]  ;;  %v10120_v36 = vpop.f32.mrf.mxu1  ;;  %v2217_v49 = vsel %vm2169_vm8, %v12544_v41, 0.0  ;;  %v12553_v41 = vld [vmem:[#allocation346_spill] sm:$0xff] }
 0x4a6   :  { %v2298_v45 = vsel %vm2258_vm5, %v12536_v51, 0.0  ;;  %v12541_v51 = vld [vmem:[#allocation241_spill] sm:$0xff]  ;;  %v2305_v59 = vadd.f32 %v2297_v60, %v2217_v49  ;;  %v12549_v49 = vld [vmem:[#allocation376_spill] sm:$0xff]  ;;  %vm2658_vm5 = vcmp.eq.s32.totalorder %v10020_v52, %v12106_v57 }
 0x4a7   :  { %vm2418_vm3 = vcmp.eq.s32.totalorder %v12541_v51, %v12106_v57  ;;  %v5731_v42 = vpop.f32.mrf.mxu1  ;;  %v2306_v55 = vadd.f32 %v2298_v45, %v2218_v4  ;;  %v2457_v45 = vsel %vm2417_vm7, %v9659_v7, 0.0  ;;  %vm2171_vm9 = vcmp.eq.s32.totalorder %v12549_v49, %v12106_v57 }
 0x4a8   :  { %3067 = vperm.xlu1 %5998, %v10125_v20   ;;  %v6037_v9 = vpack.i.bf16 %v5731_v42, %v5730_v29  ;;  %v2458_v62 = vsel %vm2418_vm3, %v9689_v31, 0.0  ;;  %v2385_v60 = vadd.f32 %v2377_v46, %v2305_v59  ;;  %v12548_v31 = vld [vmem:[#allocation29_spill] sm:$0xff]  ;;  %v2618_v51 = vsel %vm2578_vm10, %v12553_v41, 0.0  ;;  %v12555_v59 = vld [vmem:[#allocation23_spill] sm:$0xff] }
 0x4a9   :  { %v10131_v26 = vpop.permute.xlu1 %3170  ;;  %v10147_v2 = vpop.f32.mrf.mxu1  ;;  %v2386_v22 = vadd.f32 %v2378_v13, %v2306_v55  ;;  %vm2260_vm13 = vcmp.eq.s32.totalorder %v12548_v31, %v12106_v57  ;;  %v2537_v13 = vsel %vm2497_vm2, %v9933_v24, 0.0  ;;  %v2538_v55 = vsel %vm2498_vm12, %v9946_v14, 0.0  ;;  %v12554_v14 = vld [vmem:[#allocation87_spill] sm:$0xff] }
 0x4aa   :  { %12539 = vst [vmem:[#allocation168_spill] sm:$0xff] %v10131_v26  ;;  %v12546_v26 = vld [vmem:[#allocation378_spill] sm:$0xff]  ;;  %v6032_v42 = vpack.i.bf16 %v10147_v2, %v10120_v36  ;;  %6038 = vrot.lane.b32.xlu0 %v6037_v9, %s6336_s14  ;;  %v2465_v58 = vadd.f32 %v2457_v45, %v2385_v60  ;;  %v12552_v9 = vld [vmem:[#allocation52_spill] sm:$0xff]  ;;  %v2617_v24 = vsel %vm2577_vm6, %v9987_v33, 0.0  ;;  %vm2340_vm8 = vcmp.eq.s32.totalorder %v12554_v14, %v12106_v57  ;;  %v12556_v45 = vld [vmem:[#allocation121_spill] sm:$0xff]  ;;  %v2726_v31 = vpop.permute.xlu0 %2725 }
 0x4ab   :  { %vm2172_vm0 = vcmp.eq.s32.totalorder %v12546_v26, %v12106_v57  ;;  %v2466_v4 = vadd.f32 %v2458_v62, %v2386_v22  ;;  %v2300_v29 = vsel %vm2260_vm13, %v12552_v9, 0.0  ;;  %v2299_v22 = vsel %vm2259_vm4, %v12555_v59, 0.0  ;;  %v12557_v60 = vld [vmem:[#allocation50_spill] sm:$0xff]  ;;  %v12563_v59 = vld [vmem:[#allocation344_spill] sm:$0xff] }
 0x4ac   :  { %5999 = vset.pattern.permute.xlu1 %v12443_v23  ;;  %v2220_v34 = vsel %vm2172_vm0, %v12550_v54, 0.0  ;;  %v2545_v26 = vadd.f32 %v2537_v13, %v2465_v58  ;;  %v2380_v62 = vsel %vm2340_vm8, %v12556_v45, 0.0  ;;  %v2698_v17 = vsel %vm2658_vm5, %v12557_v60, 0.0  ;;  %v12564_v45 = vld [vmem:[#allocation245_spill] sm:$0xff]  ;;  %v12572_v36 = vld [vmem:[#allocation132_spill] sm:$0xff] }
 0x4ad   :  { %3102 = vperm.xlu1 %5999, %v10026_v43   ;;  %v2546_v46 = vadd.f32 %v2538_v55, %v2466_v4  ;;  %v2697_v33 = vsel %vm2657_vm1, %v10067_v25, 0.0  ;;  %vm2738_vm11 = vcmp.eq.s32.totalorder %v2726_v31, %v12106_v57  ;;  %v2219_v13 = vsel %vm2171_vm9, %v12558_v3, 0.0  ;;  %v12559_v4 = vld [vmem:[#allocation185_spill] sm:$0xff]  ;;  %v12567_v3 = vld [vmem:[#allocation39_spill] sm:$0xff]  ;;  %v12573_v2 = vld [vmem:[#allocation124_spill] sm:$0xff] }
 0x4ae   :  { %v10165_v7 = vpop.permute.xlu1 %2728  ;;  %v2625_v21 = vadd.f32 %v2617_v24, %v2545_v26  ;;  %v2308_v55 = vadd.f32 %v2300_v29, %v2220_v34  ;;  %vm2339_vm3 = vcmp.eq.s32.totalorder %v12559_v4, %v12106_v57  ;;  %v2307_v9 = vadd.f32 %v2299_v22, %v2219_v13  ;;  %v12560_v24 = vld [vmem:[#allocation243_spill] sm:$0xff]  ;;  %v12561_v29 = vld [vmem:[#allocation189_spill] sm:$0xff] }
 0x4af   :  { %v2626_v54 = vadd.f32 %v2618_v51, %v2546_v46  ;;  %vm2420_vm6 = vcmp.eq.s32.totalorder %v12560_v24, %v12106_v57  ;;  %vm2419_vm0 = vcmp.eq.s32.totalorder %v9625_v40, %v12106_v57  ;;  %vm2499_vm7 = vcmp.eq.s32.totalorder %v9907_v30, %v12106_v57  ;;  %v12562_v46 = vld [vmem:[#allocation97_spill] sm:$0xff]  ;;  %v2732_v40 = vpop.permute.xlu0 %2731 }
 0x4b0   :  { %v2705_v41 = vadd.f32 %v2697_v33, %v2625_v21  ;;  %v2388_v44 = vadd.f32 %v2380_v62, %v2308_v55  ;;  %v2379_v26 = vsel %vm2339_vm3, %v12561_v29, 0.0  ;;  %vm2500_vm2 = vcmp.eq.s32.totalorder %v12562_v46, %v12106_v57  ;;  %v12565_v62 = vld [vmem:[#allocation291_spill] sm:$0xff] }
 0x4b1   :  { %6000 = vset.pattern.permute.xlu1 %v11918_v48  ;;  %v2706_v25 = vadd.f32 %v2698_v17, %v2626_v54  ;;  %vm2579_vm12 = vcmp.eq.s32.totalorder %v12563_v59, %v12106_v57  ;;  %v2387_v22 = vadd.f32 %v2379_v26, %v2307_v9  ;;  %vm2580_vm10 = vcmp.eq.s32.totalorder %v9984_v63, %v12106_v57  ;;  %v12566_v63 = vld [vmem:[#allocation348_spill] sm:$0xff] }
 0x4b2   :  { %3367 = vperm.xlu1 %6000, %v9953_v61   ;;  %v2759_v52 = vpop.permute.xlu1 %2758  ;;  %v2460_v30 = vsel %vm2420_vm6, %v12564_v45, 0.0  ;;  %v2539_v60 = vsel %vm2499_vm7, %v12565_v62, 0.0  ;;  %v2540_v17 = vsel %vm2500_vm2, %v9956_v56, 0.0  ;;  %v2620_v54 = vsel %vm2580_vm10, %v12566_v63, 0.0 }
 0x4b3   :  { %v2777_v58 = vsel %vm2737_vm14, %v2759_v52, 0.0  ;;  %v2459_v52 = vsel %vm2419_vm0, %v9815_v27, 0.0  ;;  %v2468_v31 = vadd.f32 %v2460_v30, %v2388_v44  ;;  %v2619_v21 = vsel %vm2579_vm12, %v10008_v35, 0.0  ;;  %v2771_v35 = vpop.permute.xlu0 %2770 }
 0x4b4   :  { %v2785_v49 = vadd.f32 %v2777_v58, %v2705_v41  ;;  %v2467_v33 = vadd.f32 %v2459_v52, %v2387_v22  ;;  %vm2659_vm13 = vcmp.eq.s32.totalorder %v12567_v3, %v12106_v57  ;;  %vm2660_vm9 = vcmp.eq.s32.totalorder %v10059_v10, %v12106_v57 }
 0x4b5   :  { %v2548_v55 = vadd.f32 %v2540_v17, %v2468_v31  ;;  %v2700_v58 = vsel %vm2660_vm9, %v10086_v5, 0.0  ;;  %vm2740_vm5 = vcmp.eq.s32.totalorder %v2732_v40, %v12106_v57  ;;  %vm2739_vm4 = vcmp.eq.s32.totalorder %v10165_v7, %v12106_v57  ;;  %v6288_v17 = vld [vmem:[%s11491_s2 + $0xc0] sm:$0xff] }
 0x4b6   :  { %6001 = vset.pattern.permute.xlu1 %v12387_v8  ;;  %v2763_v51 = vpop.permute.xlu1 %2762  ;;  %v2547_v13 = vadd.f32 %v2539_v60, %v2467_v33 }
 0x4b7   :  { %v2778_v14 = vsel %vm2738_vm11, %v2763_v51, 0.0  ;;  %3407 = vperm.xlu1 %6001, %v10039_v53   ;;  %v2628_v9 = vadd.f32 %v2620_v54, %v2548_v55  ;;  %v12568_v51 = vld [vmem:[#allocation56_spill] sm:$0xff]  ;;  %vm3030_vm11 = vcmp.eq.s32.totalorder %v12573_v2, %v12106_v57 }
 0x4b8   :  { %v2786_v34 = vadd.f32 %v2778_v14, %v2706_v25  ;;  %v2627_v25 = vadd.f32 %v2619_v21, %v2547_v13  ;;  %v2699_v24 = vsel %vm2659_vm13, %v12568_v51, 0.0  ;;  %v2780_v14 = vsel %vm2740_vm5, %v2771_v35, 0.0 }
 0x4b9   :  { %v2708_v44 = vadd.f32 %v2700_v58, %v2628_v9 }
 0x4ba   :  { %v2791_v53 = vpack.c.bf16 %v2786_v34, %v2785_v49  ;;  %v2707_v29 = vadd.f32 %v2699_v24, %v2627_v25 }
 0x4bb   :  { %3410 = vperm.xlu1 %6001, %v9738_v37   ;;  %v10229_v27 = vpop.permute.xlu1 %3176  ;;  %v2788_v52 = vadd.f32 %v2780_v14, %v2708_v44 }
 0x4bc   :  { %5760 = vmatprep.mubr.msk.bf16.mxu1 %vm1242_vm15, %v2791_v53 }
 0x4bd   :  { %v5742_v56 = vpop.f32.mrf.mxu1 }
 0x4bf   :  { %6002 = vset.pattern.permute.xlu1 %v12443_v23  ;;  %v10240_v4 = vpop.permute.xlu1 %3199  ;;  %v10243_v41 = vpop.f32.mrf.mxu1 }
 0x4c0   :  { %3108 = vperm.xlu1 %6002, %v10056_v38  }
 0x4c1   :  { %v5743_v10 = vpop.f32.mrf.mxu1 }
 0x4c2   :  { %v6047_v49 = vpack.i.bf16 %v5743_v10, %v5742_v56 }
 0x4c3   :  { %v10249_v5 = vpop.f32.mrf.mxu1 }
 0x4c4   :  { %3135 = vperm.xlu1 %6002, %v10076_v16   ;;  %v2767_v34 = vpop.permute.xlu1 %2766  ;;  %v6042_v26 = vpack.i.bf16 %v10249_v5, %v10243_v41  ;;  %6048 = vrot.lane.b32.xlu0 %v6047_v49, %s6336_s14  ;;  %v12575_v41 = vld [vmem:[#allocation168_spill] sm:$0xff] }
 0x4c5   :  { %v2779_v46 = vsel %vm2739_vm4, %v2767_v34, 0.0  ;;  %vm3191_vm3 = vcmp.eq.s32.totalorder %v12575_v41, %v12106_v57 }
 0x4c6   :  { %v2787_v59 = vadd.f32 %v2779_v46, %v2707_v29  ;;  %v5746_v22 = vpop.f32.mrf.mxu1 }
 0x4c8   :  { %v2792_v40 = vpack.c.bf16 %v2788_v52, %v2787_v59  ;;  %v10255_v53 = vpop.f32.mrf.mxu1  ;;  %6003 = vset.pattern.permute.xlu1 %v12387_v8  ;;  %v12576_v59 = vld [vmem:[#allocation33_spill] sm:$0xff] }
 0x4c9   :  { %3413 = vperm.xlu1 %6003, %v9837_v28   ;;  %v10259_v7 = vpop.permute.xlu1 %3207 }
 0x4ca   :  { %v5747_v45 = vpop.f32.mrf.mxu1  ;;  %5761 = vmatmul.mubr.msk.bf16.gmra.mxu1 %vm1242_vm15, %v2792_v40  ;;  %v12577_v40 = vld [vmem:[#allocation134_spill] sm:$0xff] }
 0x4cb   :  { %v6057_v30 = vpack.i.bf16 %v5747_v45, %v5746_v22  ;;  %v3070_v45 = vsel %vm3030_vm11, %v12577_v40, 0.0 }
 0x4cc   :  { %v10262_v62 = vpop.f32.mrf.mxu1 }
 0x4cd   :  { %v6052_v60 = vpack.i.bf16 %v10262_v62, %v10255_v53  ;;  %6058 = vrot.lane.b32.xlu0 %v6057_v30, %s6336_s14  ;;  %3439 = vperm.xlu1 %6003, %v6288_v17   ;;  %v10270_v33 = vpop.permute.xlu1 %3211  ;;  %v12578_v53 = vld [vmem:[#allocation159_spill] sm:$0xff] }
 0x4d1   :  { %3443 = vperm.xlu1 %6003, %v9876_v32  }
 0x4d2   :  { %v10273_v28 = vpop.permute.xlu1 %3250 }
 0x4d3   :  { %vm3271_vm7 = vcmp.eq.s32.totalorder %v10273_v28, %v12106_v57  ;;  %v12586_v28 = vld [vmem:[#allocation293_spill] sm:$0xff] }
 0x4d4   :  { %vm3270_vm12 = vcmp.eq.s32.totalorder %v12586_v28, %v12106_v57  ;;  %v12594_v28 = vld [vmem:[#allocation137_spill] sm:$0xff] }
 0x4d5   :  { %6005 = vset.pattern.permute.xlu1 %v12443_v23 }
 0x4d6   :  { %3147 = vperm.xlu1 %6005, %v10125_v20   ;;  %v10277_v31 = vpop.permute.xlu1 %3253 }
 0x4da   :  { %6006 = vset.pattern.permute.xlu1 %v12513_v15  ;;  %v10280_v63 = vpop.permute.xlu1 %3279  ;;  %v5758_v54 = vpop.f32.mrf.mxu1 }
 0x4db   :  { %3179 = vperm.xlu1 %6006, %v10014_v18  }
 0x4dc   :  { %v10286_v32 = vpop.f32.mrf.mxu1 }
 0x4de   :  { %v5759_v23 = vpop.f32.mrf.mxu1 }
 0x4df   :  { %6007 = vset.pattern.permute.xlu1 %v12387_v8  ;;  %v10284_v21 = vpop.permute.xlu1 %2931  ;;  %v6067_v3 = vpack.i.bf16 %v5759_v23, %v5758_v54  ;;  %v12580_v54 = vld [vmem:[#allocation146_spill] sm:$0xff] }
 0x4e0   :  { %3447 = vperm.xlu1 %6007, %v9953_v61   ;;  %vm3110_vm0 = vcmp.eq.s32.totalorder %v12580_v54, %v12106_v57  ;;  %v12588_v54 = vld [vmem:[#allocation353_spill] sm:$0xff] }
 0x4e1   :  { %6068 = vrot.lane.b32.xlu0 %v6067_v3, %s6336_s14  ;;  %v12582_v3 = vld [vmem:[#allocation151_spill] sm:$0xff] }
 0x4e4   :  { %3451 = vperm.xlu1 %6007, %v9612_v39   ;;  %v10290_v13 = vpop.permute.xlu1 %3019 }
 0x4e8   :  { %6008 = vset.pattern.permute.xlu1 %v12509_v0  ;;  %v10294_v55 = vpop.permute.xlu1 %3022 }
 0x4e9   :  { %3490 = vperm.xlu1 %6008, %v9738_v37  }
 0x4ed   :  { %6009 = vset.pattern.permute.xlu1 %v12513_v15  ;;  %v10298_v56 = vpop.permute.xlu1 %3291 }
 0x4ee   :  { %3185 = vperm.xlu1 %6009, %v10050_v11  }
 0x4f2   :  { %3215 = vperm.xlu1 %6009, %v10076_v16   ;;  %v10302_v61 = vpop.permute.xlu1 %3327 }
 0x4f3   :  { %vm3350_vm13 = vcmp.eq.s32.totalorder %v10302_v61, %v12106_v57 }
 0x4f6   :  { %3219 = vperm.xlu1 %6009, %v10064_v47  }
 0x4f7   :  { %v10305_v58 = vpop.permute.xlu1 %2937 }
 0x4fa   :  { %6010 = vset.pattern.permute.xlu1 %v12509_v0 }
 0x4fb   :  { %3496 = vperm.xlu1 %6010, %v9981_v50   ;;  %v10309_v9 = vpop.permute.xlu1 %2940 }
 0x4ff   :  { %3519 = vperm.xlu1 %6010, %v6288_v17   ;;  %v10311_v37 = vpop.permute.xlu1 %2977 }
 0x503   :  { %6011 = vset.pattern.permute.xlu1 %v12513_v15 }
 0x504   :  { %3223 = vperm.xlu1 %6011, %v10095_v1   ;;  %v10315_v25 = vpop.permute.xlu1 %3025 }
 0x508   :  { %6013 = vset.pattern.permute.xlu1 %v12520_v19  ;;  %v10318_v35 = vpop.permute.xlu1 %3055 }
 0x509   :  { %3259 = vperm.xlu1 %6013, %v10014_v18  }
 0x50c   :  { %v10321_v51 = vpop.permute.xlu1 %3059 }
 0x50d   :  { %3262 = vperm.xlu1 %6013, %v10026_v43  }
 0x511   :  { %6014 = vset.pattern.permute.xlu1 %v12509_v0  ;;  %v10325_v50 = vpop.permute.xlu1 %3336 }
 0x512   :  { %3531 = vperm.xlu1 %6014, %v9612_v39  }
 0x515   :  { %v10328_v15 = vpop.permute.xlu1 %3359 }
 0x516   :  { %6015 = vset.pattern.permute.xlu1 %v12520_v19 }
 0x517   :  { %3265 = vperm.xlu1 %6015, %v10050_v11  }
 0x51a   :  { %v10332_v24 = vpop.permute.xlu1 %2982 }
 0x51b   :  { %3295 = vperm.xlu1 %6015, %v10076_v16  }
 0x51f   :  { %3299 = vperm.xlu1 %6015, %v10064_v47   ;;  %v10336_v44 = vpop.permute.xlu1 %3063 }
 0x523   :  { %3307 = vperm.xlu1 %6015, %v10125_v20   ;;  %v10339_v10 = vpop.permute.xlu1 %3067 }
 0x527   :  { %6017 = vset.pattern.permute.xlu1 %v11918_v48 }
 0x528   :  { %3342 = vperm.xlu1 %6017, %v10026_v43   ;;  %v10343_v39 = vpop.permute.xlu1 %3102 }
 0x52c   :  { %3345 = vperm.xlu1 %6017, %v10050_v11  }
 0x52d   :  { %v10346_v19 = vpop.permute.xlu1 %3367 }
 0x530   :  { %3375 = vperm.xlu1 %6017, %v10076_v16  }
 0x532   :  { %v10349_v14 = vpop.permute.xlu1 %3407 }
 0x533   :  { %vm3430_vm9 = vcmp.eq.s32.totalorder %v10349_v14, %v12106_v57 }
 0x534   :  { %3383 = vperm.xlu1 %6017, %v10095_v1  }
 0x536   :  { %v10352_v49 = vpop.permute.xlu1 %3410 }
 0x537   :  { %vm3431_vm5 = vcmp.eq.s32.totalorder %v10352_v49, %v12106_v57 }
 0x538   :  { %6019 = vset.pattern.permute.xlu1 %v12387_v8 }
 0x539   :  { %3419 = vperm.xlu1 %6019, %v10014_v18  }
 0x53b   :  { %v10356_v48 = vpop.permute.xlu1 %3108 }
 0x53d   :  { %3425 = vperm.xlu1 %6019, %v10050_v11  }
 0x53f   :  { %v10359_v34 = vpop.permute.xlu1 %3135 }
 0x541   :  { %3428 = vperm.xlu1 %6019, %v10056_v38   ;;  %v10376_v38 = vld [vmem:[%s11494_s5 + $0x18] sm:$0xff]  }
 0x542   :  { %5780 = vmatprep.subr.bf16.mxu1 %v10376_v38 }
 0x544   :  { %v10362_v29 = vpop.permute.xlu1 %3413 }
 0x545   :  { %3459 = vperm.xlu1 %6019, %v10064_v47  }
 0x548   :  { %v10365_v46 = vpop.permute.xlu1 %3439 }
 0x549   :  { %3467 = vperm.xlu1 %6019, %v10125_v20   ;;  %v12570_v20 = vld [vmem:[#allocation108_spill] sm:$0xff] }
 0x54a   :  { %vm2943_vm8 = vcmp.eq.s32.totalorder %v12570_v20, %v12106_v57 }
 0x54c   :  { %v3444_v52 = vpop.permute.xlu1 %3443 }
 0x54d   :  { %6021 = vset.pattern.permute.xlu1 %v12509_v0 }
 0x54e   :  { %3502 = vperm.xlu1 %6021, %v10026_v43   ;;  %v12569_v43 = vpack.i.bf16 %v10103_v6, %v10098_v12  ;;  %v12571_v12 = vld [vmem:[#allocation126_spill] sm:$0xff]  ;;  %v2991_v6 = vsel %vm2943_vm8, %v12572_v36, 0.0 }
 0x54f   :  { %vm3031_vm1 = vcmp.eq.s32.totalorder %v12571_v12, %v12106_v57  ;;  %v12584_v12 = vld [vmem:[#allocation247_spill] sm:$0xff] }
 0x550   :  { %v3071_v22 = vsel %vm3031_vm1, %v12576_v59, 0.0  ;;  %vm3190_vm2 = vcmp.eq.s32.totalorder %v12584_v12, %v12106_v57 }
 0x551   :  { %v10370_v8 = vpop.permute.xlu1 %3147  ;;  %v3079_v17 = vadd.f32 %v3071_v22, %v2991_v6  ;;  %v3230_v6 = vsel %vm3190_vm2, %v10240_v4, 0.0  ;;  %v3390_v4 = vsel %vm3350_vm13, %v10328_v15, 0.0  ;;  %vm3272_vm2 = vcmp.eq.s32.totalorder %v10277_v31, %v12106_v57  ;;  %v12604_v31 = vld [vmem:[#allocation352_spill] sm:$0xff] }
 0x552   :  { %3505 = vperm.xlu1 %6021, %v10050_v11   ;;  %vm3352_vm13 = vcmp.eq.s32.totalorder %v12604_v31, %v12106_v57 }
 0x556   :  { %3535 = vperm.xlu1 %6021, %v10076_v16   ;;  %v10380_v47 = vpop.permute.xlu1 %3179 }
 0x55a   :  { %3543 = vperm.xlu1 %6021, %v10095_v1   ;;  %v2846_v1 = vpop.f32.mrf.mxu1 }
 0x55b   :  { %v10383_v0 = vpop.permute.xlu1 %3447  ;;  %v6062_v5 = vpack.i.bf16 %v2846_v1, %v10286_v32  ;;  %v12581_v32 = vld [vmem:[#allocation128_spill] sm:$0xff]  ;;  %v12583_v1 = vld [vmem:[#allocation251_spill] sm:$0xff] }
 0x55c   :  { %v3231_v20 = vsel %vm3191_vm3, %v12583_v1, 0.0 }
 0x55e   :  { %6023 = vrot.lane.b32.xlu1 %v12569_v43, %s6336_s14  ;;  %v3150_v43 = vsel %vm3110_vm0, %v12582_v3, 0.0  ;;  %v3471_v3 = vsel %vm3431_vm5, %v3444_v52, 0.0  ;;  %vm3432_vm5 = vcmp.eq.s32.totalorder %v10362_v29, %v12106_v57 }
 0x55f   :  { %v10389_v11 = vpop.permute.xlu1 %3451 }
 0x562   :  { %6033 = vrot.lane.b32.xlu1 %v6032_v42, %s6336_s14  ;;  %v12574_v42 = vld [vmem:[#allocation156_spill] sm:$0xff] }
 0x563   :  { %vm3111_vm14 = vcmp.eq.s32.totalorder %v12574_v42, %v12106_v57  ;;  %v12585_v42 = vld [vmem:[#allocation297_spill] sm:$0xff] }
 0x564   :  { %v3491_v18 = vpop.permute.xlu1 %3490  ;;  %v3151_v30 = vsel %vm3111_vm14, %v12578_v53, 0.0  ;;  %v3311_v41 = vsel %vm3271_vm7, %v12585_v42, 0.0  ;;  %v3310_v53 = vsel %vm3270_vm12, %v10280_v63, 0.0  ;;  %vm3193_vm12 = vcmp.eq.s32.totalorder %v10229_v27, %v12106_v57 }
 0x565   :  { %v3159_v2 = vadd.f32 %v3151_v30, %v3079_v17  ;;  %vm3511_vm4 = vcmp.eq.s32.totalorder %v3491_v18, %v12106_v57  ;;  %v12589_v18 = vld [vmem:[#allocation31_spill] sm:$0xff]  ;;  %v3392_v27 = vsel %vm3352_vm13, %v10346_v19, 0.0  ;;  %vm2946_vm13 = vcmp.eq.s32.totalorder %v10284_v21, %v12106_v57  ;;  %v12621_v21 = vld [vmem:[#allocation357_spill] sm:$0xff] }
 0x566   :  { %6043 = vrot.lane.b32.xlu1 %v6042_v26, %s6336_s14  ;;  %v3488_v26 = vpop.permute.xlu0 %3487  ;;  %vm3032_vm1 = vcmp.eq.s32.totalorder %v12589_v18, %v12106_v57 }
 0x567   :  { %v3239_v22 = vadd.f32 %v3231_v20, %v3159_v2  ;;  %vm3510_vm8 = vcmp.eq.s32.totalorder %v3488_v26, %v12106_v57  ;;  %v12593_v26 = vld [vmem:[#allocation163_spill] sm:$0xff] }
 0x568   :  { %vm3033_vm3 = vcmp.eq.s32.totalorder %v12593_v26, %v12106_v57 }
 0x569   :  { %v10399_v16 = vpop.permute.xlu1 %3185  ;;  %v3319_v30 = vadd.f32 %v3311_v41, %v3239_v22  ;;  %v12592_v41 = vld [vmem:[#allocation111_spill] sm:$0xff]  ;;  %v12595_v22 = vld [vmem:[#allocation113_spill] sm:$0xff] }
 0x56a   :  { %6053 = vrot.lane.b32.xlu1 %v6052_v60, %s6336_s14  ;;  %v12579_v60 = vld [vmem:[#allocation75_spill] sm:$0xff]  ;;  %v10440_v40 = vpop.permute.xlu0 %3493  ;;  %vm2945_vm14 = vcmp.eq.s32.totalorder %v12592_v41, %v12106_v57  ;;  %v3472_v41 = vsel %vm3432_vm5, %v10383_v0, 0.0  ;;  %vm3034_vm5 = vcmp.eq.s32.totalorder %v10290_v13, %v12106_v57 }
 0x56b   :  { %vm2942_vm6 = vcmp.eq.s32.totalorder %v12579_v60, %v12106_v57  ;;  %v12587_v60 = vld [vmem:[#allocation350_spill] sm:$0xff] }
 0x56c   :  { %v2990_v23 = vsel %vm2942_vm6, %v12581_v32, 0.0  ;;  %vm3351_vm10 = vcmp.eq.s32.totalorder %v12587_v60, %v12106_v57  ;;  %vm3112_vm6 = vcmp.eq.s32.totalorder %v12594_v28, %v12106_v57  ;;  %v12596_v60 = vld [vmem:[#allocation152_spill] sm:$0xff]  ;;  %v12606_v28 = vld [vmem:[#allocation43_spill] sm:$0xff] }
 0x56d   :  { %v10420_v62 = vpop.permute.xlu1 %3215  ;;  %v3078_v36 = vadd.f32 %v3070_v45, %v2990_v23  ;;  %v3391_v32 = vsel %vm3351_vm10, %v12588_v54, 0.0  ;;  %v3470_v23 = vsel %vm3430_vm9, %v10365_v46, 0.0  ;;  %v12591_v46 = vld [vmem:[#allocation138_spill] sm:$0xff]  ;;  %v12599_v54 = vld [vmem:[#allocation249_spill] sm:$0xff]  ;;  %vm3353_vm9 = vcmp.eq.s32.totalorder %v10325_v50, %v12106_v57 }
 0x56e   :  { %6063 = vrot.lane.b32.xlu1 %v6062_v5, %s6336_s14  ;;  %v3399_v1 = vadd.f32 %v3391_v32, %v3319_v30  ;;  %v3072_v52 = vsel %vm3032_vm1, %v12591_v46, 0.0  ;;  %v12597_v30 = vld [vmem:[#allocation16_spill] sm:$0xff]  ;;  %vm3192_vm7 = vcmp.eq.s32.totalorder %v12599_v54, %v12106_v57 }
 0x56f   :  { %v3158_v5 = vadd.f32 %v3150_v43, %v3078_v36  ;;  %v3524_v43 = vpop.permute.xlu0 %3523 }
 0x570   :  { %v3551_v15 = vsel %vm3511_vm4, %v3524_v43, 0.0  ;;  %v3479_v14 = vadd.f32 %v3471_v3, %v3399_v1  ;;  %v12601_v43 = vld [vmem:[#allocation165_spill] sm:$0xff]  ;;  %v3232_v1 = vsel %vm3192_vm7, %v10259_v7, 0.0  ;;  %vm3433_vm4 = vcmp.eq.s32.totalorder %v12606_v28, %v12106_v57 }
 0x571   :  { %v10436_v59 = vpop.permute.xlu1 %3219  ;;  %v3238_v45 = vadd.f32 %v3230_v6, %v3158_v5  ;;  %v12590_v6 = vld [vmem:[#allocation160_spill] sm:$0xff]  ;;  %v3473_v50 = vsel %vm3433_vm4, %v10389_v11, 0.0  ;;  %v6110_v11 = vld [vmem:[%s11494_s5 + $0x10] sm:$0xff]   ;;  %vm2948_vm4 = vcmp.eq.s32.totalorder %v10305_v58, %v12106_v57  ;;  %v12616_v58 = vld [vmem:[#allocation199_spill] sm:$0xff] }
 0x572   :  { %v3559_v49 = vadd.f32 %v3551_v15, %v3479_v14  ;;  %vm2944_vm11 = vcmp.eq.s32.totalorder %v12590_v6, %v12106_v57  ;;  %v12602_v14 = vld [vmem:[#allocation295_spill] sm:$0xff] }
 0x573   :  { %v3318_v17 = vadd.f32 %v3310_v53, %v3238_v45  ;;  %v2992_v53 = vsel %vm2944_vm11, %v12595_v22, 0.0  ;;  %v2993_v45 = vsel %vm2945_vm14, %v12596_v60, 0.0  ;;  %vm3273_vm10 = vcmp.eq.s32.totalorder %v12602_v14, %v12106_v57  ;;  %v12608_v14 = vld [vmem:[#allocation197_spill] sm:$0xff] }
 0x574   :  { %v3080_v32 = vadd.f32 %v3072_v52, %v2992_v53  ;;  %v3313_v7 = vsel %vm3273_vm10, %v10298_v56, 0.0  ;;  %v3528_v53 = vpop.permute.xlu0 %3527  ;;  %vm3035_vm11 = vcmp.eq.s32.totalorder %v10294_v55, %v12106_v57  ;;  %vm3115_vm14 = vcmp.eq.s32.totalorder %v10343_v39, %v12106_v57  ;;  %v6111_v39 = vld [vmem:[%s11494_s5 + $0x8] sm:$0xff]  }
 0x575   :  { %v3398_v61 = vadd.f32 %v3390_v4, %v3318_v17  ;;  %v3152_v4 = vsel %vm3112_vm6, %v12597_v30, 0.0  ;;  %v12598_v17 = vld [vmem:[#allocation191_spill] sm:$0xff]  ;;  %v3155_v55 = vsel %vm3115_vm14, %v12608_v14, 0.0  ;;  %vm3194_vm14 = vcmp.eq.s32.totalorder %v10380_v47, %v12106_v57 }
 0x576   :  { %v10453_v63 = vpop.permute.xlu1 %3496  ;;  %vm3113_vm0 = vcmp.eq.s32.totalorder %v12598_v17, %v12106_v57 }
 0x577   :  { %v3478_v20 = vadd.f32 %v3470_v23, %v3398_v61  ;;  %v12600_v23 = vld [vmem:[#allocation35_spill] sm:$0xff]  ;;  %v3153_v61 = vsel %vm3113_vm0, %v12601_v43, 0.0  ;;  %vm3513_vm1 = vcmp.eq.s32.totalorder %v10453_v63, %v12106_v57 }
 0x578   :  { %v3073_v3 = vsel %vm3033_vm3, %v12600_v23, 0.0 }
 0x579   :  { %v3081_v15 = vadd.f32 %v3073_v3, %v2993_v45 }
 0x57a   :  { %v3520_v12 = vpop.permute.xlu1 %3519 }
 0x57b   :  { %v3550_v36 = vsel %vm3510_vm8, %v3520_v12, 0.0  ;;  %v3233_v12 = vsel %vm3193_vm12, %v10270_v33, 0.0  ;;  %v3161_v18 = vadd.f32 %v3153_v61, %v3081_v15  ;;  %v12605_v33 = vld [vmem:[#allocation355_spill] sm:$0xff]  ;;  %vm3512_vm8 = vcmp.eq.s32.totalorder %v10440_v40, %v12106_v57 }
 0x57c   :  { %v3558_v2 = vadd.f32 %v3550_v36, %v3478_v20  ;;  %v3160_v20 = vadd.f32 %v3152_v4, %v3080_v32  ;;  %v12603_v36 = vld [vmem:[#allocation299_spill] sm:$0xff]  ;;  %v3552_v29 = vsel %vm3512_vm8, %v3528_v53, 0.0  ;;  %vm3036_vm12 = vcmp.eq.s32.totalorder %v10315_v25, %v12106_v57 }
 0x57d   :  { %v3241_v46 = vadd.f32 %v3233_v12, %v3161_v18  ;;  %v12607_v15 = vld [vmem:[#allocation115_spill] sm:$0xff] }
 0x57e   :  { %v3566_v42 = vpack.c.bf16 %v3559_v49, %v3558_v2  ;;  %v3312_v49 = vsel %vm3272_vm2, %v12603_v36, 0.0  ;;  %v3240_v6 = vadd.f32 %v3232_v1, %v3160_v20  ;;  %v3075_v1 = vsel %vm3035_vm11, %v10321_v51, 0.0  ;;  %v12609_v51 = vld [vmem:[#allocation253_spill] sm:$0xff]  ;;  %v12612_v53 = vld [vmem:[#allocation195_spill] sm:$0xff] }
 0x57f   :  { %v10469_v5 = vpop.permute.xlu1 %3223  ;;  %v3321_v22 = vadd.f32 %v3313_v7, %v3241_v46  ;;  %vm2947_vm3 = vcmp.eq.s32.totalorder %v12607_v15, %v12106_v57  ;;  %vm3195_vm6 = vcmp.eq.s32.totalorder %v12609_v51, %v12106_v57  ;;  %v12610_v46 = vmov 0.0   ;;  %v12624_v51 = vld [vmem:[#allocation68_spill] sm:$0xff] }
 0x580   :  { %5772 = vmatprep.mubr.msk.bf16.mxu1 %vm1242_vm15, %v3566_v42  ;;  %v3320_v52 = vadd.f32 %v3312_v49, %v3240_v6  ;;  %v3393_v42 = vsel %vm3353_vm9, %v12605_v33, 0.0  ;;  %v2995_v20 = vsel %vm2947_vm3, %v10311_v37, 0.0  ;;  %v3235_v49 = vsel %vm3195_vm6, %v10436_v59, 0.0  ;;  %v6112_v37 = vld [vmem:[%s11494_s5] sm:$0xff]  }
 0x581   :  { %v3401_v60 = vadd.f32 %v3393_v42, %v3321_v22  ;;  %v3083_v12 = vadd.f32 %v3075_v1, %v2995_v20  ;;  %v10550_v22 = vpop.permute.xlu0 %3499  ;;  %vm2949_vm2 = vcmp.eq.s32.totalorder %v10309_v9, %v12106_v57  ;;  %vm3116_vm10 = vcmp.eq.s32.totalorder %v12612_v53, %v12106_v57  ;;  %v12613_v9 = vld [vmem:[#allocation119_spill] sm:$0xff] }
 0x582   :  { %v3400_v56 = vadd.f32 %v3392_v27, %v3320_v52  ;;  %vm3117_vm9 = vcmp.eq.s32.totalorder %v10356_v48, %v12106_v57  ;;  %v2997_v25 = vsel %vm2949_vm2, %v12613_v9, 0.0  ;;  %v12615_v48 = vld [vmem:[#allocation193_spill] sm:$0xff] }
 0x583   :  { %v3481_v4 = vadd.f32 %v3473_v50, %v3401_v60  ;;  %v3163_v31 = vadd.f32 %v3155_v55, %v3083_v12  ;;  %v3076_v60 = vsel %vm3036_vm12, %v10336_v44, 0.0  ;;  %v2996_v44 = vsel %vm2948_vm4, %v10332_v24, 0.0 }
 0x584   :  { %v10490_v2 = vpop.permute.xlu1 %3259  ;;  %v3480_v45 = vadd.f32 %v3472_v41, %v3400_v56  ;;  %v12611_v56 = vld [vmem:[#allocation37_spill] sm:$0xff] }
 0x585   :  { %vm3037_vm7 = vcmp.eq.s32.totalorder %v12611_v56, %v12106_v57  ;;  %v10578_v13 = vpop.permute.xlu0 %3508  ;;  %vm3274_vm2 = vcmp.eq.s32.totalorder %v10490_v2, %v12106_v57 }
 0x586   :  { %v3560_v32 = vadd.f32 %v3552_v29, %v3480_v45  ;;  %v12614_v45 = vld [vmem:[#allocation255_spill] sm:$0xff]  ;;  %v3074_v29 = vsel %vm3034_vm5, %v10318_v35, 0.0 }
 0x587   :  { %vm3197_vm8 = vcmp.eq.s32.totalorder %v12614_v45, %v12106_v57 }
 0x588   :  { %v3263_v26 = vpop.permute.xlu1 %3262 }
 0x589   :  { %vm3275_vm0 = vcmp.eq.s32.totalorder %v3263_v26, %v12106_v57  ;;  %v3540_v14 = vpop.permute.xlu0 %3539 }
 0x58a   :  { %v5762_v19 = vpop.f32.mrf.mxu1 }
 0x58c   :  { %v2859_v30 = vpop.f32.mrf.mxu1 }
 0x58d   :  { %v3532_v0 = vpop.permute.xlu1 %3531 }
 0x58e   :  { %v3553_v17 = vsel %vm3513_vm1, %v3532_v0, 0.0  ;;  %v5763_v54 = vpop.f32.mrf.mxu1  ;;  %vm3114_vm1 = vcmp.eq.s32.totalorder %v12615_v48, %v12106_v57  ;;  %v3084_v0 = vadd.f32 %v3076_v60, %v2996_v44 }
 0x58f   :  { %v3561_v23 = vadd.f32 %v3553_v17, %v3481_v4  ;;  %v6077_v3 = vpack.i.bf16 %v5763_v54, %v5762_v19  ;;  %v3077_v19 = vsel %vm3037_vm7, %v10339_v10, 0.0  ;;  %v3157_v10 = vsel %vm3117_vm9, %v10370_v8, 0.0  ;;  %v12617_v17 = vld [vmem:[#allocation117_spill] sm:$0xff] }
 0x590   :  { %v2862_v40 = vpop.f32.mrf.mxu1  ;;  %v3156_v8 = vsel %vm3116_vm10, %v12616_v58, 0.0  ;;  %v2994_v35 = vsel %vm2946_vm13, %v12617_v17, 0.0  ;;  %v3154_v24 = vsel %vm3114_vm1, %v10359_v34, 0.0  ;;  %vm3196_vm7 = vcmp.eq.s32.totalorder %v10399_v16, %v12106_v57  ;;  %v12623_v16 = vld [vmem:[#allocation364_spill] sm:$0xff] }
 0x591   :  { %v3567_v43 = vpack.c.bf16 %v3561_v23, %v3560_v32  ;;  %v6072_v61 = vpack.i.bf16 %v2862_v40, %v2859_v30  ;;  %6078 = vrot.lane.b32.xlu0 %v6077_v3, %s6336_s14  ;;  %v3085_v30 = vadd.f32 %v3077_v19, %v2997_v25  ;;  %v12618_v32 = vld [vmem:[#allocation257_spill] sm:$0xff]  ;;  %v12619_v3 = vld [vmem:[#allocation359_spill] sm:$0xff]  ;;  %v3082_v40 = vadd.f32 %v3074_v29, %v2994_v35  ;;  %v3548_v19 = vpop.permute.xlu0 %3547 }
 0x592   :  { %v10517_v63 = vpop.permute.xlu1 %3265  ;;  %v3237_v23 = vsel %vm3197_vm8, %v12618_v32, 0.0  ;;  %vm3357_vm11 = vcmp.eq.s32.totalorder %v12619_v3, %v12106_v57  ;;  %v3236_v47 = vsel %vm3196_vm7, %v10469_v5, 0.0  ;;  %vm3435_vm13 = vcmp.eq.s32.totalorder %v12624_v51, %v12106_v57  ;;  %v12629_v3 = vld [vmem:[#allocation164_spill] sm:$0xff] }
 0x593   :  { %6073 = vrot.lane.b32.xlu1 %v6072_v61, %s6336_s14  ;;  %5773 = vmatmul.mubr.msk.bf16.vlgmr.msra.gmra.mxu1 %vm1242_vm15, %v3567_v43  ;;  %v3165_v54 = vadd.f32 %v3157_v10, %v3085_v30  ;;  %v3234_v43 = vsel %vm3194_vm14, %v10420_v62, 0.0  ;;  %v12620_v61 = vld [vmem:[#allocation300_spill] sm:$0xff]  ;;  %v3162_v34 = vadd.f32 %v3154_v24, %v3082_v40  ;;  %vm3276_vm12 = vcmp.eq.s32.totalorder %v10517_v63, %v12106_v57 }
 0x594   :  { %5781 = vmatpush3.bf16.msra.mxu1 %v10376_v38  ;;  %v3243_v38 = vadd.f32 %v3235_v49, %v3163_v31  ;;  %vm3277_vm3 = vcmp.eq.s32.totalorder %v12620_v61, %v12106_v57  ;;  %v3397_v2 = vsel %vm3357_vm11, %v12623_v16, 0.0  ;;  %vm3514_vm1 = vcmp.eq.s32.totalorder %v10550_v22, %v12106_v57 }
 0x595   :  { %5782 = vmatprep.subr.bf16.mxu1 %v6110_v11  ;;  %v3245_v15 = vadd.f32 %v3237_v23, %v3165_v54  ;;  %v3242_v55 = vadd.f32 %v3234_v43, %v3162_v34  ;;  %vm3517_vm11 = vcmp.eq.s32.totalorder %v10578_v13, %v12106_v57  ;;  %v12628_v23 = vld [vmem:[#allocation161_spill] sm:$0xff] }
 0x596   :  { %v10532_v36 = vpop.permute.xlu1 %3295 }
 0x597   :  { %v3314_v62 = vsel %vm3274_vm2, %v10532_v36, 0.0  ;;  %vm4935_vm2 = vcmask 130048  }
 0x598   :  { %5783 = vmatpush3.bf16.msra.mxu1 %v6110_v11  ;;  %v3164_v11 = vadd.f32 %v3156_v8, %v3084_v0  ;;  %v3322_v49 = vadd.f32 %v3314_v62, %v3242_v55  ;;  %v6029_v0 = vpop.permute.xlu0 %6028  ;;  %v12633_v55 = vld [vmem:[#allocation148_spill] sm:$0xff] }
 0x599   :  { %5784 = vmatprep.subr.bf16.mxu1 %v6111_v39  ;;  %v6031_v35 = vunpack.i.h.bf16 %v6029_v0  ;;  %v6030_v24 = vunpack.i.l.bf16 %v6029_v0 }
 0x59a   :  { %v3300_v18 = vpop.permute.xlu1 %3299  ;;  %v3244_v36 = vadd.f32 %v3236_v47, %v3164_v11  ;;  %v12631_v11 = vld [vmem:[#allocation157_spill] sm:$0xff] }
 0x59b   :  { %v3315_v6 = vsel %vm3275_vm0, %v3300_v18, 0.0  ;;  %vm3354_vm0 = vcmp.eq.s32.totalorder %v12621_v21, %v12106_v57  ;;  %v12630_v21 = vld [vmem:[#allocation153_spill] sm:$0xff] }
 0x59c   :  { %v10539_v7 = vadd.f32 %v3315_v6, %v3243_v38  ;;  %5785 = vmatpush3.bf16.msra.mxu1 %v6111_v39  ;;  %v12622_v39 = vld [vmem:[#allocation361_spill] sm:$0xff]  ;;  %v12626_v6 = vld [vmem:[#allocation76_spill] sm:$0xff] }
 0x59d   :  { %5786 = vmatprep.subr.bf16.mxu1 %v6112_v37 }
 0x59e   :  { %v3308_v27 = vpop.permute.xlu1 %3307 }
 0x59f   :  { %v3317_v20 = vsel %vm3277_vm3, %v3308_v27, 0.0  ;;  %vm3779_vm3 = vcmask 261120  }
 0x5a0   :  { %5787 = vmatpush3.bf16.msra.mxu1 %v6112_v37  ;;  %v3325_v31 = vadd.f32 %v3317_v20, %v3245_v15  ;;  %v12625_v37 = vld [vmem:[#allocation302_spill] sm:$0xff]  ;;  %v3783_v34 = vsel %vm3779_vm3, %v12630_v21, %v6031_v35  ;;  %v6039_v15 = vpop.permute.xlu0 %6038  ;;  %v12632_v20 = vld [vmem:[#allocation149_spill] sm:$0xff] }
 0x5a1   :  { %5856 = vmatprep.subr.mxu1 %v12610_v46  ;;  %v3316_v38 = vsel %vm3276_vm12, %v12625_v37, 0.0  ;;  %v6040_v51 = vunpack.i.l.bf16 %v6039_v15  ;;  %v12635_v37 = vld [vmem:[#allocation144_spill] sm:$0xff]  ;;  %v12646_v21 = vld [vmem:[#allocation78_spill] sm:$0xff]  ;;  %vm6338_vm12 = vmmov 0  }
 0x5a2   :  { %v3324_v53 = vadd.f32 %v3316_v38, %v3244_v36  ;;  %v3405_v9 = vadd.f32 %v3397_v2, %v3325_v31  ;;  %v12634_v31 = vld [vmem:[#allocation145_spill] sm:$0xff] }
 0x5a3   :  { %v3343_v59 = vpop.permute.xlu1 %3342  ;;  %v3786_v38 = vsel %vm3779_vm3, %v12635_v37, %v6040_v51  ;;  %v12650_v51 = vld [vmem:[#allocation64_spill] sm:$0xff] }
 0x5a4   :  { %vm3355_vm6 = vcmp.eq.s32.totalorder %v3343_v59, %v12106_v57 }
 0x5a5   :  { %v3395_v12 = vsel %vm3355_vm6, %v12622_v39, 0.0 }
 0x5a6   :  { %v3403_v18 = vadd.f32 %v3395_v12, %v10539_v7 }
 0x5a7   :  { %v10542_v52 = vpop.permute.xlu1 %3345 }
 0x5a8   :  { %vm3356_vm5 = vcmp.eq.s32.totalorder %v10542_v52, %v12106_v57 }
 0x5ab   :  { %v3376_v33 = vpop.permute.xlu1 %3375 }
 0x5ac   :  { %v3394_v5 = vsel %vm3354_vm0, %v3376_v33, 0.0 }
 0x5ad   :  { %v3402_v33 = vadd.f32 %v3394_v5, %v3322_v49  ;;  %v6041_v5 = vunpack.i.h.bf16 %v6039_v15 }
 0x5af   :  { %v10544_v42 = vpop.permute.xlu1 %3383 }
 0x5b4   :  { %v3420_v41 = vpop.permute.xlu1 %3419 }
 0x5b5   :  { %vm3434_vm10 = vcmp.eq.s32.totalorder %v3420_v41, %v12106_v57  ;;  %v3396_v41 = vsel %vm3356_vm5, %v10544_v42, 0.0 }
 0x5b6   :  { %v3474_v27 = vsel %vm3434_vm10, %v12626_v6, 0.0  ;;  %v12636_v6 = vld [vmem:[#allocation44_spill] sm:$0xff]  ;;  %vm4839_vm10 = vcmask 64512  }
 0x5b8   :  { %v10546_v28 = vpop.permute.xlu1 %3425 }
 0x5b9   :  { %vm3436_vm4 = vcmp.eq.s32.totalorder %v10546_v28, %v12106_v57  ;;  %v12627_v28 = vld [vmem:[#allocation123_spill] sm:$0xff] }
 0x5ba   :  { %v3476_v25 = vsel %vm3436_vm4, %v12627_v28, 0.0  ;;  %v12639_v28 = vld [vmem:[#allocation45_spill] sm:$0xff] }
 0x5bc   :  { %v10548_v26 = vpop.permute.xlu1 %3428 }
 0x5bd   :  { %vm3437_vm8 = vcmp.eq.s32.totalorder %v10548_v26, %v12106_v57  ;;  %v3404_v26 = vadd.f32 %v3396_v41, %v3324_v53 }
 0x5bf   :  { %v3484_v44 = vadd.f32 %v3476_v25, %v3404_v26  ;;  %v12640_v26 = vld [vmem:[#allocation46_spill] sm:$0xff] }
 0x5c0   :  { %v3460_v50 = vpop.permute.xlu1 %3459 }
 0x5c1   :  { %v3475_v59 = vsel %vm3435_vm13, %v3460_v50, 0.0  ;;  %v3482_v50 = vadd.f32 %v3474_v27, %v3402_v33 }
 0x5c2   :  { %v3483_v60 = vadd.f32 %v3475_v59, %v3403_v18  ;;  %v6049_v18 = vpop.permute.xlu0 %6048  ;;  %v12637_v59 = vld [vmem:[#allocation63_spill] sm:$0xff] }
 0x5c4   :  { %v3468_v4 = vpop.permute.xlu1 %3467 }
 0x5c5   :  { %v3477_v56 = vsel %vm3437_vm8, %v3468_v4, 0.0  ;;  %v3557_v4 = vsel %vm3517_vm11, %v3548_v19, 0.0  ;;  %v6050_v19 = vunpack.i.l.bf16 %v6049_v18 }
 0x5c6   :  { %v3485_v45 = vadd.f32 %v3477_v56, %v3405_v9  ;;  %v12638_v9 = vld [vmem:[#allocation61_spill] sm:$0xff] }
 0x5c7   :  { %v3790_v25 = vsel %vm3779_vm3, %v12639_v28, %v6050_v19 }
 0x5c8   :  { %v3565_v58 = vadd.f32 %v3557_v4, %v3485_v45 }
 0x5c9   :  { %v3503_v1 = vpop.permute.xlu1 %3502 }
 0x5ca   :  { %vm3515_vm9 = vcmp.eq.s32.totalorder %v3503_v1, %v12106_v57  ;;  %v3782_v1 = vsel %vm3779_vm3, %v12631_v11, %v6030_v24  ;;  %v12647_v11 = vld [vmem:[#allocation67_spill] sm:$0xff] }
 0x5cb   :  { %v3555_v7 = vsel %vm3515_vm9, %v3540_v14, 0.0  ;;  %v3813_v12 = vpack.c.bf16 %v3783_v34, %v3782_v1 }
 0x5cc   :  { %v3563_v29 = vadd.f32 %v3555_v7, %v3483_v60  ;;  %v6051_v7 = vunpack.i.h.bf16 %v6049_v18  ;;  %v6114_v18 = vld [vmem:[%s11496_s7] sm:$0xff]  }
 0x5cd   :  { %v3506_v63 = vpop.permute.xlu1 %3505 }
 0x5ce   :  { %vm3516_vm14 = vcmp.eq.s32.totalorder %v3506_v63, %v12106_v57  ;;  %v3787_v63 = vsel %vm3779_vm3, %v12634_v31, %v6041_v5 }
 0x5cf   :  { %v3815_v56 = vpack.c.bf16 %v3787_v63, %v3786_v38  ;;  %v6113_v38 = vld [vmem:[%s11496_s7 + $0x8] sm:$0xff]  }
 0x5d0   :  { %5820 = vmatprep.subr.bf16.mxu0 %v6113_v38 }
 0x5d1   :  { %v3536_v52 = vpop.permute.xlu1 %3535  ;;  %5821 = vmatpush3.bf16.msra.mxu0 %v6113_v38 }
 0x5d2   :  { %v3554_v10 = vsel %vm3514_vm1, %v3536_v52, 0.0  ;;  %v3791_v52 = vsel %vm3779_vm3, %v12638_v9, %v6051_v7  ;;  %5822 = vmatprep.subr.bf16.mxu0 %v6114_v18 }
 0x5d3   :  { %v3562_v22 = vadd.f32 %v3554_v10, %v3482_v50  ;;  %v6059_v10 = vpop.permute.xlu0 %6058 }
 0x5d4   :  { %v6060_v4 = vunpack.i.l.bf16 %v6059_v10 }
 0x5d5   :  { %v3568_v42 = vpack.c.bf16 %v3563_v29, %v3562_v22  ;;  %v3544_v30 = vpop.permute.xlu1 %3543  ;;  %v12641_v29 = vld [vmem:[#allocation71_spill] sm:$0xff]  ;;  %5823 = vmatpush3.bf16.msra.mxu0 %v6114_v18 }
 0x5d6   :  { %v3556_v48 = vsel %vm3516_vm14, %v3544_v30, 0.0  ;;  %v6061_v30 = vunpack.i.h.bf16 %v6059_v10  ;;  %5875 = vmatprep.subr.mxu0 %v12610_v46 }
 0x5d7   :  { %v3564_v8 = vadd.f32 %v3556_v48, %v3484_v44  ;;  %5776 = vmatprep.mubr.msk.bf16.mxu1 %vm1242_vm15, %v3568_v42  ;;  %v3817_v42 = vpack.c.bf16 %v3791_v52, %v3790_v25  ;;  %v6069_v24 = vpop.permute.xlu0 %6068  ;;  %v10712_v25 = vld [vmem:[%s11495_s6] ss:$0 sm:$0xff]  ;;  %s4913_s6 = scvt.s32.f32 %s7439_s25  ;;  %s5033_s25 = scvt.s32.f32 %s7126_s22 }
 0x5d8   :  { %s5154_s22 = smax.f32 %s6337_s30, %s5153_s15 }
 0x5d9   :  { %v3569_v13 = vpack.c.bf16 %v3565_v58, %v3564_v8  ;;  %v6024_v17 = vpop.permute.xlu1 %6023  ;;  %v12642_v8 = vld [vmem:[#allocation172_spill] sm:$0xff]  ;;  %s5034_s16 = smax.f32 %s6337_s30, %s5033_s25 }
 0x5da   :  { %v6026_v54 = vunpack.i.h.bf16 %v6024_v17  ;;  %v6025_v32 = vunpack.i.l.bf16 %v6024_v17  ;;  %v12643_v17 = vld [vmem:[#allocation171_spill] sm:$0xff] }
 0x5db   :  { %5777 = vmatmul.mubr.msk.bf16.gmra.mxu1 %vm1242_vm15, %v3569_v13  ;;  %v3795_v13 = vsel %vm3779_vm3, %v12642_v8, %v6061_v30  ;;  %v3794_v35 = vsel %vm3779_vm3, %v12643_v17, %v6060_v4 }
 0x5dc   :  { %v3781_v57 = vsel %vm3779_vm3, %v12628_v23, %v6026_v54  ;;  %v3780_v40 = vsel %vm3779_vm3, %v12629_v3, %v6025_v32  ;;  %v12644_v54 = vld [vmem:[#allocation129_spill] sm:$0xff]  ;;  %v3819_v3 = vpack.c.bf16 %v3795_v13, %v3794_v35 }
 0x5dd   :  { %v3812_v43 = vpack.c.bf16 %v3781_v57, %v3780_v40  ;;  %v6034_v61 = vpop.permute.xlu1 %6033  ;;  %v12645_v23 = vld [vmem:[#allocation73_spill] sm:$0xff]  ;;  %v6071_v40 = vunpack.i.h.bf16 %v6069_v24 }
 0x5de   :  { %v6036_v47 = vunpack.i.h.bf16 %v6034_v61  ;;  %v6035_v62 = vunpack.i.l.bf16 %v6034_v61 }
 0x5df   :  { %5788 = vmatprep.mubr.msk.bf16.mxu1 %vm1242_vm15, %v3812_v43  ;;  %v6070_v43 = vunpack.i.l.bf16 %v6069_v24  ;;  %v3799_v34 = vsel %vm3779_vm3, %v12646_v21, %v6071_v40 }
 0x5e0   :  { %v3785_v14 = vsel %vm3779_vm3, %v12632_v20, %v6036_v47  ;;  %v3784_v39 = vsel %vm3779_vm3, %v12633_v55, %v6035_v62 }
 0x5e1   :  { %v3814_v16 = vpack.c.bf16 %v3785_v14, %v3784_v39  ;;  %v6044_v2 = vpop.permute.xlu1 %6043  ;;  %v3798_v1 = vsel %vm3779_vm3, %v12647_v11, %v6070_v43 }
 0x5e2   :  { %v6046_v36 = vunpack.i.h.bf16 %v6044_v2  ;;  %v6045_v49 = vunpack.i.l.bf16 %v6044_v2  ;;  %v3821_v47 = vpack.c.bf16 %v3799_v34, %v3798_v1  ;;  %v12649_v2 = vld [vmem:[#allocation49_spill] sm:$0xff] }
 0x5e3   :  { %5789 = vmatmul.mubr.msk.bf16.vlgmr.msra.gmra.mxu1 %vm1242_vm15, %v3813_v12  ;;  %v12648_v12 = vld [vmem:[#allocation62_spill] sm:$0xff] }
 0x5e4   :  { %5792 = vmatprep.mubr.msk.bf16.mxu1 %vm1242_vm15, %v3814_v16  ;;  %v3789_v27 = vsel %vm3779_vm3, %v12636_v6, %v6046_v36  ;;  %v3788_v33 = vsel %vm3779_vm3, %v12637_v59, %v6045_v49  ;;  %v12651_v49 = vld [vmem:[#allocation48_spill] sm:$0xff] }
 0x5e5   :  { %v6054_v41 = vpop.permute.xlu1 %6053  ;;  %v3816_v53 = vpack.c.bf16 %v3789_v27, %v3788_v33 }
 0x5e6   :  { %v6056_v50 = vunpack.i.h.bf16 %v6054_v41  ;;  %v6055_v60 = vunpack.i.l.bf16 %v6054_v41 }
 0x5e8   :  { %v3793_v45 = vsel %vm3779_vm3, %v12640_v26, %v6056_v50  ;;  %v3792_v22 = vsel %vm3779_vm3, %v12641_v29, %v6055_v60 }
 0x5e9   :  { %v6064_v44 = vpop.permute.xlu1 %6063  ;;  %v3818_v48 = vpack.c.bf16 %v3793_v45, %v3792_v22 }
 0x5ea   :  { %v6066_v0 = vunpack.i.h.bf16 %v6064_v44  ;;  %v6065_v58 = vunpack.i.l.bf16 %v6064_v44 }
 0x5eb   :  { %5793 = vmatmul.mubr.msk.bf16.gmra.mxu1 %vm1242_vm15, %v3815_v56 }
 0x5ec   :  { %5796 = vmatprep.mubr.msk.bf16.mxu1 %vm1242_vm15, %v3816_v53  ;;  %v3797_v32 = vsel %vm3779_vm3, %v12644_v54, %v6066_v0  ;;  %v3796_v57 = vsel %vm3779_vm3, %v12645_v23, %v6065_v58 }
 0x5ed   :  { %v3820_v61 = vpack.c.bf16 %v3797_v32, %v3796_v57 }
 0x5f3   :  { %5797 = vmatmul.mubr.msk.bf16.gmra.mxu1 %vm1242_vm15, %v3817_v42 }
 0x5f4   :  { %5800 = vmatprep.mubr.msk.bf16.mxu1 %vm1242_vm15, %v3818_v48 }
 0x5fb   :  { %5801 = vmatmul.mubr.msk.bf16.gmra.mxu1 %vm1242_vm15, %v3819_v3 }
 0x5fc   :  { %5804 = vmatprep.mubr.msk.bf16.mxu1 %vm1242_vm15, %v3820_v61 }
 0x603   :  { %v6079_v62 = vpop.permute.xlu0 %6078  ;;  %5805 = vmatmul.mubr.msk.bf16.gmra.mxu1 %vm1242_vm15, %v3821_v47 }
 0x604   :  { %v6081_v15 = vunpack.i.h.bf16 %v6079_v62  ;;  %v6080_v20 = vunpack.i.l.bf16 %v6079_v62 }
 0x605   :  { %v6074_v14 = vpop.permute.xlu1 %6073 }
 0x606   :  { %v6076_v55 = vunpack.i.h.bf16 %v6074_v14  ;;  %v6075_v39 = vunpack.i.l.bf16 %v6074_v14  ;;  %v3803_v16 = vsel %vm3779_vm3, %v12648_v12, %v6081_v15  ;;  %v3802_v5 = vsel %vm3779_vm3, %v12649_v2, %v6080_v20 }
 0x607   :  { %v3823_v37 = vpack.c.bf16 %v3803_v16, %v3802_v5 }
 0x608   :  { %v3801_v36 = vsel %vm3779_vm3, %v12650_v51, %v6076_v55  ;;  %v3800_v31 = vsel %vm3779_vm3, %v12651_v49, %v6075_v39 }
 0x609   :  { %v3822_v63 = vpack.c.bf16 %v3801_v36, %v3800_v31 }
 0x60b   :  { %5808 = vmatprep.mubr.msk.bf16.mxu1 %vm1242_vm15, %v3822_v63 }
 0x60c   :  { %5809 = vmatmul.mubr.msk.bf16.gmra.mxu1 %vm1242_vm15, %v3823_v37 }
 0x653   :  { %v5774_v6 = vpop.f32.mrf.mxu1 }
 0x655   :  { %v3620_v27 = vpop.f32.mrf.mxu1 }
 0x657   :  { %v5775_v59 = vpop.f32.mrf.mxu1 }
 0x658   :  { %v6087_v33 = vpack.i.bf16 %v5775_v59, %v5774_v6 }
 0x659   :  { %v3623_v41 = vpop.f32.mrf.mxu1 }
 0x65a   :  { %v6082_v56 = vpack.i.bf16 %v3623_v41, %v3620_v27  ;;  %6088 = vrot.lane.b32.xlu0 %v6087_v33, %s6336_s14 }
 0x65c   :  { %6083 = vrot.lane.b32.xlu1 %v6082_v56, %s6336_s14 }
 0x69b   :  { %v5778_v7 = vpop.f32.mrf.mxu1 }
 0x69d   :  { %v3636_v19 = vpop.f32.mrf.mxu1 }
 0x69f   :  { %v5779_v53 = vpop.f32.mrf.mxu1 }
 0x6a0   :  { %v6097_v50 = vpack.i.bf16 %v5779_v53, %v5778_v7 }
 0x6a1   :  { %v3639_v60 = vpop.f32.mrf.mxu1 }
 0x6a2   :  { %v6092_v9 = vpack.i.bf16 %v3639_v60, %v3636_v19  ;;  %6098 = vrot.lane.b32.xlu0 %v6097_v50, %s6336_s14 }
 0x6a3   :  { %v5790_v52 = vpop.f32.mrf.mxu1 }
 0x6a4   :  { %6093 = vrot.lane.b32.xlu1 %v6092_v9, %s6336_s14  ;;  %v3958_v29 = vadd.f32 %v5790_v52, %v10712_v25  ;;  %s4914_s14 = smax.f32 %s6337_s30, %s4913_s6 }
 0x6a5   :  { %v3949_v28 = vpop.f32.mrf.mxu1 }
 0x6a6   :  { %v3950_v26 = vadd.f32 %v10712_v25, %v3949_v28  ;;  %v4078_v0 = vmax.f32 %v3958_v29, 0.0 }
 0x6a7   :  { %v5791_v10 = vpop.f32.mrf.mxu1 }
 0x6a8   :  { %v3961_v45 = vadd.f32 %v5791_v10, %v10712_v25  ;;  %v4076_v4 = vmax.f32 %v3950_v26, 0.0  ;;  %v4110_v63 = vmul.f32 %v4078_v0, %v4078_v0 }
 0x6a9   :  { %v3952_v22 = vpop.f32.mrf.mxu1 }
 0x6aa   :  { %v3953_v44 = vadd.f32 %v10712_v25, %v3952_v22  ;;  %v10718_v42 = vmax.f32 %v3961_v45, 0.0  ;;  %v4108_v33 = vmul.f32 %v4076_v4, %v4076_v4  ;;  %v4146_v50 = vsel %vm3779_vm3, %v4110_v63, 0.0 }
 0x6ab   :  { %v5794_v30 = vpop.f32.mrf.mxu1 }
 0x6ac   :  { %v4077_v48 = vmax.f32 %v3953_v44, 0.0  ;;  %v4237_v13 = vpack.c.bf16 %v10718_v42, %v4078_v0  ;;  %v3974_v54 = vadd.f32 %v5794_v30, %v10712_v25  ;;  %v4111_v10 = vmul.f32 %v10718_v42, %v10718_v42 }
 0x6ad   :  { %v3965_v58 = vpop.f32.mrf.mxu1  ;;  %v4140_v22 = vsel %vm3779_vm3, %v4108_v33, 0.0 }
 0x6ae   :  { %v4236_v8 = vpack.c.bf16 %v4077_v48, %v4076_v4  ;;  %v3966_v35 = vadd.f32 %v10712_v25, %v3965_v58  ;;  %v10731_v61 = vmax.f32 %v3974_v54, 0.0  ;;  %v4109_v12 = vmul.f32 %v4077_v48, %v4077_v48 }
 0x6af   :  { %v5795_v17 = vpop.f32.mrf.mxu1  ;;  %v4915_v48 = vstv %s4914_s14 }
 0x6b0   :  { %v3977_v24 = vadd.f32 %v5795_v17, %v10712_v25  ;;  %5824 = vmatprep.mubr.msk.bf16.mxu0 %vm3779_vm3, %v4236_v8  ;;  %v4080_v40 = vmax.f32 %v3966_v35, 0.0  ;;  %v4143_v18 = vsel %vm3779_vm3, %v4109_v12, 0.0  ;;  %6115 = vrcp.f32 %v4915_v48 }
 0x6b1   :  { %v3968_v32 = vpop.f32.mrf.mxu1  ;;  %5825 = vmatmul.mubr.msk.bf16.vlgmr.msra.gmra.mxu0 %vm3779_vm3, %v4237_v13  ;;  %v4149_v17 = vsel %vm3779_vm3, %v4111_v10, 0.0  ;;  %v5275_v48 = vstv %s5274_s18 }
 0x6b2   :  { %v3969_v23 = vadd.f32 %v10712_v25, %v3968_v32  ;;  %v10727_v57 = vmax.f32 %v3977_v24, 0.0  ;;  %v4112_v26 = vmul.f32 %v4080_v40, %v4080_v40 }
 0x6b3   :  { %v5798_v3 = vpop.f32.mrf.mxu1 }
 0x6b4   :  { %v10729_v43 = vmax.f32 %v3969_v23, 0.0  ;;  %v4239_v11 = vpack.c.bf16 %v10727_v57, %v10731_v61  ;;  %v3990_v15 = vadd.f32 %v5798_v3, %v10712_v25  ;;  %v4152_v23 = vsel %vm3779_vm3, %v4112_v26, 0.0 }
 0x6b5   :  { %v3981_v21 = vpop.f32.mrf.mxu1 }
 0x6b6   :  { %v4238_v34 = vpack.c.bf16 %v10729_v43, %v4080_v40  ;;  %v3982_v47 = vadd.f32 %v10712_v25, %v3981_v21  ;;  %v10744_v5 = vmax.f32 %v3990_v15, 0.0 }
 0x6b7   :  { %v5799_v1 = vpop.f32.mrf.mxu1 }
 0x6b8   :  { %v3993_v62 = vadd.f32 %v5799_v1, %v10712_v25  ;;  %5828 = vmatprep.mubr.msk.bf16.mxu0 %vm3779_vm3, %v4238_v34  ;;  %v4084_v16 = vmax.f32 %v3982_v47, 0.0  ;;  %v4113_v34 = vmul.f32 %v10729_v43, %v10729_v43 }
 0x6b9   :  { %v3984_v20 = vpop.f32.mrf.mxu1  ;;  %5829 = vmatmul.mubr.msk.bf16.gmra.mxu0 %vm3779_vm3, %v4239_v11 }
 0x6ba   :  { %v3985_v14 = vadd.f32 %v10712_v25, %v3984_v20  ;;  %v10742_v55 = vmax.f32 %v3993_v62, 0.0  ;;  %v4116_v7 = vmul.f32 %v4084_v16, %v4084_v16  ;;  %v4118_v62 = vmul.f32 %v10744_v5, %v10744_v5 }
 0x6bb   :  { %v5802_v39 = vpop.f32.mrf.mxu1 }
 0x6bc   :  { %v4085_v2 = vmax.f32 %v3985_v14, 0.0  ;;  %v4241_v49 = vpack.c.bf16 %v10742_v55, %v10744_v5  ;;  %v4006_v6 = vadd.f32 %v5802_v39, %v10712_v25  ;;  %v4164_v4 = vsel %vm3779_vm3, %v4116_v7, 0.0  ;;  %v12652_v39 = vld [vmem:[#allocation127_spill] sm:$0xff]  ;;  %v12654_v5 = vld [vmem:[#allocation116_spill] sm:$0xff] }
 0x6bd   :  { %v3997_v51 = vpop.f32.mrf.mxu1  ;;  %v6116_v26 = vpop.eup %6115 }
 0x6be   :  { %v4240_v36 = vpack.c.bf16 %v4085_v2, %v4084_v16  ;;  %v3998_v37 = vadd.f32 %v10712_v25, %v3997_v51  ;;  %v10762_v60 = vmax.f32 %v4006_v6, 0.0  ;;  %v4117_v8 = vmul.f32 %v4085_v2, %v4085_v2  ;;  %v12653_v16 = vld [vmem:[#allocation110_spill] sm:$0xff]  ;;  %5890 = vpush %v6116_v26 }
 0x6bf   :  { %v5803_v31 = vpop.f32.mrf.mxu1 }
 0x6c0   :  { %v4009_v38 = vadd.f32 %v5803_v31, %v10712_v25  ;;  %5832 = vmatprep.mubr.msk.bf16.mxu0 %vm3779_vm3, %v4240_v36  ;;  %v10757_v19 = vmax.f32 %v3998_v37, 0.0  ;;  %v4167_v14 = vsel %vm3779_vm3, %v4117_v8, 0.0 }
 0x6c1   :  { %v4000_v27 = vpop.f32.mrf.mxu1  ;;  %4144 = vadd.xlane.f32.xlu0 %v4143_v18  ;;  %5833 = vmatmul.mubr.msk.bf16.gmra.mxu0 %vm3779_vm3, %v4241_v49 }
 0x6c2   :  { %v4001_v59 = vadd.f32 %v10712_v25, %v4000_v27  ;;  %v10755_v41 = vmax.f32 %v4009_v38, 0.0  ;;  %v12655_v38 = vld [vmem:[#allocation118_spill] sm:$0xff] }
 0x6c3   :  { %v5806_v56 = vpop.f32.mrf.mxu1 }
 0x6c4   :  { %v10759_v53 = vmax.f32 %v4001_v59, 0.0  ;;  %v4243_v45 = vpack.c.bf16 %v10755_v41, %v10762_v60  ;;  %v4022_v42 = vadd.f32 %v5806_v56, %v10712_v25  ;;  %v4170_v56 = vsel %vm3779_vm3, %v4118_v62, 0.0  ;;  %v12659_v62 = vld [vmem:[#allocation105_spill] sm:$0xff] }
 0x6c5   :  { %v4013_v9 = vpop.f32.mrf.mxu1  ;;  %4147 = vadd.xlane.f32.xlu0 %v4146_v50 }
 0x6c6   :  { %v4242_v52 = vpack.c.bf16 %v10759_v53, %v10757_v19  ;;  %v4014_v28 = vadd.f32 %v10712_v25, %v4013_v9  ;;  %v4094_v3 = vmax.f32 %v4022_v42, 0.0 }
 0x6c7   :  { %v5807_v29 = vpop.f32.mrf.mxu1 }
 0x6c8   :  { %v4092_v44 = vmax.f32 %v4014_v28, 0.0  ;;  %v4025_v30 = vadd.f32 %v5807_v29, %v10712_v25  ;;  %5836 = vmatprep.mubr.msk.bf16.mxu0 %vm3779_vm3, %v4242_v52  ;;  %4141 = vadd.xlane.f32.xlu1 %v4140_v22  ;;  %v4126_v7 = vmul.f32 %v4094_v3, %v4094_v3  ;;  %v4155_v52 = vsel %vm3779_vm3, %v4113_v34, 0.0  ;;  %v12657_v34 = vld [vmem:[#allocation131_spill] sm:$0xff] }
 0x6c9   :  { %v4016_v0 = vpop.f32.mrf.mxu1  ;;  %4165 = vadd.xlane.f32.xlu0 %v4164_v4  ;;  %5837 = vmatmul.mubr.msk.bf16.gmra.mxu0 %vm3779_vm3, %v4243_v45  ;;  %v4119_v45 = vmul.f32 %v10742_v55, %v10742_v55  ;;  %v5035_v22 = vstv %s5034_s16 }
 0x6ca   :  { %v4017_v58 = vadd.f32 %v10712_v25, %v4016_v0  ;;  %v10780_v13 = vmax.f32 %v4025_v30, 0.0  ;;  %v4124_v35 = vmul.f32 %v4092_v44, %v4092_v44  ;;  %6117 = vrcp.f32 %v5035_v22 }
 0x6cb   :  { %v4194_v55 = vsel %vm3779_vm3, %v4126_v7, 0.0  ;;  %v4173_v0 = vsel %vm3779_vm3, %v4119_v45, 0.0 }
 0x6cc   :  { %v4093_v24 = vmax.f32 %v4017_v58, 0.0  ;;  %v6089_v54 = vpop.permute.xlu0 %6088  ;;  %v5810_v32 = vpop.f32.mrf.mxu1  ;;  %4150 = vadd.xlane.f32.xlu1 %v4149_v17  ;;  %v4245_v15 = vpack.c.bf16 %v10780_v13, %v4094_v3  ;;  %v4188_v43 = vsel %vm3779_vm3, %v4124_v35, 0.0 }
 0x6cd   :  { %v6091_v40 = vunpack.i.h.bf16 %v6089_v54  ;;  %v6090_v21 = vunpack.i.l.bf16 %v6089_v54  ;;  %4153 = vadd.xlane.f32.xlu0 %v4152_v23  ;;  %v4038_v37 = vadd.f32 %v5810_v32, %v10712_v25 }
 0x6ce   :  { %v4244_v11 = vpack.c.bf16 %v4093_v24, %v4092_v44  ;;  %v6084_v1 = vpop.permute.xlu1 %6083  ;;  %v4029_v47 = vpop.f32.mrf.mxu1  ;;  %v4125_v27 = vmul.f32 %v4093_v24, %v4093_v24  ;;  %v5155_v44 = vstv %s5154_s22 }
 0x6cf   :  { %v6086_v20 = vunpack.i.h.bf16 %v6084_v1  ;;  %v3807_v12 = vsel %vm3779_vm3, %v12652_v39, %v6091_v40  ;;  %v3806_v2 = vsel %vm3779_vm3, %v12653_v16, %v6090_v21  ;;  %v6085_v51 = vunpack.i.l.bf16 %v6084_v1  ;;  %v12656_v40 = vld [vmem:[#allocation90_spill] sm:$0xff] }
 0x6d0   :  { %v5811_v36 = vpop.f32.mrf.mxu1  ;;  %5840 = vmatprep.mubr.msk.bf16.mxu0 %vm3779_vm3, %v4244_v11  ;;  %4168 = vadd.xlane.f32.xlu1 %v4167_v14  ;;  %v4030_v31 = vadd.f32 %v10712_v25, %v4029_v47  ;;  %v3825_v50 = vpack.c.bf16 %v3807_v12, %v3806_v2  ;;  %v10821_v29 = vmax.f32 %v4038_v37, 0.0  ;;  %v4191_v4 = vsel %vm3779_vm3, %v4125_v27, 0.0  ;;  %v12658_v1 = vld [vmem:[#allocation98_spill] sm:$0xff] }
 0x6d1   :  { %v3805_v49 = vsel %vm3779_vm3, %v12654_v5, %v6086_v20  ;;  %v4041_v63 = vadd.f32 %v5811_v36, %v10712_v25  ;;  %4189 = vadd.xlane.f32.xlu0 %v4188_v43  ;;  %5841 = vmatmul.mubr.msk.bf16.gmra.mxu0 %vm3779_vm3, %v4245_v15  ;;  %v3804_v18 = vsel %vm3779_vm3, %v12655_v38, %v6085_v51  ;;  %6119 = vrcp.f32 %v5155_v44  ;;  %v10895_v44 = vld [vmem:[%s11497_s8] ss:$0 sm:$0xff] }
 0x6d2   :  { %v4032_v6 = vpop.f32.mrf.mxu1  ;;  %v3824_v59 = vpack.c.bf16 %v3805_v49, %v3804_v18  ;;  %v10812_v28 = vmax.f32 %v4030_v31, 0.0  ;;  %6121 = vrcp.f32 %v5275_v48 }
 0x6d3   :  { %v4033_v33 = vadd.f32 %v10712_v25, %v4032_v6  ;;  %v10808_v9 = vmax.f32 %v4041_v63, 0.0 }
 0x6d4   :  { %4171 = vadd.xlane.f32.xlu1 %v4170_v56  ;;  %5812 = vmatprep.mubr.msk.bf16.mxu1 %vm1242_vm15, %v3824_v59 }
 0x6d5   :  { %v10814_v10 = vmax.f32 %v4033_v33, 0.0  ;;  %4156 = vadd.xlane.f32.xlu0 %v4155_v52  ;;  %5813 = vmatmul.mubr.msk.bf16.gmra.mxu1 %vm1242_vm15, %v3825_v50  ;;  %v4247_v42 = vpack.c.bf16 %v10808_v9, %v10821_v29 }
 0x6d7   :  { %v4246_v30 = vpack.c.bf16 %v10814_v10, %v10812_v28  ;;  %v6118_v58 = vpop.eup %6117 }
 0x6d8   :  { %4192 = vadd.xlane.f32.xlu1 %v4191_v4  ;;  %5892 = vpush %v6118_v58 }
 0x6d9   :  { %4195 = vadd.xlane.f32.xlu0 %v4194_v55  ;;  %5844 = vmatprep.mubr.msk.bf16.mxu0 %vm3779_vm3, %v4246_v30 }
 0x6da   :  { %5845 = vmatmul.mubr.msk.bf16.gmra.mxu0 %vm3779_vm3, %v4247_v42 }
 0x6dc   :  { %4174 = vadd.xlane.f32.xlu1 %v4173_v0 }
 0x6de   :  { %v6120_v8 = vpop.eup %6119 }
 0x6df   :  { %v6122_v17 = vpop.eup %6121  ;;  %5894 = vpush %v6120_v8 }
 0x6e0   :  { %5896 = vpush %v6122_v17 }
 0x6ef   :  { %s10917_s2 = spop %5890 }
 0x709   :  { %s10922_s19 = spop %5892 }
 0x710   :  { %s5895_s20 = spop %5894 }
 0x711   :  { %s5897_s22 = spop %5896 }
 0x714   :  { %v6099_v35 = vpop.permute.xlu0 %6098 }
 0x715   :  { %v6101_v24 = vunpack.i.h.bf16 %v6099_v35  ;;  %v6100_v54 = vunpack.i.l.bf16 %v6099_v35 }
 0x716   :  { %v6094_v32 = vpop.permute.xlu1 %6093 }
 0x717   :  { %v6096_v23 = vunpack.i.h.bf16 %v6094_v32  ;;  %v6095_v3 = vunpack.i.l.bf16 %v6094_v32  ;;  %v3811_v21 = vsel %vm3779_vm3, %v12656_v40, %v6101_v24  ;;  %v3810_v11 = vsel %vm3779_vm3, %v12657_v34, %v6100_v54 }
 0x718   :  { %v3827_v14 = vpack.c.bf16 %v3811_v21, %v3810_v11 }
 0x719   :  { %v3809_v47 = vsel %vm3779_vm3, %v12658_v1, %v6096_v23  ;;  %v3808_v15 = vsel %vm3779_vm3, %v12659_v62, %v6095_v3 }
 0x71a   :  { %v3826_v20 = vpack.c.bf16 %v3809_v47, %v3808_v15 }
 0x71c   :  { %5816 = vmatprep.mubr.msk.bf16.mxu1 %vm1242_vm15, %v3826_v20  ;;  %v4114_v20 = vmul.f32 %v10731_v61, %v10731_v61  ;;  %v4120_v61 = vmul.f32 %v10757_v19, %v10757_v19 }
 0x71d   :  { %5817 = vmatmul.mubr.msk.bf16.gmra.mxu1 %vm1242_vm15, %v3827_v14 }
 0x71e   :  { %5858 = vmatprep.mubr.msk.f32.mxu1 %vm6338_vm12, %v12610_v46 }
 0x74a   :  { %v10852_v51 = vpop.xlane.xlu0 %4144 }
 0x74e   :  { %v10860_v49 = vpop.xlane.xlu0 %4147 }
 0x751   :  { %v10866_v37 = vpop.xlane.xlu1 %4141 }
 0x752   :  { %v10870_v18 = vpop.xlane.xlu0 %4165 }
 0x755   :  { %v10876_v59 = vpop.xlane.xlu1 %4150 }
 0x756   :  { %v10880_v56 = vpop.xlane.xlu0 %4153 }
 0x759   :  { %v10886_v52 = vpop.xlane.xlu1 %4168 }
 0x75a   :  { %v4190_v45 = vpop.xlane.xlu0 %4189 }
 0x75b   :  { %v4500_v4 = vadd.f32 %v10895_v44, %v4190_v45 }
 0x75d   :  { %v10898_v42 = vpop.xlane.xlu1 %4171 }
 0x761   :  { %v4193_v54 = vpop.xlane.xlu1 %4192 }
 0x762   :  { %v4501_v3 = vadd.f32 %v10895_v44, %v4193_v54 }
 0x771   :  { %v10844_v39 = vpop.f32.mrf.mxu0 }
 0x773   :  { %v10846_v12 = vpop.f32.mrf.mxu0 }
 0x775   :  { %v10848_v16 = vpop.f32.mrf.mxu0 }
 0x777   :  { %v10850_v2 = vpop.f32.mrf.mxu0 }
 0x779   :  { %v10854_v36 = vpop.f32.mrf.mxu0 }
 0x77b   :  { %v10856_v43 = vpop.f32.mrf.mxu0 }
 0x77d   :  { %v10858_v5 = vpop.f32.mrf.mxu0 }
 0x77f   :  { %v10862_v31 = vpop.f32.mrf.mxu0 }
 0x781   :  { %v10864_v63 = vpop.f32.mrf.mxu0 }
 0x783   :  { %v10868_v38 = vpop.f32.mrf.mxu0 }
 0x785   :  { %v10872_v6 = vpop.f32.mrf.mxu0 }
 0x787   :  { %v10874_v27 = vpop.f32.mrf.mxu0 }
 0x789   :  { %v10878_v33 = vpop.f32.mrf.mxu0 }
 0x78b   :  { %v10882_v7 = vpop.f32.mrf.mxu0 }
 0x78d   :  { %v10884_v50 = vpop.f32.mrf.mxu0 }
 0x78f   :  { %v10888_v26 = vpop.f32.mrf.mxu0 }
 0x791   :  { %v10890_v22 = vpop.f32.mrf.mxu0 }
 0x793   :  { %v4414_v30 = vpop.f32.mrf.mxu0 }
 0x794   :  { %v4532_v48 = vmul.f32 2.0, %v4414_v30 }
 0x795   :  { %v5814_v0 = vpop.f32.mrf.mxu1  ;;  %v10900_v58 = vpop.f32.mrf.mxu0 }
 0x796   :  { %v4564_v55 = vsub.f32 %v4500_v4, %v4532_v48  ;;  %v4054_v47 = vadd.f32 %v5814_v0, %v10712_v25  ;;  %v4127_v48 = vmul.f32 %v10780_v13, %v10780_v13  ;;  %v4158_v0 = vsel %vm3779_vm3, %v4114_v20, 0.0 }
 0x797   :  { %v4045_v8 = vpop.f32.mrf.mxu1  ;;  %v4417_v35 = vpop.f32.mrf.mxu0  ;;  %v4115_v13 = vmul.f32 %v10727_v57, %v10727_v57  ;;  %v4121_v20 = vmul.f32 %v10759_v53, %v10759_v53 }
 0x798   :  { %v4596_v17 = vmax.f32 %v4564_v55, 0.0  ;;  %v4046_v24 = vadd.f32 %v10712_v25, %v4045_v8  ;;  %v4533_v23 = vmul.f32 2.0, %v4417_v35  ;;  %v4102_v4 = vmax.f32 %v4054_v47, 0.0 }
 0x799   :  { %v5815_v32 = vpop.f32.mrf.mxu1  ;;  %v4161_v57 = vsel %vm3779_vm3, %v4115_v13, 0.0 }
 0x79a   :  { %6123 = vrsqrt.f32 %v4596_v17  ;;  %v4100_v40 = vmax.f32 %v4046_v24, 0.0  ;;  %v4565_v11 = vsub.f32 %v4501_v3, %v4533_v23  ;;  %v4057_v1 = vadd.f32 %v5815_v32, %v10712_v25 }
 0x79b   :  { %v4048_v21 = vpop.f32.mrf.mxu1  ;;  %v4197_v23 = vsel %vm3779_vm3, %v4127_v48, 0.0  ;;  %vm4726_vm15 = vcmp.eq.f32.partialorder %v4596_v17, inf  ;;  %v4134_v19 = vmul.f32 %v4102_v4, %v4102_v4  ;;  %v4176_v3 = vsel %vm3779_vm3, %v4120_v61, 0.0  ;;  %v12661_v48 = vld [vmem:[#allocation41_spill] sm:$0xff] }
 0x79c   :  { %v4132_v34 = vmul.f32 %v4100_v40, %v4100_v40  ;;  %v4597_v62 = vmax.f32 %v4565_v11, 0.0  ;;  %v4049_v15 = vadd.f32 %v10712_v25, %v4048_v21  ;;  %v4103_v45 = vmax.f32 %v4057_v1, 0.0  ;;  %v12660_v1 = vld [vmem:[#allocation21_spill] sm:$0xff] }
 0x79d   :  { %v4128_v21 = vmul.f32 %v10812_v28, %v10812_v28  ;;  %v10928_v11 = vstv %s5895_s20  ;;  %vm4728_vm6 = vcmp.eq.f32.partialorder %v4596_v17, 0.0  ;;  %v4179_v61 = vsel %vm3779_vm3, %v4121_v20, 0.0 }
 0x79e   :  { %v4212_v14 = vsel %vm3779_vm3, %v4132_v34, 0.0  ;;  %6125 = vrsqrt.f32 %v4597_v62  ;;  %v4101_v30 = vmax.f32 %v4049_v15, 0.0  ;;  %v4249_v35 = vpack.c.bf16 %v4103_v45, %v4102_v4 }
 0x79f   :  { %4213 = vadd.xlane.f32.xlu1 %v4212_v14  ;;  %v4729_v34 = vand.u32 2147483648, %v4596_v17  ;;  %v5159_v47 = vmul.f32 %v10928_v11, %v12660_v1  ;;  %v5160_v28 = vmul.f32 %v10928_v11, %v12661_v48  ;;  %vm4733_vm0 = vcmp.eq.f32.partialorder %v4597_v62, inf }
 0x7a0   :  { %v4133_v55 = vmul.f32 %v4101_v30, %v4101_v30  ;;  %v4248_v8 = vpack.c.bf16 %v4101_v30, %v4100_v40  ;;  %v4218_v30 = vsel %vm3779_vm3, %v4134_v19, 0.0  ;;  %vm4735_vm7 = vcmp.eq.f32.partialorder %v4597_v62, 0.0 }
 0x7a1   :  { %v4135_v53 = vmul.f32 %v4103_v45, %v4103_v45  ;;  %v4123_v19 = vmul.f32 %v10755_v41, %v10755_v41  ;;  %v4837_v41 = vld [vmem:[%s11500_s11] sm:$0xff] }
 0x7a2   :  { %5848 = vmatprep.mubr.msk.bf16.mxu0 %vm3779_vm3, %v4248_v8  ;;  %v4215_v54 = vsel %vm3779_vm3, %v4133_v55, 0.0  ;;  %v4122_v55 = vmul.f32 %v10762_v60, %v10762_v60  ;;  %v4200_v8 = vsel %vm3779_vm3, %v4128_v21, 0.0  ;;  %5857 = vmatpush3.msra.mxu1 %v4837_v41 }
 0x7a3   :  { %4159 = vadd.xlane.f32.xlu1 %v4158_v0  ;;  %4216 = vadd.xlane.f32.xlu0 %v4215_v54  ;;  %v4221_v45 = vsel %vm3779_vm3, %v4135_v53, 0.0 }
 0x7a4   :  { %5849 = vmatmul.mubr.msk.bf16.gmra.mxu0 %vm3779_vm3, %v4249_v35  ;;  %5861 = vmatprep.subr.mxu1 %v12610_v46 }
 0x7a7   :  { %v6124_v24 = vpop.eup %6123  ;;  %4198 = vadd.xlane.f32.xlu1 %v4197_v23  ;;  %4177 = vadd.xlane.f32.xlu0 %v4176_v3  ;;  %v4129_v23 = vmul.f32 %v10814_v10, %v10814_v10 }
 0x7a8   :  { %v4725_v32 = vmul.f32 %v6124_v24, %v4596_v17 }
 0x7a9   :  { %v4203_v3 = vsel %vm3779_vm3, %v4129_v23, 0.0 }
 0x7aa   :  { %v4727_v40 = vsel %vm4726_vm15, %v4596_v17, %v4725_v32  ;;  %v4736_v17 = vand.u32 2147483648, %v4597_v62  ;;  %v4182_v32 = vsel %vm3779_vm3, %v4122_v55, 0.0 }
 0x7ab   :  { %4162 = vadd.xlane.f32.xlu1 %v4161_v57  ;;  %v6126_v15 = vpop.eup %6125  ;;  %v4730_v14 = vsel %vm4728_vm6, %v4729_v34, %v4727_v40  ;;  %4219 = vadd.xlane.f32.xlu0 %v4218_v30  ;;  %v4185_v40 = vsel %vm3779_vm3, %v4123_v19, 0.0  ;;  %v5558_v19 = vld [vmem:[%s11499_s10 + $0x28] sm:$0xff] }
 0x7ac   :  { %v4732_v4 = vmul.f32 %v6126_v15, %v4597_v62  ;;  %v5167_v35 = vmul.f32 %v5159_v47, %v4730_v14  ;;  %5876 = vmatpush3.msra.mxu0 %v5558_v19  ;;  %v4524_v19 = vmul.f32 2.0, %v10868_v38 }
 0x7ad   :  { %5877 = vmatprep.subr.mxu0 %v12610_v46 }
 0x7ae   :  { %v4734_v0 = vsel %vm4733_vm0, %v4597_v62, %v4732_v4  ;;  %v5175_v13 = vsel %vm4935_vm2, %v5167_v35, 0.0  ;;  %v4836_v4 = vld [vmem:[%s11498_s9] sm:$0x1] }
 0x7af   :  { %4201 = vadd.xlane.f32.xlu1 %v4200_v8  ;;  %v4737_v24 = vsel %vm4735_vm7, %v4736_v17, %v4734_v0  ;;  %4180 = vadd.xlane.f32.xlu0 %v4179_v61  ;;  %v4957_v8 = vld [vmem:[%s11499_s10] sm:$0xff]  ;;  %v4130_v0 = vmul.f32 %v10821_v29, %v10821_v29  ;;  %v4131_v29 = vmul.f32 %v10808_v9, %v10808_v9  ;;  %v4517_v9 = vmul.f32 2.0, %v10850_v2 }
 0x7b0   :  { %v5168_v54 = vmul.f32 %v5160_v28, %v4737_v24  ;;  %v4958_v28 = vld [vmem:[%s11499_s10 + $0x8] sm:$0xff]  ;;  %5859 = vmatmul.mubr.msk.f32.vlgmr.msra.gmra.mxu1 %vm4839_vm10, %v4836_v4 }
 0x7b1   :  { %5862 = vmatpush3.msra.mxu1 %v4958_v28  ;;  %5865 = vmatprep.mubr.msk.f32.mxu1 %vm6338_vm12, %v12610_v46  ;;  %v4209_v23 = vsel %vm3779_vm3, %v4131_v29, 0.0 }
 0x7b2   :  { %v5176_v60 = vsel %vm4935_vm2, %v5168_v54, 0.0  ;;  %5863 = vmatprep.subr.mxu1 %v12610_v46 }
 0x7b3   :  { %4183 = vadd.xlane.f32.xlu1 %v4182_v32  ;;  %v10947_v62 = vadd.f32 %v5176_v60, %v5175_v13  ;;  %4222 = vadd.xlane.f32.xlu0 %v4221_v45  ;;  %v4206_v32 = vsel %vm3779_vm3, %v4130_v0, 0.0 }
 0x7b4   :  { %5864 = vmatpush3.msra.mxu1 %v4957_v8 }
 0x7b5   :  { %5868 = vmatprep.subr.mxu1 %v12610_v46 }
 0x7b7   :  { %4204 = vadd.xlane.f32.xlu0 %v4203_v3  ;;  %v5557_v3 = vld [vmem:[%s11499_s10 + $0x20] sm:$0xff] }
 0x7b8   :  { %5878 = vmatpush3.msra.mxu0 %v5557_v3  ;;  %v11055_v3 = vstv %s10922_s19 }
 0x7bb   :  { %4186 = vadd.xlane.f32.xlu0 %v4185_v40  ;;  %v4485_v40 = vadd.f32 %v10895_v44, %v10852_v51  ;;  %v4519_v51 = vmul.f32 2.0, %v10848_v16  ;;  %v4488_v16 = vadd.f32 %v10895_v44, %v10880_v56  ;;  %v12662_v56 = vld [vmem:[#allocation158_spill] sm:$0xff] }
 0x7bd   :  { %v4549_v2 = vsub.f32 %v4485_v40, %v4517_v9  ;;  %v4526_v40 = vmul.f32 2.0, %v10864_v63  ;;  %v4494_v63 = vadd.f32 %v10895_v44, %v10898_v42 }
 0x7dd   :  { %v5818_v21 = vpop.f32.mrf.mxu1 }
 0x7de   :  { %v4070_v10 = vadd.f32 %v5818_v21, %v10712_v25  ;;  %v4516_v21 = vmul.f32 2.0, %v10846_v12 }
 0x7df   :  { %v4061_v34 = vpop.f32.mrf.mxu1 }
 0x7e0   :  { %v4062_v57 = vadd.f32 %v10712_v25, %v4061_v34  ;;  %v4106_v55 = vmax.f32 %v4070_v10, 0.0  ;;  %v4484_v34 = vadd.f32 %v10895_v44, %v10866_v37  ;;  %v4486_v10 = vadd.f32 %v10895_v44, %v10860_v49  ;;  %v4157_v49 = vpop.xlane.xlu0 %4156 }
 0x7e1   :  { %v5819_v1 = vpop.f32.mrf.mxu1 }
 0x7e2   :  { %v4104_v47 = vmax.f32 %v4062_v57, 0.0  ;;  %v4073_v15 = vadd.f32 %v5819_v1, %v10712_v25  ;;  %v4138_v61 = vmul.f32 %v4106_v55, %v4106_v55  ;;  %v4518_v57 = vmul.f32 2.0, %v10844_v39 }
 0x7e3   :  { %v4064_v20 = vpop.f32.mrf.mxu1  ;;  %v4548_v1 = vsub.f32 %v4484_v34, %v4516_v21  ;;  %v4520_v39 = vmul.f32 2.0, %v10856_v43  ;;  %v4175_v43 = vpop.xlane.xlu1 %4174  ;;  %v12668_v21 = vld [vmem:[#allocation139_spill] sm:$0xff] }
 0x7e4   :  { %v4136_v14 = vmul.f32 %v4104_v47, %v4104_v47  ;;  %v4065_v30 = vadd.f32 %v10712_v25, %v4064_v20  ;;  %v4107_v48 = vmax.f32 %v4073_v15, 0.0  ;;  %v4230_v13 = vsel %vm3779_vm3, %v4138_v61, 0.0 }
 0x7e5   :  { %v4550_v15 = vsub.f32 %v4486_v10, %v4518_v57  ;;  %v11010_v12 = vmax.f32 %v4548_v1, 0.0  ;;  %v4487_v20 = vadd.f32 %v10895_v44, %v10876_v59  ;;  %v4489_v59 = vadd.f32 %v10895_v44, %v4157_v49  ;;  %v11069_v1 = vpop.xlane.xlu0 %4195 }
 0x7e6   :  { %v4105_v17 = vmax.f32 %v4065_v30, 0.0  ;;  %v4224_v25 = vsel %vm3779_vm3, %v4136_v14, 0.0  ;;  %v4251_v24 = vpack.c.bf16 %v4107_v48, %v4106_v55  ;;  %v4139_v60 = vmul.f32 %v4107_v48, %v4107_v48 }
 0x7e7   :  { %4225 = vadd.xlane.f32.xlu1 %v4224_v25  ;;  %v4551_v37 = vsub.f32 %v4487_v20, %v4519_v51  ;;  %v11015_v41 = vmax.f32 %v4550_v15, 0.0  ;;  %v4521_v30 = vmul.f32 2.0, %v10862_v31  ;;  %v4552_v4 = vsub.f32 %v4488_v16, %v4520_v39  ;;  %v12663_v31 = vld [vmem:[#allocation150_spill] sm:$0xff] }
 0x7e8   :  { %v4137_v35 = vmul.f32 %v4105_v17, %v4105_v17  ;;  %v4250_v53 = vpack.c.bf16 %v4105_v17, %v4104_v47  ;;  %v4233_v45 = vsel %vm3779_vm3, %v4139_v60, 0.0  ;;  %v11007_v47 = vmax.f32 %v4549_v2, 0.0  ;;  %v12667_v60 = vld [vmem:[#allocation143_spill] sm:$0xff]  ;;  %v12669_v2 = vld [vmem:[#allocation140_spill] sm:$0xff] }
 0x7e9   :  { %v11021_v14 = vmax.f32 %v4551_v37, 0.0  ;;  %v4553_v48 = vsub.f32 %v4489_v59, %v4521_v30  ;;  %v11027_v28 = vmax.f32 %v4552_v4, 0.0  ;;  %v4918_v55 = vstv %s10917_s2  ;;  %v12670_v37 = vld [vmem:[#allocation18_spill] sm:$0xff] }
 0x7ea   :  { %5852 = vmatprep.mubr.msk.bf16.mxu0 %vm3779_vm3, %v4250_v53  ;;  %v4227_v54 = vsel %vm3779_vm3, %v4137_v35, 0.0  ;;  %6127 = vrsqrt.f32 %v11007_v47  ;;  %v11033_v8 = vmul.f32 %v4918_v55, %v12662_v56  ;;  %v11036_v0 = vmul.f32 %v4918_v55, %v12663_v31  ;;  %v12664_v35 = vld [vmem:[#allocation147_spill] sm:$0xff] }
 0x7eb   :  { %4228 = vadd.xlane.f32.xlu0 %v4227_v54  ;;  %5853 = vmatmul.mubr.msk.bf16.gmra.mxu0 %vm3779_vm3, %v4251_v24  ;;  %6129 = vrsqrt.f32 %v11010_v12  ;;  %v11030_v25 = vmax.f32 %v4553_v48, 0.0  ;;  %v11039_v53 = vmul.f32 %v4918_v55, %v12664_v35  ;;  %v4525_v24 = vmul.f32 2.0, %v10874_v27  ;;  %v12665_v54 = vld [vmem:[#allocation155_spill] sm:$0xff]  ;;  %v12671_v35 = vld [vmem:[#allocation26_spill] sm:$0xff] }
 0x7ec   :  { %4207 = vadd.xlane.f32.xlu1 %v4206_v32  ;;  %5879 = vmatprep.mubr.msk.f32.mxu0 %vm6338_vm12, %v12610_v46  ;;  %6131 = vrsqrt.f32 %v11015_v41  ;;  %v4920_v29 = vmul.f32 %v4918_v55, %v12665_v54  ;;  %v12666_v32 = vld [vmem:[#allocation141_spill] sm:$0xff]  ;;  %v11062_v34 = vmul.f32 %v4918_v55, %v12668_v21  ;;  %v11065_v57 = vmul.f32 %v4918_v55, %v12669_v2 }
 0x7ed   :  { %6133 = vrsqrt.f32 %v11021_v14  ;;  %v4527_v10 = vmul.f32 2.0, %v10872_v6  ;;  %v4495_v20 = vadd.f32 %v10895_v44, %v4175_v43  ;;  %vm4621_vm13 = vcmp.eq.f32.partialorder %v11007_v47, inf }
 0x7ee   :  { %6135 = vrsqrt.f32 %v11027_v28  ;;  %v11079_v39 = vmul.f32 %v11055_v3, %v12670_v37  ;;  %vm4614_vm9 = vcmp.eq.f32.partialorder %v11010_v12, inf  ;;  %v4522_v49 = vmul.f32 2.0, %v10854_v36 }
 0x7ef   :  { %4231 = vadd.xlane.f32.xlu0 %v4230_v13  ;;  %v11045_v13 = vmul.f32 %v4918_v55, %v12666_v32  ;;  %6137 = vrsqrt.f32 %v11030_v25  ;;  %vm4623_vm5 = vcmp.eq.f32.partialorder %v11007_v47, 0.0  ;;  %v4624_v42 = vand.u32 2147483648, %v11007_v47 }
 0x7f0   :  { %4210 = vadd.xlane.f32.xlu1 %v4209_v23  ;;  %v11048_v23 = vmul.f32 %v4918_v55, %v12667_v60  ;;  %v4558_v30 = vsub.f32 %v4494_v63, %v4526_v40  ;;  %v4559_v43 = vsub.f32 %v4495_v20, %v4527_v10  ;;  %v4617_v36 = vand.u32 2147483648, %v11010_v12 }
 0x7f1   :  { %vm4628_vm4 = vcmp.eq.f32.partialorder %v11015_v41, inf  ;;  %vm4630_vm8 = vcmp.eq.f32.partialorder %v11015_v41, 0.0  ;;  %vm4616_vm1 = vcmp.eq.f32.partialorder %v11010_v12, 0.0  ;;  %vm4635_vm11 = vcmp.eq.f32.partialorder %v11021_v14, inf }
 0x7f2   :  { %v11106_v60 = vmax.f32 %v4558_v30, 0.0  ;;  %v11111_v40 = vmax.f32 %v4559_v43, 0.0  ;;  %vm4637_vm14 = vcmp.eq.f32.partialorder %v11021_v14, 0.0  ;;  %vm4642_vm3 = vcmp.eq.f32.partialorder %v11027_v28, inf }
 0x7f3   :  { %vm4644_vm15 = vcmp.eq.f32.partialorder %v11027_v28, 0.0  ;;  %vm4649_vm6 = vcmp.eq.f32.partialorder %v11030_v25, inf  ;;  %vm4651_vm0 = vcmp.eq.f32.partialorder %v11030_v25, 0.0 }
 0x7f4   :  { %4234 = vadd.xlane.f32.xlu1 %v4233_v45  ;;  %v4493_v45 = vadd.f32 %v10895_v44, %v10886_v52  ;;  %v4492_v52 = vadd.f32 %v10895_v44, %v10870_v18  ;;  %vm4684_vm7 = vcmp.eq.f32.partialorder %v11106_v60, inf }
 0x7f6   :  { %v4557_v51 = vsub.f32 %v4493_v45, %v4525_v24  ;;  %v4556_v6 = vsub.f32 %v4492_v52, %v4524_v19  ;;  %v11096_v24 = vmul.f32 %v11055_v3, %v12671_v35  ;;  %v4523_v52 = vmul.f32 2.0, %v10858_v5 }
 0x7f7   :  { %v6128_v17 = vpop.eup %6127 }
 0x7f8   :  { %v6130_v61 = vpop.eup %6129  ;;  %v4620_v9 = vmul.f32 %v6128_v17, %v11007_v47  ;;  %v11089_v17 = vmax.f32 %v4557_v51, 0.0  ;;  %v4528_v51 = vmul.f32 2.0, %v10882_v7 }
 0x7f9   :  { %v4613_v38 = vmul.f32 %v6130_v61, %v11010_v12  ;;  %v6132_v15 = vpop.eup %6131  ;;  %v11101_v61 = vmax.f32 %v4556_v6, 0.0 }
 0x7fa   :  { %v4622_v18 = vsel %vm4621_vm13, %v11007_v47, %v4620_v9  ;;  %v6134_v4 = vpop.eup %6133  ;;  %v4627_v48 = vmul.f32 %v6132_v15, %v11015_v41  ;;  %6139 = vrsqrt.f32 %v11089_v17 }
 0x7fb   :  { %v4615_v55 = vsel %vm4614_vm9, %v11010_v12, %v4613_v38  ;;  %v4625_v31 = vsel %vm4623_vm5, %v4624_v42, %v4622_v18  ;;  %v4634_v32 = vmul.f32 %v6134_v4, %v11021_v14  ;;  %v4631_v12 = vand.u32 2147483648, %v11015_v41  ;;  %v6136_v38 = vpop.eup %6135 }
 0x7fc   :  { %v4618_v45 = vsel %vm4616_vm1, %v4617_v36, %v4615_v55  ;;  %v4629_v19 = vsel %vm4628_vm4, %v11015_v41, %v4627_v48  ;;  %v4928_v21 = vmul.f32 %v4920_v29, %v4625_v31  ;;  %v6138_v37 = vpop.eup %6137  ;;  %v4638_v18 = vand.u32 2147483648, %v11021_v14 }
 0x7fd   :  { %v4927_v10 = vmul.f32 %v11033_v8, %v4618_v45  ;;  %v4636_v63 = vsel %vm4635_vm11, %v11021_v14, %v4634_v32  ;;  %v4632_v20 = vsel %vm4630_vm8, %v4631_v12, %v4629_v19  ;;  %v4641_v6 = vmul.f32 %v6136_v38, %v11027_v28  ;;  %v12673_v14 = vld [vmem:[#allocation34_spill] sm:$0xff] }
 0x7fe   :  { %v4937_v8 = vsel %vm4935_vm2, %v4928_v21, 0.0  ;;  %v4639_v30 = vsel %vm4637_vm14, %v4638_v18, %v4636_v63  ;;  %v4648_v43 = vmul.f32 %v6138_v37, %v11030_v25  ;;  %v11147_v31 = vmul.f32 %v11055_v3, %v12673_v14 }
 0x7ff   :  { %v4936_v4 = vsel %vm4935_vm2, %v4927_v10, 0.0  ;;  %v4643_v19 = vsel %vm4642_vm3, %v11027_v28, %v4641_v6  ;;  %v4930_v21 = vmul.f32 %v11039_v53, %v4639_v30  ;;  %v4529_v12 = vmul.f32 2.0, %v10888_v26 }
 0x800   :  { %v4938_v36 = vadd.f32 %v4937_v8, %v4936_v4  ;;  %v4650_v10 = vsel %vm4649_vm6, %v11030_v25, %v4648_v43  ;;  %v4652_v53 = vand.u32 2147483648, %v11030_v25  ;;  %v11180_v8 = vadd.f32 %v10895_v44, %v11069_v1 }
 0x801   :  { %v4941_v30 = vsel %vm4935_vm2, %v4930_v21, 0.0  ;;  %vm4670_vm9 = vcmp.eq.f32.partialorder %v11101_v61, inf  ;;  %vm4672_vm5 = vcmp.eq.f32.partialorder %v11101_v61, 0.0  ;;  %vm4677_vm4 = vcmp.eq.f32.partialorder %v11089_v17, inf }
 0x802   :  { %vm4691_vm8 = vcmp.eq.f32.partialorder %v11111_v40, inf  ;;  %vm4679_vm1 = vcmp.eq.f32.partialorder %v11089_v17, 0.0  ;;  %vm4686_vm3 = vcmp.eq.f32.partialorder %v11106_v60, 0.0 }
 0x807   :  { %v6140_v18 = vpop.eup %6139 }
 0x828   :  { %v11057_v27 = vpop.xlane.xlu1 %4213 }
 0x82c   :  { %v4160_v16 = vpop.xlane.xlu1 %4159  ;;  %v11091_v56 = vpop.xlane.xlu0 %4216 }
 0x82d   :  { %v4490_v59 = vadd.f32 %v10895_v44, %v4160_v16  ;;  %v12672_v16 = vld [vmem:[#allocation28_spill] sm:$0xff] }
 0x82e   :  { %v11136_v41 = vmul.f32 %v11055_v3, %v12672_v16  ;;  %v4687_v16 = vand.u32 2147483648, %v11106_v60 }
 0x82f   :  { %v4554_v47 = vsub.f32 %v4490_v59, %v4522_v49  ;;  %v4929_v59 = vmul.f32 %v11036_v0, %v4632_v20  ;;  %v4645_v0 = vand.u32 2147483648, %v11027_v28  ;;  %v12675_v20 = vld [vmem:[#allocation8_spill] sm:$0xff] }
 0x830   :  { %v11103_v54 = vpop.xlane.xlu1 %4198  ;;  %v4178_v2 = vpop.xlane.xlu0 %4177  ;;  %v11174_v26 = vmul.f32 %v11055_v3, %v12675_v20 }
 0x831   :  { %v11108_v9 = vmax.f32 %v4554_v47, 0.0  ;;  %v4496_v29 = vadd.f32 %v10895_v44, %v4178_v2  ;;  %v12674_v47 = vld [vmem:[#allocation12_spill] sm:$0xff]  ;;  %v4939_v2 = vsel %vm4935_vm2, %v4929_v59, 0.0  ;;  %v4646_v63 = vsel %vm4644_vm15, %v4645_v0, %v4643_v19 }
 0x832   :  { %v11156_v32 = vmul.f32 %v11055_v3, %v12674_v47  ;;  %v4931_v1 = vmul.f32 %v11045_v13, %v4646_v63  ;;  %v4676_v0 = vmul.f32 %v6140_v18, %v11089_v17  ;;  %v4680_v63 = vand.u32 2147483648, %v11089_v17 }
 0x833   :  { %6141 = vrsqrt.f32 %v11108_v9  ;;  %v4560_v7 = vsub.f32 %v4496_v29, %v4528_v51  ;;  %v4940_v51 = vadd.f32 %v4939_v2, %v4938_v36  ;;  %v4530_v29 = vmul.f32 2.0, %v10878_v33  ;;  %v12676_v33 = vld [vmem:[#allocation167_spill] sm:$0xff] }
 0x834   :  { %6143 = vrsqrt.f32 %v11101_v61  ;;  %v4163_v15 = vpop.xlane.xlu1 %4162  ;;  %v11130_v49 = vpop.xlane.xlu0 %4219  ;;  %vm4656_vm10 = vcmp.eq.f32.partialorder %v11108_v9, inf  ;;  %v4659_v47 = vand.u32 2147483648, %v11108_v9  ;;  %vm4658_vm13 = vcmp.eq.f32.partialorder %v11108_v9, 0.0 }
 0x835   :  { %6145 = vrsqrt.f32 %v11106_v60  ;;  %v4491_v5 = vadd.f32 %v10895_v44, %v4163_v15  ;;  %v11140_v48 = vmax.f32 %v4560_v7, 0.0  ;;  %v11185_v7 = vmul.f32 %v11055_v3, %v12676_v33 }
 0x836   :  { %6147 = vrsqrt.f32 %v11111_v40  ;;  %v4942_v43 = vadd.f32 %v4941_v30, %v4940_v51  ;;  %v4678_v51 = vsel %vm4677_vm4, %v11089_v17, %v4676_v0  ;;  %vm4693_vm15 = vcmp.eq.f32.partialorder %v11111_v40, 0.0 }
 0x837   :  { %v4555_v42 = vsub.f32 %v4491_v5, %v4523_v52  ;;  %vm4698_vm6 = vcmp.eq.f32.partialorder %v11140_v48, inf }
 0x838   :  { %v11142_v55 = vpop.xlane.xlu1 %4201  ;;  %v4181_v45 = vpop.xlane.xlu0 %4180 }
 0x839   :  { %v11149_v35 = vmax.f32 %v4555_v42, 0.0  ;;  %v4497_v52 = vadd.f32 %v10895_v44, %v4181_v45  ;;  %v4653_v42 = vsel %vm4651_vm0, %v4652_v53, %v4650_v10  ;;  %v4943_v10 = vsel %vm4935_vm2, %v4931_v1, 0.0 }
 0x83a   :  { %v4932_v21 = vmul.f32 %v11048_v23, %v4653_v42  ;;  %v4681_v42 = vsel %vm4679_vm1, %v4680_v63, %v4678_v51 }
 0x83b   :  { %6149 = vrsqrt.f32 %v11149_v35  ;;  %v4561_v5 = vsub.f32 %v4497_v52, %v4529_v12  ;;  %vm4663_vm11 = vcmp.eq.f32.partialorder %v11149_v35, inf  ;;  %vm4665_vm14 = vcmp.eq.f32.partialorder %v11149_v35, 0.0 }
 0x83c   :  { %6151 = vrsqrt.f32 %v11140_v48  ;;  %v4184_v38 = vpop.xlane.xlu1 %4183  ;;  %v11176_v37 = vpop.xlane.xlu0 %4222  ;;  %v4945_v53 = vsel %vm4935_vm2, %v4932_v21, 0.0 }
 0x83d   :  { %v4498_v15 = vadd.f32 %v10895_v44, %v4184_v38  ;;  %v11190_v59 = vmax.f32 %v4561_v5, 0.0  ;;  %v4673_v38 = vand.u32 2147483648, %v11101_v61 }
 0x83f   :  { %v4562_v28 = vsub.f32 %v4498_v15, %v4530_v29  ;;  %6153 = vrsqrt.f32 %v11190_v59  ;;  %v4531_v29 = vmul.f32 2.0, %v10884_v50  ;;  %v4534_v50 = vmul.f32 2.0, %v10890_v22 }
 0x840   :  { %v6142_v6 = vpop.eup %6141  ;;  %v11200_v45 = vpop.xlane.xlu0 %4204  ;;  %vm4705_vm0 = vcmp.eq.f32.partialorder %v11190_v59, inf }
 0x841   :  { %v6144_v4 = vpop.eup %6143  ;;  %v4655_v25 = vmul.f32 %v6142_v6, %v11108_v9  ;;  %v11194_v36 = vmax.f32 %v4562_v28, 0.0 }
 0x842   :  { %v6146_v14 = vpop.eup %6145  ;;  %v4669_v2 = vmul.f32 %v6144_v4, %v11101_v61 }
 0x843   :  { %v6148_v19 = vpop.eup %6147  ;;  %v4657_v13 = vsel %vm4656_vm10, %v11108_v9, %v4655_v25  ;;  %6155 = vrsqrt.f32 %v11194_v36  ;;  %v4683_v52 = vmul.f32 %v6146_v14, %v11106_v60  ;;  %v4944_v9 = vadd.f32 %v4943_v10, %v4942_v43 }
 0x844   :  { %v4660_v12 = vsel %vm4658_vm13, %v4659_v47, %v4657_v13  ;;  %v4690_v23 = vmul.f32 %v6148_v19, %v11111_v40  ;;  %v4187_v15 = vpop.xlane.xlu0 %4186  ;;  %v4671_v33 = vsel %vm4670_vm9, %v11101_v61, %v4669_v2  ;;  %v4666_v43 = vand.u32 2147483648, %v11149_v35 }
 0x845   :  { %v4499_v20 = vadd.f32 %v10895_v44, %v4187_v15  ;;  %v4933_v5 = vmul.f32 %v11062_v34, %v4660_v12  ;;  %v4685_v6 = vsel %vm4684_vm7, %v11106_v60, %v4683_v52  ;;  %v4946_v1 = vadd.f32 %v4945_v53, %v4944_v9 }
 0x846   :  { %v4692_v4 = vsel %vm4691_vm8, %v11111_v40, %v4690_v23  ;;  %v4674_v17 = vsel %vm4672_vm5, %v4673_v38, %v4671_v33  ;;  %v5048_v14 = vmul.f32 %v11147_v31, %v4681_v42  ;;  %v4694_v61 = vand.u32 2147483648, %v11111_v40  ;;  %v11257_v23 = vpop.f32.mrf.mxu0 }
 0x847   :  { %v4563_v34 = vsub.f32 %v4499_v20, %v4531_v29  ;;  %v4947_v25 = vsel %vm4935_vm2, %v4933_v5, 0.0  ;;  %v5047_v13 = vmul.f32 %v11096_v24, %v4674_v17  ;;  %v4566_v12 = vsub.f32 %v11180_v8, %v4534_v50 }
 0x848   :  { %v6150_v18 = vpop.eup %6149  ;;  %v4948_v31 = vadd.f32 %v4947_v25, %v4946_v1  ;;  %v4695_v52 = vsel %vm4693_vm15, %v4694_v61, %v4692_v4  ;;  %v5056_v40 = vsel %vm4935_vm2, %v5048_v14, 0.0  ;;  %v4701_v9 = vand.u32 2147483648, %v11140_v48  ;;  %v4430_v50 = vpop.f32.mrf.mxu0 }
 0x849   :  { %v6152_v28 = vpop.eup %6151  ;;  %v4662_v30 = vmul.f32 %v6150_v18, %v11149_v35  ;;  %v11240_v47 = vmax.f32 %v4563_v34, 0.0  ;;  %v5055_v51 = vsel %vm4935_vm2, %v5047_v13, 0.0  ;;  %vm4700_vm7 = vcmp.eq.f32.partialorder %v11140_v48, 0.0  ;;  %v5555_v13 = vld [vmem:[%s11499_s10 + $0x18] sm:$0xff] }
 0x84a   :  { %v4697_v0 = vmul.f32 %v6152_v28, %v11140_v48  ;;  %v5057_v53 = vadd.f32 %v5056_v40, %v5055_v51  ;;  %v4708_v20 = vand.u32 2147483648, %v11190_v59  ;;  %vm4712_vm10 = vcmp.eq.f32.partialorder %v11194_v36, inf }
 0x84b   :  { %v4664_v22 = vsel %vm4663_vm11, %v11149_v35, %v4662_v30  ;;  %v4688_v35 = vsel %vm4686_vm3, %v4687_v16, %v4685_v6  ;;  %6157 = vrsqrt.f32 %v11240_v47  ;;  %vm4707_vm13 = vcmp.eq.f32.partialorder %v11190_v59, 0.0 }
 0x84c   :  { %v4667_v19 = vsel %vm4665_vm14, %v4666_v43, %v4664_v22  ;;  %v6154_v2 = vpop.eup %6153  ;;  %v5049_v24 = vmul.f32 %v11079_v39, %v4688_v35  ;;  %v4503_v39 = vadd.f32 %v10895_v44, %v11103_v54  ;;  %v4535_v33 = vmul.f32 2.0, %v10900_v58 }
 0x84d   :  { %v4934_v21 = vmul.f32 %v11065_v57, %v4667_v19  ;;  %v4699_v57 = vsel %vm4698_vm6, %v11140_v48, %v4697_v0  ;;  %v4704_v60 = vmul.f32 %v6154_v2, %v11190_v59  ;;  %v5050_v48 = vmul.f32 %v11136_v41, %v4695_v52  ;;  %v11280_v41 = vpop.f32.mrf.mxu0  ;;  %v12677_v0 = vld [vmem:[#allocation169_spill] sm:$0xff] }
 0x84e   :  { %v4702_v63 = vsel %vm4700_vm7, %v4701_v9, %v4699_v57  ;;  %v4715_v6 = vand.u32 2147483648, %v11194_v36  ;;  %v5058_v42 = vsel %vm4935_vm2, %v5049_v24, 0.0  ;;  %vm4714_vm9 = vcmp.eq.f32.partialorder %v11194_v36, 0.0 }
 0x84f   :  { %v4949_v38 = vsel %vm4935_vm2, %v4934_v21, 0.0  ;;  %v4706_v29 = vsel %vm4705_vm0, %v11190_v59, %v4704_v60  ;;  %v5051_v30 = vmul.f32 %v11156_v32, %v4702_v63  ;;  %v11277_v34 = vmax.f32 %v4566_v12, 0.0 }
 0x850   :  { %v6156_v10 = vpop.eup %6155  ;;  %v4950_v16 = vadd.f32 %v4949_v38, %v4948_v31  ;;  %v4709_v28 = vsel %vm4707_vm13, %v4708_v20, %v4706_v29  ;;  %v5059_v59 = vadd.f32 %v5058_v42, %v5057_v53  ;;  %v4567_v1 = vsub.f32 %v4503_v39, %v4535_v33  ;;  %v4433_v31 = vpop.f32.mrf.mxu0 }
 0x851   :  { %v4711_v8 = vmul.f32 %v6156_v10, %v11194_v36  ;;  %v5052_v58 = vmul.f32 %v11174_v26, %v4709_v28  ;;  %v4504_v17 = vadd.f32 %v10895_v44, %v11142_v55  ;;  %v5060_v22 = vsel %vm4935_vm2, %v5050_v48, 0.0  ;;  %v5554_v10 = vld [vmem:[%s11499_s10 + $0x10] sm:$0xff] }
 0x852   :  { %v4951_v15 = vrot.slane %v4950_v16, 4  ;;  %6159 = vrsqrt.f32 %v11277_v34  ;;  %v5046_v19 = vmul.f32 %v11055_v3, %v12677_v0  ;;  %v5061_v26 = vadd.f32 %v5060_v22, %v5059_v59 }
 0x853   :  { %v4713_v5 = vsel %vm4712_vm10, %v11194_v36, %v4711_v8  ;;  %v5062_v36 = vsel %vm4935_vm2, %v5051_v30, 0.0  ;;  %v4536_v61 = vmul.f32 2.0, %v4430_v50  ;;  %v11290_v21 = vmax.f32 %v4567_v1, 0.0 }
 0x854   :  { %v4952_v18 = vadd.f32 %v4951_v15, %v4950_v16  ;;  %v4716_v4 = vsel %vm4714_vm9, %v4715_v6, %v4713_v5  ;;  %vm4719_vm5 = vcmp.eq.f32.partialorder %v11240_v47, inf  ;;  %v4722_v12 = vand.u32 2147483648, %v11240_v47 }
 0x855   :  { %v5053_v32 = vmul.f32 %v11185_v7, %v4716_v4  ;;  %v5064_v7 = vsel %vm4935_vm2, %v5052_v58, 0.0  ;;  %v4568_v2 = vsub.f32 %v4504_v17, %v4536_v61  ;;  %v5063_v3 = vadd.f32 %v5062_v36, %v5061_v26  ;;  %v5561_v26 = vld [vmem:[%s11499_s10 + $0x38] sm:$0xff] }
 0x856   :  { %v4953_v54 = vrot.slane %v4952_v18, 2  ;;  %v4505_v52 = vadd.f32 %v10895_v44, %v11200_v45  ;;  %vm4721_vm4 = vcmp.eq.f32.partialorder %v11240_v47, 0.0  ;;  %v4537_v16 = vmul.f32 2.0, %v4433_v31 }
 0x857   :  { %v5066_v40 = vsel %vm4935_vm2, %v5053_v32, 0.0  ;;  %v5065_v60 = vadd.f32 %v5064_v7, %v5063_v3  ;;  %6161 = vrsqrt.f32 %v11290_v21  ;;  %v11312_v24 = vmax.f32 %v4568_v2, 0.0  ;;  %v5560_v2 = vld [vmem:[%s11499_s10 + $0x30] sm:$0xff] }
 0x858   :  { %v4954_v43 = vadd.f32 %v4953_v54, %v4952_v18  ;;  %v6158_v14 = vpop.eup %6157  ;;  %v4569_v9 = vsub.f32 %v4505_v52, %v4537_v16  ;;  %v4510_v53 = vadd.f32 %v10895_v44, %v11130_v49  ;;  %v4508_v33 = vadd.f32 %v10895_v44, %v11057_v27  ;;  %v11368_v52 = vld [vmem:[%s11497_s8] ss:$0 sm:$0xff] }
 0x859   :  { %v4718_v35 = vmul.f32 %v6158_v14, %v11240_v47  ;;  %6163 = vrsqrt.f32 %v11312_v24  ;;  %v4511_v4 = vadd.f32 %v10895_v44, %v11176_v37  ;;  %vm4740_vm8 = vcmp.eq.f32.partialorder %v11277_v34, inf }
 0x85a   :  { %v4955_v25 = vrot.slane %v4954_v43, 1  ;;  %v11319_v63 = vmax.f32 %v4569_v9, 0.0  ;;  %v4538_v61 = vmul.f32 2.0, %v11257_v23  ;;  %vm4742_vm1 = vcmp.eq.f32.partialorder %v11277_v34, 0.0 }
 0x85b   :  { %v4720_v38 = vsel %vm4719_vm5, %v11240_v47, %v4718_v35  ;;  %v5067_v47 = vadd.f32 %v5066_v40, %v5065_v60  ;;  %v12678_v35 = vld [vmem:[#allocation24_spill] sm:$0xff]  ;;  %vm4747_vm11 = vcmp.eq.f32.partialorder %v11290_v21, inf  ;;  %v4750_v60 = vand.u32 2147483648, %v11290_v21 }
 0x85c   :  { %v4956_v55 = vadd.f32 %v4955_v25, %v4954_v43  ;;  %v4723_v57 = vsel %vm4721_vm4, %v4722_v12, %v4720_v38  ;;  %6165 = vrsqrt.f32 %v11319_v63  ;;  %v4509_v43 = vadd.f32 %v10895_v44, %v11091_v56 }
 0x85d   :  { %v5054_v45 = vmul.f32 %v5046_v19, %v4723_v57  ;;  %v4743_v56 = vand.u32 2147483648, %v11277_v34  ;;  %v11376_v16 = vstv %s5897_s22  ;;  %vm4754_vm14 = vcmp.eq.f32.partialorder %v11312_v24, inf }
 0x85e   :  { %5866 = vmatmul.mubr.msk.f32.vlgmr.msra.gmra.mxu1 %vm4935_vm2, %v4956_v55  ;;  %v5161_v55 = vmul.f32 %v10928_v11, %v12678_v35  ;;  %vm4756_vm3 = vcmp.eq.f32.partialorder %v11312_v24, 0.0  ;;  %vm4761_vm15 = vcmp.eq.f32.partialorder %v11319_v63, inf  ;;  %vm4763_vm6 = vcmp.eq.f32.partialorder %v11319_v63, 0.0 }
 0x85f   :  { %5869 = vmatpush3.msra.mxu1 %v5555_v13  ;;  %5872 = vmatprep.mubr.msk.f32.mxu1 %vm6338_vm12, %v12610_v46  ;;  %v5068_v8 = vsel %vm4935_vm2, %v5054_v45, 0.0  ;;  %v6160_v18 = vpop.eup %6159 }
 0x860   :  { %5870 = vmatprep.subr.mxu1 %v12610_v46  ;;  %v5069_v51 = vadd.f32 %v5068_v8, %v5067_v47  ;;  %v4739_v59 = vmul.f32 %v6160_v18, %v11277_v34  ;;  %v12679_v47 = vld [vmem:[#allocation22_spill] sm:$0xff] }
 0x861   :  { %5871 = vmatpush3.msra.mxu1 %v5554_v10  ;;  %v4539_v10 = vmul.f32 2.0, %v11280_v41  ;;  %v5162_v9 = vmul.f32 %v10928_v11, %v12679_v47 }
 0x862   :  { %5882 = vmatprep.subr.mxu1 %v12610_v46  ;;  %v5070_v15 = vrot.slane %v5069_v51, 4  ;;  %v4741_v36 = vsel %vm4740_vm8, %v11277_v34, %v4739_v59 }
 0x863   :  { %v4744_v23 = vsel %vm4742_vm1, %v4743_v56, %v4741_v36  ;;  %v4764_v36 = vand.u32 2147483648, %v11319_v63 }
 0x864   :  { %v5850_v29 = vpop.f32.mrf.mxu0  ;;  %v5071_v5 = vadd.f32 %v5070_v15, %v5069_v51  ;;  %v6162_v32 = vpop.eup %6161  ;;  %v5169_v40 = vmul.f32 %v5161_v55, %v4744_v23  ;;  %v12680_v51 = vld [vmem:[#allocation55_spill] sm:$0xff] }
 0x865   :  { %v4542_v20 = vmul.f32 2.0, %v5850_v29  ;;  %v4746_v7 = vmul.f32 %v6162_v32, %v11290_v21  ;;  %v5163_v41 = vmul.f32 %v10928_v11, %v12680_v51  ;;  %v12681_v29 = vld [vmem:[#allocation59_spill] sm:$0xff] }
 0x866   :  { %v4446_v39 = vpop.f32.mrf.mxu0  ;;  %v5072_v6 = vrot.slane %v5071_v5, 2  ;;  %v5164_v15 = vmul.f32 %v10928_v11, %v12681_v29  ;;  %v5178_v18 = vsel %vm4935_vm2, %v5169_v40, 0.0 }
 0x867   :  { %v4574_v48 = vsub.f32 %v4510_v53, %v4542_v20  ;;  %v4540_v50 = vmul.f32 2.0, %v4446_v39  ;;  %v4748_v57 = vsel %vm4747_vm11, %v11290_v21, %v4746_v7  ;;  %v12682_v53 = vld [vmem:[#allocation42_spill] sm:$0xff] }
 0x868   :  { %v5851_v28 = vpop.f32.mrf.mxu0  ;;  %v5073_v58 = vadd.f32 %v5072_v6, %v5071_v5  ;;  %v11387_v20 = vmul.f32 %v10928_v11, %v12682_v53  ;;  %v12684_v6 = vld [vmem:[#allocation114_spill] sm:$0xff] }
 0x869   :  { %v11324_v42 = vmax.f32 %v4574_v48, 0.0  ;;  %v4572_v49 = vsub.f32 %v4508_v33, %v4540_v50  ;;  %v4543_v30 = vmul.f32 2.0, %v5851_v28  ;;  %v12683_v33 = vld [vmem:[#allocation107_spill] sm:$0xff] }
 0x86a   :  { %v4449_v1 = vpop.f32.mrf.mxu0  ;;  %v5074_v25 = vrot.slane %v5073_v58, 1 }
 0x86b   :  { %6167 = vrsqrt.f32 %v11324_v42  ;;  %v11332_v27 = vmax.f32 %v4572_v49, 0.0  ;;  %v4575_v17 = vsub.f32 %v4511_v4, %v4543_v30  ;;  %v4541_v22 = vmul.f32 2.0, %v4449_v1  ;;  %v12685_v30 = vld [vmem:[#allocation53_spill] sm:$0xff] }
 0x86c   :  { %v5075_v0 = vadd.f32 %v5074_v25, %v5073_v58  ;;  %v5279_v49 = vmul.f32 %v11376_v16, %v12684_v6  ;;  %v5282_v59 = vmul.f32 %v11376_v16, %v12685_v30  ;;  %v4757_v58 = vand.u32 2147483648, %v11312_v24 }
 0x86d   :  { %6169 = vrsqrt.f32 %v11332_v27  ;;  %v11339_v37 = vmax.f32 %v4575_v17, 0.0  ;;  %v4573_v14 = vsub.f32 %v4509_v43, %v4541_v22  ;;  %v12686_v22 = vld [vmem:[#allocation100_spill] sm:$0xff]  ;;  %vm4782_vm0 = vcmp.eq.f32.partialorder %v11332_v27, inf }
 0x86e   :  { %5873 = vmatmul.mubr.msk.f32.vlgmr.msra.gmra.mxu1 %vm4935_vm2, %v5075_v0  ;;  %v5280_v25 = vmul.f32 %v11376_v16, %v12686_v22  ;;  %vm4796_vm7 = vcmp.eq.f32.partialorder %v11324_v42, inf  ;;  %vm4784_vm10 = vcmp.eq.f32.partialorder %v11332_v27, 0.0  ;;  %vm4798_vm9 = vcmp.eq.f32.partialorder %v11324_v42, 0.0 }
 0x86f   :  { %6171 = vrsqrt.f32 %v11339_v37  ;;  %v11352_v31 = vmax.f32 %v4573_v14, 0.0  ;;  %5883 = vmatpush3.msra.mxu1 %v5561_v26  ;;  %5886 = vmatprep.mubr.msk.f32.mxu1 %vm6338_vm12, %v12610_v46  ;;  %vm4749_vm12 = vcmp.eq.f32.partialorder %v11290_v21, 0.0  ;;  %v5281_v21 = vmul.f32 %v11376_v16, %v12683_v33  ;;  %v12687_v33 = vld [vmem:[#allocation51_spill] sm:$0xff] }
 0x870   :  { %v11326_v54 = vpop.xlane.xlu1 %4225  ;;  %5884 = vmatprep.subr.mxu1 %v12610_v46  ;;  %v4751_v39 = vsel %vm4749_vm12, %v4750_v60, %v4748_v57  ;;  %vm4803_vm13 = vcmp.eq.f32.partialorder %v11339_v37, inf  ;;  %vm4805_vm8 = vcmp.eq.f32.partialorder %v11339_v37, 0.0 }
 0x871   :  { %6173 = vrsqrt.f32 %v11352_v31  ;;  %5885 = vmatpush3.msra.mxu1 %v5560_v2  ;;  %v5170_v1 = vmul.f32 %v5162_v9, %v4751_v39  ;;  %vm4789_vm5 = vcmp.eq.f32.partialorder %v11352_v31, inf  ;;  %vm4791_vm4 = vcmp.eq.f32.partialorder %v11352_v31, 0.0 }
 0x872   :  { %v5179_v9 = vadd.f32 %v5178_v18, %v10947_v62  ;;  %v5166_v62 = vmul.f32 %v10928_v11, %v12687_v33  ;;  %v12689_v33 = vld [vmem:[#allocation133_spill] sm:$0xff] }
 0x873   :  { %v5180_v26 = vsel %vm4935_vm2, %v5170_v1, 0.0 }
 0x874   :  { %v5181_v53 = vadd.f32 %v5180_v26, %v5179_v9 }
 0x875   :  { %v4208_v19 = vpop.xlane.xlu1 %4207 }
 0x876   :  { %v4506_v13 = vadd.f32 %v10895_v44, %v4208_v19  ;;  %v6164_v44 = vpop.eup %6163 }
 0x877   :  { %v4753_v46 = vmul.f32 %v6164_v44, %v11312_v24  ;;  %v6166_v45 = vpop.eup %6165  ;;  %v4792_v44 = vand.u32 2147483648, %v11352_v31 }
 0x878   :  { %v4570_v12 = vsub.f32 %v4506_v13, %v4538_v61  ;;  %v6168_v5 = vpop.eup %6167  ;;  %v4760_v28 = vmul.f32 %v6166_v45, %v11319_v63  ;;  %v4799_v13 = vand.u32 2147483648, %v11324_v42 }
 0x879   :  { %v4211_v34 = vpop.xlane.xlu1 %4210  ;;  %v4755_v50 = vsel %vm4754_vm14, %v11312_v24, %v4753_v46  ;;  %v4795_v43 = vmul.f32 %v6168_v5, %v11324_v42  ;;  %v4785_v24 = vand.u32 2147483648, %v11332_v27 }
 0x87a   :  { %v11363_v3 = vmax.f32 %v4570_v12, 0.0  ;;  %v4507_v38 = vadd.f32 %v11368_v52, %v4211_v34  ;;  %v6170_v4 = vpop.eup %6169  ;;  %v4758_v32 = vsel %vm4756_vm3, %v4757_v58, %v4755_v50  ;;  %v4762_v0 = vsel %vm4761_vm15, %v11319_v63, %v4760_v28 }
 0x87b   :  { %v4781_v17 = vmul.f32 %v6170_v4, %v11332_v27  ;;  %v4797_v61 = vsel %vm4796_vm7, %v11324_v42, %v4795_v43  ;;  %v5171_v55 = vmul.f32 %v5163_v41, %v4758_v32  ;;  %v4765_v2 = vsel %vm4763_vm6, %v4764_v36, %v4762_v0 }
 0x87c   :  { %6175 = vrsqrt.f32 %v11363_v3  ;;  %v4571_v8 = vsub.f32 %v4507_v38, %v4539_v10  ;;  %v6172_v14 = vpop.eup %6171  ;;  %v4800_v34 = vsel %vm4798_vm9, %v4799_v13, %v4797_v61  ;;  %v5172_v40 = vmul.f32 %v5164_v15, %v4765_v2 }
 0x87d   :  { %v4783_v19 = vsel %vm4782_vm0, %v11332_v27, %v4781_v17  ;;  %v4802_v56 = vmul.f32 %v6172_v14, %v11339_v37  ;;  %v4806_v27 = vand.u32 2147483648, %v11339_v37  ;;  %vm4768_vm1 = vcmp.eq.f32.partialorder %v11363_v3, inf }
 0x87e   :  { %v11393_v48 = vmax.f32 %v4571_v8, 0.0  ;;  %v6174_v35 = vpop.eup %6173  ;;  %v4786_v7 = vsel %vm4784_vm10, %v4785_v24, %v4783_v19  ;;  %v4771_v46 = vand.u32 2147483648, %v11363_v3  ;;  %v5289_v47 = vmul.f32 %v5281_v21, %v4800_v34  ;;  %v4229_v24 = vpop.xlane.xlu0 %4228 }
 0x87f   :  { %v4788_v23 = vmul.f32 %v6174_v35, %v11352_v31  ;;  %v4804_v12 = vsel %vm4803_vm13, %v11339_v37, %v4802_v56  ;;  %v5287_v63 = vmul.f32 %v5279_v49, %v4786_v7  ;;  %v5182_v8 = vsel %vm4935_vm2, %v5171_v55, 0.0  ;;  %v11458_v19 = vpop.f32.mrf.mxu1  ;;  %v4235_v7 = vpop.xlane.xlu1 %4234 }
 0x880   :  { %6177 = vrsqrt.f32 %v11393_v48  ;;  %v4807_v60 = vsel %vm4805_vm8, %v4806_v27, %v4804_v12  ;;  %vm4770_vm11 = vcmp.eq.f32.partialorder %v11363_v3, 0.0  ;;  %v5184_v18 = vsel %vm4935_vm2, %v5172_v40, 0.0 }
 0x881   :  { %v4790_v10 = vsel %vm4789_vm5, %v11352_v31, %v4788_v23  ;;  %v5290_v51 = vmul.f32 %v5282_v59, %v4807_v60  ;;  %v5295_v41 = vsel %vm4935_vm2, %v5287_v63, 0.0  ;;  %v5298_v21 = vsel %vm4935_vm2, %v5289_v47, 0.0 }
 0x882   :  { %v4793_v57 = vsel %vm4791_vm4, %v4792_v44, %v4790_v10  ;;  %v5183_v50 = vadd.f32 %v5182_v8, %v5181_v53  ;;  %vm4775_vm12 = vcmp.eq.f32.partialorder %v11393_v48, inf  ;;  %v4778_v6 = vand.u32 2147483648, %v11393_v48  ;;  %v4232_v26 = vpop.xlane.xlu0 %4231 }
 0x883   :  { %v5288_v45 = vmul.f32 %v5280_v25, %v4793_v57  ;;  %vm4777_vm14 = vcmp.eq.f32.partialorder %v11393_v48, 0.0  ;;  %v4514_v61 = vadd.f32 %v11368_v52, %v4232_v26  ;;  %v4512_v13 = vadd.f32 %v11368_v52, %v11326_v54 }
 0x884   :  { %v5185_v11 = vadd.f32 %v5184_v18, %v5183_v50  ;;  %v4513_v57 = vadd.f32 %v11368_v52, %v4229_v24  ;;  %vm5393_vm5 = vcmask 16384  }
 0x885   :  { %v5296_v29 = vsel %vm4935_vm2, %v5288_v45, 0.0 }
 0x886   :  { %v5297_v5 = vadd.f32 %v5296_v29, %v5295_v41 }
 0x888   :  { %v5299_v28 = vadd.f32 %v5298_v21, %v5297_v5 }
 0x889   :  { %v6176_v38 = vpop.eup %6175 }
 0x88a   :  { %v4767_v42 = vmul.f32 %v6176_v38, %v11363_v3  ;;  %v4515_v38 = vadd.f32 %v11368_v52, %v4235_v7 }
 0x88c   :  { %v4769_v31 = vsel %vm4768_vm1, %v11363_v3, %v4767_v42 }
 0x88d   :  { %v4772_v37 = vsel %vm4770_vm11, %v4771_v46, %v4769_v31  ;;  %v6178_v15 = vpop.eup %6177 }
 0x88e   :  { %v5173_v39 = vmul.f32 %v11387_v20, %v4772_v37  ;;  %v4774_v3 = vmul.f32 %v6178_v15, %v11393_v48  ;;  %v5300_v20 = vsel %vm4935_vm2, %v5290_v51, 0.0  ;;  %v12688_v51 = vld [vmem:[#allocation95_spill] sm:$0xff] }
 0x88f   :  { %v11454_v59 = vadd.f32 %v5300_v20, %v5299_v28  ;;  %v5283_v41 = vmul.f32 %v11376_v16, %v12688_v51 }
 0x890   :  { %v5186_v49 = vsel %vm4935_vm2, %v5173_v39, 0.0  ;;  %v4776_v30 = vsel %vm4775_vm12, %v11393_v48, %v4774_v3  ;;  %v5860_v48 = vpop.f32.mrf.mxu1 }
 0x891   :  { %v4779_v4 = vsel %vm4777_vm14, %v4778_v6, %v4776_v30  ;;  %v5187_v58 = vadd.f32 %v5186_v49, %v5185_v11  ;;  %v12690_v30 = vld [vmem:[#allocation54_spill] sm:$0xff] }
 0x892   :  { %v5174_v1 = vmul.f32 %v5166_v62, %v4779_v4  ;;  %v5284_v62 = vmul.f32 %v11376_v16, %v12689_v33  ;;  %v5285_v11 = vmul.f32 %v11376_v16, %v12690_v30 }
 0x894   :  { %v5188_v43 = vsel %vm4935_vm2, %v5174_v1, 0.0 }
 0x895   :  { %v5189_v17 = vadd.f32 %v5188_v43, %v5187_v58  ;;  %v12691_v43 = vld [vmem:[#allocation89_spill] sm:$0xff] }
 0x897   :  { %v5190_v22 = vrot.slane %v5189_v17, 4 }
 0x899   :  { %v5191_v25 = vadd.f32 %v5190_v22, %v5189_v17  ;;  %v5286_v17 = vmul.f32 %v11376_v16, %v12691_v43  ;;  %v4838_v16 = vld [vmem:[%s11501_s12] sm:$0x1]  ;;  %s6339_s12 = smov [#allocation5]  }
 0x89a   :  { %v4910_v7 = vadd.f32 %v11458_v19, %v4838_v16  ;;  %s5413_s17 = sshll.u32 %s6339_s12, 4  ;;  %s5414_s17 = int_to_ptr.vmem [resolvable:$true] %s5413_s17 }
 0x89b   :  { %v5192_v32 = vrot.slane %v5191_v25, 2  ;;  %s6302_s2 = scalar_lea.vmem %s5414_s17, 16  ;;  %s6306_s19 = scalar_lea.vmem %s5414_s17, 32 }
 0x89c   :  { %p6303_p5 = scmp.ne.s32.totalorder %s5414_s17, %s6302_s2  ;;  %p6307_p6 = scmp.lt.s32.totalorder %s5414_s17, %s5414_s17 }
 0x89d   :  { %v5193_v36 = vadd.f32 %v5192_v32, %v5191_v25  ;;  %p6308_p7 = scmp.lt.s32.totalorder %s6306_s19, %s6302_s2 }
 0x89f   :  { %v5194_v14 = vrot.slane %v5193_v36, 1  ;;  %p6309_p8 = por %p6308_p7, %p6307_p6 }
 0x8a1   :  { %v5195_v0 = vadd.f32 %v5194_v14, %v5193_v36  ;;  %p6310_p9 = pnand %p6309_p8, %p6303_p5 }
 0x8a3   :  { %5880 = vmatmul.mubr.msk.f32.vlgmr.msra.gmra.mxu0 %vm4935_vm2, %v5195_v0 }
 0x8ab   :  { %v5854_v56 = vpop.f32.mrf.mxu0 }
 0x8ac   :  { %v4546_v35 = vmul.f32 2.0, %v5854_v56 }
 0x8ad   :  { %v4462_v55 = vpop.f32.mrf.mxu0 }
 0x8ae   :  { %v4578_v2 = vsub.f32 %v4514_v61, %v4546_v35  ;;  %v4544_v23 = vmul.f32 2.0, %v4462_v55 }
 0x8af   :  { %v5855_v12 = vpop.f32.mrf.mxu0 }
 0x8b0   :  { %v4610_v27 = vmax.f32 %v4578_v2, 0.0  ;;  %v4576_v44 = vsub.f32 %v4512_v13, %v4544_v23  ;;  %v4547_v34 = vmul.f32 2.0, %v5855_v12 }
 0x8b1   :  { %v4465_v10 = vpop.f32.mrf.mxu0 }
 0x8b2   :  { %6179 = vrsqrt.f32 %v4610_v27  ;;  %v4608_v63 = vmax.f32 %v4576_v44, 0.0  ;;  %v4579_v40 = vsub.f32 %v4515_v38, %v4547_v34  ;;  %v4545_v42 = vmul.f32 2.0, %v4465_v10 }
 0x8b3   :  { %vm4824_vm6 = vcmp.eq.f32.partialorder %v4610_v27, inf  ;;  %vm4826_vm0 = vcmp.eq.f32.partialorder %v4610_v27, 0.0  ;;  %v4827_v18 = vand.u32 2147483648, %v4610_v27 }
 0x8b4   :  { %6181 = vrsqrt.f32 %v4608_v63  ;;  %v4611_v60 = vmax.f32 %v4579_v40, 0.0  ;;  %v4577_v46 = vsub.f32 %v4513_v57, %v4545_v42  ;;  %vm4810_vm3 = vcmp.eq.f32.partialorder %v4608_v63, inf }
 0x8b5   :  { %v4813_v31 = vand.u32 2147483648, %v4608_v63  ;;  %vm4812_vm15 = vcmp.eq.f32.partialorder %v4608_v63, 0.0 }
 0x8b6   :  { %6183 = vrsqrt.f32 %v4611_v60  ;;  %v4609_v54 = vmax.f32 %v4577_v46, 0.0  ;;  %vm4831_vm7 = vcmp.eq.f32.partialorder %v4611_v60, inf  ;;  %v4834_v3 = vand.u32 2147483648, %v4611_v60 }
 0x8b7   :  { %vm4833_vm13 = vcmp.eq.f32.partialorder %v4611_v60, 0.0 }
 0x8b8   :  { %6185 = vrsqrt.f32 %v4609_v54  ;;  %vm4817_vm10 = vcmp.eq.f32.partialorder %v4609_v54, inf  ;;  %v4820_v49 = vand.u32 2147483648, %v4609_v54  ;;  %vm4819_vm9 = vcmp.eq.f32.partialorder %v4609_v54, 0.0 }
 0x8bf   :  { %v6180_v45 = vpop.eup %6179 }
 0x8c0   :  { %v4823_v9 = vmul.f32 %v6180_v45, %v4610_v27 }
 0x8c1   :  { %v6182_v47 = vpop.eup %6181 }
 0x8c2   :  { %v4809_v8 = vmul.f32 %v6182_v47, %v4608_v63  ;;  %v4825_v53 = vsel %vm4824_vm6, %v4610_v27, %v4823_v9 }
 0x8c3   :  { %v6184_v37 = vpop.eup %6183  ;;  %v4828_v6 = vsel %vm4826_vm0, %v4827_v18, %v4825_v53 }
 0x8c4   :  { %v4811_v29 = vsel %vm4810_vm3, %v4608_v63, %v4809_v8  ;;  %v4830_v15 = vmul.f32 %v6184_v37, %v4611_v60  ;;  %v5293_v25 = vmul.f32 %v5285_v11, %v4828_v6 }
 0x8c5   :  { %v4814_v52 = vsel %vm4812_vm15, %v4813_v31, %v4811_v29  ;;  %v6186_v5 = vpop.eup %6185 }
 0x8c6   :  { %v5291_v39 = vmul.f32 %v5283_v41, %v4814_v52  ;;  %v4832_v21 = vsel %vm4831_vm7, %v4611_v60, %v4830_v15  ;;  %v4816_v50 = vmul.f32 %v6186_v5, %v4609_v54  ;;  %v5306_v0 = vsel %vm4935_vm2, %v5293_v25, 0.0 }
 0x8c7   :  { %v4835_v58 = vsel %vm4833_vm13, %v4834_v3, %v4832_v21 }
 0x8c8   :  { %v5302_v28 = vsel %vm4935_vm2, %v5291_v39, 0.0  ;;  %v4818_v4 = vsel %vm4817_vm10, %v4609_v54, %v4816_v50  ;;  %v5294_v32 = vmul.f32 %v5286_v17, %v4835_v58 }
 0x8c9   :  { %v5303_v20 = vadd.f32 %v5302_v28, %v11454_v59  ;;  %v4821_v1 = vsel %vm4819_vm9, %v4820_v49, %v4818_v4 }
 0x8ca   :  { %v5292_v22 = vmul.f32 %v5284_v62, %v4821_v1  ;;  %v5308_v24 = vsel %vm4935_vm2, %v5294_v32, 0.0 }
 0x8cc   :  { %v5304_v36 = vsel %vm4935_vm2, %v5292_v22, 0.0 }
 0x8cd   :  { %v5305_v14 = vadd.f32 %v5304_v36, %v5303_v20 }
 0x8cf   :  { %v5307_v59 = vadd.f32 %v5306_v0, %v5305_v14 }
 0x8d1   :  { %v5309_v48 = vadd.f32 %v5308_v24, %v5307_v59 }
 0x8d3   :  { %v5310_v26 = vrot.slane %v5309_v48, 4 }
 0x8d5   :  { %v5311_v56 = vadd.f32 %v5310_v26, %v5309_v48 }
 0x8d7   :  { %v5312_v61 = vrot.slane %v5311_v56, 2 }
 0x8d9   :  { %v5313_v35 = vadd.f32 %v5312_v61, %v5311_v56 }
 0x8db   :  { %v5314_v55 = vrot.slane %v5313_v35, 1 }
 0x8dd   :  { %v5315_v13 = vadd.f32 %v5314_v55, %v5313_v35 }
 0x8df   :  { %5887 = vmatmul.mubr.msk.f32.vlgmr.msra.gmra.mxu1 %vm4935_vm2, %v5315_v13 }
 0x91e   :  { %v5028_v2 = vpop.f32.mrf.mxu1 }
 0x91f   :  { %v5032_v23 = vadd.f32 %v5028_v2, %v4910_v7 }
 0x920   :  { %v5867_v12 = vpop.f32.mrf.mxu1 }
 0x92e   :  { %v5148_v27 = vpop.f32.mrf.mxu1 }
 0x92f   :  { %v5152_v44 = vadd.f32 %v5148_v27, %v5032_v23 }
 0x930   :  { %v5874_v34 = vpop.f32.mrf.mxu1 }
 0x963   :  { %v5268_v38 = vpop.f32.mrf.mxu0 }
 0x964   :  { %v5272_v63 = vadd.f32 %v5268_v38, %v5152_v44 }
 0x965   :  { %v5881_v10 = vpop.f32.mrf.mxu0 }
 0x99f   :  { %v5388_v40 = vpop.f32.mrf.mxu1 }
 0x9a0   :  { %v5392_v42 = vadd.f32 %v5388_v40, %v5272_v63 }
 0x9a1   :  { %v5888_v57 = vpop.f32.mrf.mxu1 }
 0x9a2   :  { %v5394_v60 = vsel %vm5393_vm5, %v5392_v42, -inf }
 0x9a3   :  { %5395 = vmax.xlane.f32.xlu0 %v5394_v60 }
 0xa2c   :  { %v5396_v46 = vpop.xlane.xlu0 %5395 }
 0xa2d   :  { %v5397_v54 = vsub.f32 %v5392_v42, %v5396_v46 }
 0xa2f   :  { %v5398_v45 = vmul.f32 1.442695, %v5397_v54 }
 0xa31   :  { %6187 = vpow2.f32 %v5398_v45 }
 0xa3e   :  { %v6188_v19 = vpop.eup %6187 }
 0xa3f   :  { %v5400_v47 = vsel %vm5393_vm5, %v6188_v19, 0.0 }
 0xa40   :  { %5401 = vadd.xlane.f32.xlu1 %v5400_v47 }
 0xac9   :  { %v5402_v9 = vpop.xlane.xlu1 %5401 }
 0xaca   :  { %6189 = vlog2.f32 %v5402_v9 }
 0xad7   :  { %v6190_v8 = vpop.eup %6189 }
 0xad8   :  { %v5404_v31 = vmul.f32 0.6931472, %v6190_v8 }
 0xada   :  { %v5405_v37 = vsub.f32 %v5397_v54, %v5404_v31 }
 0xadc   :  { %5406 = vst.msk [vmem:[#allocation5] sm:$0x1] %vm5393_vm5, %v5405_v37 }
 0xadd   :  { %6313 = shalt.err (!%p6310_p9)
}
 0xade   :  { %5416 = dma.vmem_to_hbm [thread:$0]  %s5414_s17, 16, %s11502_s13, [#allocation3]  }
 0xadf   :  { %6324 = dma.done.wait [#allocation3], 16  }
 0xae0   :  { %6325 = vsyncadd [#allocation3], 4294967280 }
 0xae1   :  { %5420 = vsyncpa [#allocation3], 1 }
 0xae2   :  { %5421 = vsyncpa [#allocation4], 1 }

</bundles_post_ra>
